<compile_context>
chip_gen: v7x
topology: tpu7x:2x2x1
jax: 0.10.0
libtpu: 0.0.40
codegen_flags: <defaults>
</compile_context>

<pallas_src>
import functools

import numpy as np
import jax
import jax.numpy as jnp
from jax.experimental import pallas as pl
from jax.experimental.pallas import tpu as pltpu


# ----------------------------- Pallas kernels ------------------------------

def _stem12_fused_kernel(x_ref, w1_ref, s1_ref, b1_ref,
                         w2a_ref, s2a_ref, b2a_ref,
                         w2b_ref, s2b_ref, b2b_ref,
                         o_ref, t1p_ref, y2ap_ref, *, ho, wo):
    """Fused stem1 (3x3 s2 as 2x2-on-s2d) -> pad -> stem2a -> pad -> stem2b,
    plus MaxPool2d(2,1,ceil_mode=True) and channel concat.  One image / step.

    x_ref   : (1, ho+1, wo+1, 4*c1) bf16   space-to-depth(2) of padded input
    w*_ref  : merged-tap weights (k*k*cin, cout) bf16
    s*/b*   : folded-BN scale / bias (1, cout) f32
    o_ref   : (1, ho, wo, 2*cm)            channels = [maxpool || stem2b]
    t1p_ref : VMEM (ho+1, wo+1, cm)   bf16 stem1 output incl. F.pad border
    y2ap_ref: VMEM (ho+1, wo+1, cm/2) bf16 stem2a output incl. F.pad border
    """
    hp, wp = ho + 1, wo + 1
    cm = t1p_ref.shape[-1]
    cmh = y2ap_ref.shape[-1]

    def merged_patch(slice_fn, c):
        # Lane-concat the four 2x2 tap slices -> (ho*wo, 4*c): feeds ONE dot.
        parts = [slice_fn(ky, kx).reshape(ho * wo, c)
                 for ky in range(2) for kx in range(2)]
        return jnp.concatenate(parts, axis=-1)

    def conv_bn_relu(patch, w_ref, s_ref, b_ref):
        y = jnp.dot(patch, w_ref[...], preferred_element_type=jnp.float32)
        return jnp.maximum(y * s_ref[...] + b_ref[...], 0.0)

    def store_padded(dst_ref, y, c):
        # Conv output + F.pad([0,1,0,1]) zero border.  No full-buffer zero
        # fill: border + interior stores cover the whole scratch each step.
        dst_ref[ho:hp, :, :] = jnp.zeros((1, wp, c), dst_ref.dtype)
        dst_ref[:, wo:wp, :] = jnp.zeros((hp, 1, c), dst_ref.dtype)
        dst_ref[0:ho, 0:wo, :] = y.reshape(ho, wo, c).astype(dst_ref.dtype)

    # ---- stem1: 3x3 stride-2 conv lowered to one 2x2 stride-1 merged dot ----
    cin = x_ref.shape[-1]
    p1 = merged_patch(lambda ky, kx: x_ref[0, ky:ky + ho, kx:kx + wo, :], cin)
    store_padded(t1p_ref, conv_bn_relu(p1, w1_ref, s1_ref, b1_ref), cm)

    # ---- stem2a on the padded stem1 output (never leaves the chip) ----
    p2a = merged_patch(lambda ky, kx: t1p_ref[ky:ky + ho, kx:kx + wo, :], cm)
    store_padded(y2ap_ref, conv_bn_relu(p2a, w2a_ref, s2a_ref, b2a_ref), cmh)

    # ---- stem2b on the padded stem2a output ----
    p2b = merged_patch(lambda ky, kx: y2ap_ref[ky:ky + ho, kx:kx + wo, :], cmh)
    y2b = conv_bn_relu(p2b, w2b_ref, s2b_ref, b2b_ref)

    # ---- MaxPool2d(k=2, s=1, p=0, ceil_mode=True) on padded stem1 output ----
    pooled = jnp.maximum(
        jnp.maximum(t1p_ref[0:ho, 0:wo, :], t1p_ref[0:ho, 1:wo + 1, :]),
        jnp.maximum(t1p_ref[1:ho + 1, 0:wo, :], t1p_ref[1:ho + 1, 1:wo + 1, :]))

    # ---- channel concat in registers, single store ----
    o_ref[0] = jnp.concatenate(
        [pooled.astype(o_ref.dtype),
         y2b.reshape(ho, wo, cm).astype(o_ref.dtype)], axis=-1)


def _stem34_fused_kernel(x_ref, w3_ref, s3_ref, b3_ref,
                         w4_ref, s4_ref, b4_ref, o_ref, *, ho, wo):
    """Fused stem3 (3x3 s2 as 2x2-on-s2d, one merged dot) -> stem4 (1x1).

    x_ref : (1, ho+1, wo+1, 8*cm) bf16 (s2d of padded concat; lane-dense input)
    o_ref : (1, ho, wo, c2)
    """
    cin = x_ref.shape[-1]
    c2 = o_ref.shape[-1]
    parts = [x_ref[0, ky:ky + ho, kx:kx + wo, :].reshape(ho * wo, cin)
             for ky in range(2) for kx in range(2)]
    p3 = jnp.concatenate(parts, axis=-1)            # K = 4*cin (>= 512)
    t3 = jnp.dot(p3, w3_ref[...], preferred_element_type=jnp.float32)
    t3 = jnp.maximum(t3 * s3_ref[...] + b3_ref[...], 0.0).astype(jnp.bfloat16)
    y = jnp.dot(t3, w4_ref[...], preferred_element_type=jnp.float32)
    y = jnp.maximum(y * s4_ref[...] + b4_ref[...], 0.0)
    o_ref[0] = y.reshape(ho, wo, c2).astype(o_ref.dtype)


# --------------------------- pallas_call wrappers ---------------------------

_VMEM_LIMIT = 32 * 1024 * 1024   # explicit; >= usage here, <= physical on all gens


def stem12_fused(xs, p1, p2a, p2b):
    """xs: (B, hs, ws, 4*c1) bf16 (s2d of padded input) -> cat (B, hs-1, ws-1, 2*cm)."""
    B, hs, ws, cin = xs.shape
    ho, wo = hs - 1, ws - 1
    cm = p1["w"].shape[-1]
    cmh = p2a["w"].shape[-1]
    return pl.pallas_call(
        functools.partial(_stem12_fused_kernel, ho=ho, wo=wo),
        out_shape=jax.ShapeDtypeStruct((B, ho, wo, 2 * cm), jnp.bfloat16),
        grid=(B,),
        in_specs=[
            pl.BlockSpec((1, hs, ws, cin), lambda b: (b, 0, 0, 0)),
            pl.BlockSpec(p1["w"].shape, lambda b: (0, 0)),
            pl.BlockSpec((1, cm), lambda b: (0, 0)),
            pl.BlockSpec((1, cm), lambda b: (0, 0)),
            pl.BlockSpec(p2a["w"].shape, lambda b: (0, 0)),
            pl.BlockSpec((1, cmh), lambda b: (0, 0)),
            pl.BlockSpec((1, cmh), lambda b: (0, 0)),
            pl.BlockSpec(p2b["w"].shape, lambda b: (0, 0)),
            pl.BlockSpec((1, cm), lambda b: (0, 0)),
            pl.BlockSpec((1, cm), lambda b: (0, 0)),
        ],
        out_specs=pl.BlockSpec((1, ho, wo, 2 * cm), lambda b: (b, 0, 0, 0)),
        scratch_shapes=[pltpu.VMEM((ho + 1, wo + 1, cm), jnp.bfloat16),
                        pltpu.VMEM((ho + 1, wo + 1, cmh), jnp.bfloat16)],
        compiler_params=pltpu.CompilerParams(
            dimension_semantics=("parallel",),
            vmem_limit_bytes=_VMEM_LIMIT),
    )(xs, p1["w"], p1["scale"], p1["bias"],
      p2a["w"], p2a["scale"], p2a["bias"],
      p2b["w"], p2b["scale"], p2b["bias"])


def stem34_fused(cs, p3, p4, out_dtype=jnp.float32):
    """cs: (B, hs, ws, 8*cm) bf16 (s2d of padded concat) -> (B, hs-1, ws-1, c2)."""
    B, hs, ws, cin = cs.shape
    ho, wo = hs - 1, ws - 1
    cm = p3["w"].shape[-1]
    c2 = p4["w"].shape[-1]
    return pl.pallas_call(
        functools.partial(_stem34_fused_kernel, ho=ho, wo=wo),
        out_shape=jax.ShapeDtypeStruct((B, ho, wo, c2), out_dtype),
        grid=(B,),
        in_specs=[
            pl.BlockSpec((1, hs, ws, cin), lambda b: (b, 0, 0, 0)),
            pl.BlockSpec(p3["w"].shape, lambda b: (0, 0)),
            pl.BlockSpec((1, cm), lambda b: (0, 0)),
            pl.BlockSpec((1, cm), lambda b: (0, 0)),
            pl.BlockSpec(p4["w"].shape, lambda b: (0, 0)),
            pl.BlockSpec((1, c2), lambda b: (0, 0)),
            pl.BlockSpec((1, c2), lambda b: (0, 0)),
        ],
        out_specs=pl.BlockSpec((1, ho, wo, c2), lambda b: (b, 0, 0, 0)),
        compiler_params=pltpu.CompilerParams(
            dimension_semantics=("parallel",),
            vmem_limit_bytes=_VMEM_LIMIT),
    )(cs, p3["w"], p3["scale"], p3["bias"], p4["w"], p4["scale"], p4["bias"])


# ------------------------------- glue (JAX) --------------------------------

def _space_to_depth2(x):
    # (B, H, W, C) with even H, W -> (B, H//2, W//2, 4*C); channel order (py, px, c).
    B, H, W, C = x.shape
    x = x.reshape(B, H // 2, 2, W // 2, 2, C)
    x = jnp.transpose(x, (0, 1, 3, 2, 4, 5))
    return x.reshape(B, H // 2, W // 2, 4 * C)


def _pad_for_s2_conv(x):
    # pad=1 on all sides (autopad for k=3), then bottom/right to even H/W.
    # The extra even-padding rows/cols only meet the zero-filled weight taps,
    # so semantics are exact.
    B, H, W, C = x.shape
    return jnp.pad(x, ((0, 0), (1, 1 + (H % 2)), (1, 1 + (W % 2)), (0, 0)))


@jax.jit
def hgstem_forward(params, x_nchw):
    """HGStem forward. Input NCHW (PyTorch convention); kernels compute in NHWC."""
    x = jnp.transpose(x_nchw, (0, 2, 3, 1)).astype(jnp.bfloat16)

    # stem1..stem2b + pool + concat: ONE kernel. The stride-2 3x3 stem1 conv is
    # lowered to a 2x2 stride-1 conv on the space-to-depth(2) input (one cheap
    # fused XLA relayout pass over the 3-channel input).
    xs = _space_to_depth2(_pad_for_s2_conv(x))
    cat = stem12_fused(xs, params["stem1"], params["stem2a"], params["stem2b"])

    # stem3 (3x3 s2 p1, via s2d) fused with stem4 (1x1) in a second kernel.
    cs = _space_to_depth2(_pad_for_s2_conv(cat))
    out = stem34_fused(cs, params["stem3"], params["stem4"])
    return jnp.transpose(out, (0, 3, 1, 2))


# ------------------------- pure-JAX reference path --------------------------
# Standard lax convs with the SAME dtype policy (bf16 operands / f32 accumulate,
# bf16 activation hand-offs) so it validates the whole lowering (merged-tap
# weight transforms, padding, pooling, concat order) tightly.

def _ref_conv_bn_relu(x, w, scale, bias, stride, pad):
    w_hwio = jnp.transpose(w, (2, 3, 1, 0)).astype(jnp.bfloat16)
    y = jax.lax.conv_general_dilated(
        x.astype(jnp.bfloat16), w_hwio, (stride, stride),
        [(pad, pad), (pad, pad)],
        dimension_numbers=("NHWC", "HWIO", "NHWC"),
        preferred_element_type=jnp.float32)
    return jnp.maximum(y * scale + bias, 0.0)


@jax.jit
def hgstem_forward_ref(params, x_nchw):
    p = params
    x = jnp.transpose(x_nchw, (0, 2, 3, 1))
    t1 = _ref_conv_bn_relu(x, p["stem1"]["w_raw"], p["stem1"]["scale"],
                           p["stem1"]["bias"], 2, 1).astype(jnp.bfloat16)
    xp1 = jnp.pad(t1, ((0, 0), (0, 1), (0, 1), (0, 0)))
    x2 = _ref_conv_bn_relu(xp1, p["stem2a"]["w_raw"], p["stem2a"]["scale"],
                           p["stem2a"]["bias"], 1, 0).astype(jnp.bfloat16)
    x2 = jnp.pad(x2, ((0, 0), (0, 1), (0, 1), (0, 0)))
    x2 = _ref_conv_bn_relu(x2, p["stem2b"]["w_raw"], p["stem2b"]["scale"],
                           p["stem2b"]["bias"], 1, 0).astype(jnp.bfloat16)
    x1 = jnp.maximum(jnp.maximum(xp1[:, :-1, :-1], xp1[:, :-1, 1:]),
                     jnp.maximum(xp1[:, 1:, :-1], xp1[:, 1:, 1:]))
    cat = jnp.concatenate([x1, x2], axis=-1)
    t3 = _ref_conv_bn_relu(cat, p["stem3"]["w_raw"], p["stem3"]["scale"],
                           p["stem3"]["bias"], 2, 1).astype(jnp.bfloat16)
    out = _ref_conv_bn_relu(t3, p["stem4"]["w_raw"], p["stem4"]["scale"],
                            p["stem4"]["bias"], 1, 0)
    return jnp.transpose(out, (0, 3, 1, 2))


# ---------------------------- parameter setup ------------------------------
# All weight reshuffling / tap merging / bf16 casts / BN folding are done ONCE
# here (hoisted out of the forward pass).

def _prep_w_s1(w):
    """(cout, cin, k, k) stride-1 conv weight -> merged (k*k*cin, cout) bf16.

    Row order (ky, kx, cin) matches the kernel's lane-concat patch order."""
    cout, cin, k, _ = w.shape
    return jnp.transpose(w, (2, 3, 1, 0)).reshape(k * k * cin, cout).astype(jnp.bfloat16)


def _prep_w_s2_3x3(w):
    """(cout, cin, 3, 3) stride-2 weight -> merged (16*cin, cout) bf16 weight for
    the equivalent 2x2 stride-1 conv on the space-to-depth(2) input.

    Row order (dy, dx, py, px, cin): (dy, dx) matches the kernel tap-concat
    order, (py, px, cin) matches the s2d channel order; the extra taps are
    zero-padded so semantics are exact."""
    cout, cin = w.shape[0], w.shape[1]
    wp = jnp.pad(w, ((0, 0), (0, 0), (0, 1), (0, 1)))        # (cout, cin, 4, 4)
    wp = wp.reshape(cout, cin, 2, 2, 2, 2)                    # (cout, cin, dy, py, dx, px)
    wp = jnp.transpose(wp, (2, 4, 3, 5, 1, 0))                # (dy, dx, py, px, cin, cout)
    return wp.reshape(16 * cin, cout).astype(jnp.bfloat16)


def _init_conv(key, cin, cout, k):
    k1, k2, k3, k4, k5 = jax.random.split(key, 5)
    w = jax.random.normal(k1, (cout, cin, k, k), jnp.float32) / np.sqrt(cin * k * k)
    gamma = 1.0 + 0.1 * jax.random.normal(k2, (cout,), jnp.float32)
    beta = 0.1 * jax.random.normal(k3, (cout,), jnp.float32)
    mean = 0.1 * jax.random.normal(k4, (cout,), jnp.float32)
    var = jnp.abs(jax.random.normal(k5, (cout,), jnp.float32)) + 0.5
    eps = 1e-3                                   # ultralytics BatchNorm2d eps
    scale = gamma / jnp.sqrt(var + eps)          # fold BN (eval mode) into affine
    bias = beta - mean * scale
    return {"w_raw": w,
            "scale": scale.reshape(1, cout),
            "bias": bias.reshape(1, cout)}


def init_hgstem_params(key, c1, cm, c2):
    assert cm % 2 == 0
    ks = jax.random.split(key, 5)
    params = {
        "stem1": _init_conv(ks[0], c1, cm, 3),
        "stem2a": _init_conv(ks[1], cm, cm // 2, 2),
        "stem2b": _init_conv(ks[2], cm // 2, cm, 2),
        "stem3": _init_conv(ks[3], 2 * cm, cm, 3),
        "stem4": _init_conv(ks[4], cm, c2, 1),
    }
    params["stem1"]["w"] = _prep_w_s2_3x3(params["stem1"]["w_raw"])
    params["stem2a"]["w"] = _prep_w_s1(params["stem2a"]["w_raw"])
    params["stem2b"]["w"] = _prep_w_s1(params["stem2b"]["w_raw"])
    params["stem3"]["w"] = _prep_w_s2_3x3(params["stem3"]["w_raw"])
    params["stem4"]["w"] = _prep_w_s1(params["stem4"]["w_raw"])
    return params


if __name__ == "__main__":
    B, C1, H, W = 2, 3, 32, 32
    CM, C2 = 16, 32

    key = jax.random.PRNGKey(0)
    kp, kx = jax.random.split(key)
    params = init_hgstem_params(kp, C1, CM, C2)
    x = jax.random.normal(kx, (B, C1, H, W), jnp.float32)

    out = jax.block_until_ready(hgstem_forward(params, x))
    H2 = (H - 1) // 2 + 1
    H3 = (H2 - 1) // 2 + 1
    assert out.shape == (B, C2, H3, H3), out.shape

    ref = jax.block_until_ready(hgstem_forward_ref(params, x))
    np.testing.assert_allclose(np.asarray(out), np.asarray(ref),
                               rtol=1e-2, atol=1e-2)
    print("KERNEL_OK")
</pallas_src>

<mosaic_0001>
module attributes {stable_mosaic.version = 11 : i64} {
  func.func @_stem12_fused_kernel(%arg0: i32, %arg1: memref<1x17x17x12xbf16, #tpu.memory_space<vmem>>, %arg2: memref<48x16xbf16, #tpu.memory_space<vmem>>, %arg3: memref<1x16xf32, #tpu.memory_space<vmem>>, %arg4: memref<1x16xf32, #tpu.memory_space<vmem>>, %arg5: memref<64x8xbf16, #tpu.memory_space<vmem>>, %arg6: memref<1x8xf32, #tpu.memory_space<vmem>>, %arg7: memref<1x8xf32, #tpu.memory_space<vmem>>, %arg8: memref<32x16xbf16, #tpu.memory_space<vmem>>, %arg9: memref<1x16xf32, #tpu.memory_space<vmem>>, %arg10: memref<1x16xf32, #tpu.memory_space<vmem>>, %arg11: memref<1x16x16x32xbf16, #tpu.memory_space<vmem>>, %arg12: memref<17x17x16xbf16, #tpu.memory_space<vmem>>, %arg13: memref<17x17x8xbf16, #tpu.memory_space<vmem>>) attributes {dimension_semantics = [#tpu.dimension_semantics<parallel>], iteration_bounds = array<i64: 2>, scalar_prefetch = 0 : i64, scratch_operands = 2 : i64, tpu.core_type = #tpu.core_type<tc>, window_params = [{transform_indices = @transform_0, window_bounds = array<i64: 1, 17, 17, 12>}, {pipeline_mode = #tpu.pipeline_mode<synchronous>, transform_indices = @transform_1, window_bounds = array<i64: 48, 16>}, {pipeline_mode = #tpu.pipeline_mode<synchronous>, transform_indices = @transform_2, window_bounds = array<i64: 1, 16>}, {pipeline_mode = #tpu.pipeline_mode<synchronous>, transform_indices = @transform_3, window_bounds = array<i64: 1, 16>}, {pipeline_mode = #tpu.pipeline_mode<synchronous>, transform_indices = @transform_4, window_bounds = array<i64: 64, 8>}, {pipeline_mode = #tpu.pipeline_mode<synchronous>, transform_indices = @transform_5, window_bounds = array<i64: 1, 8>}, {pipeline_mode = #tpu.pipeline_mode<synchronous>, transform_indices = @transform_6, window_bounds = array<i64: 1, 8>}, {pipeline_mode = #tpu.pipeline_mode<synchronous>, transform_indices = @transform_7, window_bounds = array<i64: 32, 16>}, {pipeline_mode = #tpu.pipeline_mode<synchronous>, transform_indices = @transform_8, window_bounds = array<i64: 1, 16>}, {pipeline_mode = #tpu.pipeline_mode<synchronous>, transform_indices = @transform_9, window_bounds = array<i64: 1, 16>}, {transform_indices = @transform_10, window_bounds = array<i64: 1, 16, 16, 32>}]} {
    %c0 = arith.constant 0 : index
    %c0_0 = arith.constant 0 : index
    %c0_1 = arith.constant 0 : index
    %c0_2 = arith.constant 0 : index
    %0 = vector.load %arg1[%c0, %c0_0, %c0_1, %c0_2] : memref<1x17x17x12xbf16, #tpu.memory_space<vmem>>, vector<1x16x16x12xbf16>
    %1 = vector.shape_cast %0 : vector<1x16x16x12xbf16> to vector<16x16x12xbf16>
    %2 = vector.shape_cast %1 : vector<16x16x12xbf16> to vector<256x12xbf16>
    %c0_3 = arith.constant 0 : index
    %c0_4 = arith.constant 0 : index
    %c1 = arith.constant 1 : index
    %c0_5 = arith.constant 0 : index
    %3 = vector.load %arg1[%c0_3, %c0_4, %c1, %c0_5] : memref<1x17x17x12xbf16, #tpu.memory_space<vmem>>, vector<1x16x16x12xbf16>
    %4 = vector.shape_cast %3 : vector<1x16x16x12xbf16> to vector<16x16x12xbf16>
    %5 = vector.shape_cast %4 : vector<16x16x12xbf16> to vector<256x12xbf16>
    %c0_6 = arith.constant 0 : index
    %c1_7 = arith.constant 1 : index
    %c0_8 = arith.constant 0 : index
    %c0_9 = arith.constant 0 : index
    %6 = vector.load %arg1[%c0_6, %c1_7, %c0_8, %c0_9] : memref<1x17x17x12xbf16, #tpu.memory_space<vmem>>, vector<1x16x16x12xbf16>
    %7 = vector.shape_cast %6 : vector<1x16x16x12xbf16> to vector<16x16x12xbf16>
    %8 = vector.shape_cast %7 : vector<16x16x12xbf16> to vector<256x12xbf16>
    %c0_10 = arith.constant 0 : index
    %c1_11 = arith.constant 1 : index
    %c1_12 = arith.constant 1 : index
    %c0_13 = arith.constant 0 : index
    %9 = vector.load %arg1[%c0_10, %c1_11, %c1_12, %c0_13] : memref<1x17x17x12xbf16, #tpu.memory_space<vmem>>, vector<1x16x16x12xbf16>
    %10 = vector.shape_cast %9 : vector<1x16x16x12xbf16> to vector<16x16x12xbf16>
    %11 = vector.shape_cast %10 : vector<16x16x12xbf16> to vector<256x12xbf16>
    %12 = tpu.concatenate %2, %5, %8, %11 in 1 : vector<256x12xbf16>, vector<256x12xbf16>, vector<256x12xbf16>, vector<256x12xbf16> -> vector<256x48xbf16>
    %c0_14 = arith.constant 0 : index
    %c0_15 = arith.constant 0 : index
    %13 = vector.load %arg2[%c0_14, %c0_15] : memref<48x16xbf16, #tpu.memory_space<vmem>>, vector<48x16xbf16>
    %cst = arith.constant dense<0.000000e+00> : vector<256x16xf32>
    %14 = tpu.matmul %12, %13, %cst {dimension_numbers = #tpu.dot_dimension_numbers<[1], [0], [0], [1], [0, 0, 1, 1], [], []>} : vector<256x48xbf16>, vector<48x16xbf16>, vector<256x16xf32> -> vector<256x16xf32>
    %c0_16 = arith.constant 0 : index
    %c0_17 = arith.constant 0 : index
    %15 = vector.load %arg3[%c0_16, %c0_17] : memref<1x16xf32, #tpu.memory_space<vmem>>, vector<1x16xf32>
    %16 = vector.broadcast %15 : vector<1x16xf32> to vector<256x16xf32>
    %17 = arith.mulf %14, %16 : vector<256x16xf32>
    %c0_18 = arith.constant 0 : index
    %c0_19 = arith.constant 0 : index
    %18 = vector.load %arg4[%c0_18, %c0_19] : memref<1x16xf32, #tpu.memory_space<vmem>>, vector<1x16xf32>
    %19 = vector.broadcast %18 : vector<1x16xf32> to vector<256x16xf32>
    %20 = arith.addf %17, %19 : vector<256x16xf32>
    %cst_20 = arith.constant 0.000000e+00 : f32
    %21 = vector.broadcast %cst_20 : f32 to vector<256x16xf32>
    %22 = arith.maximumf %20, %21 : vector<256x16xf32>
    %cst_21 = arith.constant 0.000000e+00 : bf16
    %23 = vector.broadcast %cst_21 : bf16 to vector<1x17x16xbf16>
    %c16 = arith.constant 16 : index
    %c0_22 = arith.constant 0 : index
    %c0_23 = arith.constant 0 : index
    %24 = vector.load %arg12[%c16, %c0_22, %c0_23] : memref<17x17x16xbf16, #tpu.memory_space<vmem>>, vector<1x17x16xbf16>
    tpu.vector_store %arg12[%c16, %c0_22, %c0_23], %23 {strides = array<i32>} : memref<17x17x16xbf16, #tpu.memory_space<vmem>>, vector<1x17x16xbf16>,
    %cst_24 = arith.constant 0.000000e+00 : bf16
    %25 = vector.broadcast %cst_24 : bf16 to vector<17x1x16xbf16>
    %c0_25 = arith.constant 0 : index
    %c16_26 = arith.constant 16 : index
    %c0_27 = arith.constant 0 : index
    %26 = vector.load %arg12[%c0_25, %c16_26, %c0_27] : memref<17x17x16xbf16, #tpu.memory_space<vmem>>, vector<17x1x16xbf16>
    tpu.vector_store %arg12[%c0_25, %c16_26, %c0_27], %25 {strides = array<i32>} : memref<17x17x16xbf16, #tpu.memory_space<vmem>>, vector<17x1x16xbf16>,
    %27 = vector.shape_cast %22 : vector<256x16xf32> to vector<16x16x16xf32>
    %28 = arith.truncf %27 : vector<16x16x16xf32> to vector<16x16x16xbf16>
    %c0_28 = arith.constant 0 : index
    %c0_29 = arith.constant 0 : index
    %c0_30 = arith.constant 0 : index
    %29 = vector.load %arg12[%c0_28, %c0_29, %c0_30] : memref<17x17x16xbf16, #tpu.memory_space<vmem>>, vector<16x16x16xbf16>
    tpu.vector_store %arg12[%c0_28, %c0_29, %c0_30], %28 {strides = array<i32>} : memref<17x17x16xbf16, #tpu.memory_space<vmem>>, vector<16x16x16xbf16>,
    %c0_31 = arith.constant 0 : index
    %c0_32 = arith.constant 0 : index
    %c0_33 = arith.constant 0 : index
    %30 = vector.load %arg12[%c0_31, %c0_32, %c0_33] : memref<17x17x16xbf16, #tpu.memory_space<vmem>>, vector<16x16x16xbf16>
    %31 = vector.shape_cast %30 : vector<16x16x16xbf16> to vector<256x16xbf16>
    %c0_34 = arith.constant 0 : index
    %c1_35 = arith.constant 1 : index
    %c0_36 = arith.constant 0 : index
    %32 = vector.load %arg12[%c0_34, %c1_35, %c0_36] : memref<17x17x16xbf16, #tpu.memory_space<vmem>>, vector<16x16x16xbf16>
    %33 = vector.shape_cast %32 : vector<16x16x16xbf16> to vector<256x16xbf16>
    %c1_37 = arith.constant 1 : index
    %c0_38 = arith.constant 0 : index
    %c0_39 = arith.constant 0 : index
    %34 = vector.load %arg12[%c1_37, %c0_38, %c0_39] : memref<17x17x16xbf16, #tpu.memory_space<vmem>>, vector<16x16x16xbf16>
    %35 = vector.shape_cast %34 : vector<16x16x16xbf16> to vector<256x16xbf16>
    %c1_40 = arith.constant 1 : index
    %c1_41 = arith.constant 1 : index
    %c0_42 = arith.constant 0 : index
    %36 = vector.load %arg12[%c1_40, %c1_41, %c0_42] : memref<17x17x16xbf16, #tpu.memory_space<vmem>>, vector<16x16x16xbf16>
    %37 = vector.shape_cast %36 : vector<16x16x16xbf16> to vector<256x16xbf16>
    %38 = tpu.concatenate %31, %33, %35, %37 in 1 : vector<256x16xbf16>, vector<256x16xbf16>, vector<256x16xbf16>, vector<256x16xbf16> -> vector<256x64xbf16>
    %c0_43 = arith.constant 0 : index
    %c0_44 = arith.constant 0 : index
    %39 = vector.load %arg5[%c0_43, %c0_44] : memref<64x8xbf16, #tpu.memory_space<vmem>>, vector<64x8xbf16>
    %cst_45 = arith.constant dense<0.000000e+00> : vector<256x8xf32>
    %40 = tpu.matmul %38, %39, %cst_45 {dimension_numbers = #tpu.dot_dimension_numbers<[1], [0], [0], [1], [0, 0, 1, 1], [], []>} : vector<256x64xbf16>, vector<64x8xbf16>, vector<256x8xf32> -> vector<256x8xf32>
    %c0_46 = arith.constant 0 : index
    %c0_47 = arith.constant 0 : index
    %41 = vector.load %arg6[%c0_46, %c0_47] : memref<1x8xf32, #tpu.memory_space<vmem>>, vector<1x8xf32>
    %42 = vector.broadcast %41 : vector<1x8xf32> to vector<256x8xf32>
    %43 = arith.mulf %40, %42 : vector<256x8xf32>
    %c0_48 = arith.constant 0 : index
    %c0_49 = arith.constant 0 : index
    %44 = vector.load %arg7[%c0_48, %c0_49] : memref<1x8xf32, #tpu.memory_space<vmem>>, vector<1x8xf32>
    %45 = vector.broadcast %44 : vector<1x8xf32> to vector<256x8xf32>
    %46 = arith.addf %43, %45 : vector<256x8xf32>
    %cst_50 = arith.constant 0.000000e+00 : f32
    %47 = vector.broadcast %cst_50 : f32 to vector<256x8xf32>
    %48 = arith.maximumf %46, %47 : vector<256x8xf32>
    %cst_51 = arith.constant 0.000000e+00 : bf16
    %49 = vector.broadcast %cst_51 : bf16 to vector<1x17x8xbf16>
    %c16_52 = arith.constant 16 : index
    %c0_53 = arith.constant 0 : index
    %c0_54 = arith.constant 0 : index
    %50 = vector.load %arg13[%c16_52, %c0_53, %c0_54] : memref<17x17x8xbf16, #tpu.memory_space<vmem>>, vector<1x17x8xbf16>
    tpu.vector_store %arg13[%c16_52, %c0_53, %c0_54], %49 {strides = array<i32>} : memref<17x17x8xbf16, #tpu.memory_space<vmem>>, vector<1x17x8xbf16>,
    %cst_55 = arith.constant 0.000000e+00 : bf16
    %51 = vector.broadcast %cst_55 : bf16 to vector<17x1x8xbf16>
    %c0_56 = arith.constant 0 : index
    %c16_57 = arith.constant 16 : index
    %c0_58 = arith.constant 0 : index
    %52 = vector.load %arg13[%c0_56, %c16_57, %c0_58] : memref<17x17x8xbf16, #tpu.memory_space<vmem>>, vector<17x1x8xbf16>
    tpu.vector_store %arg13[%c0_56, %c16_57, %c0_58], %51 {strides = array<i32>} : memref<17x17x8xbf16, #tpu.memory_space<vmem>>, vector<17x1x8xbf16>,
    %53 = vector.shape_cast %48 : vector<256x8xf32> to vector<16x16x8xf32>
    %54 = arith.truncf %53 : vector<16x16x8xf32> to vector<16x16x8xbf16>
    %c0_59 = arith.constant 0 : index
    %c0_60 = arith.constant 0 : index
    %c0_61 = arith.constant 0 : index
    %55 = vector.load %arg13[%c0_59, %c0_60, %c0_61] : memref<17x17x8xbf16, #tpu.memory_space<vmem>>, vector<16x16x8xbf16>
    tpu.vector_store %arg13[%c0_59, %c0_60, %c0_61], %54 {strides = array<i32>} : memref<17x17x8xbf16, #tpu.memory_space<vmem>>, vector<16x16x8xbf16>,
    %c0_62 = arith.constant 0 : index
    %c0_63 = arith.constant 0 : index
    %c0_64 = arith.constant 0 : index
    %56 = vector.load %arg13[%c0_62, %c0_63, %c0_64] : memref<17x17x8xbf16, #tpu.memory_space<vmem>>, vector<16x16x8xbf16>
    %57 = vector.shape_cast %56 : vector<16x16x8xbf16> to vector<256x8xbf16>
    %c0_65 = arith.constant 0 : index
    %c1_66 = arith.constant 1 : index
    %c0_67 = arith.constant 0 : index
    %58 = vector.load %arg13[%c0_65, %c1_66, %c0_67] : memref<17x17x8xbf16, #tpu.memory_space<vmem>>, vector<16x16x8xbf16>
    %59 = vector.shape_cast %58 : vector<16x16x8xbf16> to vector<256x8xbf16>
    %c1_68 = arith.constant 1 : index
    %c0_69 = arith.constant 0 : index
    %c0_70 = arith.constant 0 : index
    %60 = vector.load %arg13[%c1_68, %c0_69, %c0_70] : memref<17x17x8xbf16, #tpu.memory_space<vmem>>, vector<16x16x8xbf16>
    %61 = vector.shape_cast %60 : vector<16x16x8xbf16> to vector<256x8xbf16>
    %c1_71 = arith.constant 1 : index
    %c1_72 = arith.constant 1 : index
    %c0_73 = arith.constant 0 : index
    %62 = vector.load %arg13[%c1_71, %c1_72, %c0_73] : memref<17x17x8xbf16, #tpu.memory_space<vmem>>, vector<16x16x8xbf16>
    %63 = vector.shape_cast %62 : vector<16x16x8xbf16> to vector<256x8xbf16>
    %64 = tpu.concatenate %57, %59, %61, %63 in 1 : vector<256x8xbf16>, vector<256x8xbf16>, vector<256x8xbf16>, vector<256x8xbf16> -> vector<256x32xbf16>
    %c0_74 = arith.constant 0 : index
    %c0_75 = arith.constant 0 : index
    %65 = vector.load %arg8[%c0_74, %c0_75] : memref<32x16xbf16, #tpu.memory_space<vmem>>, vector<32x16xbf16>
    %cst_76 = arith.constant dense<0.000000e+00> : vector<256x16xf32>
    %66 = tpu.matmul %64, %65, %cst_76 {dimension_numbers = #tpu.dot_dimension_numbers<[1], [0], [0], [1], [0, 0, 1, 1], [], []>} : vector<256x32xbf16>, vector<32x16xbf16>, vector<256x16xf32> -> vector<256x16xf32>
    %c0_77 = arith.constant 0 : index
    %c0_78 = arith.constant 0 : index
    %67 = vector.load %arg9[%c0_77, %c0_78] : memref<1x16xf32, #tpu.memory_space<vmem>>, vector<1x16xf32>
    %68 = vector.broadcast %67 : vector<1x16xf32> to vector<256x16xf32>
    %69 = arith.mulf %66, %68 : vector<256x16xf32>
    %c0_79 = arith.constant 0 : index
    %c0_80 = arith.constant 0 : index
    %70 = vector.load %arg10[%c0_79, %c0_80] : memref<1x16xf32, #tpu.memory_space<vmem>>, vector<1x16xf32>
    %71 = vector.broadcast %70 : vector<1x16xf32> to vector<256x16xf32>
    %72 = arith.addf %69, %71 : vector<256x16xf32>
    %cst_81 = arith.constant 0.000000e+00 : f32
    %73 = vector.broadcast %cst_81 : f32 to vector<256x16xf32>
    %74 = arith.maximumf %72, %73 : vector<256x16xf32>
    %c0_82 = arith.constant 0 : index
    %c0_83 = arith.constant 0 : index
    %c0_84 = arith.constant 0 : index
    %75 = vector.load %arg12[%c0_82, %c0_83, %c0_84] : memref<17x17x16xbf16, #tpu.memory_space<vmem>>, vector<16x16x16xbf16>
    %c0_85 = arith.constant 0 : index
    %c1_86 = arith.constant 1 : index
    %c0_87 = arith.constant 0 : index
    %76 = vector.load %arg12[%c0_85, %c1_86, %c0_87] : memref<17x17x16xbf16, #tpu.memory_space<vmem>>, vector<16x16x16xbf16>
    %77 = arith.maximumf %75, %76 : vector<16x16x16xbf16>
    %c1_88 = arith.constant 1 : index
    %c0_89 = arith.constant 0 : index
    %c0_90 = arith.constant 0 : index
    %78 = vector.load %arg12[%c1_88, %c0_89, %c0_90] : memref<17x17x16xbf16, #tpu.memory_space<vmem>>, vector<16x16x16xbf16>
    %c1_91 = arith.constant 1 : index
    %c1_92 = arith.constant 1 : index
    %c0_93 = arith.constant 0 : index
    %79 = vector.load %arg12[%c1_91, %c1_92, %c0_93] : memref<17x17x16xbf16, #tpu.memory_space<vmem>>, vector<16x16x16xbf16>
    %80 = arith.maximumf %78, %79 : vector<16x16x16xbf16>
    %81 = arith.maximumf %77, %80 : vector<16x16x16xbf16>
    %82 = vector.shape_cast %74 : vector<256x16xf32> to vector<16x16x16xf32>
    %83 = arith.truncf %82 : vector<16x16x16xf32> to vector<16x16x16xbf16>
    %84 = tpu.concatenate %81, %83 in 2 : vector<16x16x16xbf16>, vector<16x16x16xbf16> -> vector<16x16x32xbf16>
    %c0_94 = arith.constant 0 : index
    %c0_95 = arith.constant 0 : index
    %c0_96 = arith.constant 0 : index
    %c0_97 = arith.constant 0 : index
    %85 = vector.load %arg11[%c0_94, %c0_95, %c0_96, %c0_97] : memref<1x16x16x32xbf16, #tpu.memory_space<vmem>>, vector<1x16x16x32xbf16>
    %86 = vector.shape_cast %85 : vector<1x16x16x32xbf16> to vector<16x16x32xbf16>
    %87 = vector.shape_cast %84 : vector<16x16x32xbf16> to vector<1x16x16x32xbf16>
    tpu.vector_store %arg11[%c0_94, %c0_95, %c0_96, %c0_97], %87 {strides = array<i32>} : memref<1x16x16x32xbf16, #tpu.memory_space<vmem>>, vector<1x16x16x32xbf16>,
    return
  }
  func.func @transform_0(%arg0: i32) -> (i32, i32, i32, i32) {
    %c0_i32 = arith.constant 0 : i32
    %c0_i32_0 = arith.constant 0 : i32
    %c0_i32_1 = arith.constant 0 : i32
    %c0_i32_2 = arith.constant 0 : i32
    return %arg0, %c0_i32, %c0_i32_0, %c0_i32_1 : i32, i32, i32, i32
  }
  func.func @transform_1(%arg0: i32) -> (i32, i32) {
    %c0_i32 = arith.constant 0 : i32
    %c0_i32_0 = arith.constant 0 : i32
    %c0_i32_1 = arith.constant 0 : i32
    return %c0_i32, %c0_i32_0 : i32, i32
  }
  func.func @transform_2(%arg0: i32) -> (i32, i32) {
    %c0_i32 = arith.constant 0 : i32
    %c0_i32_0 = arith.constant 0 : i32
    %c0_i32_1 = arith.constant 0 : i32
    return %c0_i32, %c0_i32_0 : i32, i32
  }
  func.func @transform_3(%arg0: i32) -> (i32, i32) {
    %c0_i32 = arith.constant 0 : i32
    %c0_i32_0 = arith.constant 0 : i32
    %c0_i32_1 = arith.constant 0 : i32
    return %c0_i32, %c0_i32_0 : i32, i32
  }
  func.func @transform_4(%arg0: i32) -> (i32, i32) {
    %c0_i32 = arith.constant 0 : i32
    %c0_i32_0 = arith.constant 0 : i32
    %c0_i32_1 = arith.constant 0 : i32
    return %c0_i32, %c0_i32_0 : i32, i32
  }
  func.func @transform_5(%arg0: i32) -> (i32, i32) {
    %c0_i32 = arith.constant 0 : i32
    %c0_i32_0 = arith.constant 0 : i32
    %c0_i32_1 = arith.constant 0 : i32
    return %c0_i32, %c0_i32_0 : i32, i32
  }
  func.func @transform_6(%arg0: i32) -> (i32, i32) {
    %c0_i32 = arith.constant 0 : i32
    %c0_i32_0 = arith.constant 0 : i32
    %c0_i32_1 = arith.constant 0 : i32
    return %c0_i32, %c0_i32_0 : i32, i32
  }
  func.func @transform_7(%arg0: i32) -> (i32, i32) {
    %c0_i32 = arith.constant 0 : i32
    %c0_i32_0 = arith.constant 0 : i32
    %c0_i32_1 = arith.constant 0 : i32
    return %c0_i32, %c0_i32_0 : i32, i32
  }
  func.func @transform_8(%arg0: i32) -> (i32, i32) {
    %c0_i32 = arith.constant 0 : i32
    %c0_i32_0 = arith.constant 0 : i32
    %c0_i32_1 = arith.constant 0 : i32
    return %c0_i32, %c0_i32_0 : i32, i32
  }
  func.func @transform_9(%arg0: i32) -> (i32, i32) {
    %c0_i32 = arith.constant 0 : i32
    %c0_i32_0 = arith.constant 0 : i32
    %c0_i32_1 = arith.constant 0 : i32
    return %c0_i32, %c0_i32_0 : i32, i32
  }
  func.func @transform_10(%arg0: i32) -> (i32, i32, i32, i32) {
    %c0_i32 = arith.constant 0 : i32
    %c0_i32_0 = arith.constant 0 : i32
    %c0_i32_1 = arith.constant 0 : i32
    %c0_i32_2 = arith.constant 0 : i32
    return %arg0, %c0_i32, %c0_i32_0, %c0_i32_1 : i32, i32, i32, i32
  }
}

module attributes {stable_mosaic.version = 11 : i64} {
  func.func @_stem34_fused_kernel(%arg0: i32, %arg1: memref<1x9x9x128xbf16, #tpu.memory_space<vmem>>, %arg2: memref<512x16xbf16, #tpu.memory_space<vmem>>, %arg3: memref<1x16xf32, #tpu.memory_space<vmem>>, %arg4: memref<1x16xf32, #tpu.memory_space<vmem>>, %arg5: memref<16x32xbf16, #tpu.memory_space<vmem>>, %arg6: memref<1x32xf32, #tpu.memory_space<vmem>>, %arg7: memref<1x32xf32, #tpu.memory_space<vmem>>, %arg8: memref<1x8x8x32xf32, #tpu.memory_space<vmem>>) attributes {dimension_semantics = [#tpu.dimension_semantics<parallel>], iteration_bounds = array<i64: 2>, scalar_prefetch = 0 : i64, scratch_operands = 0 : i64, tpu.core_type = #tpu.core_type<tc>, window_params = [{transform_indices = @transform_0, window_bounds = array<i64: 1, 9, 9, 128>}, {pipeline_mode = #tpu.pipeline_mode<synchronous>, transform_indices = @transform_1, window_bounds = array<i64: 512, 16>}, {pipeline_mode = #tpu.pipeline_mode<synchronous>, transform_indices = @transform_2, window_bounds = array<i64: 1, 16>}, {pipeline_mode = #tpu.pipeline_mode<synchronous>, transform_indices = @transform_3, window_bounds = array<i64: 1, 16>}, {pipeline_mode = #tpu.pipeline_mode<synchronous>, transform_indices = @transform_4, window_bounds = array<i64: 16, 32>}, {pipeline_mode = #tpu.pipeline_mode<synchronous>, transform_indices = @transform_5, window_bounds = array<i64: 1, 32>}, {pipeline_mode = #tpu.pipeline_mode<synchronous>, transform_indices = @transform_6, window_bounds = array<i64: 1, 32>}, {transform_indices = @transform_7, window_bounds = array<i64: 1, 8, 8, 32>}]} {
    %c0 = arith.constant 0 : index
    %c0_0 = arith.constant 0 : index
    %c0_1 = arith.constant 0 : index
    %c0_2 = arith.constant 0 : index
    %0 = vector.load %arg1[%c0, %c0_0, %c0_1, %c0_2] : memref<1x9x9x128xbf16, #tpu.memory_space<vmem>>, vector<1x8x8x128xbf16>
    %1 = vector.shape_cast %0 : vector<1x8x8x128xbf16> to vector<8x8x128xbf16>
    %2 = vector.shape_cast %1 : vector<8x8x128xbf16> to vector<64x128xbf16>
    %c0_3 = arith.constant 0 : index
    %c0_4 = arith.constant 0 : index
    %c1 = arith.constant 1 : index
    %c0_5 = arith.constant 0 : index
    %3 = vector.load %arg1[%c0_3, %c0_4, %c1, %c0_5] : memref<1x9x9x128xbf16, #tpu.memory_space<vmem>>, vector<1x8x8x128xbf16>
    %4 = vector.shape_cast %3 : vector<1x8x8x128xbf16> to vector<8x8x128xbf16>
    %5 = vector.shape_cast %4 : vector<8x8x128xbf16> to vector<64x128xbf16>
    %c0_6 = arith.constant 0 : index
    %c1_7 = arith.constant 1 : index
    %c0_8 = arith.constant 0 : index
    %c0_9 = arith.constant 0 : index
    %6 = vector.load %arg1[%c0_6, %c1_7, %c0_8, %c0_9] : memref<1x9x9x128xbf16, #tpu.memory_space<vmem>>, vector<1x8x8x128xbf16>
    %7 = vector.shape_cast %6 : vector<1x8x8x128xbf16> to vector<8x8x128xbf16>
    %8 = vector.shape_cast %7 : vector<8x8x128xbf16> to vector<64x128xbf16>
    %c0_10 = arith.constant 0 : index
    %c1_11 = arith.constant 1 : index
    %c1_12 = arith.constant 1 : index
    %c0_13 = arith.constant 0 : index
    %9 = vector.load %arg1[%c0_10, %c1_11, %c1_12, %c0_13] : memref<1x9x9x128xbf16, #tpu.memory_space<vmem>>, vector<1x8x8x128xbf16>
    %10 = vector.shape_cast %9 : vector<1x8x8x128xbf16> to vector<8x8x128xbf16>
    %11 = vector.shape_cast %10 : vector<8x8x128xbf16> to vector<64x128xbf16>
    %12 = tpu.concatenate %2, %5, %8, %11 in 1 : vector<64x128xbf16>, vector<64x128xbf16>, vector<64x128xbf16>, vector<64x128xbf16> -> vector<64x512xbf16>
    %c0_14 = arith.constant 0 : index
    %c0_15 = arith.constant 0 : index
    %13 = vector.load %arg2[%c0_14, %c0_15] : memref<512x16xbf16, #tpu.memory_space<vmem>>, vector<512x16xbf16>
    %cst = arith.constant dense<0.000000e+00> : vector<64x16xf32>
    %14 = tpu.matmul %12, %13, %cst {dimension_numbers = #tpu.dot_dimension_numbers<[1], [0], [0], [1], [0, 0, 1, 1], [], []>} : vector<64x512xbf16>, vector<512x16xbf16>, vector<64x16xf32> -> vector<64x16xf32>
    %c0_16 = arith.constant 0 : index
    %c0_17 = arith.constant 0 : index
    %15 = vector.load %arg3[%c0_16, %c0_17] : memref<1x16xf32, #tpu.memory_space<vmem>>, vector<1x16xf32>
    %16 = vector.broadcast %15 : vector<1x16xf32> to vector<64x16xf32>
    %17 = arith.mulf %14, %16 : vector<64x16xf32>
    %c0_18 = arith.constant 0 : index
    %c0_19 = arith.constant 0 : index
    %18 = vector.load %arg4[%c0_18, %c0_19] : memref<1x16xf32, #tpu.memory_space<vmem>>, vector<1x16xf32>
    %19 = vector.broadcast %18 : vector<1x16xf32> to vector<64x16xf32>
    %20 = arith.addf %17, %19 : vector<64x16xf32>
    %cst_20 = arith.constant 0.000000e+00 : f32
    %21 = vector.broadcast %cst_20 : f32 to vector<64x16xf32>
    %22 = arith.maximumf %20, %21 : vector<64x16xf32>
    %23 = arith.truncf %22 : vector<64x16xf32> to vector<64x16xbf16>
    %c0_21 = arith.constant 0 : index
    %c0_22 = arith.constant 0 : index
    %24 = vector.load %arg5[%c0_21, %c0_22] : memref<16x32xbf16, #tpu.memory_space<vmem>>, vector<16x32xbf16>
    %cst_23 = arith.constant dense<0.000000e+00> : vector<64x32xf32>
    %25 = tpu.matmul %23, %24, %cst_23 {dimension_numbers = #tpu.dot_dimension_numbers<[1], [0], [0], [1], [0, 0, 1, 1], [], []>} : vector<64x16xbf16>, vector<16x32xbf16>, vector<64x32xf32> -> vector<64x32xf32>
    %c0_24 = arith.constant 0 : index
    %c0_25 = arith.constant 0 : index
    %26 = vector.load %arg6[%c0_24, %c0_25] : memref<1x32xf32, #tpu.memory_space<vmem>>, vector<1x32xf32>
    %27 = vector.broadcast %26 : vector<1x32xf32> to vector<64x32xf32>
    %28 = arith.mulf %25, %27 : vector<64x32xf32>
    %c0_26 = arith.constant 0 : index
    %c0_27 = arith.constant 0 : index
    %29 = vector.load %arg7[%c0_26, %c0_27] : memref<1x32xf32, #tpu.memory_space<vmem>>, vector<1x32xf32>
    %30 = vector.broadcast %29 : vector<1x32xf32> to vector<64x32xf32>
    %31 = arith.addf %28, %30 : vector<64x32xf32>
    %cst_28 = arith.constant 0.000000e+00 : f32
    %32 = vector.broadcast %cst_28 : f32 to vector<64x32xf32>
    %33 = arith.maximumf %31, %32 : vector<64x32xf32>
    %34 = vector.shape_cast %33 : vector<64x32xf32> to vector<8x8x32xf32>
    %c0_29 = arith.constant 0 : index
    %c0_30 = arith.constant 0 : index
    %c0_31 = arith.constant 0 : index
    %c0_32 = arith.constant 0 : index
    %35 = vector.load %arg8[%c0_29, %c0_30, %c0_31, %c0_32] : memref<1x8x8x32xf32, #tpu.memory_space<vmem>>, vector<1x8x8x32xf32>
    %36 = vector.shape_cast %35 : vector<1x8x8x32xf32> to vector<8x8x32xf32>
    %37 = vector.shape_cast %34 : vector<8x8x32xf32> to vector<1x8x8x32xf32>
    tpu.vector_store %arg8[%c0_29, %c0_30, %c0_31, %c0_32], %37 {strides = array<i32>} : memref<1x8x8x32xf32, #tpu.memory_space<vmem>>, vector<1x8x8x32xf32>,
    return
  }
  func.func @transform_0(%arg0: i32) -> (i32, i32, i32, i32) {
    %c0_i32 = arith.constant 0 : i32
    %c0_i32_0 = arith.constant 0 : i32
    %c0_i32_1 = arith.constant 0 : i32
    %c0_i32_2 = arith.constant 0 : i32
    return %arg0, %c0_i32, %c0_i32_0, %c0_i32_1 : i32, i32, i32, i32
  }
  func.func @transform_1(%arg0: i32) -> (i32, i32) {
    %c0_i32 = arith.constant 0 : i32
    %c0_i32_0 = arith.constant 0 : i32
    %c0_i32_1 = arith.constant 0 : i32
    return %c0_i32, %c0_i32_0 : i32, i32
  }
  func.func @transform_2(%arg0: i32) -> (i32, i32) {
    %c0_i32 = arith.constant 0 : i32
    %c0_i32_0 = arith.constant 0 : i32
    %c0_i32_1 = arith.constant 0 : i32
    return %c0_i32, %c0_i32_0 : i32, i32
  }
  func.func @transform_3(%arg0: i32) -> (i32, i32) {
    %c0_i32 = arith.constant 0 : i32
    %c0_i32_0 = arith.constant 0 : i32
    %c0_i32_1 = arith.constant 0 : i32
    return %c0_i32, %c0_i32_0 : i32, i32
  }
  func.func @transform_4(%arg0: i32) -> (i32, i32) {
    %c0_i32 = arith.constant 0 : i32
    %c0_i32_0 = arith.constant 0 : i32
    %c0_i32_1 = arith.constant 0 : i32
    return %c0_i32, %c0_i32_0 : i32, i32
  }
  func.func @transform_5(%arg0: i32) -> (i32, i32) {
    %c0_i32 = arith.constant 0 : i32
    %c0_i32_0 = arith.constant 0 : i32
    %c0_i32_1 = arith.constant 0 : i32
    return %c0_i32, %c0_i32_0 : i32, i32
  }
  func.func @transform_6(%arg0: i32) -> (i32, i32) {
    %c0_i32 = arith.constant 0 : i32
    %c0_i32_0 = arith.constant 0 : i32
    %c0_i32_1 = arith.constant 0 : i32
    return %c0_i32, %c0_i32_0 : i32, i32
  }
  func.func @transform_7(%arg0: i32) -> (i32, i32, i32, i32) {
    %c0_i32 = arith.constant 0 : i32
    %c0_i32_0 = arith.constant 0 : i32
    %c0_i32_1 = arith.constant 0 : i32
    %c0_i32_2 = arith.constant 0 : i32
    return %arg0, %c0_i32, %c0_i32_0, %c0_i32_1 : i32, i32, i32, i32
  }
}

</mosaic_0001>

<bundles_post_ra>
// kernel: hgstem_forward.3
= control target key start
LH: loop header
LB: loop body
LE: loop exit
PB: predicated region body
PF: predicated region fallthrough
CT: control target
= control target key end

     0   :  { %12 = vsyncpa [#allocation3], 0  ;;  %s2019_s0 = inlined_call_operand.vmem [shape: bf16[2,9,9,128], index: 0, kind: input, shape index: {}]   ;;  %s2020_s1 = inlined_call_operand.vmem [shape: bf16[512,16], index: 1, kind: input, shape index: {}]   ;;  %s2021_s2 = inlined_call_operand.vmem [shape: f32[1,16], index: 2, kind: input, shape index: {}]   ;;  %s2022_s3 = inlined_call_operand.vmem [shape: f32[1,16], index: 3, kind: input, shape index: {}]   ;;  %s2023_s4 = inlined_call_operand.vmem [shape: bf16[16,32], index: 4, kind: input, shape index: {}]   ;;  %s2024_s5 = inlined_call_operand.vmem [shape: f32[1,32], index: 5, kind: input, shape index: {}]   ;;  %s2025_s6 = inlined_call_operand.vmem [shape: f32[1,32], index: 6, kind: input, shape index: {}]   ;;  %s2026_s7 = inlined_call_operand.hbm [shape: f32[2,8,8,32], index: 7, kind: output, shape index: {}]  }
   0x1   :  { %14 = vsyncpa [#allocation3 + $0x1], 0  ;;  %s1627_s24 = smov 0   ;;  %s1629_s25 = smov 0  }
   0x2   :  { %s1631_s26 = smov 0   ;;  %s1633_s27 = smov 0  }
   0x3 LB: > { %s1648_s28 = sadd.s32 4294967295, %s1582_s27   ;;  %s1255_s29 = sadd.s32 4294967294, %s1582_s27   ;;  %s1582_s27 = sphi %s1633_s27, %s2034_s27   ;;  %s1578_s26 = sphi %s1631_s26, %s2033_s26   ;;  %s1574_s25 = sphi %s1629_s25, %s2032_s25   ;;  %s1570_s24 = sphi %s1627_s24, %s2031_s24  }
   0x4   : > { %s1652_s30 = sadd.s32 1, %s1582_s27   ;;  %s179_s8 = sadd.s32 1, %s1578_s26 }
   0x5   : > { %s176_s9 = ssub.s32 %s1582_s27, %s1652_s30  ;;  %p189_p0 = scmp.ne.s32.totalorder %s1578_s26, %s1574_s25 }
   0x6   : > { %p177_p1 = scmp.eq.s32.totalorder %s176_s9, 0  ;;  %p190_p2 = scmp.eq.s32.totalorder %s1648_s28, 1 }
   0x7   : > { %p195_p3 = scmp.ne.s32.totalorder %s1574_s25, %s1570_s24  ;;  %p196_p4 = scmp.eq.s32.totalorder %s1255_s29, 1 }
   0x8   : > { %s1663_s10 = scalar_select %p177_p1, %s1578_s26, %s179_s8  }
   0x9   : > { %p1665_p5 = por %p190_p2, %p189_p0  ;;  %p1669_p6 = por %p196_p4, %p195_p3 }
   0xa   : > { %p1258_p7 = scmp.ge.s32.totalorder %s1582_s27, 1  ;;  %p240_p8 = scmp.lt.s32.totalorder %s1582_s27, 3 }
   0xc   : > { %p241_p9 = pnand %p1258_p7, %p240_p8 }
   0xd   : > { %v1479_v0 = vld [vmem:[%s2020_s1 + $0x40] sm:$0xff] (!%p241_p9)   ;;  %v1483_v4 = vld [vmem:[%s2020_s1 + $0x48] sm:$0xff] (!%p241_p9)   ;;  %v1487_v8 = vld [vmem:[%s2020_s1 + $0x50] sm:$0xff] (!%p241_p9)   ;;  %p272_p10 = scmp.lt.s32.totalorder (!%p241_p9), %s1648_s28, 1  ;;  %vm294_vm0 = vsmask.f32 (!%p241_p9), 3328 }
   0xe   : > { %244 = sbr.rel (%p241_p9) target bundleno = 538 (0x21a), region = 48  ;;  %v1480_v1 = vld [vmem:[%s2020_s1 + $0xc0] sm:$0xff] (!%p241_p9)   ;;  %1340 = vmatprep.subr.bf16.mxu0 (!%p241_p9), %v1479_v0  ;;  %v1484_v5 = vld [vmem:[%s2020_s1 + $0xc8] sm:$0xff] (!%p241_p9)   ;;  %v1488_v9 = vld [vmem:[%s2020_s1 + $0xd0] sm:$0xff] (!%p241_p9)   ;;  %vm295_vm1 = vsmask.f32 (!%p241_p9), 7440 }
   0xf   : > { %v1481_v2 = vld [vmem:[%s2020_s1] sm:$0xff] (!%p241_p9)   ;;  %1380 = vmatprep.subr.bf16.mxu1 (!%p241_p9), %v1480_v1  ;;  %v1485_v6 = vld [vmem:[%s2020_s1 + $0x8] sm:$0xff] (!%p241_p9)   ;;  %v1489_v10 = vld [vmem:[%s2020_s1 + $0x10] sm:$0xff] (!%p241_p9)   ;;  %vm1054_vm3 = vcmask (!%p241_p9), 130048   ;;  %s269_s19 = sand.u32 (!%p241_p9), 1, %s1574_s25   ;;  %vm1170_vm4 = vcmask (!%p241_p9), 261120  }
  0x10   : > { %v1482_v3 = vld [vmem:[%s2020_s1 + $0x80] sm:$0xff] (!%p241_p9)   ;;  %1341 = vmatpush3.bf16.msra.mxu0 (!%p241_p9), %v1481_v2  ;;  %v1486_v7 = vld [vmem:[%s2020_s1 + $0x88] sm:$0xff] (!%p241_p9)   ;;  %v1490_v11 = vld [vmem:[%s2020_s1 + $0x90] sm:$0xff] (!%p241_p9)   ;;  %s1259_s23 = sshll.u32 (!%p241_p9), %s269_s19, 6  ;;  %s1339_s9 = sshll.u32 (!%p241_p9), %s1648_s28, 10 }
  0x11   : > { %1381 = vmatpush3.bf16.msra.mxu1 (!%p241_p9), %v1482_v3  ;;  %1342 = vmatprep.subr.bf16.mxu0 (!%p241_p9), %v1483_v4  ;;  %v1491_v12 = vld [vmem:[%s2020_s1 + $0x58] sm:$0xff] (!%p241_p9)   ;;  %v1495_v16 = vld [vmem:[%s2020_s1 + $0x60] sm:$0xff] (!%p241_p9)   ;;  %v1499_v20 = vld [vmem:[%s2020_s1 + $0x68] sm:$0xff] (!%p241_p9)   ;;  %s271_s8 = scalar_lea.vmem (!%p241_p9), [#allocation2], %s1259_s23  ;;  %s1969_s16 = scalar_lea.hbm (!%p241_p9), %s2026_s7, %s1339_s9 }
  0x12   : > { %1382 = vmatprep.subr.bf16.mxu1 (!%p241_p9), %v1484_v5  ;;  %v1492_v13 = vld [vmem:[%s2020_s1 + $0xd8] sm:$0xff] (!%p241_p9)   ;;  %v1496_v17 = vld [vmem:[%s2020_s1 + $0xe0] sm:$0xff] (!%p241_p9)   ;;  %v1500_v21 = vld [vmem:[%s2020_s1 + $0xe8] sm:$0xff] (!%p241_p9)   ;;  %s1584_s18 = smov (!%p241_p9), [#allocation2]  }
  0x13   : > { %v1493_v14 = vld [vmem:[%s2020_s1 + $0x18] sm:$0xff] (!%p241_p9)   ;;  %v1497_v18 = vld [vmem:[%s2020_s1 + $0x20] sm:$0xff] (!%p241_p9)   ;;  %v1501_v22 = vld [vmem:[%s2020_s1 + $0x28] sm:$0xff] (!%p241_p9)  }
  0x14   : > { %1343 = vmatpush3.bf16.msra.mxu0 (!%p241_p9), %v1485_v6  ;;  %v1494_v15 = vld [vmem:[%s2020_s1 + $0x98] sm:$0xff] (!%p241_p9)   ;;  %v1498_v19 = vld [vmem:[%s2020_s1 + $0xa0] sm:$0xff] (!%p241_p9)   ;;  %v1502_v23 = vld [vmem:[%s2020_s1 + $0xa8] sm:$0xff] (!%p241_p9)  }
  0x15   : > { %1383 = vmatpush3.bf16.msra.mxu1 %v1486_v7  ;;  %1344 = vmatprep.subr.bf16.mxu0 %v1487_v8  ;;  %s273_s15 = scalar_select %p272_p10, %s1648_s28, 1  ;;  %v1503_v24 = vld [vmem:[%s2020_s1 + $0x70] sm:$0xff]   ;;  %v1507_v28 = vld [vmem:[%s2020_s1 + $0x78] sm:$0xff]   ;;  %vm1809_vm2 = vmor %vm294_vm0, %vm295_vm1 }
  0x16   : > { %1384 = vmatprep.subr.bf16.mxu1 %v1488_v9  ;;  %v1504_v25 = vld [vmem:[%s2020_s1 + $0xf0] sm:$0xff]   ;;  %v1508_v29 = vld [vmem:[%s2020_s1 + $0xf8] sm:$0xff]   ;;  %s1978_s28 = scalar_lea.sflag [#allocation3], %s269_s19 }
  0x17   : > { %s1437_s29 = smul.u32 72, %s273_s15  ;;  %v1505_v26 = vld [vmem:[%s2020_s1 + $0x30] sm:$0xff]   ;;  %v1509_v30 = vld [vmem:[%s2020_s1 + $0x38] sm:$0xff]   ;;  %s1524_s15 = sshll.u32 %s1584_s18, 4  ;;  %s1525_s15 = int_to_ptr.vmem [resolvable:$false] %s1524_s15 }
  0x18   : > { %1345 = vmatpush3.bf16.msra.mxu0 %v1489_v10  ;;  %v1506_v27 = vld [vmem:[%s2020_s1 + $0xb0] sm:$0xff]   ;;  %v1510_v31 = vld [vmem:[%s2020_s1 + $0xb8] sm:$0xff]   ;;  %s1526_s20 = scalar_lea.vmem %s1525_s15, 2048 }
  0x19   : > { %1385 = vmatpush3.bf16.msra.mxu1 %v1490_v11  ;;  %1346 = vmatprep.subr.bf16.mxu0 %v1491_v12  ;;  %s1770_s21 = scalar_lea.vmem %s2019_s0, %s1437_s29  ;;  %s1193_s29 = sshll.u32 %s271_s8, 4  ;;  %s1971_s29 = int_to_ptr.vmem [resolvable:$true] %s1193_s29 }
  0x1a   : > { %1386 = vmatprep.subr.bf16.mxu1 %v1492_v13  ;;  %v1779_v32 = vld [vmem:[%s1770_s21] sm:$0xf]  ;;  %v1782_v33 = vld [vmem:[%s1770_s21 + $0x8] sm:$0xf]  ;;  %v286_v34 = vld [vmem:[%s1770_s21 + $0x4] sm:$0x1]  ;;  %p1527_p0 = scmp.lt.s32.totalorder %s1971_s29, %s1525_s15 }
  0x1b   : > { %v287_v35 = vld [vmem:[%s1770_s21 + $0xc] sm:$0x1]  ;;  %v298_v36 = vshrl.u32 %v1779_v32, 16  ;;  %v301_v37 = vshll.u32 %v1779_v32, 16  ;;  %v307_v38 = vshll.u32 %v286_v34, 16  ;;  %v312_v39 = vshrl.u32 %v1782_v33, 16 }
  0x1c   : > { %1347 = vmatpush3.bf16.msra.mxu0 %v1493_v14  ;;  %v1790_v40 = vld [vmem:[%s1770_s21 + $0x8] sm:$0xf]  ;;  %v315_v41 = vshll.u32 %v1782_v33, 16  ;;  %v321_v42 = vshll.u32 %v287_v35, 16  ;;  %v1794_v43 = vld [vmem:[%s1770_s21 + $0x10] sm:$0xf]  ;;  %v1277_v45 = vcombine.low %v1779_v32, %v1782_v33 }
  0x1d   : > { %1387 = vmatpush3.bf16.msra.mxu1 %v1494_v15  ;;  %1348 = vmatprep.subr.bf16.mxu0 %v1495_v16  ;;  %v1269_v44 = vld [vmem:[%s1770_s21 + $0xc] sm:$0x1]  ;;  %v300_v46 = vrot.slane %v298_v36, 4  ;;  %v303_v47 = vrot.slane %v301_v37, 5  ;;  %v309_v48 = vrot.slane %v307_v38, 5  ;;  %v314_v49 = vrot.slane %v312_v39, 4 }
  0x1e   : > { %1388 = vmatprep.subr.bf16.mxu1 %v1496_v17  ;;  %v1270_v50 = vld [vmem:[%s1770_s21 + $0x14] sm:$0x1]  ;;  %v317_v51 = vrot.slane %v315_v41, 5  ;;  %v323_v52 = vrot.slane %v321_v42, 5  ;;  %v427_v53 = vshrl.u32 %v1790_v40, 16  ;;  %v430_v54 = vshll.u32 %v1790_v40, 16 }
  0x1f   : > { %v304_v55 = vor.u32 %v303_v47, %v300_v46  ;;  %v436_v56 = vshll.u32 %v1269_v44, 16  ;;  %v441_v57 = vshrl.u32 %v1794_v43, 16  ;;  %v444_v58 = vshll.u32 %v1794_v43, 16  ;;  %v1805_v59 = vld [vmem:[%s1770_s21 + $0x10] sm:$0xf]  ;;  %s1520_s17 = scalar_lea.vmem %s1971_s29, 1024 }
  0x20   : > { %1349 = vmatpush3.bf16.msra.mxu0 %v1497_v18  ;;  %v318_v61 = vor.u32 %v317_v51, %v314_v49  ;;  %v429_v62 = vrot.slane %v427_v53, 4  ;;  %v432_v63 = vrot.slane %v430_v54, 5  ;;  %v450_v0 = vshll.u32 %v1270_v50, 16  ;;  %v1814_v1 = vld [vmem:[%s1770_s21 + $0x18] sm:$0xf]  ;;  %p1521_p11 = scmp.ne.s32.totalorder %s1971_s29, %s1520_s17  ;;  %p1528_p1 = scmp.lt.s32.totalorder %s1526_s20, %s1520_s17 }
  0x21   : > { %1389 = vmatpush3.bf16.msra.mxu1 %v1498_v19  ;;  %1350 = vmatprep.subr.bf16.mxu0 %v1499_v20  ;;  %v305_v2 = vrot.slane %v304_v55, 4  ;;  %v438_v3 = vrot.slane %v436_v56, 5  ;;  %v443_v4 = vrot.slane %v441_v57, 4  ;;  %v446_v5 = vrot.slane %v444_v58, 5  ;;  %v288_v6 = vld [vmem:[%s1770_s21 + $0x14] sm:$0x1] }
  0x22   : > { %1390 = vmatprep.subr.bf16.mxu1 %v1500_v21  ;;  %v319_v7 = vrot.slane %v318_v61, 4  ;;  %v433_v8 = vor.u32 %v432_v63, %v429_v62  ;;  %v452_v9 = vrot.slane %v450_v0, 5  ;;  %v1285_v10 = vcombine.low %v1790_v40, %v1794_v43  ;;  %v289_v13 = vld [vmem:[%s1770_s21 + $0x1c] sm:$0x1]  ;;  %v1828_v20 = vld [vmem:[%s1770_s21 + $0x18] sm:$0xf]  ;;  %p1522_p12 = pnand %p1521_p11, %p1665_p5  ;;  %p1529_p2 = por %p1528_p1, %p1527_p0 }
  0x23   : > { %v310_v11 = vsel %vm1809_vm2, %v305_v2, %v309_v48  ;;  %v447_v12 = vor.u32 %v446_v5, %v443_v4  ;;  %v326_v14 = vshrl.u32 %v1805_v59, 16  ;;  %v329_v15 = vshll.u32 %v1805_v59, 16  ;;  %v1272_v37 = vld [vmem:[%s1770_s21 + $0x24] sm:$0x1]  ;;  %v1844_v44 = vld [vmem:[%s1770_s21 + $0x20] sm:$0xf] }
  0x24   : > { %1351 = vmatpush3.bf16.msra.mxu0 %v1501_v22  ;;  %v324_v16 = vsel %vm1809_vm2, %v319_v7, %v323_v52  ;;  %v434_v17 = vrot.slane %v433_v8, 4  ;;  %v335_v18 = vshll.u32 %v288_v6, 16  ;;  %v340_v19 = vshrl.u32 %v1814_v1, 16  ;;  %v290_v49 = vld [vmem:[%s1770_s21 + $0x24] sm:$0x1]  ;;  %p1523_p13 = pneg %p1522_p12 }
  0x25   : > { %1391 = vmatpush3.bf16.msra.mxu1 %v1502_v23  ;;  %1352 = vmatprep.subr.bf16.mxu0 %v1503_v24  ;;  %v1281_v21 = vcombine.low %v310_v11, %v324_v16  ;;  %v448_v22 = vrot.slane %v447_v12, 4  ;;  %v328_v23 = vrot.slane %v326_v14, 4  ;;  %v331_v24 = vrot.slane %v329_v15, 5  ;;  %v1853_v54 = vld [vmem:[%s1770_s21 + $0x28] sm:$0xf] }
  0x26   : > { %1392 = vmatprep.subr.bf16.mxu1 %v1504_v25  ;;  %v1271_v25 = vld [vmem:[%s1770_s21 + $0x1c] sm:$0x1]  ;;  %v349_v33 = vshll.u32 %v289_v13, 16  ;;  %v455_v34 = vshrl.u32 %v1828_v20, 16  ;;  %v458_v38 = vshll.u32 %v1828_v20, 16  ;;  %v478_v52 = vshll.u32 %v1272_v37, 16  ;;  %p1530_p3 = pnand %p1529_p2, %p1523_p13 }
  0x27   : > { %906 = vmatprep.mubr.bf16.mxu0 %v1281_v21  ;;  %v332_v32 = vor.u32 %v331_v24, %v328_v23  ;;  %v464_v39 = vshll.u32 %v1271_v25, 16  ;;  %v1278_v53 = vcombine.low %v1805_v59, %v1814_v1  ;;  %v291_v62 = vld [vmem:[%s1770_s21 + $0x2c] sm:$0x1]  ;;  %v354_v63 = vshrl.u32 %v1844_v44, 16  ;;  %v1864_v5 = vld [vmem:[%s1770_s21 + $0x28] sm:$0xf] }
  0x28   : > { %1353 = vmatpush3.bf16.msra.mxu0 %v1505_v26  ;;  %v439_v26 = vsel %vm1809_vm2, %v434_v17, %v438_v3  ;;  %v351_v41 = vrot.slane %v349_v33, 5  ;;  %v457_v42 = vrot.slane %v455_v34, 4  ;;  %v460_v47 = vrot.slane %v458_v38, 5  ;;  %v1867_v6 = vld [vmem:[%s1770_s21 + $0x30] sm:$0xf] }
  0x29   : > { %1393 = vmatpush3.bf16.msra.mxu1 %v1506_v27  ;;  %1354 = vmatprep.subr.bf16.mxu0 %v1507_v28  ;;  %v337_v27 = vrot.slane %v335_v18, 5  ;;  %v342_v28 = vrot.slane %v340_v19, 4  ;;  %v333_v40 = vrot.slane %v332_v32, 4  ;;  %v466_v48 = vrot.slane %v464_v39, 5  ;;  %v1273_v11 = vld [vmem:[%s1770_s21 + $0x2c] sm:$0x1] }
  0x2a   : > { %1394 = vmatprep.subr.bf16.mxu1 %v1508_v29  ;;  %v343_v29 = vshll.u32 %v1814_v1, 16  ;;  %v461_v56 = vor.u32 %v460_v47, %v457_v42  ;;  %v480_v61 = vrot.slane %v478_v52, 5  ;;  %v357_v0 = vshll.u32 %v1844_v44, 16  ;;  %v292_v33 = vld [vmem:[%s1770_s21 + $0x34] sm:$0x1] }
  0x2b   : > { %v338_v50 = vsel %vm1809_vm2, %v333_v40, %v337_v27  ;;  %v363_v2 = vshll.u32 %v290_v49, 16  ;;  %v368_v4 = vshrl.u32 %v1853_v54, 16  ;;  %v356_v8 = vrot.slane %v354_v63, 4  ;;  %v1887_v38 = vld [vmem:[%s1770_s21 + $0x38] sm:$0xf] }
  0x2c   : > { %1355 = vmatpush3.bf16.msra.mxu0 %v1509_v30  ;;  %v1835_v30 = vld [vmem:[%s1770_s21 + $0x20] sm:$0xf]  ;;  %v345_v36 = vrot.slane %v343_v29, 5  ;;  %v462_v1 = vrot.slane %v461_v56, 4  ;;  %v371_v15 = vshll.u32 %v1853_v54, 16  ;;  %v377_v17 = vshll.u32 %v291_v62, 16 }
  0x2d   : > { %1395 = vmatpush3.bf16.msra.mxu1 %v1510_v31  ;;  %v453_v31 = vsel %vm1809_vm2, %v448_v22, %v452_v9  ;;  %v469_v43 = vshrl.u32 %v1835_v30, 16  ;;  %v1286_v58 = vcombine.low %v1828_v20, %v1835_v30  ;;  %v359_v9 = vrot.slane %v357_v0, 5  ;;  %v1274_v22 = vld [vmem:[%s1770_s21 + $0x34] sm:$0x1]  ;;  %v293_v47 = vld [vmem:[%s1770_s21 + $0x3c] sm:$0x1] }
  0x2e   : > { %v1289_v35 = vcombine.low %v439_v26, %v453_v31  ;;  %v346_v46 = vor.u32 %v345_v36, %v342_v28  ;;  %v467_v12 = vsel %vm1809_vm2, %v462_v1, %v466_v48  ;;  %v370_v14 = vrot.slane %v368_v4, 4  ;;  %v1880_v28 = vld [vmem:[%s1770_s21 + $0x30] sm:$0xf] }
  0x2f   : > { %907 = vmatmul.mubr.bf16.vlgmr.msra.gmra.mrb[0].mxu0 %v1277_v45  ;;  %v472_v45 = vshll.u32 %v1835_v30, 16  ;;  %v471_v51 = vrot.slane %v469_v43, 4  ;;  %v360_v16 = vor.u32 %v359_v9, %v356_v8  ;;  %v483_v18 = vshrl.u32 %v1864_v5, 16 }
  0x30   : > { %971 = vmatprep.mubr.bf16.mxu1 %v1289_v35  ;;  %v347_v55 = vrot.slane %v346_v46, 4  ;;  %v486_v19 = vshll.u32 %v1864_v5, 16  ;;  %v373_v21 = vrot.slane %v371_v15, 5  ;;  %v492_v23 = vshll.u32 %v1273_v11, 16 }
  0x31   : > { %972 = vmatmul.mubr.bf16.vlgmr.msra.gmra.mrb[0].mxu1 %v1285_v10  ;;  %v474_v57 = vrot.slane %v472_v45, 5  ;;  %v365_v10 = vrot.slane %v363_v2, 5  ;;  %v497_v24 = vshrl.u32 %v1867_v6, 16  ;;  %v361_v26 = vrot.slane %v360_v16, 4 }
  0x32   : > { %v352_v59 = vsel %vm1809_vm2, %v347_v55, %v351_v41  ;;  %v485_v27 = vrot.slane %v483_v18, 4  ;;  %v374_v29 = vor.u32 %v373_v21, %v370_v14  ;;  %v379_v30 = vrot.slane %v377_v17, 5 }
  0x33   : > { %v475_v3 = vor.u32 %v474_v57, %v471_v51  ;;  %v1282_v7 = vcombine.low %v338_v50, %v352_v59  ;;  %v488_v31 = vrot.slane %v486_v19, 5  ;;  %v494_v32 = vrot.slane %v492_v23, 5  ;;  %v1268_v57 = vld [vmem:[%s1770_s21 + $0x40] sm:$0xf] }
  0x34   : > { %v366_v34 = vsel %vm1809_vm2, %v361_v26, %v365_v10  ;;  %v499_v35 = vrot.slane %v497_v24, 4  ;;  %v500_v36 = vshll.u32 %v1867_v6, 16  ;;  %v506_v37 = vshll.u32 %v1274_v22, 16 }
  0x35   : > { %v476_v13 = vrot.slane %v475_v3, 4  ;;  %914 = vmatprep.mubr.bf16.mxu0 %v1282_v7  ;;  %v375_v39 = vrot.slane %v374_v29, 4  ;;  %v489_v40 = vor.u32 %v488_v31, %v485_v27  ;;  %v1279_v41 = vcombine.low %v1844_v44, %v1853_v54  ;;  %v1267_v44 = vld [vmem:[%s1770_s21 + $0x38] sm:$0xf] }
  0x36   : > { %v382_v42 = vshrl.u32 %v1880_v28, 16  ;;  %v502_v43 = vrot.slane %v500_v36, 5  ;;  %v1287_v46 = vcombine.low %v1864_v5, %v1867_v6  ;;  %v385_v48 = vshll.u32 %v1880_v28, 16  ;;  %v1276_v6 = vld [vmem:[%s1770_s21 + $0x44] sm:$0x1] }
  0x37   : > { %v481_v20 = vsel %vm1809_vm2, %v476_v13, %v480_v61  ;;  %915 = vmatmul.mubr.bf16.gmra.mrb[4].mxu0 %v1278_v53  ;;  %v391_v45 = vshll.u32 %v292_v33, 16  ;;  %v380_v49 = vsel %vm1809_vm2, %v375_v39, %v379_v30  ;;  %v490_v50 = vrot.slane %v489_v40, 4 }
  0x38   : > { %v1290_v25 = vcombine.low %v467_v12, %v481_v20  ;;  %v384_v51 = vrot.slane %v382_v42, 4  ;;  %v396_v52 = vshrl.u32 %v1887_v38, 16  ;;  %v1283_v53 = vcombine.low %v366_v34, %v380_v49 }
  0x39   : > { %v503_v54 = vor.u32 %v502_v43, %v499_v35  ;;  %v508_v55 = vrot.slane %v506_v37, 5  ;;  %v387_v56 = vrot.slane %v385_v48, 5  ;;  %v495_v61 = vsel %vm1809_vm2, %v490_v50, %v494_v32  ;;  %v1929_v50 = vld [vmem:[%s2022_s3] ss:$0 sm:$0xff] }
  0x3a   : > { %979 = vmatprep.mubr.bf16.mxu1 %v1290_v25  ;;  %v398_v62 = vrot.slane %v396_v52, 4  ;;  %v399_v63 = vshll.u32 %v1887_v38, 16  ;;  %v405_v0 = vshll.u32 %v293_v47, 16  ;;  %922 = vmatprep.mubr.bf16.mxu0 %v1283_v53  ;;  %v511_v1 = vshrl.u32 %v1267_v44, 16  ;;  %v1924_v47 = vld [vmem:[%s2021_s2] ss:$0 sm:$0xff] }
  0x3b   : > { %980 = vmatmul.mubr.bf16.gmra.mrb[4].mxu1 %v1286_v58  ;;  %v1275_v58 = vld [vmem:[%s1770_s21 + $0x3c] sm:$0x1]  ;;  %v504_v2 = vrot.slane %v503_v54, 4  ;;  %v388_v59 = vor.u32 %v387_v56, %v384_v51  ;;  %v514_v3 = vshll.u32 %v1267_v44, 16  ;;  %v393_v4 = vrot.slane %v391_v45, 5 }
  0x3c   : > { %v401_v5 = vrot.slane %v399_v63, 5  ;;  %v520_v7 = vshll.u32 %v1275_v58, 16  ;;  %v525_v8 = vshrl.u32 %v1268_v57, 16  ;;  %v513_v11 = vrot.slane %v511_v1, 4 }
  0x3d   : > { %v509_v9 = vsel %vm1809_vm2, %v504_v2, %v508_v55  ;;  %v389_v10 = vrot.slane %v388_v59, 4  ;;  %v516_v12 = vrot.slane %v514_v3, 5  ;;  %v407_v15 = vrot.slane %v405_v0, 5 }
  0x3e   : > { %v1291_v13 = vcombine.low %v495_v61, %v509_v9  ;;  %v402_v14 = vor.u32 %v401_v5, %v398_v62  ;;  %v527_v17 = vrot.slane %v525_v8, 4  ;;  %v528_v18 = vshll.u32 %v1268_v57, 16 }
  0x3f   : > { %923 = vmatmul.mubr.bf16.gmra.mrb[8].mxu0 %v1279_v41  ;;  %v517_v16 = vor.u32 %v516_v12, %v513_v11  ;;  %v534_v19 = vshll.u32 %v1276_v6, 16  ;;  %v394_v20 = vsel %vm1809_vm2, %v389_v10, %v393_v4  ;;  %v522_v23 = vrot.slane %v520_v7, 5 }
  0x40   : > { %987 = vmatprep.mubr.bf16.mxu1 %v1291_v13  ;;  %v403_v21 = vrot.slane %v402_v14, 4  ;;  %v530_v24 = vrot.slane %v528_v18, 5  ;;  %v1280_v26 = vcombine.low %v1880_v28, %v1887_v38  ;;  %v1288_v34 = vcombine.low %v1267_v44, %v1268_v57  ;;  %v1519_v28 = vld [vmem:[%s2023_s4] sm:$0xff]  }
  0x41   : > { %v518_v22 = vrot.slane %v517_v16, 4  ;;  %v536_v30 = vrot.slane %v534_v19, 5  ;;  %1425 = vmatprep.subr.bf16.mxu0 %v1519_v28  ;;  %1435 = vmatprep.subr.bf16.mxu1 %v1519_v28 }
  0x42   : > { %v408_v25 = vsel %vm1809_vm2, %v403_v21, %v407_v15  ;;  %v531_v29 = vor.u32 %v530_v24, %v527_v17  ;;  %1426 = vmatpush3.bf16.msra.mxu0 %v1519_v28  ;;  %1436 = vmatpush3.bf16.msra.mxu1 %v1519_v28 }
  0x43   : > { %988 = vmatmul.mubr.bf16.gmra.mrb[8].mxu1 %v1287_v46  ;;  %v1284_v27 = vcombine.low %v394_v20, %v408_v25  ;;  %v523_v31 = vsel %vm1809_vm2, %v518_v22, %v522_v23 }
  0x44   : > { %v532_v32 = vrot.slane %v531_v29, 4 }
  0x45   : > { %930 = vmatprep.mubr.bf16.mxu0 %v1284_v27 }
  0x46   : > { %v537_v33 = vsel %vm1809_vm2, %v532_v32, %v536_v30 }
  0x47   : > { %931 = vmatmul.mubr.bf16.gmra.mrb[12].mxu0 %v1280_v26  ;;  %v1292_v35 = vcombine.low %v523_v31, %v537_v33 }
  0x49   : > { %995 = vmatprep.mubr.bf16.mxu1 %v1292_v35 }
  0x4b   : > { %996 = vmatmul.mubr.bf16.gmra.mrb[12].mxu1 %v1288_v34 }
 0x102   : > { %v1356_v36 = vpop.f32.mrb[0].mxu0 }
 0x103   : > { %v1357_v37 = vpop.f32.mrb[1].mxu0 }
 0x104   : > { %v1358_v38 = vadd.f32 %v1357_v37, %v1356_v36  ;;  %v1359_v39 = vpop.f32.mrb[2].mxu0  ;;  %v1396_v40 = vpop.f32.mrb[0].mxu1 }
 0x105   : > { %v1360_v41 = vpop.f32.mrb[3].mxu0  ;;  %v1397_v60 = vpop.f32.mrb[1].mxu1 }
 0x106   : > { %v1361_v42 = vadd.f32 %v1360_v41, %v1359_v39  ;;  %v1398_v43 = vadd.f32 %v1397_v60, %v1396_v40  ;;  %v1399_v46 = vpop.f32.mrb[2].mxu1 }
 0x107   : > { %v1400_v48 = vpop.f32.mrb[3].mxu1 }
 0x108   : > { %v974_v45 = vadd.f32 %v1398_v43, %v1358_v38  ;;  %v1401_v49 = vadd.f32 %v1400_v48, %v1399_v46 }
 0x10a   : > { %v1011_v51 = vmul.f32 %v1924_v47, %v974_v45  ;;  %v977_v52 = vadd.f32 %v1401_v49, %v1361_v42  ;;  %v1362_v44 = vpop.f32.mrb[4].mxu0 }
 0x10b   : > { %v1363_v55 = vpop.f32.mrb[5].mxu0 }
 0x10c   : > { %v1026_v53 = vadd.f32 %v1929_v50, %v1011_v51  ;;  %v1012_v54 = vmul.f32 %v1924_v47, %v977_v52  ;;  %v1364_v56 = vadd.f32 %v1363_v55, %v1362_v44  ;;  %v1365_v57 = vpop.f32.mrb[6].mxu0 }
 0x10d   : > { %v1366_v61 = vpop.f32.mrb[7].mxu0 }
 0x10e   : > { %v1027_v58 = vadd.f32 %v1929_v50, %v1012_v54  ;;  %v1402_v62 = vpop.f32.mrb[4].mxu1  ;;  %v1367_v63 = vadd.f32 %v1366_v61, %v1365_v57  ;;  %v1034_v0 = vmax.f32 %v1026_v53, 0.0  ;;  %v1332_v61 = vld [vmem:[%s2024_s5] ss:$0 sm:$0xff] }
 0x10f   : > { %v1403_v59 = vpop.f32.mrb[5].mxu1 }
 0x110   : > { %v1035_v2 = vmax.f32 %v1027_v58, 0.0  ;;  %v1404_v1 = vadd.f32 %v1403_v59, %v1402_v62  ;;  %v1405_v3 = vpop.f32.mrb[6].mxu1 }
 0x111   : > { %v1406_v4 = vpop.f32.mrb[7].mxu1 }
 0x112   : > { %v1042_v5 = vpack.c.bf16 %v1035_v2, %v1034_v0  ;;  %v982_v6 = vadd.f32 %v1404_v1, %v1364_v56  ;;  %v1407_v7 = vadd.f32 %v1406_v4, %v1405_v3  ;;  %v1368_v10 = vpop.f32.mrb[8].mxu0 }
 0x113   : > { %v1369_v11 = vpop.f32.mrb[9].mxu0 }
 0x114   : > { %1427 = vmatprep.mubr.msk.bf16.mxu0 %vm1054_vm3, %v1042_v5  ;;  %v1013_v8 = vmul.f32 %v1924_v47, %v982_v6  ;;  %v985_v9 = vadd.f32 %v1407_v7, %v1367_v63  ;;  %v1370_v14 = vadd.f32 %v1369_v11, %v1368_v10  ;;  %v1371_v15 = vpop.f32.mrb[10].mxu0  ;;  %v1333_v63 = vld [vmem:[%s2025_s6] ss:$0 sm:$0xff] }
 0x115   : > { %v1372_v16 = vpop.f32.mrb[11].mxu0 }
 0x116   : > { %v1028_v12 = vadd.f32 %v1929_v50, %v1013_v8  ;;  %v1014_v13 = vmul.f32 %v1924_v47, %v985_v9  ;;  %v1373_v18 = vadd.f32 %v1372_v16, %v1371_v15  ;;  %v1408_v19 = vpop.f32.mrb[8].mxu1 }
 0x117   : > { %v1409_v22 = vpop.f32.mrb[9].mxu1 }
 0x118   : > { %v1029_v17 = vadd.f32 %v1929_v50, %v1014_v13  ;;  %v1036_v20 = vmax.f32 %v1028_v12, 0.0  ;;  %v1410_v23 = vadd.f32 %v1409_v22, %v1408_v19  ;;  %v1411_v24 = vpop.f32.mrb[10].mxu1 }
 0x119   : > { %v1412_v26 = vpop.f32.mrb[11].mxu1 }
 0x11a   : > { %v1037_v21 = vmax.f32 %v1029_v17, 0.0  ;;  %v990_v27 = vadd.f32 %v1410_v23, %v1370_v14  ;;  %v1413_v29 = vadd.f32 %v1412_v26, %v1411_v24  ;;  %v1374_v30 = vpop.f32.mrb[12].mxu0 }
 0x11b   : > { %v1375_v33 = vpop.f32.mrb[13].mxu0 }
 0x11c   : > { %v1043_v25 = vpack.c.bf16 %v1037_v21, %v1036_v20  ;;  %v1015_v31 = vmul.f32 %v1924_v47, %v990_v27  ;;  %v993_v32 = vadd.f32 %v1413_v29, %v1373_v18  ;;  %v1376_v34 = vadd.f32 %v1375_v33, %v1374_v30  ;;  %v1377_v35 = vpop.f32.mrb[14].mxu0 }
 0x11d   : > { %v1378_v37 = vpop.f32.mrb[15].mxu0 }
 0x11e   : > { %1428 = vmatmul.mubr.msk.bf16.vlgmr.msra.gmra.mrb[16].mxu0 %vm1054_vm3, %v1043_v25  ;;  %v1030_v28 = vadd.f32 %v1929_v50, %v1015_v31  ;;  %v1016_v36 = vmul.f32 %v1924_v47, %v993_v32  ;;  %v1379_v38 = vadd.f32 %v1378_v37, %v1377_v35  ;;  %v1414_v40 = vpop.f32.mrb[12].mxu1 }
 0x11f   : > { %v1415_v41 = vpop.f32.mrb[13].mxu1 }
 0x120   : > { %v1031_v39 = vadd.f32 %v1929_v50, %v1016_v36  ;;  %v1038_v60 = vmax.f32 %v1030_v28, 0.0  ;;  %v1416_v43 = vadd.f32 %v1415_v41, %v1414_v40  ;;  %v1417_v46 = vpop.f32.mrb[14].mxu1 }
 0x121   : > { %v1418_v48 = vpop.f32.mrb[15].mxu1 }
 0x122   : > { %v1039_v42 = vmax.f32 %v1031_v39, 0.0  ;;  %v998_v45 = vadd.f32 %v1416_v43, %v1376_v34  ;;  %v1419_v49 = vadd.f32 %v1418_v48, %v1417_v46 }
 0x124   : > { %v1044_v51 = vpack.c.bf16 %v1039_v42, %v1038_v60  ;;  %v1017_v52 = vmul.f32 %v1924_v47, %v998_v45  ;;  %v1001_v44 = vadd.f32 %v1419_v49, %v1379_v38 }
 0x126   : > { %1431 = vmatprep.mubr.msk.bf16.mxu1 %vm1054_vm3, %v1044_v51  ;;  %v1032_v53 = vadd.f32 %v1929_v50, %v1017_v52  ;;  %v1018_v54 = vmul.f32 %v1924_v47, %v1001_v44 }
 0x128   : > { %v1033_v55 = vadd.f32 %v1929_v50, %v1018_v54  ;;  %v1040_v56 = vmax.f32 %v1032_v53, 0.0 }
 0x12a   : > { %v1041_v57 = vmax.f32 %v1033_v55, 0.0 }
 0x12c   : > { %v1045_v58 = vpack.c.bf16 %v1041_v57, %v1040_v56 }
 0x12e   : > { %1432 = vmatmul.mubr.msk.bf16.vlgmr.msra.gmra.mrb[16].mxu1 %vm1054_vm3, %v1045_v58 }
 0x1f1   : > { %v1429_v62 = vpop.f32.mrb[16].mxu0 }
 0x1f2   : > { %v1141_v47 = vmul.f32 %v1429_v62, %v1332_v61  ;;  %v1101_v0 = vpop.f32.mrb[17].mxu0 }
 0x1f3   : > { %v1139_v50 = vmul.f32 %v1332_v61, %v1101_v0  ;;  %v1430_v2 = vpop.f32.mrb[18].mxu0 }
 0x1f4   : > { %v1156_v59 = vadd.f32 %v1333_v63, %v1141_v47  ;;  %v1142_v1 = vmul.f32 %v1430_v2, %v1332_v61  ;;  %v1104_v3 = vpop.f32.mrb[19].mxu0 }
 0x1f5   : > { %v1154_v4 = vadd.f32 %v1333_v63, %v1139_v50  ;;  %v1140_v5 = vmul.f32 %v1332_v61, %v1104_v3 }
 0x1f6   : > { %v1164_v6 = vmax.f32 %v1156_v59, 0.0  ;;  %v1157_v7 = vadd.f32 %v1333_v63, %v1142_v1 }
 0x1f7   : > { %v1162_v8 = vmax.f32 %v1154_v4, 0.0  ;;  %v1155_v9 = vadd.f32 %v1333_v63, %v1140_v5 }
 0x1f8   : > { %1173 = vst.msk [vmem:[%s271_s8 + $0x10] sm:$0xff] %vm1170_vm4, %v1164_v6  ;;  %v1165_v10 = vmax.f32 %v1157_v7, 0.0 }
 0x1f9   : > { %1171 = vst.msk [vmem:[%s271_s8] sm:$0xff] %vm1170_vm4, %v1162_v8  ;;  %v1163_v11 = vmax.f32 %v1155_v9, 0.0 }
 0x1fa   : > { %1174 = vst.msk [vmem:[%s271_s8 + $0x18] sm:$0xff] %vm1170_vm4, %v1165_v10 }
 0x1fb   : > { %1172 = vst.msk [vmem:[%s271_s8 + $0x8] sm:$0xff] %vm1170_vm4, %v1163_v11 }
 0x201   : > { %v1433_v12 = vpop.f32.mrb[16].mxu1 }
 0x202   : > { %v1145_v13 = vmul.f32 %v1433_v12, %v1332_v61  ;;  %v1117_v14 = vpop.f32.mrb[17].mxu1 }
 0x203   : > { %v1143_v15 = vmul.f32 %v1332_v61, %v1117_v14  ;;  %v1434_v16 = vpop.f32.mrb[18].mxu1 }
 0x204   : > { %v1160_v17 = vadd.f32 %v1333_v63, %v1145_v13  ;;  %v1146_v18 = vmul.f32 %v1434_v16, %v1332_v61  ;;  %v1120_v19 = vpop.f32.mrb[19].mxu1 }
 0x205   : > { %v1158_v20 = vadd.f32 %v1333_v63, %v1143_v15  ;;  %v1144_v21 = vmul.f32 %v1332_v61, %v1120_v19 }
 0x206   : > { %v1168_v22 = vmax.f32 %v1160_v17, 0.0  ;;  %v1161_v23 = vadd.f32 %v1333_v63, %v1146_v18 }
 0x207   : > { %v1166_v24 = vmax.f32 %v1158_v20, 0.0  ;;  %v1159_v25 = vadd.f32 %v1333_v63, %v1144_v21 }
 0x208   : > { %1177 = vst.msk [vmem:[%s271_s8 + $0x30] sm:$0xff] %vm1170_vm4, %v1168_v22  ;;  %v1169_v26 = vmax.f32 %v1161_v23, 0.0 }
 0x209   : > { %1175 = vst.msk [vmem:[%s271_s8 + $0x20] sm:$0xff] %vm1170_vm4, %v1166_v24  ;;  %v1167_v27 = vmax.f32 %v1159_v25, 0.0 }
 0x20a   : > { %1178 = vst.msk [vmem:[%s271_s8 + $0x38] sm:$0xff] %vm1170_vm4, %v1169_v26 }
 0x20b   : > { %1176 = vst.msk [vmem:[%s271_s8 + $0x28] sm:$0xff] %vm1170_vm4, %v1167_v27 }
 0x20c   : > { %1533 = shalt.err (!%p1530_p3)
}
 0x20d   : > { %s1534_s19 = scalar_lea.hbm %s1969_s16, 1024  ;;  %s1538_s23 = scalar_lea.hbm %s2026_s7, 2048 }
 0x20e   : > { %p1535_p4 = scmp.ne.s32.totalorder %s1969_s16, %s1534_s19  ;;  %p1539_p9 = scmp.lt.u32.totalorder %s1969_s16, %s2026_s7 }
 0x20f   : > { %p1540_p10 = scmp.lt.u32.totalorder %s1538_s23, %s1534_s19  ;;  %p1542_p12 = scmp.lt.u32.totalorder %s1534_s19, %s1969_s16 }
 0x210   : > { %p1536_p7 = pnand %p1535_p4, %p1665_p5 }
 0x211   : > { %p1541_p11 = por %p1540_p10, %p1539_p9 }
 0x212   : > { %p1537_p8 = pneg %p1536_p7 }
 0x213   : > { %p1543_p13 = por %p1542_p12, %p1541_p11 }
 0x215   : > { %p1544_p0 = pnand %p1543_p13, %p1537_p8 }
 0x217   : > { %1547 = shalt.err (!%p1544_p0)
}
 0x218   : > { %s1585_s13 = smov 128   ;;  %s1586_s14 = smov 8  }
 0x219   : > { %1438 = dma.vmem_to_hbm [thread:$0]  (%p1665_p5), %s1971_s29, 1024, %s1969_s16, %s1978_s28, %s1585_s13, %s1585_s13, %s1586_s14  }
 0x21a PF: > { %p1444_p1 = scmp.ge.s32.totalorder %s1582_s27, 2  ;;  %s1208_s17 = sand.u32 1, %s1570_s24  }
 0x21b   : > { %s1209_s18 = scalar_lea.sflag [#allocation3], %s1208_s17 }
 0x21c   : > { %p1441_p2 = pnand %p1444_p1, %p1669_p6 }
 0x21e   : > { %1565 = dma.done.wait (!%p1441_p2), %s1209_s18, 1024  }
 0x21f   : > { %1567 = vsyncadd (!%p1441_p2), %s1209_s18, 4294966272  ;;  %p17_p3 = scmp.ge.s32.totalorder %s1652_s30, 4   ;;  %s2031_s24 = smov %s1574_s25 }
 0x220   : > { %s2032_s25 = smov %s1578_s26  ;;  %s2033_s26 = smov %s1663_s10 }
 0x221   : > { %s2034_s27 = smov %s1652_s30  ;;  %19 = sbr.rel (!%p17_p3) target bundleno = 3 (0x3), region = 84 }
 0x228   :  { %1214 = vsyncpa [#allocation3], 1 }
 0x229   :  { %1216 = vsyncpa [#allocation3 + $0x1], 1 }

// kernel: hgstem_forward.2
= control target key start
LH: loop header
LB: loop body
LE: loop exit
PB: predicated region body
PF: predicated region fallthrough
CT: control target
= control target key end

     0   :  { %s8073_s13 = smov 0   ;;  %s11418_s0 = inlined_call_operand.vmem [shape: bf16[2,17,17,12], index: 0, kind: input, shape index: {}]   ;;  %s11419_s1 = inlined_call_operand.vmem [shape: bf16[48,16], index: 1, kind: input, shape index: {}]   ;;  %s11420_s2 = inlined_call_operand.vmem [shape: f32[1,16], index: 2, kind: input, shape index: {}]   ;;  %s11421_s3 = inlined_call_operand.vmem [shape: f32[1,16], index: 3, kind: input, shape index: {}]   ;;  %s11422_s4 = inlined_call_operand.vmem [shape: bf16[64,8], index: 4, kind: input, shape index: {}]   ;;  %s11423_s5 = inlined_call_operand.vmem [shape: f32[1,8], index: 5, kind: input, shape index: {}]   ;;  %s11424_s6 = inlined_call_operand.vmem [shape: f32[1,8], index: 6, kind: input, shape index: {}]   ;;  %s11425_s7 = inlined_call_operand.vmem [shape: bf16[32,16], index: 7, kind: input, shape index: {}]   ;;  %s11426_s8 = inlined_call_operand.vmem [shape: f32[1,16], index: 8, kind: input, shape index: {}]   ;;  %s11427_s9 = inlined_call_operand.vmem [shape: f32[1,16], index: 9, kind: input, shape index: {}]   ;;  %s11428_s10 = inlined_call_operand.vmem [shape: bf16[2,16,16,32], index: 10, kind: output, shape index: {}]  }
   0x1 LB: > { %s7197_s14 = sadd.s32 4294967295, %s8008_s13   ;;  %p7201_p0 = scmp.ge.s32.totalorder %s8008_s13, 1  ;;  %s8008_s13 = sphi %s8073_s13, %s20_s13  }
   0x2   : > { %p312_p1 = scmp.lt.s32.totalorder %s8008_s13, 3 }
   0x4   : > { %p313_p2 = pnand %p7201_p0, %p312_p1 }
   0x6   : > { %316 = sbr.rel (%p313_p2) target bundleno = 1483 (0x5cb), region = 60 }
   0xd   : > { %p350_p3 = scmp.lt.s32.totalorder %s7197_s14, 1  ;;  %s8010_s19 = smov 24   ;;  %vm409_vm0 = vsmask.f32 3328  ;;  %vm410_vm1 = vsmask.f32 7440 }
   0xe   : > { %vm8137_vm2 = vmor %vm409_vm0, %vm410_vm1  ;;  %s8011_s24 = smov 36   ;;  %s8012_s27 = smov 12   ;;  %vm1581_vm3 = vcmask 97280   ;;  %vm1630_vm4 = vcmask 195584   ;;  %vm1663_vm5 = vcmask 293888   ;;  %vm1720_vm6 = vcmask 392192  }
   0xf   : > { %s11505_s14 = smov (!%p350_p3, %s7197_s14), 1  ;;  %vm2028_vm7 = vcmask 122880   ;;  %vm2029_vm8 = vsmask.f32 256  ;;  %vm2025_vm10 = vcmask 125952   ;;  %s8013_s12 = smov 32  }
  0x10   : > { %s7864_s15 = smul.u32 204, %s11505_s14  ;;  %vm8662_vm9 = vmand %vm2028_vm7, %vm2029_vm8  ;;  %s8014_s20 = smov 16   ;;  %vm3462_vm11 = vcmask 130048   ;;  %vm3511_vm12 = vcmask 261120   ;;  %vm3608_vm13 = vcmask 523264   ;;  %vm3913_vm14 = vcmask 60416  }
  0x11   : > { %s8015_s21 = smov 48   ;;  %vm3916_vm15 = vcmask 57344   ;;  %s8017_s16 = smov 8   ;;  %vm5349_vm1 = vcmask 64512  }
  0x12   : > { %s8087_s18 = scalar_lea.vmem %s11418_s0, %s7864_s15  ;;  %vm9661_vm0 = vmand %vm3916_vm15, %vm2029_vm8  ;;  %s7622_s26 = sshll.u32 %s11505_s14, 7 }
  0x13   : > { %v7205_v0 = vld [vmem:[%s8087_s18 + $0xc] sm:$0xf]  ;;  %v7206_v1 = vld [vmem:[%s8087_s18 + $0x10] sm:$0xf]  ;;  %v7207_v2 = vld [vmem:[%s8087_s18 + $0x18] sm:$0xf]  ;;  %s10849_s28 = scalar_lea.vmem %s11428_s10, %s7622_s26 }
  0x14   : > { %v855_v3 = vshll.u32 %v7206_v1, 16  ;;  %v859_v4 = vshrl.u32 %v7206_v1, 16  ;;  %v7285_v5 = vcombine.low %v7205_v0, %v7206_v1  ;;  %v846_v6 = vshrl.u32 %v7205_v0, 16  ;;  %v7208_v7 = vld [vmem:[%s8087_s18 + $0x1c] sm:$0xf] }
  0x15   : > { %v849_v8 = vshll.u32 %v7205_v0, 16  ;;  %v870_v9 = vshrl.u32 %v7207_v2, 16  ;;  %v873_v10 = vshll.u32 %v7207_v2, 16  ;;  %v879_v11 = vshll.u32 %v7208_v7, 16  ;;  %v7209_v12 = vld [vmem:[%s8087_s18 + $0x24] sm:$0xf] }
  0x16   : > { %v8094_v13 = vrot.slane %v855_v3, 5  ;;  %v861_v14 = vrot.slane %v859_v4, 4  ;;  %1469 = vrot.lane.b32.xlu1 %v7285_v5, %s8010_s19  ;;  %v848_v15 = vrot.slane %v846_v6, 4  ;;  %v883_v16 = vshrl.u32 %v7208_v7, 16  ;;  %v7210_v17 = vld [vmem:[%s8087_s18 + $0x28] sm:$0xf] }
  0x17   : > { %v851_v18 = vrot.slane %v849_v8, 5  ;;  %v872_v19 = vrot.slane %v870_v9, 4  ;;  %v875_v20 = vrot.slane %v873_v10, 5  ;;  %v8098_v21 = vrot.slane %v879_v11, 5  ;;  %v7211_v30 = vld [vmem:[%s8087_s18 + $0x30] sm:$0xf] }
  0x18   : > { %v862_v22 = vor.u32 %v861_v14, %v8094_v13  ;;  %v885_v23 = vrot.slane %v883_v16, 4  ;;  %v7286_v24 = vcombine.low %v7207_v2, %v7208_v7  ;;  %v903_v25 = vshll.u32 %v7210_v17, 16  ;;  %v7212_v31 = vld [vmem:[%s8087_s18 + $0x34] sm:$0xf]  ;;  %v361_v36 = vld [vmem:[%s8087_s18] sm:$0xf] }
  0x19   : > { %v852_v26 = vor.u32 %v851_v18, %v848_v15  ;;  %v907_v27 = vshrl.u32 %v7210_v17, 16  ;;  %v7287_v28 = vcombine.low %v7209_v12, %v7210_v17  ;;  %v894_v29 = vshrl.u32 %v7209_v12, 16  ;;  %v362_v45 = vld [vmem:[%s8087_s18 + $0x4] sm:$0xf]  ;;  %v393_v49 = vld [vmem:[%s8087_s18 + $0x8] sm:$0x1] }
  0x1a   : > { %v8103_v32 = vrot.slane %v862_v22, 4  ;;  %1471 = vrot.lane.b32.xlu1 %v7286_v24, %s8010_s19  ;;  %v8106_v33 = vrot.slane %v903_v25, 5  ;;  %v897_v34 = vshll.u32 %v7209_v12, 16  ;;  %v918_v35 = vshrl.u32 %v7211_v30, 16  ;;  %v7238_v55 = vld [vmem:[%s8087_s18 + $0x20] sm:$0x1] }
  0x1b   : > { %v8109_v37 = vrot.slane %v852_v26, 4  ;;  %v909_v38 = vrot.slane %v907_v27, 4  ;;  %1473 = vrot.lane.b32.xlu0 %v7287_v28, %s8010_s19  ;;  %v896_v39 = vrot.slane %v894_v29, 4  ;;  %v921_v40 = vshll.u32 %v7211_v30, 16  ;;  %v363_v60 = vld [vmem:[%s8087_s18 + $0xc] sm:$0xf] }
  0x1c   : > { %v899_v41 = vrot.slane %v897_v34, 5  ;;  %v8112_v42 = vrot.slane %v918_v35, 4  ;;  %v927_v43 = vshll.u32 %v7212_v31, 16  ;;  %v931_v44 = vshrl.u32 %v7212_v31, 16  ;;  %v364_v5 = vld [vmem:[%s8087_s18 + $0x10] sm:$0xf] }
  0x1d   : > { %v910_v46 = vor.u32 %v909_v38, %v8106_v33  ;;  %v8116_v47 = vrot.slane %v921_v40, 5  ;;  %v7288_v48 = vcombine.low %v7211_v30, %v7212_v31  ;;  %v413_v50 = vshrl.u32 %v361_v36, 16  ;;  %v7897_v6 = vld [vmem:[%s11419_s1] sm:$0xff]   ;;  %v394_v16 = vld [vmem:[%s8087_s18 + $0x14] sm:$0x1]  ;;  %v7899_v29 = vld [vmem:[%s11419_s1 + $0x8] sm:$0xff]  }
  0x1e   : > { %v900_v51 = vor.u32 %v899_v41, %v896_v39  ;;  %v8119_v52 = vrot.slane %v927_v43, 5  ;;  %v8121_v53 = vrot.slane %v931_v44, 4  ;;  %v416_v54 = vshll.u32 %v361_v36, 16  ;;  %7744 = vmatprep.subr.bf16.mxu0 %v7897_v6  ;;  %7858 = vmatprep.subr.bf16.mxu1 %v7897_v6  ;;  %v368_v28 = vld [vmem:[%s8087_s18 + $0x28] sm:$0xf] }
  0x1f   : > { %v8124_v56 = vrot.slane %v910_v46, 4  ;;  %1475 = vrot.lane.b32.xlu1 %v7288_v48, %s8010_s19  ;;  %v415_v57 = vrot.slane %v413_v50, 4  ;;  %v422_v58 = vshll.u32 %v362_v45, 16  ;;  %v426_v59 = vshrl.u32 %v362_v45, 16  ;;  %7745 = vmatpush3.bf16.msra.mxu0 %v7897_v6  ;;  %v396_v39 = vld [vmem:[%s8087_s18 + $0x2c] sm:$0x1] }
  0x20   : > { %v8128_v61 = vrot.slane %v900_v51, 4  ;;  %v418_v62 = vrot.slane %v416_v54, 5  ;;  %v432_v63 = vshll.u32 %v393_v49, 16  ;;  %v876_v0 = vor.u32 %v875_v20, %v872_v19  ;;  %7861 = vmatpush3.bf16.msra.mxu1 %v7897_v6  ;;  %7746 = vmatprep.subr.bf16.mxu0 %v7899_v29  ;;  %v7237_v46 = vld [vmem:[%s8087_s18 + $0x14] sm:$0x1] }
  0x21   : > { %v424_v1 = vrot.slane %v422_v58, 5  ;;  %v428_v2 = vrot.slane %v426_v59, 4  ;;  %v886_v3 = vor.u32 %v885_v23, %v8098_v21  ;;  %v889_v4 = vshll.u32 %v7238_v55, 16  ;;  %v367_v23 = vld [vmem:[%s8087_s18 + $0x24] sm:$0xf]  ;;  %7859 = vmatprep.subr.bf16.mxu1 %v7899_v29  ;;  %v7901_v48 = vld [vmem:[%s11419_s1 + $0x10] sm:$0xff]  }
  0x22   : > { %v419_v7 = vor.u32 %v418_v62, %v415_v57  ;;  %v434_v8 = vrot.slane %v432_v63, 5  ;;  %v877_v9 = vrot.slane %v876_v0, 4  ;;  %v437_v10 = vshrl.u32 %v363_v60, 16  ;;  %v365_v6 = vld [vmem:[%s8087_s18 + $0x18] sm:$0xf] }
  0x23   : > { %v429_v12 = vor.u32 %v428_v2, %v424_v1  ;;  %v887_v14 = vrot.slane %v886_v3, 4  ;;  %v891_v15 = vrot.slane %v889_v4, 5  ;;  %v440_v17 = vshll.u32 %v363_v60, 16  ;;  %7747 = vmatpush3.bf16.msra.mxu0 %v7899_v29  ;;  %v7240_v60 = vld [vmem:[%s8087_s18 + $0x38] sm:$0x1] }
  0x24   : > { %v420_v18 = vrot.slane %v419_v7, 4  ;;  %v882_v19 = vsel %vm8137_vm2, %v877_v9, %v8098_v21  ;;  %v439_v20 = vrot.slane %v437_v10, 4  ;;  %v446_v22 = vshll.u32 %v364_v5, 16  ;;  %7862 = vmatpush3.bf16.msra.mxu1 %v7899_v29  ;;  %7748 = vmatprep.subr.bf16.mxu0 %v7901_v48 }
  0x25   : > { %v430_v24 = vrot.slane %v429_v12, 4  ;;  %v892_v25 = vsel %vm8137_vm2, %v887_v14, %v891_v15  ;;  %v442_v26 = vrot.slane %v440_v17, 5  ;;  %v450_v27 = vshrl.u32 %v364_v5, 16  ;;  %7860 = vmatprep.subr.bf16.mxu1 %v7901_v48  ;;  %v366_v15 = vld [vmem:[%s8087_s18 + $0x1c] sm:$0xf] }
  0x26   : > { %v425_v21 = vsel %vm8137_vm2, %v420_v18, %v424_v1  ;;  %v7302_v30 = vcombine.low %v882_v19, %v892_v25  ;;  %v448_v31 = vrot.slane %v446_v22, 5  ;;  %v456_v34 = vshll.u32 %v394_v16, 16 }
  0x27   : > { %v435_v35 = vsel %vm8137_vm2, %v430_v24, %v434_v8  ;;  %v443_v36 = vor.u32 %v442_v26, %v439_v20  ;;  %v452_v38 = vrot.slane %v450_v27, 4  ;;  %v485_v40 = vshrl.u32 %v367_v23, 16  ;;  %7749 = vmatpush3.bf16.msra.mxu0 %v7901_v48  ;;  %v395_v20 = vld [vmem:[%s8087_s18 + $0x20] sm:$0x1] }
  0x28   : > { %v7269_v41 = vcombine.low %v425_v21, %v435_v35  ;;  %1551 = vrot.lane.b32.xlu1 %v7302_v30, %s8011_s24  ;;  %v458_v43 = vrot.slane %v456_v34, 5  ;;  %v488_v44 = vshll.u32 %v367_v23, 16  ;;  %v494_v45 = vshll.u32 %v368_v28, 16  ;;  %7863 = vmatpush3.bf16.msra.mxu1 %v7901_v48  ;;  %v371_v23 = vld [vmem:[%s8087_s18 + $0x3c] sm:$0xf] }
  0x29   : > { %v444_v49 = vrot.slane %v443_v36, 4  ;;  %v453_v50 = vor.u32 %v452_v38, %v448_v31  ;;  %v487_v51 = vrot.slane %v485_v40, 4  ;;  %v498_v54 = vshrl.u32 %v368_v28, 16  ;;  %v372_v27 = vld [vmem:[%s8087_s18 + $0x40] sm:$0xf] }
  0x2a   : > { %1357 = vrot.lane.b32.xlu0 %v7269_v41, %s8012_s27  ;;  %v490_v55 = vrot.slane %v488_v44, 5  ;;  %v496_v57 = vrot.slane %v494_v45, 5  ;;  %v504_v58 = vshll.u32 %v396_v39, 16  ;;  %v858_v59 = vsel %vm8137_vm2, %v8109_v37, %v8094_v13 }
  0x2b   : > { %v449_v62 = vsel %vm8137_vm2, %v444_v49, %v448_v31  ;;  %v454_v63 = vrot.slane %v453_v50, 4  ;;  %v500_v0 = vrot.slane %v498_v54, 4  ;;  %v865_v1 = vshll.u32 %v7237_v46, 16  ;;  %v398_v31 = vld [vmem:[%s8087_s18 + $0x44] sm:$0x1] }
  0x2c   : > { %v491_v2 = vor.u32 %v490_v55, %v487_v51  ;;  %v506_v3 = vrot.slane %v504_v58, 5  ;;  %v924_v4 = vor.u32 %v8116_v47, %v8112_v42  ;;  %v934_v5 = vor.u32 %v8121_v53, %v8119_v52  ;;  %v8199_v49 = vld [vmem:[%s8087_s18 + $0x48] sm:$0xf] }
  0x2d   : > { %v459_v13 = vsel %vm8137_vm2, %v454_v63, %v458_v43  ;;  %v501_v37 = vor.u32 %v500_v0, %v496_v57  ;;  %v867_v7 = vrot.slane %v865_v1, 5  ;;  %v937_v8 = vshll.u32 %v7240_v60, 16  ;;  %v7239_v43 = vld [vmem:[%s8087_s18 + $0x2c] sm:$0x1] }
  0x2e   : > { %v7270_v9 = vcombine.low %v449_v62, %v459_v13  ;;  %v492_v10 = vrot.slane %v491_v2, 4  ;;  %v925_v12 = vrot.slane %v924_v4, 4  ;;  %v935_v14 = vrot.slane %v934_v5, 4 }
  0x2f   : > { %v502_v42 = vrot.slane %v501_v37, 4  ;;  %v868_v47 = vsel %vm8137_vm2, %v8103_v32, %v867_v7  ;;  %v939_v53 = vrot.slane %v937_v8, 5  ;;  %v461_v16 = vshrl.u32 %v365_v6, 16  ;;  %v369_v7 = vld [vmem:[%s8087_s18 + $0x30] sm:$0xf] }
  0x30   : > { %1359 = vrot.lane.b32.xlu0 %v7270_v9, %s8012_s27  ;;  %v497_v17 = vsel %vm8137_vm2, %v492_v10, %v496_v57  ;;  %v7301_v18 = vcombine.low %v858_v59, %v868_v47  ;;  %v930_v19 = vsel %vm8137_vm2, %v925_v12, %v8119_v52  ;;  %v464_v22 = vshll.u32 %v365_v6, 16  ;;  %v7216_v57 = vld [vmem:[%s8087_s18 + $0x4c] sm:$0xf] }
  0x31   : > { %v507_v24 = vsel %vm8137_vm2, %v502_v42, %v506_v3  ;;  %v940_v32 = vsel %vm8137_vm2, %v935_v14, %v939_v53  ;;  %v463_v25 = vrot.slane %v461_v16, 4  ;;  %v470_v26 = vshll.u32 %v366_v15, 16  ;;  %v370_v14 = vld [vmem:[%s8087_s18 + $0x34] sm:$0xf] }
  0x32   : > { %v7272_v28 = vcombine.low %v497_v17, %v507_v24  ;;  %v7304_v29 = vcombine.low %v930_v19, %v940_v32  ;;  %v466_v21 = vrot.slane %v464_v22, 5  ;;  %v474_v30 = vshrl.u32 %v366_v15, 16  ;;  %v397_v15 = vld [vmem:[%s8087_s18 + $0x38] sm:$0x1]  ;;  %v7242_v17 = vld [vmem:[%s8087_s18 + $0x50] sm:$0x1] }
  0x33   : > { %v472_v52 = vrot.slane %v470_v26, 5  ;;  %v480_v34 = vshll.u32 %v395_v20, 16  ;;  %v533_v35 = vshrl.u32 %v371_v23, 16  ;;  %v536_v36 = vshll.u32 %v371_v23, 16 }
  0x34   : > { %1363 = vrot.lane.b32.xlu1 %v7272_v28, %s8012_s27  ;;  %1549 = vrot.lane.b32.xlu0 %v7301_v18, %s8011_s24  ;;  %v467_v38 = vor.u32 %v466_v21, %v463_v25  ;;  %v476_v39 = vrot.slane %v474_v30, 4  ;;  %v542_v40 = vshll.u32 %v372_v27, 16  ;;  %v546_v41 = vshrl.u32 %v372_v27, 16  ;;  %v8227_v25 = vld [vmem:[%s8087_s18 + $0x3c] sm:$0xf] }
  0x35   : > { %v482_v44 = vrot.slane %v480_v34, 5  ;;  %v535_v45 = vrot.slane %v533_v35, 4  ;;  %v538_v46 = vrot.slane %v536_v36, 5  ;;  %v552_v48 = vshll.u32 %v398_v31, 16  ;;  %v8231_v21 = vld [vmem:[%s8087_s18 + $0x40] sm:$0xf] }
  0x36   : > { %v468_v50 = vrot.slane %v467_v38, 4  ;;  %v477_v51 = vor.u32 %v476_v39, %v472_v52  ;;  %v544_v54 = vrot.slane %v542_v40, 5  ;;  %v548_v55 = vrot.slane %v546_v41, 4 }
  0x37   : > { %v539_v58 = vor.u32 %v538_v46, %v535_v45  ;;  %v554_v59 = vrot.slane %v552_v48, 5  ;;  %v906_v60 = vsel %vm8137_vm2, %v8128_v61, %v8106_v33  ;;  %v913_v62 = vshll.u32 %v7239_v43, 16  ;;  %v375_v45 = vld [vmem:[%s8087_s18 + $0x54] sm:$0xf] }
  0x38   : > { %1555 = vrot.lane.b32.xlu1 %v7304_v29, %s8011_s24  ;;  %v473_v63 = vsel %vm8137_vm2, %v468_v50, %v472_v52  ;;  %v478_v0 = vrot.slane %v477_v51, 4  ;;  %v549_v1 = vor.u32 %v548_v55, %v544_v54  ;;  %v966_v2 = vshrl.u32 %v8199_v49, 16  ;;  %v376_v51 = vld [vmem:[%s8087_s18 + $0x58] sm:$0xf] }
  0x39   : > { %v540_v3 = vrot.slane %v539_v58, 4  ;;  %v915_v4 = vrot.slane %v913_v62, 5  ;;  %v969_v5 = vshll.u32 %v8199_v49, 16  ;;  %v975_v6 = vshll.u32 %v7216_v57, 16 }
  0x3a   : > { %v483_v33 = vsel %vm8137_vm2, %v478_v0, %v482_v44  ;;  %v550_v61 = vrot.slane %v549_v1, 4  ;;  %v968_v13 = vrot.slane %v966_v2, 4  ;;  %v979_v37 = vshrl.u32 %v7216_v57, 16  ;;  %v7241_v1 = vld [vmem:[%s8087_s18 + $0x44] sm:$0x1] }
  0x3b   : > { %v7271_v8 = vcombine.low %v473_v63, %v483_v33  ;;  %v545_v9 = vsel %vm8137_vm2, %v540_v3, %v544_v54  ;;  %v916_v10 = vsel %vm8137_vm2, %v8124_v56, %v915_v4  ;;  %v971_v12 = vrot.slane %v969_v5, 5 }
  0x3c   : > { %v555_v42 = vsel %vm8137_vm2, %v550_v61, %v554_v59  ;;  %v7303_v47 = vcombine.low %v906_v60, %v916_v10  ;;  %v977_v53 = vrot.slane %v975_v6, 5  ;;  %v981_v16 = vrot.slane %v979_v37, 4  ;;  %v400_v59 = vld [vmem:[%s8087_s18 + $0x5c] sm:$0x1]  ;;  %v8254_v6 = vld [vmem:[%s8087_s18 + $0x60] sm:$0xf] }
  0x3d   : > { %1361 = vrot.lane.b32.xlu0 %v7271_v8, %s8012_s27  ;;  %v7274_v18 = vcombine.low %v545_v9, %v555_v42  ;;  %v7290_v19 = vcombine.low %v8199_v49, %v7216_v57  ;;  %v509_v20 = vshrl.u32 %v369_v7, 16  ;;  %v512_v22 = vshll.u32 %v369_v7, 16 }
  0x3e   : > { %v518_v56 = vshll.u32 %v370_v14, 16  ;;  %v522_v23 = vshrl.u32 %v370_v14, 16  ;;  %v528_v24 = vshll.u32 %v397_v15, 16  ;;  %v972_v32 = vor.u32 %v971_v12, %v968_v13  ;;  %v7220_v12 = vld [vmem:[%s8087_s18 + $0x64] sm:$0xf] }
  0x3f   : > { %1367 = vrot.lane.b32.xlu1 %v7274_v18, %s8012_s27  ;;  %v511_v26 = vrot.slane %v509_v20, 4  ;;  %v514_v27 = vrot.slane %v512_v22, 5  ;;  %v982_v28 = vor.u32 %v981_v16, %v977_v53  ;;  %v985_v29 = vshll.u32 %v7242_v17, 16 }
  0x40   : > { %v520_v30 = vrot.slane %v518_v56, 5  ;;  %v524_v31 = vrot.slane %v522_v23, 4  ;;  %v530_v52 = vrot.slane %v528_v24, 5  ;;  %v973_v34 = vrot.slane %v972_v32, 4 }
  0x41   : > { %1553 = vrot.lane.b32.xlu0 %v7303_v47, %s8011_s24  ;;  %v515_v35 = vor.u32 %v514_v27, %v511_v26  ;;  %v983_v36 = vrot.slane %v982_v28, 4  ;;  %v987_v38 = vrot.slane %v985_v29, 5  ;;  %v942_v39 = vshrl.u32 %v8227_v25, 16  ;;  %v8267_v27 = vld [vmem:[%s8087_s18 + $0x4c] sm:$0xf] }
  0x42   : > { %v525_v40 = vor.u32 %v524_v31, %v520_v30  ;;  %v978_v41 = vsel %vm8137_vm2, %v973_v34, %v977_v53  ;;  %v945_v43 = vshll.u32 %v8227_v25, 16  ;;  %v951_v44 = vshll.u32 %v8231_v21, 16 }
  0x43   : > { %1479 = vrot.lane.b32.xlu1 %v7290_v19, %s8010_s19  ;;  %v516_v46 = vrot.slane %v515_v35, 4  ;;  %v988_v48 = vsel %vm8137_vm2, %v983_v36, %v987_v38  ;;  %v944_v49 = vrot.slane %v942_v39, 4  ;;  %v955_v50 = vshrl.u32 %v8231_v21, 16  ;;  %v8262_v19 = vld [vmem:[%s8087_s18 + $0x48] sm:$0xf] }
  0x44   : > { %v526_v54 = vrot.slane %v525_v40, 4  ;;  %v7306_v55 = vcombine.low %v978_v41, %v988_v48  ;;  %v947_v57 = vrot.slane %v945_v43, 5  ;;  %v953_v58 = vrot.slane %v951_v44, 5  ;;  %v7244_v38 = vld [vmem:[%s8087_s18 + $0x68] sm:$0x1] }
  0x45   : > { %v521_v60 = vsel %vm8137_vm2, %v516_v46, %v520_v30  ;;  %v957_v62 = vrot.slane %v955_v50, 4  ;;  %v7289_v63 = vcombine.low %v8227_v25, %v8231_v21  ;;  %v581_v0 = vshrl.u32 %v375_v45, 16  ;;  %v399_v30 = vld [vmem:[%s8087_s18 + $0x50] sm:$0x1]  ;;  %v8281_v39 = vld [vmem:[%s8087_s18 + $0x54] sm:$0xf] }
  0x46   : > { %v531_v2 = vsel %vm8137_vm2, %v526_v54, %v530_v52  ;;  %v584_v3 = vshll.u32 %v375_v45, 16  ;;  %v590_v4 = vshll.u32 %v376_v51, 16  ;;  %v594_v5 = vshrl.u32 %v376_v51, 16 }
  0x47   : > { %v7273_v33 = vcombine.low %v521_v60, %v531_v2  ;;  %1559 = vrot.lane.b32.xlu1 %v7306_v55, %s8011_s24  ;;  %v583_v61 = vrot.slane %v581_v0, 4  ;;  %v600_v13 = vshll.u32 %v400_v59, 16  ;;  %v948_v37 = vor.u32 %v947_v57, %v944_v49  ;;  %v8289_v55 = vld [vmem:[%s8087_s18 + $0x58] sm:$0xf] }
  0x48   : > { %v586_v7 = vrot.slane %v584_v3, 5  ;;  %v592_v8 = vrot.slane %v590_v4, 5  ;;  %v596_v9 = vrot.slane %v594_v5, 4  ;;  %v958_v10 = vor.u32 %v957_v62, %v953_v58 }
  0x49   : > { %1365 = vrot.lane.b32.xlu0 %v7273_v33, %s8012_s27  ;;  %v602_v14 = vrot.slane %v600_v13, 5  ;;  %v949_v15 = vrot.slane %v948_v37, 4  ;;  %v961_v42 = vshll.u32 %v7241_v1, 16  ;;  %v1014_v47 = vshrl.u32 %v8254_v6, 16  ;;  %v8298_v33 = vld [vmem:[%s8087_s18 + $0x6c] sm:$0xf] }
  0x4a   : > { %v587_v53 = vor.u32 %v586_v7, %v583_v61  ;;  %v597_v16 = vor.u32 %v596_v9, %v592_v8  ;;  %v959_v17 = vrot.slane %v958_v10, 4  ;;  %v1017_v18 = vshll.u32 %v8254_v6, 16  ;;  %v8301_v61 = vld [vmem:[%s8087_s18 + $0x70] sm:$0xf]  ;;  %v402_v9 = vld [vmem:[%s8087_s18 + $0x74] sm:$0x1] }
  0x4b   : > { %v954_v20 = vsel %vm8137_vm2, %v949_v15, %v953_v58  ;;  %v963_v22 = vrot.slane %v961_v42, 5  ;;  %v1016_v56 = vrot.slane %v1014_v47, 4  ;;  %v1023_v23 = vshll.u32 %v7220_v12, 16  ;;  %v7243_v42 = vld [vmem:[%s8087_s18 + $0x5c] sm:$0x1] }
  0x4c   : > { %v588_v24 = vrot.slane %v587_v53, 4  ;;  %v598_v32 = vrot.slane %v597_v16, 4  ;;  %v1019_v25 = vrot.slane %v1017_v18, 5  ;;  %v1027_v26 = vshrl.u32 %v7220_v12, 16  ;;  %v8316_v18 = vld [vmem:[%s8087_s18 + $0x78] sm:$0xf] }
  0x4d   : > { %1477 = vrot.lane.b32.xlu0 %v7289_v63, %s8010_s19  ;;  %v964_v28 = vsel %vm8137_vm2, %v959_v17, %v963_v22  ;;  %v1025_v29 = vrot.slane %v1023_v23, 5  ;;  %v7292_v21 = vcombine.low %v8254_v6, %v7220_v12  ;;  %v557_v31 = vshrl.u32 %v8262_v19, 16 }
  0x4e   : > { %v593_v52 = vsel %vm8137_vm2, %v588_v24, %v592_v8  ;;  %v603_v34 = vsel %vm8137_vm2, %v598_v32, %v602_v14  ;;  %v7305_v35 = vcombine.low %v954_v20, %v964_v28  ;;  %v1029_v36 = vrot.slane %v1027_v26, 4  ;;  %v8322_v24 = vld [vmem:[%s8087_s18 + $0x7c] sm:$0xf] }
  0x4f   : > { %v7276_v40 = vcombine.low %v593_v52, %v603_v34  ;;  %v559_v41 = vrot.slane %v557_v31, 4  ;;  %v560_v43 = vshll.u32 %v8262_v19, 16  ;;  %v566_v44 = vshll.u32 %v8267_v27, 16 }
  0x50   : > { %v570_v45 = vshrl.u32 %v8267_v27, 16  ;;  %v576_v46 = vshll.u32 %v399_v30, 16  ;;  %v1020_v48 = vor.u32 %v1019_v25, %v1016_v56  ;;  %v1030_v49 = vor.u32 %v1029_v36, %v1025_v29 }
  0x51   : > { %1371 = vrot.lane.b32.xlu1 %v7276_v40, %s8012_s27  ;;  %1557 = vrot.lane.b32.xlu0 %v7305_v35, %s8011_s24  ;;  %v562_v50 = vrot.slane %v560_v43, 5  ;;  %v568_v51 = vrot.slane %v566_v44, 5  ;;  %v1033_v54 = vshll.u32 %v7244_v38, 16  ;;  %v990_v57 = vshrl.u32 %v8281_v39, 16  ;;  %v8332_v43 = vld [vmem:[%s8087_s18 + $0x60] sm:$0xf] }
  0x52   : > { %v572_v58 = vrot.slane %v570_v45, 4  ;;  %v578_v59 = vrot.slane %v576_v46, 5  ;;  %v1021_v60 = vrot.slane %v1020_v48, 4  ;;  %v1031_v62 = vrot.slane %v1030_v49, 4  ;;  %v8335_v49 = vld [vmem:[%s8087_s18 + $0x64] sm:$0xf] }
  0x53   : > { %v563_v63 = vor.u32 %v562_v50, %v559_v41  ;;  %v1035_v0 = vrot.slane %v1033_v54, 5  ;;  %v992_v1 = vrot.slane %v990_v57, 4  ;;  %v993_v2 = vshll.u32 %v8281_v39, 16 }
  0x54   : > { %v573_v3 = vor.u32 %v572_v58, %v568_v51  ;;  %v1026_v4 = vsel %vm8137_vm2, %v1021_v60, %v1025_v29  ;;  %v999_v5 = vshll.u32 %v8289_v55, 16  ;;  %v1003_v6 = vshrl.u32 %v8289_v55, 16 }
  0x55   : > { %1483 = vrot.lane.b32.xlu1 %v7292_v21, %s8010_s19  ;;  %v564_v13 = vrot.slane %v563_v63, 4  ;;  %v1036_v37 = vsel %vm8137_vm2, %v1031_v62, %v1035_v0  ;;  %v995_v7 = vrot.slane %v993_v2, 5  ;;  %v7291_v8 = vcombine.low %v8281_v39, %v8289_v55 }
  0x56   : > { %v574_v10 = vrot.slane %v573_v3, 4  ;;  %v7308_v12 = vcombine.low %v1026_v4, %v1036_v37  ;;  %v1001_v14 = vrot.slane %v999_v5, 5  ;;  %v1005_v15 = vrot.slane %v1003_v6, 4  ;;  %v7246_v3 = vld [vmem:[%s8087_s18 + $0x80] sm:$0x1] }
  0x57   : > { %v569_v47 = vsel %vm8137_vm2, %v564_v13, %v568_v51  ;;  %v629_v53 = vshrl.u32 %v8298_v33, 16  ;;  %v632_v16 = vshll.u32 %v8298_v33, 16  ;;  %v638_v17 = vshll.u32 %v8301_v61, 16  ;;  %v8353_v4 = vld [vmem:[%s8087_s18 + $0x6c] sm:$0xf] }
  0x58   : > { %v579_v20 = vsel %vm8137_vm2, %v574_v10, %v578_v59  ;;  %v642_v22 = vshrl.u32 %v8301_v61, 16  ;;  %v648_v56 = vshll.u32 %v402_v9, 16  ;;  %v996_v23 = vor.u32 %v995_v7, %v992_v1  ;;  %v401_v59 = vld [vmem:[%s8087_s18 + $0x68] sm:$0x1] }
  0x59   : > { %v7275_v32 = vcombine.low %v569_v47, %v579_v20  ;;  %1563 = vrot.lane.b32.xlu1 %v7308_v12, %s8011_s24  ;;  %v631_v25 = vrot.slane %v629_v53, 4  ;;  %v634_v26 = vrot.slane %v632_v16, 5  ;;  %v640_v28 = vrot.slane %v638_v17, 5 }
  0x5a   : > { %v644_v29 = vrot.slane %v642_v22, 4  ;;  %v650_v21 = vrot.slane %v648_v56, 5  ;;  %v997_v30 = vrot.slane %v996_v23, 4  ;;  %v1006_v31 = vor.u32 %v1005_v15, %v1001_v14 }
  0x5b   : > { %1369 = vrot.lane.b32.xlu0 %v7275_v32, %s8012_s27  ;;  %v635_v52 = vor.u32 %v634_v26, %v631_v25  ;;  %v1009_v34 = vshll.u32 %v7243_v42, 16  ;;  %v1062_v35 = vshrl.u32 %v8316_v18, 16  ;;  %v1065_v36 = vshll.u32 %v8316_v18, 16  ;;  %v7222_v42 = vld [vmem:[%s8087_s18 + $0x70] sm:$0xf] }
  0x5c   : > { %v645_v38 = vor.u32 %v644_v29, %v640_v28  ;;  %v1002_v39 = vsel %vm8137_vm2, %v997_v30, %v1001_v14  ;;  %v1007_v40 = vrot.slane %v1006_v31, 4  ;;  %v1071_v41 = vshll.u32 %v8322_v24, 16  ;;  %v8365_v29 = vld [vmem:[%s8087_s18 + $0x84] sm:$0xf] }
  0x5d   : > { %v636_v44 = vrot.slane %v635_v52, 4  ;;  %v1011_v45 = vrot.slane %v1009_v34, 5  ;;  %v1064_v46 = vrot.slane %v1062_v35, 4  ;;  %v1067_v48 = vrot.slane %v1065_v36, 5  ;;  %v8374_v34 = vld [vmem:[%s8087_s18 + $0x88] sm:$0xf] }
  0x5e   : > { %v646_v50 = vrot.slane %v645_v38, 4  ;;  %v1073_v51 = vrot.slane %v1071_v41, 5  ;;  %v1075_v54 = vshrl.u32 %v8322_v24, 16  ;;  %v7294_v55 = vcombine.low %v8316_v18, %v8322_v24  ;;  %v7245_v24 = vld [vmem:[%s8087_s18 + $0x74] sm:$0x1] }
  0x5f   : > { %1481 = vrot.lane.b32.xlu0 %v7291_v8, %s8010_s19  ;;  %v641_v57 = vsel %vm8137_vm2, %v636_v44, %v640_v28  ;;  %v1012_v58 = vsel %vm8137_vm2, %v1007_v40, %v1011_v45  ;;  %v605_v60 = vshrl.u32 %v8332_v43, 16  ;;  %v608_v62 = vshll.u32 %v8332_v43, 16  ;;  %v404_v44 = vld [vmem:[%s8087_s18 + $0x8c] sm:$0x1] }
  0x60   : > { %v651_v63 = vsel %vm8137_vm2, %v646_v50, %v650_v21  ;;  %v7307_v0 = vcombine.low %v1002_v39, %v1012_v58  ;;  %v1077_v1 = vrot.slane %v1075_v54, 4  ;;  %v614_v2 = vshll.u32 %v8335_v49, 16 }
  0x61   : > { %v7278_v5 = vcombine.low %v641_v57, %v651_v63  ;;  %v607_v6 = vrot.slane %v605_v60, 4  ;;  %v610_v13 = vrot.slane %v608_v62, 5  ;;  %v618_v37 = vshrl.u32 %v8335_v49, 16  ;;  %v8388_v62 = vld [vmem:[%s8087_s18 + $0x7c] sm:$0xf] }
  0x62   : > { %v616_v7 = vrot.slane %v614_v2, 5  ;;  %v624_v8 = vshll.u32 %v401_v59, 16  ;;  %v1068_v9 = vor.u32 %v1067_v48, %v1064_v46  ;;  %v1078_v10 = vor.u32 %v1077_v1, %v1073_v51 }
  0x63   : > { %1375 = vrot.lane.b32.xlu1 %v7278_v5, %s8012_s27  ;;  %1561 = vrot.lane.b32.xlu0 %v7307_v0, %s8011_s24  ;;  %v611_v12 = vor.u32 %v610_v13, %v607_v6  ;;  %v620_v14 = vrot.slane %v618_v37, 4  ;;  %v1081_v15 = vshll.u32 %v7246_v3, 16  ;;  %v1038_v47 = vshrl.u32 %v8353_v4, 16  ;;  %v403_v5 = vld [vmem:[%s8087_s18 + $0x80] sm:$0x1] }
  0x64   : > { %v626_v53 = vrot.slane %v624_v8, 5  ;;  %v1069_v16 = vrot.slane %v1068_v9, 4  ;;  %v1079_v17 = vrot.slane %v1078_v10, 4  ;;  %v1041_v18 = vshll.u32 %v8353_v4, 16  ;;  %v7227_v10 = vld [vmem:[%s8087_s18 + $0x90] sm:$0xf] }
  0x65   : > { %v612_v20 = vrot.slane %v611_v12, 4  ;;  %v621_v22 = vor.u32 %v620_v14, %v616_v7  ;;  %v1083_v56 = vrot.slane %v1081_v15, 5  ;;  %v1040_v23 = vrot.slane %v1038_v47, 4  ;;  %v7228_v47 = vld [vmem:[%s8087_s18 + $0x94] sm:$0xf] }
  0x66   : > { %v1074_v32 = vsel %vm8137_vm2, %v1069_v16, %v1073_v51  ;;  %v1043_v25 = vrot.slane %v1041_v18, 5  ;;  %v1047_v26 = vshll.u32 %v7222_v42, 16  ;;  %v1051_v28 = vshrl.u32 %v7222_v42, 16 }
  0x67   : > { %1487 = vrot.lane.b32.xlu1 %v7294_v55, %s8010_s19  ;;  %v617_v21 = vsel %vm8137_vm2, %v612_v20, %v616_v7  ;;  %v622_v30 = vrot.slane %v621_v22, 4  ;;  %v1084_v31 = vsel %vm8137_vm2, %v1079_v17, %v1083_v56  ;;  %v7293_v52 = vcombine.low %v8353_v4, %v7222_v42  ;;  %v8383_v55 = vld [vmem:[%s8087_s18 + $0x78] sm:$0xf] }
  0x68   : > { %v7310_v35 = vcombine.low %v1074_v32, %v1084_v31  ;;  %v1049_v36 = vrot.slane %v1047_v26, 5  ;;  %v1053_v38 = vrot.slane %v1051_v28, 4  ;;  %v1044_v39 = vor.u32 %v1043_v25, %v1040_v23  ;;  %v7225_v28 = vld [vmem:[%s8087_s18 + $0x84] sm:$0xf] }
  0x69   : > { %v627_v40 = vsel %vm8137_vm2, %v622_v30, %v626_v53  ;;  %v1057_v41 = vshll.u32 %v7245_v24, 16  ;;  %v677_v45 = vshrl.u32 %v8365_v29, 16  ;;  %v680_v46 = vshll.u32 %v8365_v29, 16 }
  0x6a   : > { %v7277_v48 = vcombine.low %v617_v21, %v627_v40  ;;  %v1045_v50 = vrot.slane %v1044_v39, 4  ;;  %v1054_v51 = vor.u32 %v1053_v38, %v1049_v36  ;;  %v686_v54 = vshll.u32 %v8374_v34, 16 }
  0x6b   : > { %1567 = vrot.lane.b32.xlu1 %v7310_v35, %s8011_s24  ;;  %v1059_v57 = vrot.slane %v1057_v41, 5  ;;  %v679_v58 = vrot.slane %v677_v45, 4  ;;  %v682_v59 = vrot.slane %v680_v46, 5  ;;  %v690_v60 = vshrl.u32 %v8374_v34, 16  ;;  %v7226_v35 = vld [vmem:[%s8087_s18 + $0x88] sm:$0xf] }
  0x6c   : > { %1373 = vrot.lane.b32.xlu0 %v7277_v48, %s8012_s27  ;;  %v1050_v63 = vsel %vm8137_vm2, %v1045_v50, %v1049_v36  ;;  %v1055_v0 = vrot.slane %v1054_v51, 4  ;;  %v688_v1 = vrot.slane %v686_v54, 5  ;;  %v696_v2 = vshll.u32 %v404_v44, 16  ;;  %v7248_v48 = vld [vmem:[%s8087_s18 + $0x98] sm:$0x1] }
  0x6d   : > { %v683_v3 = vor.u32 %v682_v59, %v679_v58  ;;  %v692_v4 = vrot.slane %v690_v60, 4  ;;  %v653_v6 = vshrl.u32 %v8383_v55, 16  ;;  %v656_v13 = vshll.u32 %v8383_v55, 16  ;;  %v7247_v58 = vld [vmem:[%s8087_s18 + $0x8c] sm:$0x1] }
  0x6e   : > { %v1060_v37 = vsel %vm8137_vm2, %v1055_v0, %v1059_v57  ;;  %v698_v7 = vrot.slane %v696_v2, 5  ;;  %v662_v8 = vshll.u32 %v8388_v62, 16  ;;  %v666_v9 = vshrl.u32 %v8388_v62, 16  ;;  %v8418_v59 = vld [vmem:[%s8087_s18 + $0x90] sm:$0xf] }
  0x6f   : > { %v7309_v12 = vcombine.low %v1050_v63, %v1060_v37  ;;  %v684_v14 = vrot.slane %v683_v3, 4  ;;  %v693_v15 = vor.u32 %v692_v4, %v688_v1  ;;  %v655_v42 = vrot.slane %v653_v6, 4 }
  0x70   : > { %1485 = vrot.lane.b32.xlu0 %v7293_v52, %s8010_s19  ;;  %v658_v53 = vrot.slane %v656_v13, 5  ;;  %v664_v16 = vrot.slane %v662_v8, 5  ;;  %v668_v17 = vrot.slane %v666_v9, 4  ;;  %v672_v18 = vshll.u32 %v403_v5, 16 }
  0x71   : > { %v689_v20 = vsel %vm8137_vm2, %v684_v14, %v688_v1  ;;  %v694_v22 = vrot.slane %v693_v15, 4  ;;  %v1110_v56 = vshrl.u32 %v7227_v10, 16  ;;  %v1113_v23 = vshll.u32 %v7227_v10, 16  ;;  %v405_v14 = vld [vmem:[%s8087_s18 + $0x98] sm:$0x1] }
  0x72   : > { %v659_v24 = vor.u32 %v658_v53, %v655_v42  ;;  %v669_v32 = vor.u32 %v668_v17, %v664_v16  ;;  %v674_v25 = vrot.slane %v672_v18, 5  ;;  %v1119_v26 = vshll.u32 %v7228_v47, 16 }
  0x73   : > { %v699_v21 = vsel %vm8137_vm2, %v694_v22, %v698_v7  ;;  %v1112_v30 = vrot.slane %v1110_v56, 4  ;;  %v1115_v31 = vrot.slane %v1113_v23, 5  ;;  %v1123_v52 = vshrl.u32 %v7228_v47, 16  ;;  %v8422_v7 = vld [vmem:[%s8087_s18 + $0x94] sm:$0xf] }
  0x74   : > { %1565 = vrot.lane.b32.xlu0 %v7309_v12, %s8011_s24  ;;  %v7280_v36 = vcombine.low %v689_v20, %v699_v21  ;;  %v660_v38 = vrot.slane %v659_v24, 4  ;;  %v670_v39 = vrot.slane %v669_v32, 4  ;;  %v1121_v40 = vrot.slane %v1119_v26, 5  ;;  %v8432_v56 = vld [vmem:[%s8087_s18 + $0x9c] sm:$0xf] }
  0x75   : > { %v1125_v41 = vrot.slane %v1123_v52, 4  ;;  %v7296_v44 = vcombine.low %v7227_v10, %v7228_v47  ;;  %v1086_v45 = vshrl.u32 %v7225_v28, 16  ;;  %v1089_v46 = vshll.u32 %v7225_v28, 16  ;;  %v8441_v26 = vld [vmem:[%s8087_s18 + $0xa0] sm:$0xf] }
  0x76   : > { %1379 = vrot.lane.b32.xlu1 %v7280_v36, %s8012_s27  ;;  %v665_v50 = vsel %vm8137_vm2, %v660_v38, %v664_v16  ;;  %v675_v51 = vsel %vm8137_vm2, %v670_v39, %v674_v25  ;;  %v1095_v54 = vshll.u32 %v7226_v35, 16  ;;  %v1099_v57 = vshrl.u32 %v7226_v35, 16  ;;  %v406_v52 = vld [vmem:[%s8087_s18 + $0xa4] sm:$0x1] }
  0x77   : > { %v7279_v60 = vcombine.low %v665_v50, %v675_v51  ;;  %v1088_v63 = vrot.slane %v1086_v45, 4  ;;  %v1091_v0 = vrot.slane %v1089_v46, 5  ;;  %v7295_v1 = vcombine.low %v7225_v28, %v7226_v35  ;;  %v8447_v35 = vld [vmem:[%s8087_s18 + $0x9c] sm:$0xf] }
  0x78   : > { %v1097_v2 = vrot.slane %v1095_v54, 5  ;;  %v1101_v3 = vrot.slane %v1099_v57, 4  ;;  %v1116_v4 = vor.u32 %v1115_v31, %v1112_v30  ;;  %v1126_v5 = vor.u32 %v1125_v41, %v1121_v40  ;;  %v7230_v54 = vld [vmem:[%s8087_s18 + $0xa0] sm:$0xf] }
  0x79   : > { %1377 = vrot.lane.b32.xlu0 %v7279_v60, %s8012_s27  ;;  %v1129_v6 = vshll.u32 %v7248_v48, 16  ;;  %v1092_v13 = vor.u32 %v1091_v0, %v1088_v63  ;;  %v1105_v37 = vshll.u32 %v7247_v58, 16  ;;  %v701_v8 = vshrl.u32 %v8418_v59, 16 }
  0x7a   : > { %1491 = vrot.lane.b32.xlu1 %v7296_v44, %s8010_s19  ;;  %v1117_v9 = vrot.slane %v1116_v4, 4  ;;  %v1127_v10 = vrot.slane %v1126_v5, 4  ;;  %v1102_v12 = vor.u32 %v1101_v3, %v1097_v2  ;;  %v704_v15 = vshll.u32 %v8418_v59, 16 }
  0x7b   : > { %v1131_v42 = vrot.slane %v1129_v6, 5  ;;  %v1093_v47 = vrot.slane %v1092_v13, 4  ;;  %v1107_v53 = vrot.slane %v1105_v37, 5  ;;  %v703_v16 = vrot.slane %v701_v8, 4 }
  0x7c   : > { %v1122_v17 = vsel %vm8137_vm2, %v1117_v9, %v1121_v40  ;;  %v1103_v18 = vrot.slane %v1102_v12, 4  ;;  %v706_v20 = vrot.slane %v704_v15, 5  ;;  %v710_v22 = vshll.u32 %v8422_v7, 16  ;;  %v7232_v9 = vld [vmem:[%s8087_s18 + $0xac] sm:$0xf] }
  0x7d   : > { %1489 = vrot.lane.b32.xlu0 %v7295_v1, %s8010_s19  ;;  %v1132_v23 = vsel %vm8137_vm2, %v1127_v10, %v1131_v42  ;;  %v1098_v24 = vsel %vm8137_vm2, %v1093_v47, %v1097_v2  ;;  %v714_v32 = vshrl.u32 %v8422_v7, 16  ;;  %v720_v25 = vshll.u32 %v405_v14, 16  ;;  %v7231_v1 = vld [vmem:[%s8087_s18 + $0xa8] sm:$0xf] }
  0x7e   : > { %v7312_v28 = vcombine.low %v1122_v17, %v1132_v23  ;;  %v1108_v21 = vsel %vm8137_vm2, %v1103_v18, %v1107_v53  ;;  %v707_v30 = vor.u32 %v706_v20, %v703_v16  ;;  %v712_v31 = vrot.slane %v710_v22, 5  ;;  %v7249_v17 = vld [vmem:[%s8087_s18 + $0xa4] sm:$0x1] }
  0x7f   : > { %v7311_v36 = vcombine.low %v1098_v24, %v1108_v21  ;;  %v716_v38 = vrot.slane %v714_v32, 4  ;;  %v722_v39 = vrot.slane %v720_v25, 5  ;;  %v725_v40 = vshrl.u32 %v8432_v56, 16  ;;  %v7250_v24 = vld [vmem:[%s8087_s18 + $0xb0] sm:$0x1] }
  0x80   : > { %1571 = vrot.lane.b32.xlu1 %v7312_v28, %s8011_s24  ;;  %v708_v41 = vrot.slane %v707_v30, 4  ;;  %v728_v44 = vshll.u32 %v8432_v56, 16  ;;  %v734_v45 = vshll.u32 %v8441_v26, 16  ;;  %v738_v46 = vshrl.u32 %v8441_v26, 16  ;;  %v8473_v30 = vld [vmem:[%s8087_s18 + $0xa8] sm:$0xf] }
  0x81   : > { %1569 = vrot.lane.b32.xlu0 %v7311_v36, %s8011_s24  ;;  %v717_v48 = vor.u32 %v716_v38, %v712_v31  ;;  %v727_v50 = vrot.slane %v725_v40, 4  ;;  %v744_v51 = vshll.u32 %v406_v52, 16  ;;  %v1134_v57 = vshrl.u32 %v8447_v35, 16 }
  0x82   : > { %v713_v58 = vsel %vm8137_vm2, %v708_v41, %v712_v31  ;;  %v730_v60 = vrot.slane %v728_v44, 5  ;;  %v736_v63 = vrot.slane %v734_v45, 5  ;;  %v740_v0 = vrot.slane %v738_v46, 4  ;;  %v8477_v46 = vld [vmem:[%s8087_s18 + $0xac] sm:$0xf] }
  0x83   : > { %v718_v2 = vrot.slane %v717_v48, 4  ;;  %v746_v3 = vrot.slane %v744_v51, 5  ;;  %v1136_v4 = vrot.slane %v1134_v57, 4  ;;  %v1137_v5 = vshll.u32 %v8447_v35, 16 }
  0x84   : > { %v731_v6 = vor.u32 %v730_v60, %v727_v50  ;;  %v741_v13 = vor.u32 %v740_v0, %v736_v63  ;;  %v1143_v37 = vshll.u32 %v7230_v54, 16  ;;  %v1147_v8 = vshrl.u32 %v7230_v54, 16  ;;  %v407_v60 = vld [vmem:[%s8087_s18 + $0xb0] sm:$0x1] }
  0x85   : > { %v723_v10 = vsel %vm8137_vm2, %v718_v2, %v722_v39  ;;  %v1139_v12 = vrot.slane %v1137_v5, 5  ;;  %v7297_v14 = vcombine.low %v8447_v35, %v7230_v54  ;;  %v1158_v15 = vshrl.u32 %v7231_v1, 16 }
  0x86   : > { %v7281_v42 = vcombine.low %v713_v58, %v723_v10  ;;  %v732_v47 = vrot.slane %v731_v6, 4  ;;  %v742_v53 = vrot.slane %v741_v13, 4  ;;  %v1145_v16 = vrot.slane %v1143_v37, 5 }
  0x87   : > { %v1149_v18 = vrot.slane %v1147_v8, 4  ;;  %v1160_v20 = vrot.slane %v1158_v15, 4  ;;  %v1161_v22 = vshll.u32 %v7231_v1, 16  ;;  %v1167_v23 = vshll.u32 %v7232_v9, 16 }
  0x88   : > { %1381 = vrot.lane.b32.xlu0 %v7281_v42, %s8012_s27  ;;  %v737_v32 = vsel %vm8137_vm2, %v732_v47, %v736_v63  ;;  %v747_v25 = vsel %vm8137_vm2, %v742_v53, %v746_v3  ;;  %v1171_v28 = vshrl.u32 %v7232_v9, 16  ;;  %v7298_v21 = vcombine.low %v7231_v1, %v7232_v9  ;;  %v8486_v3 = vld [vmem:[%s8087_s18 + $0xb4] sm:$0xf]  ;;  %v8501_v42 = vpop.permute.xlu1 %1469 }
  0x89   : > { %v7282_v31 = vcombine.low %v737_v32, %v747_v25  ;;  %v1163_v52 = vrot.slane %v1161_v22, 5  ;;  %v1169_v35 = vrot.slane %v1167_v23, 5  ;;  %v1140_v36 = vor.u32 %v1139_v12, %v1136_v4  ;;  %v8496_v12 = vld [vmem:[%s8087_s18 + $0xb8] sm:$0xf] }
  0x8a   : > { %v1173_v38 = vrot.slane %v1171_v28, 4  ;;  %v1150_v39 = vor.u32 %v1149_v18, %v1145_v16  ;;  %v1153_v40 = vshll.u32 %v7249_v17, 16  ;;  %v1177_v41 = vshll.u32 %v7250_v24, 16  ;;  %v7233_v17 = vld [vmem:[%s8087_s18 + $0xb4] sm:$0xf] }
  0x8b   : > { %1383 = vrot.lane.b32.xlu1 %v7282_v31, %s8012_s27  ;;  %v1141_v44 = vrot.slane %v1140_v36, 4  ;;  %v1164_v45 = vor.u32 %v1163_v52, %v1160_v20  ;;  %v749_v48 = vshrl.u32 %v8473_v30, 16  ;;  %v752_v50 = vshll.u32 %v8473_v30, 16 }
  0x8c   : > { %1493 = vrot.lane.b32.xlu0 %v7297_v14, %s8010_s19  ;;  %v1151_v51 = vrot.slane %v1150_v39, 4  ;;  %v1155_v54 = vrot.slane %v1153_v40, 5  ;;  %v1174_v57 = vor.u32 %v1173_v38, %v1169_v35  ;;  %v1179_v58 = vrot.slane %v1177_v41, 5  ;;  %v408_v14 = vld [vmem:[%s8087_s18 + $0xbc] sm:$0x1] }
  0x8d   : > { %v1146_v63 = vsel %vm8137_vm2, %v1141_v44, %v1145_v16  ;;  %v1165_v0 = vrot.slane %v1164_v45, 4  ;;  %v751_v1 = vrot.slane %v749_v48, 4  ;;  %v754_v2 = vrot.slane %v752_v50, 5 }
  0x8e   : > { %v1156_v4 = vsel %vm8137_vm2, %v1151_v51, %v1155_v54  ;;  %v1175_v5 = vrot.slane %v1174_v57, 4  ;;  %v758_v6 = vshll.u32 %v8477_v46, 16  ;;  %v762_v13 = vshrl.u32 %v8477_v46, 16  ;;  %v7235_v51 = vld [vmem:[%s8087_s18 + $0xc0] sm:$0xf] }
  0x8f   : > { %1495 = vrot.lane.b32.xlu1 %v7298_v21, %s8010_s19  ;;  %v7313_v37 = vcombine.low %v1146_v63, %v1156_v4  ;;  %v1170_v8 = vsel %vm8137_vm2, %v1165_v0, %v1169_v35  ;;  %v755_v9 = vor.u32 %v754_v2, %v751_v1  ;;  %v768_v10 = vshll.u32 %v407_v60, 16  ;;  %v7234_v21 = vld [vmem:[%s8087_s18 + $0xb8] sm:$0xf]  ;;  %v8518_v0 = vpop.permute.xlu0 %1473  ;;  %v7236_v1 = vld [vmem:[%s8087_s18 + $0xc4] sm:$0xf] }
  0x90   : > { %v1180_v15 = vsel %vm8137_vm2, %v1175_v5, %v1179_v58  ;;  %v760_v47 = vrot.slane %v758_v6, 5  ;;  %v764_v53 = vrot.slane %v762_v13, 4  ;;  %v773_v16 = vshrl.u32 %v8486_v3, 16  ;;  %v8516_v58 = vpop.permute.xlu1 %1471 }
  0x91   : > { %1573 = vrot.lane.b32.xlu0 %v7313_v37, %s8011_s24  ;;  %v7314_v18 = vcombine.low %v1170_v8, %v1180_v15  ;;  %v756_v20 = vrot.slane %v755_v9, 4  ;;  %v770_v22 = vrot.slane %v768_v10, 5  ;;  %v776_v23 = vshll.u32 %v8486_v3, 16 }
  0x92   : > { %v765_v24 = vor.u32 %v764_v53, %v760_v47  ;;  %v775_v32 = vrot.slane %v773_v16, 4  ;;  %v782_v25 = vshll.u32 %v8496_v12, 16  ;;  %v786_v28 = vshrl.u32 %v8496_v12, 16  ;;  %v7252_v53 = vld [vmem:[%s8087_s18 + $0xc8] sm:$0x1] }
  0x93   : > { %1575 = vrot.lane.b32.xlu1 %v7314_v18, %s8011_s24  ;;  %v761_v31 = vsel %vm8137_vm2, %v756_v20, %v760_v47  ;;  %v778_v52 = vrot.slane %v776_v23, 5  ;;  %v792_v35 = vshll.u32 %v408_v14, 16  ;;  %v1182_v36 = vshrl.u32 %v7233_v17, 16  ;;  %v7251_v47 = vld [vmem:[%s8087_s18 + $0xbc] sm:$0x1] }
  0x94   : > { %v766_v38 = vrot.slane %v765_v24, 4  ;;  %v784_v39 = vrot.slane %v782_v25, 5  ;;  %v788_v40 = vrot.slane %v786_v28, 4  ;;  %v1185_v41 = vshll.u32 %v7233_v17, 16  ;;  %v8528_v28 = vpop.permute.xlu1 %1475 }
  0x95   : > { %v779_v44 = vor.u32 %v778_v52, %v775_v32  ;;  %v794_v45 = vrot.slane %v792_v35, 5  ;;  %v1184_v48 = vrot.slane %v1182_v36, 4  ;;  %v1191_v50 = vshll.u32 %v7234_v21, 16 }
  0x96   : > { %v771_v54 = vsel %vm8137_vm2, %v766_v38, %v770_v22  ;;  %v789_v57 = vor.u32 %v788_v40, %v784_v39  ;;  %v1187_v60 = vrot.slane %v1185_v41, 5  ;;  %v1195_v63 = vshrl.u32 %v7234_v21, 16 }
  0x97   : > { %v7283_v2 = vcombine.low %v761_v31, %v771_v54  ;;  %v780_v4 = vrot.slane %v779_v44, 4  ;;  %v1193_v5 = vrot.slane %v1191_v50, 5  ;;  %v1206_v37 = vshrl.u32 %v7235_v51, 16  ;;  %v7960_v50 = vld [vmem:[%s8087_s18] sm:$0xf] }
  0x98   : > { %v790_v6 = vrot.slane %v789_v57, 4  ;;  %v1197_v13 = vrot.slane %v1195_v63, 4  ;;  %v1209_v8 = vshll.u32 %v7235_v51, 16  ;;  %v7299_v10 = vcombine.low %v7233_v17, %v7234_v21  ;;  %v7961_v54 = vld [vmem:[%s8087_s18 + $0x4] sm:$0xf] }
  0x99   : > { %1385 = vrot.lane.b32.xlu0 %v7283_v2, %s8012_s27  ;;  %v785_v9 = vsel %vm8137_vm2, %v780_v4, %v784_v39  ;;  %v1215_v14 = vshll.u32 %v7236_v1, 16  ;;  %v1219_v15 = vshrl.u32 %v7236_v1, 16  ;;  %v1208_v18 = vrot.slane %v1206_v37, 4  ;;  %v7963_v63 = vld [vmem:[%s8087_s18 + $0x10] sm:$0xf] }
  0x9a   : > { %v795_v16 = vsel %vm8137_vm2, %v790_v6, %v794_v45  ;;  %v1211_v20 = vrot.slane %v1209_v8, 5  ;;  %v1188_v22 = vor.u32 %v1187_v60, %v1184_v48  ;;  %v1198_v25 = vor.u32 %v1197_v13, %v1193_v5  ;;  %v7962_v60 = vld [vmem:[%s8087_s18 + $0xc] sm:$0xf]  ;;  %v1552_v13 = vpop.permute.xlu1 %1551 }
  0x9b   : > { %v7284_v23 = vcombine.low %v785_v9, %v795_v16  ;;  %v1217_v24 = vrot.slane %v1215_v14, 5  ;;  %v1221_v32 = vrot.slane %v1219_v15, 4  ;;  %v1201_v17 = vshll.u32 %v7251_v47, 16 }
  0x9c   : > { %v1189_v31 = vrot.slane %v1188_v22, 4  ;;  %v1212_v21 = vor.u32 %v1211_v20, %v1208_v18  ;;  %v1225_v52 = vshll.u32 %v7252_v53, 16  ;;  %v1358_v35 = vpop.permute.xlu0 %1357  ;;  %v7300_v36 = vcombine.low %v7235_v51, %v7236_v1 }
  0x9d   : > { %1387 = vrot.lane.b32.xlu1 %v7284_v23, %s8012_s27  ;;  %1497 = vrot.lane.b32.xlu0 %v7299_v10, %s8010_s19  ;;  %v1199_v38 = vrot.slane %v1198_v25, 4  ;;  %v1222_v39 = vor.u32 %v1221_v32, %v1217_v24  ;;  %v1203_v41 = vrot.slane %v1201_v17, 5  ;;  %v7253_v57 = vcombine.low %v7960_v50, %v7961_v54  ;;  %v7964_v32 = vld [vmem:[%s8087_s18 + $0x18] sm:$0xf]  ;;  %v7965_v25 = vld [vmem:[%s8087_s18 + $0x1c] sm:$0xf] }
  0x9e   : > { %v1194_v40 = vsel %vm8137_vm2, %v1189_v31, %v1193_v5  ;;  %v1213_v44 = vrot.slane %v1212_v21, 4  ;;  %v1227_v45 = vrot.slane %v1225_v52, 5  ;;  %v7254_v2 = vcombine.low %v7962_v60, %v7963_v63  ;;  %v7966_v17 = vld [vmem:[%s8087_s18 + $0x24] sm:$0xf]  ;;  %v7967_v21 = vld [vmem:[%s8087_s18 + $0x28] sm:$0xf] }
  0x9f   : > { %v1223_v48 = vrot.slane %v1222_v39, 4  ;;  %v1204_v4 = vsel %vm8137_vm2, %v1199_v38, %v1203_v41  ;;  %v1584_v8 = vsel %vm1581_vm3, %v7253_v57, %v1358_v35  ;;  %v7264_v10 = vcombine.low %v8365_v29, %v8374_v34  ;;  %v7968_v54 = vld [vmem:[%s8087_s18 + $0x3c] sm:$0xf]  ;;  %v7969_v57 = vld [vmem:[%s8087_s18 + $0x40] sm:$0xf] }
  0xa0   : > { %v1218_v51 = vsel %vm8137_vm2, %v1213_v44, %v1217_v24  ;;  %v7315_v1 = vcombine.low %v1194_v40, %v1204_v4  ;;  %v7263_v14 = vcombine.low %v8383_v55, %v8388_v62  ;;  %v7265_v47 = vcombine.low %v8418_v59, %v8422_v7 }
  0xa1   : > { %1499 = vrot.lane.b32.xlu1 %v7300_v36, %s8010_s19  ;;  %v1228_v5 = vsel %vm8137_vm2, %v1223_v48, %v1227_v45  ;;  %v7266_v53 = vcombine.low %v8432_v56, %v8441_v26  ;;  %v7267_v16 = vcombine.low %v8473_v30, %v8477_v46  ;;  %v1632_v20 = vsel %vm1630_vm4, %v1584_v8, %v8501_v42 }
  0xa2   : > { %v7316_v6 = vcombine.low %v1218_v51, %v1228_v5  ;;  %v1360_v37 = vpop.permute.xlu0 %1359  ;;  %1577 = vrot.lane.b32.xlu0 %v7315_v1, %s8011_s24  ;;  %v7268_v22 = vcombine.low %v8486_v3, %v8496_v12  ;;  %v7255_v31 = vcombine.low %v7964_v32, %v7965_v25  ;;  %v7256_v42 = vcombine.low %v7966_v17, %v7967_v21  ;;  %v2037_v3 = vld [vmem:[#allocation2 + $0x14] sm:$0x1] }
  0xa3   : > { %v1587_v9 = vsel %vm1581_vm3, %v7254_v2, %v1360_v37  ;;  %v7258_v60 = vcombine.low %v7968_v54, %v7969_v57  ;;  %v7970_v2 = vld [vmem:[%s8087_s18 + $0x30] sm:$0xf]  ;;  %v7259_v32 = vcombine.low %v8262_v19, %v8267_v27  ;;  %v7262_v19 = vcombine.low %v8298_v33, %v8301_v61 }
  0xa4   : > { %v1634_v15 = vsel %vm1630_vm4, %v1587_v9, %v8516_v58  ;;  %v11443_v46 = vmov 0  ;;  %v2038_v12 = vsel %vm8662_vm9, 0, %v2037_v3 }
  0xa5   : > { %1579 = vrot.lane.b32.xlu1 %v7316_v6, %s8011_s24  ;;  %v1667_v24 = vsel %vm1663_vm5, %v1634_v15, %v1552_v13  ;;  %v11444_v46 = vsel %vm8662_vm9, 4294967295, %v11443_v46  ;;  %2039 = vst [vmem:[#allocation2 + $0x14] sm:$0x1] %v2038_v12 }
  0xa6   : > { %v1550_v18 = vpop.permute.xlu0 %1549  ;;  %v1364_v58 = vpop.permute.xlu1 %1363  ;;  %11445 = vst [vmem:[#allocation4_spill] sm:$0xff] %v11444_v46 }
  0xa7   : > { %v1665_v23 = vsel %vm1663_vm5, %v1632_v20, %v1550_v18  ;;  %v1593_v38 = vsel %vm1581_vm3, %v7256_v42, %v1364_v58  ;;  %v7972_v20 = vld [vmem:[%s8087_s18 + $0x54] sm:$0xf] }
  0xa8   : > { %7750 = vmatprep.mubr.msk.bf16.mxu0 %vm1720_vm6, %v1665_v23  ;;  %v1638_v41 = vsel %vm1630_vm4, %v1593_v38, %v8528_v28  ;;  %v7973_v23 = vld [vmem:[%s8087_s18 + $0x58] sm:$0xf] }
  0xa9   : > { %7751 = vmatmul.mubr.msk.bf16.vlgmr.msra.gmra.mrb[0].mxu0 %vm1720_vm6, %v1667_v24  ;;  %v7260_v58 = vcombine.low %v7972_v20, %v7973_v23 }
  0xaa   : > { %v1556_v52 = vpop.permute.xlu1 %1555 }
  0xab   : > { %v1671_v48 = vsel %vm1663_vm5, %v1638_v41, %v1556_v52  ;;  %v7261_v41 = vcombine.low %v8332_v43, %v8335_v49 }
  0xaf   : > { %v1362_v35 = vpop.permute.xlu0 %1361 }
  0xb0   : > { %v1590_v36 = vsel %vm1581_vm3, %v7255_v31, %v1362_v35 }
  0xb1   : > { %v1636_v39 = vsel %vm1630_vm4, %v1590_v36, %v8518_v0  ;;  %v1368_v44 = vpop.permute.xlu1 %1367  ;;  %v7971_v0 = vld [vmem:[%s8087_s18 + $0x34] sm:$0xf] }
  0xb2   : > { %v7257_v4 = vcombine.low %v7970_v2, %v7971_v0  ;;  %v1599_v28 = vsel %vm1581_vm3, %v7258_v60, %v1368_v44 }
  0xb3   : > { %v1554_v40 = vpop.permute.xlu0 %1553 }
  0xb4   : > { %v1669_v45 = vsel %vm1663_vm5, %v1636_v39, %v1554_v40 }
  0xb5   : > { %7754 = vmatprep.mubr.msk.bf16.mxu0 %vm1720_vm6, %v1669_v45  ;;  %v1480_v50 = vpop.permute.xlu1 %1479 }
  0xb6   : > { %7755 = vmatmul.mubr.msk.bf16.gmra.mrb[4].mxu0 %vm1720_vm6, %v1671_v48  ;;  %v1642_v5 = vsel %vm1630_vm4, %v1599_v28, %v1480_v50 }
  0xb9   : > { %v1560_v1 = vpop.permute.xlu1 %1559 }
  0xba   : > { %v1675_v9 = vsel %vm1663_vm5, %v1642_v5, %v1560_v1 }
  0xbb   : > { %v1366_v63 = vpop.permute.xlu0 %1365 }
  0xbc   : > { %v1596_v6 = vsel %vm1581_vm3, %v7257_v4, %v1366_v63 }
  0xbf   : > { %v1478_v51 = vpop.permute.xlu0 %1477 }
  0xc0   : > { %v1640_v13 = vsel %vm1630_vm4, %v1596_v6, %v1478_v51 }
  0xc3   : > { %v1558_v37 = vpop.permute.xlu0 %1557  ;;  %v1372_v15 = vpop.permute.xlu1 %1371 }
  0xc4   : > { %v1673_v8 = vsel %vm1663_vm5, %v1640_v13, %v1558_v37  ;;  %v1605_v25 = vsel %vm1581_vm3, %v7260_v58, %v1372_v15 }
  0xc5   : > { %7758 = vmatprep.mubr.msk.bf16.mxu0 %vm1720_vm6, %v1673_v8 }
  0xc6   : > { %7759 = vmatmul.mubr.msk.bf16.gmra.mrb[8].mxu0 %vm1720_vm6, %v1675_v9 }
  0xc7   : > { %v1484_v18 = vpop.permute.xlu1 %1483 }
  0xc8   : > { %v1646_v21 = vsel %vm1630_vm4, %v1605_v25, %v1484_v18 }
  0xcb   : > { %v1564_v17 = vpop.permute.xlu1 %1563 }
  0xcc   : > { %v1679_v38 = vsel %vm1663_vm5, %v1646_v21, %v1564_v17  ;;  %v2040_v21 = vld [vmem:[#allocation2 + $0x20] sm:$0x1] }
  0xcd   : > { %v1370_v24 = vpop.permute.xlu0 %1369 }
  0xce   : > { %v1602_v42 = vsel %vm1581_vm3, %v7259_v32, %v1370_v24 }
  0xd1   : > { %v1482_v31 = vpop.permute.xlu0 %1481 }
  0xd2   : > { %v1644_v52 = vsel %vm1630_vm4, %v1602_v42, %v1482_v31  ;;  %v2043_v31 = vld [vmem:[#allocation2 + $0x2c] sm:$0x1]  ;;  %v2041_v42 = vsel %vm8662_vm9, 0, %v2040_v21 }
  0xd3   : > { %v2044_v17 = vsel %vm8662_vm9, 0, %v2043_v31  ;;  %2042 = vst [vmem:[#allocation2 + $0x20] sm:$0x1] %v2041_v42 }
  0xd4   : > { %2045 = vst [vmem:[#allocation2 + $0x2c] sm:$0x1] %v2044_v17 }
  0xd5   : > { %v1562_v35 = vpop.permute.xlu0 %1561  ;;  %v1376_v39 = vpop.permute.xlu1 %1375 }
  0xd6   : > { %v1677_v36 = vsel %vm1663_vm5, %v1644_v52, %v1562_v35  ;;  %v1611_v44 = vsel %vm1581_vm3, %v7262_v19, %v1376_v39  ;;  %v2049_v52 = vld [vmem:[#allocation2 + $0x44] sm:$0x1]  ;;  %v2061_v39 = vld [vmem:[#allocation2 + $0x74] sm:$0x1] }
  0xd7   : > { %7762 = vmatprep.mubr.msk.bf16.mxu0 %vm1720_vm6, %v1677_v36  ;;  %v2050_v35 = vsel %vm8662_vm9, 0, %v2049_v52  ;;  %v2046_v36 = vld [vmem:[#allocation2 + $0x38] sm:$0x1]  ;;  %v2062_v19 = vsel %vm8662_vm9, 0, %v2061_v39 }
  0xd8   : > { %7763 = vmatmul.mubr.msk.bf16.gmra.mrb[12].mxu0 %vm1720_vm6, %v1679_v38  ;;  %2051 = vst [vmem:[#allocation2 + $0x44] sm:$0x1] %v2050_v35  ;;  %v2047_v38 = vsel %vm8662_vm9, 0, %v2046_v36  ;;  %2063 = vst [vmem:[#allocation2 + $0x74] sm:$0x1] %v2062_v19 }
  0xd9   : > { %v1488_v27 = vpop.permute.xlu1 %1487  ;;  %2048 = vst [vmem:[#allocation2 + $0x38] sm:$0x1] %v2047_v38 }
  0xda   : > { %v1650_v50 = vsel %vm1630_vm4, %v1611_v44, %v1488_v27  ;;  %v2058_v27 = vld [vmem:[#allocation2 + $0x68] sm:$0x1] }
  0xdd   : > { %v1568_v48 = vpop.permute.xlu1 %1567 }
  0xde   : > { %v1374_v40 = vpop.permute.xlu0 %1373  ;;  %v1683_v33 = vsel %vm1663_vm5, %v1650_v50, %v1568_v48  ;;  %v2278_v50 = vld [vmem:[#allocation2 + $0x14] sm:$0x1] }
  0xdf   : > { %v1608_v54 = vsel %vm1581_vm3, %v7261_v41, %v1374_v40  ;;  %v2059_v40 = vsel %vm8662_vm9, 0, %v2058_v27  ;;  %v2055_v41 = vld [vmem:[#allocation2 + $0x5c] sm:$0x1] }
  0xe0   : > { %2060 = vst [vmem:[#allocation2 + $0x68] sm:$0x1] %v2059_v40  ;;  %v2056_v44 = vsel %vm8662_vm9, 0, %v2055_v41  ;;  %v2713_v42 = vld [vmem:[#allocation2 + $0x38] sm:$0x1] }
  0xe1   : > { %2057 = vst [vmem:[#allocation2 + $0x5c] sm:$0x1] %v2056_v44 }
  0xe2   : > { %v1486_v45 = vpop.permute.xlu0 %1485 }
  0xe3   : > { %v1648_v57 = vsel %vm1630_vm4, %v1608_v54, %v1486_v45  ;;  %v2052_v45 = vld [vmem:[#allocation2 + $0x50] sm:$0x1]  ;;  %v2710_v54 = vld [vmem:[#allocation2 + $0x14] sm:$0x1] }
  0xe4   : > { %v2053_v48 = vsel %vm8662_vm9, 0, %v2052_v45 }
  0xe5   : > { %2054 = vst [vmem:[#allocation2 + $0x50] sm:$0x1] %v2053_v48 }
  0xe6   : > { %v1566_v60 = vpop.permute.xlu0 %1565 }
  0xe7   : > { %v1681_v63 = vsel %vm1663_vm5, %v1648_v57, %v1566_v60  ;;  %v2337_v60 = vshll.u32 %v2278_v50, 16  ;;  %v2717_v21 = vld [vmem:[#allocation2 + $0x68] sm:$0x1] }
  0xe8   : > { %7766 = vmatprep.mubr.msk.bf16.mxu1 %vm1720_vm6, %v1681_v63  ;;  %v1380_v61 = vpop.permute.xlu1 %1379  ;;  %v2746_v63 = vshll.u32 %v2710_v54, 16  ;;  %v2716_v38 = vld [vmem:[#allocation2 + $0x5c] sm:$0x1]  ;;  %v2818_v54 = vshll.u32 %v2713_v42, 16 }
  0xe9   : > { %7767 = vmatmul.mubr.msk.bf16.vlgmr.msra.gmra.mrb[0].mxu1 %vm1720_vm6, %v1683_v33  ;;  %v1617_v2 = vsel %vm1581_vm3, %v7264_v10, %v1380_v61  ;;  %v2280_v33 = vld [vmem:[#allocation2 + $0x2c] sm:$0x1]  ;;  %v2284_v39 = vld [vmem:[#allocation2 + $0x5c] sm:$0x1] }
  0xea   : > { %v2712_v61 = vld [vmem:[#allocation2 + $0x2c] sm:$0x1] }
  0xeb   : > { %v1378_v43 = vpop.permute.xlu0 %1377 }
  0xec   : > { %v1492_v49 = vpop.permute.xlu1 %1491  ;;  %v1614_v4 = vsel %vm1581_vm3, %v7263_v14, %v1378_v43  ;;  %v2283_v44 = vld [vmem:[#allocation2 + $0x50] sm:$0x1] }
  0xed   : > { %v1654_v28 = vsel %vm1630_vm4, %v1617_v2, %v1492_v49  ;;  %v2279_v49 = vld [vmem:[#allocation2 + $0x20] sm:$0x1] }
  0xee   : > { %v2711_v2 = vld [vmem:[#allocation2 + $0x20] sm:$0x1] }
  0xef   : > { %v1490_v0 = vpop.permute.xlu0 %1489 }
  0xf0   : > { %v1652_v1 = vsel %vm1630_vm4, %v1614_v4, %v1490_v0  ;;  %v8689_v0 = vld [vmem:[%s11420_s2] ss:$0 sm:$0xff]  ;;  %v2385_v4 = vshll.u32 %v2280_v33, 16  ;;  %v2890_v33 = vshll.u32 %v2716_v38, 16 }
  0xf2   : > { %v1572_v51 = vpop.permute.xlu1 %1571 }
  0xf3   : > { %v1570_v5 = vpop.permute.xlu0 %1569  ;;  %v1687_v13 = vsel %vm1663_vm5, %v1654_v28, %v1572_v51  ;;  %v2794_v28 = vshll.u32 %v2712_v61, 16  ;;  %v8694_v51 = vld [vmem:[%s11421_s3] ss:$0 sm:$0xff]  ;;  %v2481_v61 = vshll.u32 %v2284_v39, 16 }
  0xf4   : > { %v1685_v6 = vsel %vm1663_vm5, %v1652_v1, %v1570_v5  ;;  %v8696_v1 = vrot.slane %v2337_v60, 5  ;;  %v8698_v5 = vrot.slane %v2746_v63, 5  ;;  %v2914_v63 = vshll.u32 %v2717_v21, 16 }
  0xf5   : > { %7770 = vmatprep.mubr.msk.bf16.mxu1 %vm1720_vm6, %v1685_v6  ;;  %v2361_v6 = vshll.u32 %v2279_v49, 16 }
  0xf6   : > { %7771 = vmatmul.mubr.msk.bf16.gmra.mrb[4].mxu1 %vm1720_vm6, %v1687_v13  ;;  %v2770_v13 = vshll.u32 %v2711_v2, 16 }
  0xfa   : > { %v1382_v29 = vpop.permute.xlu0 %1381 }
  0xfb   : > { %v1620_v55 = vsel %vm1581_vm3, %v7265_v47, %v1382_v29 }
  0xfd   : > { %v1384_v34 = vpop.permute.xlu1 %1383 }
  0xfe   : > { %v1494_v62 = vpop.permute.xlu0 %1493  ;;  %v1623_v10 = vsel %vm1581_vm3, %v7266_v53, %v1384_v34 }
  0xff   : > { %v1656_v14 = vsel %vm1630_vm4, %v1620_v55, %v1494_v62  ;;  %v2282_v55 = vld [vmem:[#allocation2 + $0x44] sm:$0x1]  ;;  %v2067_v62 = vld [vmem:[#allocation2 + $0x8c] sm:$0x1] }
 0x100   : > { %v2433_v3 = vshll.u32 %v2282_v55, 16 }
 0x101   : > { %v1496_v37 = vpop.permute.xlu1 %1495 }
 0x102   : > { %v1658_v8 = vsel %vm1630_vm4, %v1623_v10, %v1496_v37  ;;  %v2714_v37 = vld [vmem:[#allocation2 + $0x44] sm:$0x1]  ;;  %v8722_v50 = vrot.slane %v2433_v3, 5 }
 0x103   : > { %v1574_v9 = vpop.permute.xlu0 %1573  ;;  %v2842_v12 = vshll.u32 %v2714_v37, 16 }
 0x104   : > { %v1689_v15 = vsel %vm1663_vm5, %v1656_v14, %v1574_v9  ;;  %v2068_v9 = vsel %vm8662_vm9, 0, %v2067_v62 }
 0x105   : > { %v1576_v18 = vpop.permute.xlu1 %1575  ;;  %7774 = vmatprep.mubr.msk.bf16.mxu1 %vm1720_vm6, %v1689_v15  ;;  %2069 = vst [vmem:[#allocation2 + $0x8c] sm:$0x1] %v2068_v9 }
 0x106   : > { %v1691_v59 = vsel %vm1663_vm5, %v1658_v8, %v1576_v18  ;;  %v2064_v8 = vld [vmem:[#allocation2 + $0x80] sm:$0x1] }
 0x107   : > { %7775 = vmatmul.mubr.msk.bf16.gmra.mrb[8].mxu1 %vm1720_vm6, %v1691_v59  ;;  %v2718_v59 = vld [vmem:[#allocation2 + $0x74] sm:$0x1] }
 0x108   : > { %v2938_v17 = vshll.u32 %v2718_v59, 16  ;;  %v8748_v59 = vrot.slane %v2481_v61, 5 }
 0x10a   : > { %v8726_v2 = vrot.slane %v2938_v17, 5 }
 0x10b   : > { %v1386_v7 = vpop.permute.xlu0 %1385 }
 0x10c   : > { %v1626_v26 = vsel %vm1581_vm3, %v7267_v16, %v1386_v7  ;;  %v2034_v16 = vld [vmem:[#allocation2 + $0x8] sm:$0x1]  ;;  %v8706_v7 = vrot.slane %v2385_v4, 5  ;;  %v8728_v4 = vrot.slane %v2842_v12, 5  ;;  %v2720_v62 = vld [vmem:[#allocation2 + $0x8c] sm:$0x1] }
 0x10f   : > { %v1388_v47 = vpop.permute.xlu1 %1387  ;;  %v1498_v56 = vpop.permute.xlu0 %1497 }
 0x110   : > { %v1629_v53 = vsel %vm1581_vm3, %v7268_v22, %v1388_v47  ;;  %v1660_v20 = vsel %vm1630_vm4, %v1626_v26, %v1498_v56  ;;  %v2035_v22 = vsel %vm8662_vm9, 0, %v2034_v16  ;;  %v8708_v47 = vrot.slane %v2794_v28, 5  ;;  %v2281_v16 = vld [vmem:[#allocation2 + $0x38] sm:$0x1] }
 0x111   : > { %2036 = vst [vmem:[#allocation2 + $0x8] sm:$0x1] %v2035_v22  ;;  %v2065_v56 = vsel %vm8662_vm9, 0, %v2064_v8  ;;  %v2409_v41 = vshll.u32 %v2281_v16, 16  ;;  %v2457_v28 = vshll.u32 %v2283_v44, 16  ;;  %vm7109_vm3 = vcmask 257024  }
 0x112   : > { %2066 = vst [vmem:[#allocation2 + $0x80] sm:$0x1] %v2065_v56  ;;  %v2070_v56 = vld [vmem:[#allocation2 + $0x98] sm:$0x1] }
 0x113   : > { %v1500_v23 = vpop.permute.xlu1 %1499 }
 0x114   : > { %v1662_v58 = vsel %vm1630_vm4, %v1629_v53, %v1500_v23  ;;  %v1578_v24 = vpop.permute.xlu0 %1577  ;;  %v2286_v23 = vld [vmem:[#allocation2 + $0x74] sm:$0x1] }
 0x115   : > { %v1693_v32 = vsel %vm1663_vm5, %v1660_v20, %v1578_v24  ;;  %v8716_v24 = vrot.slane %v2770_v13, 5  ;;  %v2529_v36 = vshll.u32 %v2286_v23, 16  ;;  %v2986_v23 = vshll.u32 %v2720_v62, 16 }
 0x116   : > { %7778 = vmatprep.mubr.msk.bf16.mxu1 %vm1720_vm6, %v1693_v32 }
 0x117   : > { %v1580_v25 = vpop.permute.xlu1 %1579  ;;  %v8770_v44 = vrot.slane %v2986_v23, 5 }
 0x118   : > { %v1695_v30 = vsel %vm1663_vm5, %v1662_v58, %v1580_v25  ;;  %v2277_v57 = vld [vmem:[#allocation2 + $0x8] sm:$0x1]  ;;  %v8714_v58 = vrot.slane %v2361_v6, 5  ;;  %v8731_v6 = vrot.slane %v2529_v36, 5 }
 0x119   : > { %7779 = vmatmul.mubr.msk.bf16.gmra.mrb[12].mxu1 %vm1720_vm6, %v1695_v30  ;;  %v2313_v43 = vshll.u32 %v2277_v57, 16  ;;  %v2285_v30 = vld [vmem:[#allocation2 + $0x68] sm:$0x1]  ;;  %v2715_v57 = vld [vmem:[#allocation2 + $0x50] sm:$0x1]  ;;  %11450 = vst [vmem:[#allocation9_spill] sm:$0xff] %v8770_v44 }
 0x11a   : > { %v2505_v40 = vshll.u32 %v2285_v30, 16  ;;  %v2866_v55 = vshll.u32 %v2715_v57, 16  ;;  %v8742_v37 = vld [vmem:[#allocation2 + $0x80] sm:$0x1] }
 0x11b   : > { %v8700_v34 = vrot.slane %v2313_v43, 5  ;;  %v2288_v43 = vld [vmem:[#allocation2 + $0x8c] sm:$0x1]  ;;  %v2962_v16 = vshll.u32 %v8742_v37, 16 }
 0x11c   : > { %v8733_v13 = vrot.slane %v2505_v40, 5  ;;  %v2577_v8 = vshll.u32 %v2288_v43, 16  ;;  %v8756_v3 = vrot.slane %v2866_v55, 5 }
 0x11e   : > { %11447 = vst [vmem:[#allocation6_spill] sm:$0xff] %v8756_v3 }
 0x17c   : > { %v7752_v29 = vpop.f32.mrb[0].mxu0 }
 0x17d   : > { %v1923_v10 = vmul.f32 %v7752_v29, %v8689_v0  ;;  %v1787_v14 = vpop.f32.mrb[1].mxu0  ;;  %v8735_v29 = vrot.slane %v2409_v41, 5 }
 0x17e   : > { %v1921_v15 = vmul.f32 %v8689_v0, %v1787_v14  ;;  %v7753_v18 = vpop.f32.mrb[2].mxu0  ;;  %v8740_v14 = vld [vmem:[#allocation2 + $0x80] sm:$0x1] }
 0x17f   : > { %v1962_v26 = vadd.f32 %v8694_v51, %v1923_v10  ;;  %v1924_v53 = vmul.f32 %v7753_v18, %v8689_v0  ;;  %v1790_v20 = vpop.f32.mrb[3].mxu0  ;;  %v8738_v10 = vrot.slane %v2818_v54, 5  ;;  %v8746_v18 = vrot.slane %v2890_v33, 5 }
 0x180   : > { %v1960_v32 = vadd.f32 %v8694_v51, %v1921_v15  ;;  %v1922_v25 = vmul.f32 %v8689_v0, %v1790_v20  ;;  %v8744_v15 = vrot.slane %v2914_v63, 5  ;;  %v8751_v20 = vrot.slane %v2457_v28, 5 }
 0x181   : > { %v1994_v22 = vmax.f32 %v1962_v26, 0.0  ;;  %v1963_v31 = vadd.f32 %v8694_v51, %v1924_v53  ;;  %v2553_v12 = vshll.u32 %v8740_v14, 16 }
 0x182   : > { %v1992_v52 = vmax.f32 %v1960_v32, 0.0  ;;  %v1961_v35 = vadd.f32 %v8694_v51, %v1922_v25  ;;  %11446 = vst [vmem:[#allocation5_spill] sm:$0xff] %v8751_v20  ;;  %v2071_v32 = vsel %vm8662_vm9, 0, %v2070_v56 }
 0x183   : > { %v7625_v19 = vpack.c.bf16 %v1994_v22, %v1994_v22  ;;  %v1995_v27 = vmax.f32 %v1963_v31, 0.0  ;;  %2072 = vst [vmem:[#allocation2 + $0x98] sm:$0x1] %v2071_v32 }
 0x184   : > { %v7623_v45 = vpack.c.bf16 %v1992_v52, %v1992_v52  ;;  %v1993_v48 = vmax.f32 %v1961_v35, 0.0  ;;  %v8764_v52 = vrot.slane %v2577_v8, 5 }
 0x185   : > { %2215 = vst.msk [vmem:[#allocation2 + $0xc] sm:$0xf] %vm2025_vm10, %v7625_v19  ;;  %v7626_v60 = vpack.c.bf16 %v1995_v27, %v1995_v27 }
 0x186   : > { %2213 = vst.msk [vmem:[#allocation2] sm:$0xf] %vm2025_vm10, %v7623_v45  ;;  %v7624_v49 = vpack.c.bf16 %v1993_v48, %v1993_v48  ;;  %11449 = vst [vmem:[#allocation8_spill] sm:$0xff] %v8764_v52 }
 0x187   : > { %2216 = vst.msk [vmem:[#allocation2 + $0x10] sm:$0xf] %vm2025_vm10, %v7626_v60 }
 0x188   : > { %2214 = vst.msk [vmem:[#allocation2 + $0x4] sm:$0xf] %vm2025_vm10, %v7624_v49 }
 0x189   : > { %v7756_v9 = vpop.f32.mrb[4].mxu0 }
 0x18a   : > { %v1927_v26 = vmul.f32 %v7756_v9, %v8689_v0  ;;  %v1803_v53 = vpop.f32.mrb[5].mxu0 }
 0x18b   : > { %v1925_v25 = vmul.f32 %v8689_v0, %v1803_v53  ;;  %v7757_v30 = vpop.f32.mrb[6].mxu0 }
 0x18c   : > { %v1966_v22 = vadd.f32 %v8694_v51, %v1927_v26  ;;  %v1928_v31 = vmul.f32 %v7757_v30, %v8689_v0  ;;  %v1806_v17 = vpop.f32.mrb[7].mxu0  ;;  %v2678_v21 = vld [vmem:[#allocation2 + $0xc] sm:$0xf] }
 0x18d   : > { %v8762_v42 = vld [vmem:[#allocation2 + $0xc] sm:$0xf]  ;;  %v1964_v35 = vadd.f32 %v8694_v51, %v1925_v25  ;;  %v1926_v36 = vmul.f32 %v8689_v0, %v1806_v17  ;;  %v2727_v38 = vshrl.u32 %v2678_v21, 16  ;;  %v2730_v39 = vshll.u32 %v2678_v21, 16  ;;  %v8775_v14 = vld [vmem:[#allocation2] sm:$0xf] }
 0x18e   : > { %11448 = vst [vmem:[#allocation7_spill] sm:$0xff] %v8762_v42  ;;  %v1998_v19 = vmax.f32 %v1966_v22, 0.0  ;;  %v1967_v27 = vadd.f32 %v8694_v51, %v1928_v31  ;;  %v2679_v40 = vld [vmem:[#allocation2 + $0x10] sm:$0xf]  ;;  %v2318_v41 = vshrl.u32 %v8762_v42, 16  ;;  %11452 = vst [vmem:[#allocation11_spill] sm:$0xff] %v8775_v14 }
 0x18f   : > { %v1996_v45 = vmax.f32 %v1964_v35, 0.0  ;;  %v1965_v48 = vadd.f32 %v8694_v51, %v1926_v36  ;;  %v2729_v54 = vrot.slane %v2727_v38, 4  ;;  %v2732_v57 = vrot.slane %v2730_v39, 5  ;;  %v8773_v60 = vld [vmem:[#allocation2 + $0x10] sm:$0xf] }
 0x190   : > { %11451 = vst [vmem:[#allocation10_spill] sm:$0xff] %v8773_v60  ;;  %v7629_v63 = vpack.c.bf16 %v1998_v19, %v1998_v19  ;;  %v1999_v33 = vmax.f32 %v1967_v27, 0.0  ;;  %v7402_v61 = vcombine.low %v2678_v21, %v2679_v40  ;;  %v2736_v43 = vshll.u32 %v2679_v40, 16  ;;  %v8781_v26 = vld [vmem:[#allocation2 + $0x4] sm:$0xf] }
 0x191   : > { %v7627_v49 = vpack.c.bf16 %v1996_v45, %v1996_v45  ;;  %v1997_v28 = vmax.f32 %v1965_v48, 0.0  ;;  %v2740_v55 = vshrl.u32 %v2679_v40, 16  ;;  %v2320_v62 = vrot.slane %v2318_v41, 4  ;;  %11453 = vst [vmem:[#allocation12_spill] sm:$0xff] %v8781_v26 }
 0x192   : > { %2219 = vst.msk [vmem:[#allocation2 + $0x24] sm:$0xf] %vm2025_vm10, %v7629_v63  ;;  %v7630_v37 = vpack.c.bf16 %v1999_v33, %v1999_v33  ;;  %3350 = vrot.lane.b32.xlu0 %v7402_v61, %s8013_s12  ;;  %v2738_v8 = vrot.slane %v2736_v43, 5  ;;  %v2321_v9 = vshll.u32 %v8762_v42, 16  ;;  %v2327_v56 = vshll.u32 %v8773_v60, 16 }
 0x193   : > { %2217 = vst.msk [vmem:[#allocation2 + $0x18] sm:$0xf] %vm2025_vm10, %v7627_v49  ;;  %v7628_v53 = vpack.c.bf16 %v1997_v28, %v1997_v28  ;;  %v2742_v23 = vrot.slane %v2740_v55, 4  ;;  %v2331_v32 = vshrl.u32 %v8773_v60, 16  ;;  %v2733_v25 = vor.u32 %v2732_v57, %v2729_v54  ;;  %v8799_v43 = vld [vmem:[#allocation2 + $0x98] sm:$0x1] }
 0x194   : > { %2220 = vst.msk [vmem:[#allocation2 + $0x28] sm:$0xf] %vm2025_vm10, %v7630_v37  ;;  %v2323_v30 = vrot.slane %v2321_v9, 5  ;;  %v2329_v22 = vrot.slane %v2327_v56, 5  ;;  %v2294_v31 = vshrl.u32 %v8775_v14, 16  ;;  %v2297_v17 = vshll.u32 %v8775_v14, 16 }
 0x195   : > { %2218 = vst.msk [vmem:[#allocation2 + $0x1c] sm:$0xf] %vm2025_vm10, %v7628_v53  ;;  %v2333_v21 = vrot.slane %v2331_v32, 4  ;;  %v2734_v35 = vrot.slane %v2733_v25, 4  ;;  %v2743_v36 = vor.u32 %v2742_v23, %v2738_v8  ;;  %v2303_v38 = vshll.u32 %v8781_v26, 16  ;;  %11456 = vst [vmem:[#allocation15_spill] sm:$0xff] %v8799_v43 }
 0x196   : > { %v2324_v39 = vor.u32 %v2323_v30, %v2320_v62  ;;  %v2296_v19 = vrot.slane %v2294_v31, 4  ;;  %v2299_v27 = vrot.slane %v2297_v17, 5  ;;  %v2307_v40 = vshrl.u32 %v8781_v26, 16 }
 0x197   : > { %v2334_v41 = vor.u32 %v2333_v21, %v2329_v22  ;;  %v2744_v45 = vrot.slane %v2743_v36, 4  ;;  %v8791_v48 = vrot.slane %v2553_v12, 5  ;;  %v8793_v54 = vrot.slane %v2962_v16, 5 }
 0x198   : > { %v2325_v57 = vrot.slane %v2324_v39, 4  ;;  %v2739_v63 = vsel %vm8137_vm2, %v2734_v35, %v2738_v8  ;;  %v2300_v33 = vor.u32 %v2299_v27, %v2296_v19  ;;  %v8797_v61 = vrot.slane %v2303_v38, 5 }
 0x199   : > { %11454 = vst [vmem:[#allocation13_spill] sm:$0xff] %v8791_v48  ;;  %11455 = vst [vmem:[#allocation14_spill] sm:$0xff] %v8793_v54  ;;  %v7760_v49 = vpop.f32.mrb[8].mxu0  ;;  %v8801_v28 = vld [vmem:[#allocation2 + $0x24] sm:$0xf]  ;;  %v2335_v55 = vrot.slane %v2334_v41, 4  ;;  %v2749_v12 = vsel %vm8137_vm2, %v2744_v45, %v8698_v5 }
 0x19a   : > { %v1931_v37 = vmul.f32 %v7760_v49, %v8689_v0  ;;  %v1819_v8 = vpop.f32.mrb[9].mxu0  ;;  %v2775_v9 = vshrl.u32 %v8801_v28, 16  ;;  %v2778_v56 = vshll.u32 %v8801_v28, 16  ;;  %v8813_v53 = vld [vmem:[#allocation2 + $0x18] sm:$0xf]  ;;  %v2309_v23 = vrot.slane %v2307_v40, 4 }
 0x19b   : > { %v1929_v32 = vmul.f32 %v8689_v0, %v1819_v8  ;;  %v7761_v25 = vpop.f32.mrb[10].mxu0  ;;  %v8816_v5 = vld [vmem:[#allocation2 + $0x28] sm:$0xf]  ;;  %v2330_v30 = vsel %vm8137_vm2, %v2325_v57, %v2329_v22  ;;  %v2340_v31 = vsel %vm8137_vm2, %v2335_v55, %v8696_v1  ;;  %v8826_v38 = vcombine.low %v2739_v63, %v2749_v12 }
 0x19c   : > { %v1970_v21 = vadd.f32 %v8694_v51, %v1931_v37  ;;  %v1932_v35 = vmul.f32 %v7761_v25, %v8689_v0  ;;  %v1822_v36 = vpop.f32.mrb[11].mxu0  ;;  %v2751_v39 = vshrl.u32 %v8813_v53, 16  ;;  %v2784_v22 = vshll.u32 %v8816_v5, 16  ;;  %v8839_v37 = vld [vmem:[#allocation2 + $0x1c] sm:$0xf] }
 0x19d   : > { %v1968_v19 = vadd.f32 %v8694_v51, %v1929_v32  ;;  %v1930_v27 = vmul.f32 %v8689_v0, %v1822_v36  ;;  %v2788_v40 = vshrl.u32 %v8816_v5, 16  ;;  %v2777_v45 = vrot.slane %v2775_v9, 4 }
 0x19e   : > { %v2002_v1 = vmax.f32 %v1970_v21, 0.0  ;;  %v1971_v41 = vadd.f32 %v8694_v51, %v1932_v35  ;;  %v2780_v57 = vrot.slane %v2778_v56, 5  ;;  %v8837_v12 = vcombine.low %v2330_v30, %v2340_v31  ;;  %v2251_v21 = vld [vmem:[#allocation2 + $0x24] sm:$0xf] }
 0x19f   : > { %v2000_v49 = vmax.f32 %v1968_v19, 0.0  ;;  %v1969_v55 = vadd.f32 %v8694_v51, %v1930_v27  ;;  %v2786_v25 = vrot.slane %v2784_v22, 5  ;;  %v2754_v36 = vshll.u32 %v8813_v53, 16  ;;  %v2252_v19 = vld [vmem:[#allocation2 + $0x28] sm:$0xf] }
 0x1a0   : > { %v7633_v8 = vpack.c.bf16 %v2002_v1, %v2002_v1  ;;  %v2003_v32 = vmax.f32 %v1971_v41, 0.0  ;;  %v2790_v9 = vrot.slane %v2788_v40, 4  ;;  %v8842_v56 = vrot.slane %v2751_v39, 4  ;;  %v8853_v40 = vld [vmem:[#allocation2 + $0x18] sm:$0xf] }
 0x1a1   : > { %v7631_v16 = vpack.c.bf16 %v2000_v49, %v2000_v49  ;;  %v2001_v35 = vmax.f32 %v1969_v55, 0.0  ;;  %v2760_v30 = vshll.u32 %v8839_v37, 16  ;;  %v2764_v31 = vshrl.u32 %v8839_v37, 16 }
 0x1a2   : > { %2223 = vst.msk [vmem:[#allocation2 + $0x3c] sm:$0xf] %vm2025_vm10, %v7633_v8  ;;  %v7634_v27 = vpack.c.bf16 %v2003_v32, %v2003_v32  ;;  %v2301_v62 = vrot.slane %v2300_v33, 4  ;;  %v8848_v1 = vrot.slane %v2754_v36, 5  ;;  %v2310_v39 = vor.u32 %v2309_v23, %v8797_v61 }
 0x1a3   : > { %2221 = vst.msk [vmem:[#allocation2 + $0x30] sm:$0xf] %vm2025_vm10, %v7631_v16  ;;  %v7632_v22 = vpack.c.bf16 %v2001_v35, %v2001_v35  ;;  %v2366_v55 = vshrl.u32 %v2251_v21, 16  ;;  %v2369_v33 = vshll.u32 %v2251_v21, 16  ;;  %v2375_v8 = vshll.u32 %v2252_v19, 16 }
 0x1a4   : > { %2224 = vst.msk [vmem:[#allocation2 + $0x40] sm:$0xf] %vm2025_vm10, %v7634_v27  ;;  %v2306_v49 = vsel %vm8137_vm2, %v2301_v62, %v8797_v61  ;;  %v2311_v16 = vrot.slane %v2310_v39, 4  ;;  %v2379_v32 = vshrl.u32 %v2252_v19, 16  ;;  %v2781_v36 = vor.u32 %v2780_v57, %v2777_v45  ;;  %v8864_v21 = vld [vmem:[#allocation2 + $0x1c] sm:$0xf] }
 0x1a5   : > { %2222 = vst.msk [vmem:[#allocation2 + $0x34] sm:$0xf] %vm2025_vm10, %v7632_v22  ;;  %v2791_v35 = vor.u32 %v2790_v9, %v2786_v25  ;;  %v2368_v17 = vrot.slane %v2366_v55, 4  ;;  %v2371_v41 = vrot.slane %v2369_v33, 5  ;;  %v2377_v23 = vrot.slane %v2375_v8, 5 }
 0x1a6   : > { %v2342_v63 = vshrl.u32 %v8853_v40, 16  ;;  %v2316_v27 = vsel %vm8137_vm2, %v2311_v16, %v8700_v34  ;;  %v2381_v60 = vrot.slane %v2379_v32, 4  ;;  %v2782_v61 = vrot.slane %v2781_v36, 4 }
 0x1a7   : > { %v2792_v62 = vrot.slane %v2791_v35, 4  ;;  %v8866_v42 = vrot.slane %v2760_v30, 5  ;;  %v8868_v22 = vrot.slane %v2764_v31, 4  ;;  %v8870_v45 = vcombine.low %v2306_v49, %v2316_v27 }
 0x1a8   : > { %v2372_v57 = vor.u32 %v2371_v41, %v2368_v17  ;;  %v2382_v19 = vor.u32 %v2381_v60, %v2377_v23  ;;  %v2344_v34 = vrot.slane %v2342_v63, 4  ;;  %v2345_v55 = vshll.u32 %v8853_v40, 16 }
 0x1a9   : > { %v8872_v9 = vld [vmem:[#allocation2 + $0x3c] sm:$0xf]  ;;  %v2797_v39 = vsel %vm8137_vm2, %v2792_v62, %v8708_v47  ;;  %v2787_v31 = vsel %vm8137_vm2, %v2782_v61, %v2786_v25  ;;  %v2351_v17 = vshll.u32 %v8864_v21, 16  ;;  %v2757_v35 = vor.u32 %v8848_v1, %v8842_v56 }
 0x1aa   : > { %v2823_v33 = vshrl.u32 %v8872_v9, 16  ;;  %v2826_v30 = vshll.u32 %v8872_v9, 16  ;;  %v8882_v49 = vld [vmem:[#allocation2 + $0x30] sm:$0xf]  ;;  %v2373_v8 = vrot.slane %v2372_v57, 4  ;;  %v2383_v16 = vrot.slane %v2382_v19, 4 }
 0x1ab   : > { %v7764_v41 = vpop.f32.mrb[12].mxu0  ;;  %v8885_v60 = vld [vmem:[#allocation2 + $0x40] sm:$0xf]  ;;  %v8887_v47 = vcombine.low %v2787_v31, %v2797_v39  ;;  %v2799_v63 = vshrl.u32 %v8882_v49, 16  ;;  %v2802_v25 = vshll.u32 %v8882_v49, 16 }
 0x1ac   : > { %v1935_v40 = vmul.f32 %v7764_v41, %v8689_v0  ;;  %v1835_v32 = vpop.f32.mrb[13].mxu0  ;;  %v2832_v36 = vshll.u32 %v8885_v60, 16  ;;  %v8896_v62 = vrot.slane %v2823_v33, 4  ;;  %v8898_v57 = vrot.slane %v2826_v30, 5 }
 0x1ad   : > { %v1933_v27 = vmul.f32 %v8689_v0, %v1835_v32  ;;  %v7765_v61 = vpop.f32.mrb[14].mxu0  ;;  %v2836_v19 = vshrl.u32 %v8885_v60, 16  ;;  %v2388_v56 = vsel %vm8137_vm2, %v2383_v16, %v8706_v7  ;;  %v2378_v32 = vsel %vm8137_vm2, %v2373_v8, %v2377_v23  ;;  %v2255_v8 = vld [vmem:[#allocation2 + $0x3c] sm:$0xf] }
 0x1ae   : > { %v1974_v39 = vadd.f32 %v8694_v51, %v1935_v40  ;;  %v1936_v31 = vmul.f32 %v7765_v61, %v8689_v0  ;;  %v1838_v41 = vpop.f32.mrb[15].mxu0  ;;  %v8910_v30 = vrot.slane %v2832_v36, 5  ;;  %v8914_v40 = vld [vmem:[#allocation2 + $0x34] sm:$0xf]  ;;  %v8917_v26 = vcombine.low %v2378_v32, %v2388_v56  ;;  %v2256_v56 = vld [vmem:[#allocation2 + $0x40] sm:$0xf] }
 0x1af   : > { %v1972_v1 = vadd.f32 %v8694_v51, %v1933_v27  ;;  %v1934_v33 = vmul.f32 %v8689_v0, %v1838_v41  ;;  %11457 = vst [vmem:[#allocation16_spill] sm:$0xff] %v8914_v40  ;;  %v2838_v46 = vrot.slane %v2836_v19, 4  ;;  %v8920_v16 = vrot.slane %v2799_v63, 4 }
 0x1b0   : > { %v2006_v61 = vmax.f32 %v1974_v39, 0.0  ;;  %v1975_v14 = vadd.f32 %v8694_v51, %v1936_v31  ;;  %v8922_v27 = vrot.slane %v2802_v25, 5  ;;  %v2808_v52 = vshll.u32 %v8914_v40, 16 }
 0x1b1   : > { %v2004_v43 = vmax.f32 %v1972_v1, 0.0  ;;  %v1973_v7 = vadd.f32 %v8694_v51, %v1934_v33  ;;  %v2347_v23 = vrot.slane %v2345_v55, 5  ;;  %v2812_v31 = vshrl.u32 %v8914_v40, 16 }
 0x1b2   : > { %v7637_v36 = vpack.c.bf16 %v2006_v61, %v2006_v61  ;;  %v2007_v41 = vmax.f32 %v1975_v14, 0.0  ;;  %v2353_v25 = vrot.slane %v2351_v17, 5  ;;  %v2355_v33 = vshrl.u32 %v8864_v21, 16 }
 0x1b3   : > { %v7635_v44 = vpack.c.bf16 %v2004_v43, %v2004_v43  ;;  %v2005_v39 = vmax.f32 %v1973_v7, 0.0  ;;  %v2348_v1 = vor.u32 %v2347_v23, %v2344_v34  ;;  %v2758_v55 = vrot.slane %v2757_v35, 4 }
 0x1b4   : > { %2227 = vst.msk [vmem:[#allocation2 + $0x54] sm:$0xf] %vm2025_vm10, %v7637_v36  ;;  %v7638_v63 = vpack.c.bf16 %v2007_v41, %v2007_v41  ;;  %v2767_v43 = vor.u32 %v8868_v22, %v8866_v42  ;;  %v2414_v32 = vshrl.u32 %v2255_v8, 16  ;;  %v2357_v7 = vrot.slane %v2355_v33, 4  ;;  %v8939_v22 = vld [vmem:[#allocation2 + $0x30] sm:$0xf] }
 0x1b5   : > { %2225 = vst.msk [vmem:[#allocation2 + $0x48] sm:$0xf] %vm2025_vm10, %v7635_v44  ;;  %v7636_v14 = vpack.c.bf16 %v2005_v39, %v2005_v39  ;;  %v2349_v61 = vrot.slane %v2348_v1, 4  ;;  %v2417_v19 = vshll.u32 %v2255_v8, 16  ;;  %v2423_v48 = vshll.u32 %v2256_v56, 16 }
 0x1b6   : > { %2228 = vst.msk [vmem:[#allocation2 + $0x58] sm:$0xf] %vm2025_vm10, %v7638_v63  ;;  %v8935_v34 = vrot.slane %v2808_v52, 5  ;;  %v2768_v17 = vrot.slane %v2767_v43, 4  ;;  %v2416_v21 = vrot.slane %v2414_v32, 4  ;;  %v2427_v36 = vshrl.u32 %v2256_v56, 16 }
 0x1b7   : > { %2226 = vst.msk [vmem:[#allocation2 + $0x4c] sm:$0xf] %vm2025_vm10, %v7636_v14  ;;  %v8937_v44 = vrot.slane %v2812_v31, 4  ;;  %v2358_v35 = vor.u32 %v2357_v7, %v2353_v25  ;;  %v2419_v41 = vrot.slane %v2417_v19, 5  ;;  %v2425_v23 = vrot.slane %v2423_v48, 5 }
 0x1b8   : > { %v2773_v39 = vsel %vm8137_vm2, %v2768_v17, %v8716_v24  ;;  %v2429_v8 = vrot.slane %v2427_v36, 4  ;;  %v2829_v63 = vor.u32 %v8898_v57, %v8896_v62  ;;  %v2839_v52 = vor.u32 %v2838_v46, %v8910_v30 }
 0x1b9   : > { %v2354_v56 = vsel %vm8137_vm2, %v2349_v61, %v2353_v25  ;;  %v2359_v31 = vrot.slane %v2358_v35, 4  ;;  %v2763_v48 = vsel %vm8137_vm2, %v2758_v55, %v8866_v42  ;;  %v2420_v19 = vor.u32 %v2419_v41, %v2416_v21 }
 0x1ba   : > { %v8952_v1 = vcombine.low %v2763_v48, %v2773_v39  ;;  %v2430_v24 = vor.u32 %v2429_v8, %v2425_v23  ;;  %v2830_v14 = vrot.slane %v2829_v63, 4  ;;  %v2390_v43 = vshrl.u32 %v8939_v22, 16 }
 0x1bb   : > { %v8954_v33 = vld [vmem:[#allocation2 + $0x54] sm:$0xf]  ;;  %v2364_v46 = vsel %vm8137_vm2, %v2359_v31, %v8714_v58  ;;  %v2840_v32 = vrot.slane %v2839_v52, 4  ;;  %v2421_v7 = vrot.slane %v2420_v19, 4  ;;  %v2393_v21 = vshll.u32 %v8939_v22, 16 }
 0x1bc   : > { %11458 = vst [vmem:[#allocation17_spill] sm:$0xff] %v8952_v1  ;;  %11459 = vst [vmem:[#allocation18_spill] sm:$0xff] %v8954_v33  ;;  %v7768_v62 = vpop.f32.mrb[0].mxu1  ;;  %v2871_v57 = vshrl.u32 %v8954_v33, 16  ;;  %v2874_v25 = vshll.u32 %v8954_v33, 16  ;;  %v2431_v17 = vrot.slane %v2430_v24, 4  ;;  %v8967_v41 = vcombine.low %v2354_v56, %v2364_v46 }
 0x1bd   : > { %v1939_v42 = vmul.f32 %v7768_v62, %v8689_v0  ;;  %v1851_v55 = vpop.f32.mrb[1].mxu1  ;;  %v8963_v61 = vld [vmem:[#allocation2 + $0x58] sm:$0xf]  ;;  %v2835_v39 = vsel %vm8137_vm2, %v2830_v14, %v8910_v30  ;;  %v8980_v62 = vld [vmem:[#allocation2 + $0x48] sm:$0xf] }
 0x1be   : > { %11460 = vst [vmem:[#allocation19_spill] sm:$0xff] %v8963_v61  ;;  %v1937_v36 = vmul.f32 %v8689_v0, %v1851_v55  ;;  %v7769_v35 = vpop.f32.mrb[2].mxu1  ;;  %11461 = vst [vmem:[#allocation20_spill] sm:$0xff] %v8967_v41  ;;  %v2880_v58 = vshll.u32 %v8963_v61, 16  ;;  %v2873_v31 = vrot.slane %v2871_v57, 4  ;;  %v2884_v48 = vshrl.u32 %v8963_v61, 16 }
 0x1bf   : > { %v1978_v8 = vadd.f32 %v8694_v51, %v1939_v42  ;;  %v1940_v63 = vmul.f32 %v7769_v35, %v8689_v0  ;;  %v1854_v52 = vpop.f32.mrb[3].mxu1  ;;  %v2876_v56 = vrot.slane %v2874_v25, 5  ;;  %11462 = vst [vmem:[#allocation21_spill] sm:$0xff] %v8980_v62  ;;  %v2436_v57 = vsel %vm8137_vm2, %v2431_v17, %v8722_v50  ;;  %v8994_v35 = vld [vmem:[#allocation2 + $0x4c] sm:$0xf] }
 0x1c0   : > { %v1976_v22 = vadd.f32 %v8694_v51, %v1937_v36  ;;  %v1938_v19 = vmul.f32 %v8689_v0, %v1854_v52  ;;  %v8983_v14 = vrot.slane %v2880_v58, 5  ;;  %v2426_v25 = vsel %vm8137_vm2, %v2421_v7, %v2425_v23  ;;  %11463 = vst [vmem:[#allocation22_spill] sm:$0xff] %v8994_v35 }
 0x1c1   : > { %v2010_v46 = vmax.f32 %v1978_v8, 0.0  ;;  %v1979_v30 = vadd.f32 %v8694_v51, %v1940_v63  ;;  %v2845_v36 = vsel %vm8137_vm2, %v2840_v32, %v8728_v4  ;;  %v2886_v58 = vrot.slane %v2884_v48, 4 }
 0x1c2   : > { %v2008_v42 = vmax.f32 %v1976_v22, 0.0  ;;  %v1977_v55 = vadd.f32 %v8694_v51, %v1938_v19  ;;  %v2847_v52 = vshrl.u32 %v8980_v62, 16  ;;  %v8997_v50 = vcombine.low %v2426_v25, %v2436_v57  ;;  %v2254_v22 = vld [vmem:[#allocation2 + $0x34] sm:$0xf] }
 0x1c3   : > { %v7641_v8 = vpack.c.bf16 %v2010_v46, %v2010_v46  ;;  %v2011_v63 = vmax.f32 %v1979_v30, 0.0  ;;  %v2850_v17 = vshll.u32 %v8980_v62, 16  ;;  %v9001_v7 = vcombine.low %v2835_v39, %v2845_v36  ;;  %v9013_v25 = vld [vmem:[#allocation2 + $0x54] sm:$0xf] }
 0x1c4   : > { %v7639_v24 = vpack.c.bf16 %v2008_v42, %v2008_v42  ;;  %v2009_v54 = vmax.f32 %v1977_v55, 0.0  ;;  %11464 = vst [vmem:[#allocation23_spill] sm:$0xff] %v8997_v50  ;;  %v9003_v4 = vrot.slane %v2847_v52, 4  ;;  %v2856_v32 = vshll.u32 %v8994_v35, 16 }
 0x1c5   : > { %2231 = vst.msk [vmem:[#allocation2 + $0x6c] sm:$0xf] %vm2025_vm10, %v7641_v8  ;;  %v7642_v23 = vpack.c.bf16 %v2011_v63, %v2011_v63  ;;  %11465 = vst [vmem:[#allocation24_spill] sm:$0xff] %v9001_v7  ;;  %v2860_v19 = vshrl.u32 %v8994_v35, 16  ;;  %v2392_v30 = vrot.slane %v2390_v43, 4  ;;  %v9011_v57 = vrot.slane %v2850_v17, 5 }
 0x1c6   : > { %2229 = vst.msk [vmem:[#allocation2 + $0x60] sm:$0xf] %vm2025_vm10, %v7639_v24  ;;  %v7640_v48 = vpack.c.bf16 %v2009_v54, %v2009_v54  ;;  %v2395_v42 = vrot.slane %v2393_v21, 5  ;;  %v2399_v39 = vshll.u32 %v2254_v22, 16  ;;  %v2403_v55 = vshrl.u32 %v2254_v22, 16 }
 0x1c7   : > { %2232 = vst.msk [vmem:[#allocation2 + $0x70] sm:$0xf] %vm2025_vm10, %v7642_v23  ;;  %v2805_v54 = vor.u32 %v8922_v27, %v8920_v16  ;;  %v2815_v24 = vor.u32 %v8937_v44, %v8935_v34  ;;  %v2877_v36 = vor.u32 %v2876_v56, %v2873_v31  ;;  %v2887_v43 = vor.u32 %v2886_v58, %v8983_v14 }
 0x1c8   : > { %2230 = vst.msk [vmem:[#allocation2 + $0x64] sm:$0xf] %vm2025_vm10, %v7640_v48  ;;  %v9021_v63 = vrot.slane %v2856_v32, 5  ;;  %v2396_v52 = vor.u32 %v2395_v42, %v2392_v30  ;;  %v9023_v21 = vrot.slane %v2399_v39, 5  ;;  %v9025_v17 = vrot.slane %v2403_v55, 4  ;;  %v7932_v30 = vld [vmem:[%s11422_s4] sm:$0xff]  }
 0x1c9   : > { %v7772_v8 = vpop.f32.mrb[4].mxu1  ;;  %v9028_v48 = vrot.slane %v2860_v19, 4  ;;  %v9030_v16 = vrot.slane %v2805_v54, 4  ;;  %v9036_v58 = vrot.slane %v2815_v24, 4  ;;  %v9038_v32 = vrot.slane %v2877_v36, 4  ;;  %7782 = vmatprep.subr.bf16.mxu1 %v7932_v30 }
 0x1ca   : > { %v1943_v22 = vmul.f32 %v7772_v8, %v8689_v0  ;;  %v1867_v23 = vpop.f32.mrb[5].mxu1  ;;  %v9034_v56 = vrot.slane %v2396_v52, 4  ;;  %v9047_v8 = vrot.slane %v2887_v43, 4  ;;  %7783 = vmatpush3.bf16.msra.mxu1 %v7932_v30 }
 0x1cb   : > { %v1941_v44 = vmul.f32 %v8689_v0, %v1867_v23  ;;  %v7773_v31 = vpop.f32.mrb[6].mxu1 }
 0x1cc   : > { %v1982_v19 = vadd.f32 %v8694_v51, %v1943_v22  ;;  %v1944_v42 = vmul.f32 %v7773_v31, %v8689_v0  ;;  %v1870_v39 = vpop.f32.mrb[7].mxu1  ;;  %v2694_v55 = vld [vmem:[#allocation2 + $0x6c] sm:$0xf] }
 0x1cd   : > { %v1980_v24 = vadd.f32 %v8694_v51, %v1941_v44  ;;  %v1942_v36 = vmul.f32 %v8689_v0, %v1870_v39  ;;  %v2919_v52 = vshrl.u32 %v2694_v55, 16  ;;  %v2922_v23 = vshll.u32 %v2694_v55, 16  ;;  %v2692_v46 = vld [vmem:[#allocation2 + $0x60] sm:$0xf] }
 0x1ce   : > { %v2014_v27 = vmax.f32 %v1982_v19, 0.0  ;;  %v1983_v22 = vadd.f32 %v8694_v51, %v1944_v42  ;;  %v2695_v35 = vld [vmem:[#allocation2 + $0x70] sm:$0xf]  ;;  %v2895_v31 = vshrl.u32 %v2692_v46, 16  ;;  %v2263_v42 = vld [vmem:[#allocation2 + $0x6c] sm:$0xf] }
 0x1cf   : > { %v2012_v43 = vmax.f32 %v1980_v24, 0.0  ;;  %v1981_v44 = vadd.f32 %v8694_v51, %v1942_v36  ;;  %v2921_v62 = vrot.slane %v2919_v52, 4  ;;  %v2924_v39 = vrot.slane %v2922_v23, 5  ;;  %v9057_v7 = vld [vmem:[#allocation2 + $0x64] sm:$0xf] }
 0x1d0   : > { %v7645_v50 = vpack.c.bf16 %v2014_v27, %v2014_v27  ;;  %v2015_v61 = vmax.f32 %v1983_v22, 0.0  ;;  %v7410_v19 = vcombine.low %v2694_v55, %v2695_v35  ;;  %v2928_v33 = vshll.u32 %v2695_v35, 16  ;;  %v2264_v40 = vld [vmem:[#allocation2 + $0x70] sm:$0xf] }
 0x1d1   : > { %v7643_v1 = vpack.c.bf16 %v2012_v43, %v2012_v43  ;;  %v2013_v3 = vmax.f32 %v1981_v44, 0.0  ;;  %v2932_v20 = vshrl.u32 %v2695_v35, 16  ;;  %v2898_v41 = vshll.u32 %v2692_v46, 16  ;;  %v2261_v43 = vld [vmem:[#allocation2 + $0x60] sm:$0xf] }
 0x1d2   : > { %2235 = vst.msk [vmem:[#allocation2 + $0x84] sm:$0xf] %vm2025_vm10, %v7645_v50  ;;  %v7646_v30 = vpack.c.bf16 %v2015_v61, %v2015_v61  ;;  %3366 = vrot.lane.b32.xlu0 %v7410_v19, %s8013_s12  ;;  %v2930_v24 = vrot.slane %v2928_v33, 5  ;;  %v7409_v36 = vcombine.low %v2692_v46, %v9057_v7  ;;  %v9067_v35 = vrot.slane %v2895_v31, 4  ;;  %v7933_v61 = vld [vmem:[%s11422_s4 + $0x8] sm:$0xff]  }
 0x1d3   : > { %2233 = vst.msk [vmem:[#allocation2 + $0x78] sm:$0xf] %vm2025_vm10, %v7643_v1  ;;  %v7644_v55 = vpack.c.bf16 %v2013_v3, %v2013_v3  ;;  %v2934_v52 = vrot.slane %v2932_v20, 4  ;;  %v2904_v23 = vshll.u32 %v9057_v7, 16  ;;  %v2925_v33 = vor.u32 %v2924_v39, %v2921_v62  ;;  %v2262_v44 = vld [vmem:[#allocation2 + $0x64] sm:$0xf]  ;;  %7784 = vmatprep.subr.bf16.mxu1 %v7933_v61 }
 0x1d4   : > { %2236 = vst.msk [vmem:[#allocation2 + $0x88] sm:$0xf] %vm2025_vm10, %v7646_v30  ;;  %3364 = vrot.lane.b32.xlu1 %v7409_v36, %s8013_s12  ;;  %v2510_v50 = vshrl.u32 %v2263_v42, 16  ;;  %v2513_v46 = vshll.u32 %v2263_v42, 16  ;;  %v2519_v22 = vshll.u32 %v2264_v40, 16  ;;  %v9076_v20 = vrot.slane %v2898_v41, 5  ;;  %7785 = vmatpush3.bf16.msra.mxu1 %v7933_v61 }
 0x1d5   : > { %2234 = vst.msk [vmem:[#allocation2 + $0x7c] sm:$0xf] %vm2025_vm10, %v7644_v55  ;;  %v2908_v3 = vshrl.u32 %v9057_v7, 16  ;;  %v2935_v1 = vor.u32 %v2934_v52, %v2930_v24  ;;  %v2523_v31 = vshrl.u32 %v2264_v40, 16  ;;  %v11466_v19 = vcombine.low %v8801_v28, %v8816_v5 }
 0x1d6   : > { %v2926_v62 = vrot.slane %v2925_v33, 4  ;;  %v2512_v39 = vrot.slane %v2510_v50, 4  ;;  %v2515_v42 = vrot.slane %v2513_v46, 5  ;;  %v2521_v30 = vrot.slane %v2519_v22, 5 }
 0x1d7   : > { %3354 = vrot.lane.b32.xlu0 %v11466_v19, %s8013_s12  ;;  %v2936_v36 = vrot.slane %v2935_v1, 4  ;;  %v2525_v55 = vrot.slane %v2523_v31, 4  ;;  %v2486_v41 = vshrl.u32 %v2261_v43, 16  ;;  %v2489_v54 = vshll.u32 %v2261_v43, 16 }
 0x1d8   : > { %v9083_v27 = vrot.slane %v2904_v23, 5  ;;  %3240 = vrot.lane.b32.xlu1 %v8837_v12, %s8014_s20  ;;  %v2516_v40 = vor.u32 %v2515_v42, %v2512_v39  ;;  %v2495_v7 = vshll.u32 %v2262_v44, 16  ;;  %v2499_v52 = vshrl.u32 %v2262_v44, 16 }
 0x1d9   : > { %v2941_v28 = vsel %vm8137_vm2, %v2936_v36, %v8726_v2  ;;  %v2526_v5 = vor.u32 %v2525_v55, %v2521_v30  ;;  %v2488_v33 = vrot.slane %v2486_v41, 4  ;;  %v2491_v61 = vrot.slane %v2489_v54, 5  ;;  %v7934_v36 = vld [vmem:[%s11422_s4 + $0x10] sm:$0xff]  }
 0x1da   : > { %v7776_v50 = vpop.f32.mrb[8].mxu1  ;;  %v2931_v23 = vsel %vm8137_vm2, %v2926_v62, %v2930_v24  ;;  %v2517_v46 = vrot.slane %v2516_v40, 4  ;;  %v2696_v12 = vld [vmem:[#allocation2 + $0x78] sm:$0xf]  ;;  %v2497_v22 = vrot.slane %v2495_v7, 5  ;;  %v2501_v43 = vrot.slane %v2499_v52, 4  ;;  %7786 = vmatprep.subr.bf16.mxu1 %v7934_v36 }
 0x1db   : > { %3430 = vrot.lane.b32.xlu0 %v8826_v38, %s8015_s21  ;;  %v1947_v1 = vmul.f32 %v7776_v50, %v8689_v0  ;;  %v1883_v31 = vpop.f32.mrb[9].mxu1  ;;  %v2527_v44 = vrot.slane %v2526_v5, 4  ;;  %v2943_v2 = vshrl.u32 %v2696_v12, 16  ;;  %v2946_v19 = vshll.u32 %v2696_v12, 16  ;;  %v9118_v52 = vld [vmem:[%s11421_s3] ss:$0 sm:$0xff]  ;;  %7787 = vmatpush3.bf16.msra.mxu1 %v7934_v36 }
 0x1dc   : > { %v1945_v54 = vmul.f32 %v8689_v0, %v1883_v31  ;;  %v7777_v39 = vpop.f32.mrb[10].mxu1  ;;  %v11467_v38 = vcombine.low %v8813_v53, %v8839_v37  ;;  %v7426_v42 = vcombine.low %v2931_v23, %v2941_v28  ;;  %v2522_v24 = vsel %vm8137_vm2, %v2517_v46, %v2521_v30  ;;  %v9109_v0 = vld [vmem:[%s11420_s2] ss:$0 sm:$0xff]  ;;  %v2697_v30 = vld [vmem:[#allocation2 + $0x7c] sm:$0xf] }
 0x1dd   : > { %v2492_v62 = vor.u32 %v2491_v61, %v2488_v33  ;;  %v1986_v55 = vadd.f32 %v8694_v51, %v1947_v1  ;;  %v1948_v41 = vmul.f32 %v9109_v0, %v7777_v39  ;;  %v1886_v53 = vpop.f32.mrb[11].mxu1  ;;  %v2532_v37 = vsel %vm8137_vm2, %v2527_v44, %v8731_v6 }
 0x1de   : > { %3352 = vrot.lane.b32.xlu1 %v11467_v38, %s8013_s12  ;;  %v2502_v40 = vor.u32 %v2501_v43, %v2497_v22  ;;  %v2910_v7 = vrot.slane %v2908_v3, 4  ;;  %v1984_v51 = vadd.f32 %v9118_v52, %v1945_v54  ;;  %v1946_v28 = vmul.f32 %v9109_v0, %v1886_v53 }
 0x1df   : > { %3446 = vrot.lane.b32.xlu0 %v7426_v42, %s8015_s21  ;;  %v7395_v5 = vcombine.low %v2522_v24, %v2532_v37  ;;  %v2018_v33 = vmax.f32 %v1986_v55, 0.0  ;;  %v1987_v61 = vadd.f32 %v9118_v52, %v1948_v41  ;;  %v9124_v6 = vrot.slane %v2943_v2, 4  ;;  %v9155_v37 = vld [vmem:[#allocation2 + $0x58] sm:$0xf] }
 0x1e0   : > { %v9126_v50 = vrot.slane %v2946_v19, 5  ;;  %v2016_v3 = vmax.f32 %v1984_v51, 0.0  ;;  %v1985_v23 = vadd.f32 %v9118_v52, %v1946_v28  ;;  %v2952_v46 = vshll.u32 %v2697_v30, 16 }
 0x1e1   : > { %v2493_v43 = vrot.slane %v2492_v62, 4  ;;  %v7649_v1 = vpack.c.bf16 %v2018_v33, %v2018_v33  ;;  %v2019_v31 = vmax.f32 %v1987_v61, 0.0  ;;  %v2956_v44 = vshrl.u32 %v2697_v30, 16 }
 0x1e2   : > { %3256 = vrot.lane.b32.xlu1 %v7395_v5, %s8014_s20  ;;  %v2503_v54 = vrot.slane %v2502_v40, 4  ;;  %v7647_v39 = vpack.c.bf16 %v2016_v3, %v2016_v3  ;;  %v2017_v38 = vmax.f32 %v1985_v23, 0.0  ;;  %v7411_v2 = vcombine.low %v2696_v12, %v2697_v30  ;;  %v7935_v30 = vld [vmem:[%s11422_s4 + $0x18] sm:$0xff]   ;;  %v9181_v5 = vld [vmem:[#allocation2 + $0x48] sm:$0xf] }
 0x1e3   : > { %3238 = vrot.lane.b32.xlu0 %v8870_v45, %s8014_s20  ;;  %v2498_v19 = vsel %vm8137_vm2, %v2493_v43, %v2497_v22  ;;  %2239 = vst.msk [vmem:[#allocation2 + $0x9c] sm:$0xf] %vm2025_vm10, %v7649_v1  ;;  %v7650_v42 = vpack.c.bf16 %v2019_v31, %v2019_v31  ;;  %v2901_v62 = vor.u32 %v9076_v20, %v9067_v35  ;;  %v9143_v45 = vrot.slane %v2952_v46, 5 }
 0x1e4   : > { %v2508_v24 = vsel %vm8137_vm2, %v2503_v54, %v8733_v13  ;;  %v2911_v36 = vor.u32 %v2910_v7, %v9083_v27  ;;  %2237 = vst.msk [vmem:[#allocation2 + $0x90] sm:$0xf] %vm2025_vm10, %v7647_v39  ;;  %v7648_v55 = vpack.c.bf16 %v2017_v38, %v2017_v38  ;;  %v11468_v22 = vor.u32 %v9025_v17, %v9023_v21  ;;  %v9213_v39 = vld [vmem:[#allocation2 + $0x78] sm:$0xf] }
 0x1e5   : > { %v7394_v12 = vcombine.low %v2498_v19, %v2508_v24  ;;  %2240 = vst.msk [vmem:[#allocation2 + $0xa0] sm:$0xf] %vm2025_vm10, %v7650_v42  ;;  %v9149_v13 = vrot.slane %v2956_v44, 4  ;;  %v2902_v53 = vrot.slane %v2901_v62, 4  ;;  %v2402_v20 = vsel %vm8137_vm2, %v9034_v56, %v9023_v21  ;;  %7788 = vmatprep.subr.bf16.mxu1 %v7935_v30 }
 0x1e6   : > { %3368 = vrot.lane.b32.xlu1 %v7411_v2, %s8013_s12  ;;  %v2407_v41 = vrot.slane %v11468_v22, 4  ;;  %v2912_v35 = vrot.slane %v2911_v36, 4  ;;  %2238 = vst.msk [vmem:[#allocation2 + $0x94] sm:$0xf] %vm2025_vm10, %v7648_v55  ;;  %v11469_v17 = vsel %vm8137_vm2, %v9036_v58, %v8738_v10  ;;  %v11470_v21 = vsel %vm8137_vm2, %v9030_v16, %v8935_v34  ;;  %v9183_v10 = vld [vmem:[#allocation2 + $0x4c] sm:$0xf]  ;;  %7789 = vmatpush3.bf16.msra.mxu1 %v7935_v30 }
 0x1e7   : > { %3254 = vrot.lane.b32.xlu0 %v7394_v12, %s8014_s20  ;;  %v9172_v56 = vcombine.low %v11470_v21, %v11469_v17  ;;  %v2883_v40 = vsel %vm8137_vm2, %v9038_v32, %v8983_v14  ;;  %v11471_v7 = vshrl.u32 %v9013_v25, 16  ;;  %v2465_v28 = vshll.u32 %v9013_v25, 16 }
 0x1e8   : > { %v2907_v34 = vsel %vm8137_vm2, %v2902_v53, %v9083_v27  ;;  %v2917_v16 = vsel %vm8137_vm2, %v2912_v35, %v8744_v15  ;;  %v2412_v14 = vsel %vm8137_vm2, %v2407_v41, %v8735_v29  ;;  %v2893_v25 = vsel %vm8137_vm2, %v9047_v8, %v8746_v18 }
 0x1e9   : > { %v2464_v51 = vrot.slane %v11471_v7, 4  ;;  %v7425_v58 = vcombine.low %v2907_v34, %v2917_v16  ;;  %v2467_v32 = vrot.slane %v2465_v28, 5  ;;  %v2471_v33 = vshll.u32 %v9155_v37, 16  ;;  %v11473_v34 = vld [vmem:[#allocation16_spill] sm:$0xff] }
 0x1ea   : > { %v2475_v27 = vshrl.u32 %v9155_v37, 16  ;;  %v2438_v61 = vshrl.u32 %v9181_v5, 16  ;;  %v2441_v15 = vshll.u32 %v9181_v5, 16  ;;  %v2447_v3 = vshll.u32 %v9183_v10, 16  ;;  %v11475_v16 = vld [vmem:[#allocation20_spill] sm:$0xff] }
 0x1eb   : > { %v2451_v29 = vshrl.u32 %v9183_v10, 16  ;;  %3444 = vrot.lane.b32.xlu1 %v7425_v58, %s8015_s21  ;;  %v11472_v18 = vcombine.low %v8872_v9, %v8885_v60  ;;  %v2468_v8 = vor.u32 %v2467_v32, %v2464_v51  ;;  %v2473_v23 = vrot.slane %v2471_v33, 5  ;;  %v9257_v32 = vld [vmem:[#allocation2 + $0x7c] sm:$0xf] }
 0x1ec   : > { %v2477_v46 = vrot.slane %v2475_v27, 4  ;;  %v2853_v43 = vor.u32 %v9011_v57, %v9003_v4  ;;  %v2440_v1 = vrot.slane %v2438_v61, 4  ;;  %v2443_v31 = vrot.slane %v2441_v15, 5  ;;  %v7780_v38 = vpop.f32.mrb[12].mxu1  ;;  %v11476_v27 = vld [vmem:[#allocation5_spill] sm:$0xff]  ;;  %v11477_v61 = vld [vmem:[#allocation6_spill] sm:$0xff] }
 0x1ed   : > { %3358 = vrot.lane.b32.xlu0 %v11472_v18, %s8013_s12  ;;  %v9211_v44 = vrot.slane %v2447_v3, 5  ;;  %v2453_v54 = vrot.slane %v2451_v29, 4  ;;  %v9215_v2 = vcombine.low %v2402_v20, %v2412_v14  ;;  %v2469_v19 = vrot.slane %v2468_v8, 4  ;;  %v1899_v24 = vpop.f32.mrb[13].mxu1  ;;  %v9265_v3 = vld [vmem:[#allocation2 + $0x84] sm:$0xf] }
 0x1ee   : > { %v2478_v42 = vor.u32 %v2477_v46, %v2473_v23  ;;  %v2863_v9 = vor.u32 %v9028_v48, %v9021_v63  ;;  %v1951_v60 = vmul.f32 %v9109_v0, %v7780_v38  ;;  %v2444_v62 = vor.u32 %v2443_v31, %v2440_v1  ;;  %v7781_v55 = vpop.f32.mrb[14].mxu1  ;;  %v9273_v31 = vld [vmem:[#allocation2 + $0x88] sm:$0xf]  ;;  %v11480_v38 = vld [vmem:[#allocation19_spill] sm:$0xff] }
 0x1ef   : > { %v2454_v4 = vor.u32 %v2453_v54, %v9211_v44  ;;  %v9221_v57 = vrot.slane %v2853_v43, 4  ;;  %3244 = vrot.lane.b32.xlu1 %v8917_v26, %s8014_s20  ;;  %v1949_v36 = vmul.f32 %v9109_v0, %v1899_v24  ;;  %v9228_v12 = vcombine.low %v2883_v40, %v2893_v25  ;;  %v1902_v35 = vpop.f32.mrb[15].mxu1  ;;  %v11479_v54 = vld [vmem:[#allocation18_spill] sm:$0xff] }
 0x1f0   : > { %v2479_v48 = vrot.slane %v2478_v42, 4  ;;  %v2534_v22 = vshrl.u32 %v9213_v39, 16  ;;  %v1990_v41 = vadd.f32 %v9118_v52, %v1951_v60  ;;  %v1952_v53 = vmul.f32 %v9109_v0, %v7781_v55 }
 0x1f1   : > { %3434 = vrot.lane.b32.xlu0 %v8887_v47, %s8015_s21  ;;  %v2445_v20 = vrot.slane %v2444_v62, 4  ;;  %v2455_v30 = vrot.slane %v2454_v4, 4  ;;  %v1988_v26 = vadd.f32 %v9118_v52, %v1949_v36  ;;  %v1950_v17 = vmul.f32 %v9109_v0, %v1902_v35 }
 0x1f2   : > { %v2484_v47 = vsel %vm8137_vm2, %v2479_v48, %v8748_v59  ;;  %v2864_v21 = vrot.slane %v2863_v9, 4  ;;  %v2022_v40 = vmax.f32 %v1990_v41, 0.0  ;;  %v1991_v7 = vadd.f32 %v9118_v52, %v1952_v53 }
 0x1f3   : > { %v2474_v51 = vsel %vm8137_vm2, %v2469_v19, %v2473_v23  ;;  %v2859_v28 = vsel %vm8137_vm2, %v9221_v57, %v9021_v63  ;;  %v11474_v0 = vcombine.low %v8882_v49, %v11473_v34  ;;  %v2020_v59 = vmax.f32 %v1988_v26, 0.0  ;;  %v11483_v26 = vld [vmem:[#allocation24_spill] sm:$0xff] }
 0x1f4   : > { %v1989_v14 = vadd.f32 %v9118_v52, %v1950_v17  ;;  %v9252_v25 = vcombine.low %v2474_v51, %v2484_v47  ;;  %v2450_v58 = vsel %vm8137_vm2, %v2445_v20, %v9211_v44  ;;  %v7653_v63 = vpack.c.bf16 %v2022_v40, %v2022_v40  ;;  %v11478_v44 = vld [vmem:[#allocation17_spill] sm:$0xff]  ;;  %v9294_v20 = vld [vmem:[#allocation2 + $0x88] sm:$0xf] }
 0x1f5   : > { %3356 = vrot.lane.b32.xlu1 %v11474_v0, %s8013_s12  ;;  %3242 = vrot.lane.b32.xlu0 %v11475_v16, %s8014_s20  ;;  %v2023_v33 = vmax.f32 %v1991_v7, 0.0  ;;  %v2460_v49 = vsel %vm8137_vm2, %v2455_v30, %v11476_v27  ;;  %v2869_v15 = vsel %vm8137_vm2, %v2864_v21, %v11477_v61  ;;  %v7651_v52 = vpack.c.bf16 %v2020_v59, %v2020_v59  ;;  %v11482_v30 = vld [vmem:[#allocation23_spill] sm:$0xff]  ;;  %v11484_v21 = vld [vmem:[#allocation14_spill] sm:$0xff] }
 0x1f6   : > { %v2021_v29 = vmax.f32 %v1989_v14, 0.0  ;;  %v2536_v18 = vrot.slane %v2534_v22, 4  ;;  %v2537_v8 = vshll.u32 %v9213_v39, 16  ;;  %2243 = vst.msk [vmem:[#allocation2 + $0xb4] sm:$0xf] %vm2025_vm10, %v7653_v63  ;;  %v2543_v46 = vshll.u32 %v9257_v32, 16 }
 0x1f7   : > { %v7654_v23 = vpack.c.bf16 %v2023_v33, %v2023_v33  ;;  %v2547_v43 = vshrl.u32 %v9257_v32, 16  ;;  %v2949_v1 = vor.u32 %v9126_v50, %v9124_v6  ;;  %v11481_v19 = vcombine.low %v11479_v54, %v11480_v38  ;;  %2241 = vst.msk [vmem:[#allocation2 + $0xa8] sm:$0xf] %vm2025_vm10, %v7651_v52  ;;  %v9291_v22 = vld [vmem:[#allocation2 + $0x84] sm:$0xf]  ;;  %v11486_v52 = vld [vmem:[#allocation22_spill] sm:$0xff] }
 0x1f8   : > { %v7652_v42 = vpack.c.bf16 %v2021_v29, %v2021_v29  ;;  %v2539_v9 = vrot.slane %v2537_v8, 5  ;;  %v2959_v60 = vor.u32 %v9149_v13, %v9143_v45  ;;  %v2967_v24 = vshrl.u32 %v9265_v3, 16  ;;  %v9318_v61 = vld [vmem:[#allocation2 + $0x94] sm:$0xf] }
 0x1f9   : > { %3432 = vrot.lane.b32.xlu1 %v11478_v44, %s8015_s21  ;;  %3362 = vrot.lane.b32.xlu0 %v11481_v19, %s8013_s12  ;;  %2244 = vst.msk [vmem:[#allocation2 + $0xb8] sm:$0xf] %vm2025_vm10, %v7654_v23  ;;  %v2545_v6 = vrot.slane %v2543_v46, 5  ;;  %v2549_v50 = vrot.slane %v2547_v43, 4  ;;  %v2950_v62 = vrot.slane %v2949_v1, 4  ;;  %v2970_v4 = vshll.u32 %v9265_v3, 16 }
 0x1fa   : > { %2242 = vst.msk [vmem:[#allocation2 + $0xac] sm:$0xf] %vm2025_vm10, %v7652_v42  ;;  %v9288_v57 = vcombine.low %v2450_v58, %v2460_v49  ;;  %v2540_v36 = vor.u32 %v2539_v9, %v2536_v18  ;;  %v2960_v55 = vrot.slane %v2959_v60, 4  ;;  %v2976_v48 = vshll.u32 %v9273_v31, 16  ;;  %v11488_v18 = vld [vmem:[#allocation13_spill] sm:$0xff] }
 0x1fb   : > { %v2550_v13 = vor.u32 %v2549_v50, %v2545_v6  ;;  %v2969_v41 = vrot.slane %v2967_v24, 4  ;;  %v2972_v53 = vrot.slane %v2970_v4, 5  ;;  %v2980_v35 = vshrl.u32 %v9273_v31, 16  ;;  %v9337_v60 = vld [vmem:[#allocation2 + $0x90] sm:$0xf]  ;;  %v11489_v4 = vld [vmem:[#allocation9_spill] sm:$0xff] }
 0x1fc   : > { %v9300_v17 = vcombine.low %v2859_v28, %v2869_v15  ;;  %v2955_v47 = vsel %vm8137_vm2, %v2950_v62, %v9143_v45  ;;  %v2965_v40 = vsel %vm8137_vm2, %v2960_v55, %v11484_v21  ;;  %v2978_v7 = vrot.slane %v2976_v48, 5  ;;  %v9314_v45 = vld [vmem:[#allocation2 + $0x90] sm:$0xf]  ;;  %v11485_v15 = vld [vmem:[#allocation21_spill] sm:$0xff]  ;;  %v9339_v24 = vld [vmem:[#allocation2 + $0x94] sm:$0xf] }
 0x1fd   : > { %3248 = vrot.lane.b32.xlu1 %v11482_v30, %s8014_s20  ;;  %3438 = vrot.lane.b32.xlu0 %v11483_v26, %s8015_s21  ;;  %v2541_v51 = vrot.slane %v2540_v36, 4  ;;  %v2551_v34 = vrot.slane %v2550_v13, 4  ;;  %v2982_v0 = vrot.slane %v2980_v35, 4  ;;  %v2558_v16 = vshrl.u32 %v9291_v22, 16 }
 0x1fe   : > { %v7412_v59 = vcombine.low %v9265_v3, %v9273_v31  ;;  %v2561_v28 = vshll.u32 %v9291_v22, 16  ;;  %v2567_v14 = vshll.u32 %v9294_v20, 16  ;;  %v2571_v58 = vshrl.u32 %v9294_v20, 16 }
 0x1ff   : > { %v9316_v63 = vcombine.low %v2955_v47, %v2965_v40  ;;  %v2560_v33 = vrot.slane %v2558_v16, 4  ;;  %v2973_v27 = vor.u32 %v2972_v53, %v2969_v41  ;;  %v2983_v49 = vor.u32 %v2982_v0, %v2978_v7  ;;  %v2721_v47 = vld [vmem:[#allocation2 + $0x98] sm:$0x1] }
 0x200   : > { %v11487_v29 = vcombine.low %v11485_v15, %v11486_v52  ;;  %v2556_v8 = vsel %vm8137_vm2, %v2551_v34, %v11488_v18  ;;  %v2563_v23 = vrot.slane %v2561_v28, 5  ;;  %v9329_v46 = vrot.slane %v2567_v14, 5  ;;  %v9369_v14 = vld [vmem:[#allocation2 + $0xa0] sm:$0xf] }
 0x201   : > { %3246 = vrot.lane.b32.xlu0 %v9215_v2, %s8014_s20  ;;  %v2573_v43 = vrot.slane %v2571_v58, 4  ;;  %v2974_v1 = vrot.slane %v2973_v27, 4  ;;  %v2984_v44 = vrot.slane %v2983_v49, 4  ;;  %v2991_v54 = vshrl.u32 %v9314_v45, 16 }
 0x202   : > { %3360 = vrot.lane.b32.xlu1 %v11487_v29, %s8013_s12  ;;  %v2994_v38 = vshll.u32 %v9314_v45, 16  ;;  %v2546_v19 = vsel %vm8137_vm2, %v2541_v51, %v2545_v6  ;;  %v2564_v42 = vor.u32 %v2563_v23, %v2560_v33  ;;  %v3000_v9 = vshll.u32 %v9318_v61, 16  ;;  %v11490_v51 = vld [vmem:[#allocation8_spill] sm:$0xff] }
 0x203   : > { %v2574_v2 = vor.u32 %v2573_v43, %v9329_v46  ;;  %v7396_v50 = vcombine.low %v2546_v19, %v2556_v8  ;;  %v2979_v62 = vsel %vm8137_vm2, %v2974_v1, %v2978_v7  ;;  %v2989_v36 = vsel %vm8137_vm2, %v2984_v44, %v11489_v4  ;;  %v9364_v7 = vld [vmem:[#allocation2 + $0x9c] sm:$0xf]  ;;  %v11491_v44 = vld [vmem:[#allocation15_spill] sm:$0xff] }
 0x204   : > { %v2993_v55 = vrot.slane %v2991_v54, 4  ;;  %v2565_v6 = vrot.slane %v2564_v42, 4  ;;  %v2996_v13 = vrot.slane %v2994_v38, 5  ;;  %v9350_v41 = vrot.slane %v3000_v9, 5  ;;  %v9381_v42 = vld [vmem:[#allocation2 + $0x9c] sm:$0xf] }
 0x205   : > { %3442 = vrot.lane.b32.xlu0 %v9228_v12, %s8015_s21  ;;  %v2575_v48 = vrot.slane %v2574_v2, 4  ;;  %v3004_v53 = vshrl.u32 %v9318_v61, 16  ;;  %v2582_v35 = vshrl.u32 %v9337_v60, 16  ;;  %v2585_v30 = vshll.u32 %v9337_v60, 16 }
 0x206   : > { %3436 = vrot.lane.b32.xlu1 %v9172_v56, %s8015_s21  ;;  %v2591_v26 = vshll.u32 %v9339_v24, 16  ;;  %v2570_v56 = vsel %vm8137_vm2, %v2565_v6, %v9329_v46  ;;  %v9359_v21 = vcombine.low %v2979_v62, %v2989_v36  ;;  %v7413_v12 = vcombine.low %v9314_v45, %v9318_v61  ;;  %v9389_v36 = vld [vmem:[#allocation2 + $0xa0] sm:$0xf]  ;;  %v9463_v45 = vld [vmem:[#allocation2 + $0xa8] sm:$0xf] }
 0x207   : > { %v2595_v40 = vshrl.u32 %v9339_v24, 16  ;;  %v2580_v34 = vsel %vm8137_vm2, %v2575_v48, %v11490_v51  ;;  %v3006_v0 = vrot.slane %v3004_v53, 4  ;;  %v2584_v16 = vrot.slane %v2582_v35, 4 }
 0x208   : > { %v2587_v28 = vrot.slane %v2585_v30, 5  ;;  %v2593_v58 = vrot.slane %v2591_v26, 5  ;;  %v2997_v27 = vor.u32 %v2996_v13, %v2993_v55  ;;  %v3010_v49 = vshll.u32 %v2721_v47, 16 }
 0x209   : > { %3250 = vrot.lane.b32.xlu0 %v9288_v57, %s8014_s20  ;;  %v2597_v33 = vrot.slane %v2595_v40, 4  ;;  %v3007_v52 = vor.u32 %v3006_v0, %v9350_v41  ;;  %v3015_v29 = vshrl.u32 %v9364_v7, 16  ;;  %v3018_v18 = vshll.u32 %v9364_v7, 16 }
 0x20a   : > { %3252 = vrot.lane.b32.xlu1 %v9252_v25, %s8014_s20  ;;  %v2588_v15 = vor.u32 %v2587_v28, %v2584_v16  ;;  %v2998_v23 = vrot.slane %v2997_v27, 4  ;;  %v3012_v46 = vrot.slane %v3010_v49, 5  ;;  %v3024_v43 = vshll.u32 %v9369_v14, 16  ;;  %v2073_v25 = vld [vmem:[#allocation2 + $0xa4] sm:$0x1] }
 0x20b   : > { %v2598_v8 = vor.u32 %v2597_v33, %v2593_v58  ;;  %v11492_v57 = vshll.u32 %v11491_v44, 16  ;;  %v3008_v38 = vrot.slane %v3007_v52, 4  ;;  %v3017_v19 = vrot.slane %v3015_v29, 4  ;;  %v9417_v16 = vld [vmem:[#allocation2 + $0xac] sm:$0xf] }
 0x20c   : > { %v2589_v1 = vrot.slane %v2588_v15, 4  ;;  %v3020_v9 = vrot.slane %v3018_v18, 5  ;;  %v9386_v62 = vrot.slane %v3024_v43, 5  ;;  %v3028_v4 = vshrl.u32 %v9369_v14, 16  ;;  %v9421_v15 = vld [vmem:[#allocation2 + $0xb4] sm:$0xf] }
 0x20d   : > { %v2603_v54 = vrot.slane %v11492_v57, 5  ;;  %3258 = vrot.lane.b32.xlu0 %v7396_v50, %s8014_s20  ;;  %v2599_v2 = vrot.slane %v2598_v8, 4  ;;  %v7397_v55 = vcombine.low %v2570_v56, %v2580_v34  ;;  %v3003_v48 = vsel %vm8137_vm2, %v2998_v23, %v9350_v41  ;;  %v9398_v50 = vld [vmem:[#allocation2 + $0xa8] sm:$0xf]  ;;  %v2079_v23 = vld [vmem:[#allocation2 + $0xbc] sm:$0x1] }
 0x20e   : > { %3440 = vrot.lane.b32.xlu1 %v9300_v17, %s8015_s21  ;;  %v2594_v6 = vsel %vm8137_vm2, %v2589_v1, %v2593_v58  ;;  %v2074_v17 = vsel %vm8662_vm9, 0, %v2073_v25  ;;  %v3013_v53 = vsel %vm8137_vm2, %v3008_v38, %v3012_v46  ;;  %v3030_v35 = vrot.slane %v3028_v4, 4  ;;  %v9432_v25 = vld [vmem:[#allocation2 + $0xb8] sm:$0xf]  ;;  %v9436_v57 = vld [vmem:[#allocation2 + $0xb4] sm:$0xf] }
 0x20f   : > { %v7414_v30 = vcombine.low %v9364_v7, %v9369_v14  ;;  %2075 = vst [vmem:[#allocation2 + $0xa4] sm:$0x1] %v2074_v17  ;;  %v2606_v26 = vshrl.u32 %v9381_v42, 16  ;;  %v2604_v47 = vsel %vm8137_vm2, %v2599_v2, %v2603_v54  ;;  %v2609_v41 = vshll.u32 %v9381_v42, 16 }
 0x210   : > { %v2615_v56 = vshll.u32 %v9389_v36, 16  ;;  %v2619_v40 = vshrl.u32 %v9389_v36, 16  ;;  %v3021_v34 = vor.u32 %v3020_v9, %v3017_v19  ;;  %v3031_v0 = vor.u32 %v3030_v35, %v9386_v62 }
 0x211   : > { %3370 = vrot.lane.b32.xlu0 %v7412_v59, %s8013_s12  ;;  %v2608_v51 = vrot.slane %v2606_v26, 4  ;;  %v3039_v28 = vshrl.u32 %v9398_v50, 16  ;;  %v2611_v58 = vrot.slane %v2609_v41, 5  ;;  %v3042_v49 = vshll.u32 %v9398_v50, 16 }
 0x212   : > { %3448 = vrot.lane.b32.xlu1 %v9316_v63, %s8015_s21  ;;  %v2617_v33 = vrot.slane %v2615_v56, 5  ;;  %v2621_v27 = vrot.slane %v2619_v40, 4  ;;  %v7398_v63 = vcombine.low %v2594_v6, %v2604_v47  ;;  %v7429_v52 = vcombine.low %v3003_v48, %v3013_v53  ;;  %v9445_v48 = vld [vmem:[#allocation2 + $0xb8] sm:$0xf] }
 0x213   : > { %v3022_v29 = vrot.slane %v3021_v34, 4  ;;  %v9423_v3 = vrot.slane %v3039_v28, 4  ;;  %v2612_v31 = vor.u32 %v2611_v58, %v2608_v51  ;;  %v9425_v18 = vrot.slane %v3042_v49, 5  ;;  %v2076_v51 = vld [vmem:[#allocation2 + $0xb0] sm:$0x1] }
 0x214   : > { %v2622_v59 = vor.u32 %v2621_v27, %v2617_v33  ;;  %v3048_v8 = vshll.u32 %v9417_v16, 16  ;;  %v3032_v46 = vrot.slane %v3031_v0, 4  ;;  %v3052_v43 = vshrl.u32 %v9417_v16, 16  ;;  %v9472_v49 = vld [vmem:[#allocation2 + $0xac] sm:$0xf] }
 0x215   : > { %3450 = vrot.lane.b32.xlu0 %v9359_v21, %s8015_s21  ;;  %v3063_v1 = vshrl.u32 %v9421_v15, 16  ;;  %v3066_v44 = vshll.u32 %v9421_v15, 16  ;;  %v2613_v38 = vrot.slane %v2612_v31, 4  ;;  %v3027_v9 = vsel %vm8137_vm2, %v3022_v29, %v9386_v62 }
 0x216   : > { %3260 = vrot.lane.b32.xlu1 %v7397_v55, %s8014_s20  ;;  %v2290_v54 = vld [vmem:[#allocation2 + $0xa4] sm:$0x1]  ;;  %v2623_v19 = vrot.slane %v2622_v59, 4  ;;  %v7415_v21 = vcombine.low %v9398_v50, %v9417_v16  ;;  %v9443_v6 = vrot.slane %v3048_v8, 5  ;;  %v3045_v17 = vor.u32 %v9425_v18, %v9423_v3 }
 0x217   : > { %v2722_v2 = vld [vmem:[#allocation2 + $0xa4] sm:$0x1]  ;;  %v2625_v4 = vshll.u32 %v2290_v54, 16  ;;  %v2618_v53 = vsel %vm8137_vm2, %v2613_v38, %v2617_v33  ;;  %v3054_v35 = vrot.slane %v3052_v43, 4  ;;  %v3065_v26 = vrot.slane %v3063_v1, 4 }
 0x218   : > { %v3034_v55 = vshll.u32 %v2722_v2, 16  ;;  %v3072_v47 = vshll.u32 %v9432_v25, 16  ;;  %v3068_v56 = vrot.slane %v3066_v44, 5  ;;  %v2080_v40 = vsel %vm8662_vm9, 0, %v2079_v23 }
 0x219   : > { %3262 = vrot.lane.b32.xlu0 %v7398_v63, %s8014_s20  ;;  %v2627_v62 = vrot.slane %v2625_v4, 5  ;;  %v3076_v34 = vshrl.u32 %v9432_v25, 16  ;;  %2081 = vst [vmem:[#allocation2 + $0xbc] sm:$0x1] %v2080_v40  ;;  %v2654_v0 = vshrl.u32 %v9436_v57, 16  ;;  %v2657_v28 = vshll.u32 %v9436_v57, 16 }
 0x21a   : > { %3372 = vrot.lane.b32.xlu1 %v7413_v12, %s8013_s12  ;;  %v3036_v41 = vrot.slane %v3034_v55, 5  ;;  %v2663_v58 = vshll.u32 %v9445_v48, 16  ;;  %v9469_v33 = vrot.slane %v3072_v47, 5  ;;  %v2667_v27 = vshrl.u32 %v9445_v48, 16 }
 0x21b   : > { %v2628_v61 = vsel %vm8137_vm2, %v2623_v19, %v2627_v62  ;;  %v2656_v3 = vrot.slane %v2654_v0, 4  ;;  %v2659_v31 = vrot.slane %v2657_v28, 5  ;;  %v2077_v8 = vsel %vm8662_vm9, 0, %v2076_v51 }
 0x21c   : > { %v3037_v12 = vsel %vm8137_vm2, %v3032_v46, %v3036_v41  ;;  %v7399_v63 = vcombine.low %v2618_v53, %v2628_v61  ;;  %v2665_v59 = vrot.slane %v2663_v58, 5  ;;  %v2669_v18 = vrot.slane %v2667_v27, 4  ;;  %2078 = vst [vmem:[#allocation2 + $0xb0] sm:$0x1] %v2077_v8 }
 0x21d   : > { %v7430_v29 = vcombine.low %v3027_v9, %v3037_v12  ;;  %3374 = vrot.lane.b32.xlu0 %v7414_v30, %s8013_s12  ;;  %v2630_v23 = vshrl.u32 %v9463_v45, 16  ;;  %v2660_v46 = vor.u32 %v2659_v31, %v2656_v3  ;;  %v2633_v43 = vshll.u32 %v9463_v45, 16  ;;  %v2031_v9 = vld [vmem:[#allocation2 + $0xc8] sm:$0x1] }
 0x21e   : > { %3452 = vrot.lane.b32.xlu1 %v7429_v52, %s8015_s21  ;;  %v2639_v1 = vshll.u32 %v9472_v49, 16  ;;  %v2643_v52 = vshrl.u32 %v9472_v49, 16  ;;  %v3078_v44 = vrot.slane %v3076_v34, 4  ;;  %v2670_v54 = vor.u32 %v2669_v18, %v2665_v59 }
 0x21f   : > { %v2632_v38 = vrot.slane %v2630_v23, 4  ;;  %v3055_v7 = vor.u32 %v3054_v35, %v9443_v6  ;;  %v2661_v14 = vrot.slane %v2660_v46, 4  ;;  %v2635_v30 = vrot.slane %v2633_v43, 5 }
 0x220   : > { %v2641_v19 = vrot.slane %v2639_v1, 5  ;;  %v2645_v2 = vrot.slane %v2643_v52, 4  ;;  %v7416_v4 = vcombine.low %v9421_v15, %v9432_v25  ;;  %v2292_v55 = vld [vmem:[#allocation2 + $0xbc] sm:$0x1]  ;;  %v2671_v53 = vrot.slane %v2670_v54, 4 }
 0x221   : > { %3454 = vrot.lane.b32.xlu0 %v7430_v29, %s8015_s21  ;;  %v3046_v47 = vrot.slane %v3045_v17, 4  ;;  %v2724_v62 = vld [vmem:[#allocation2 + $0xbc] sm:$0x1]  ;;  %v3069_v41 = vor.u32 %v3068_v56, %v3065_v26  ;;  %v2673_v40 = vshll.u32 %v2292_v55, 16  ;;  %v2636_v51 = vor.u32 %v2635_v30, %v2632_v38 }
 0x222   : > { %3264 = vrot.lane.b32.xlu1 %v7399_v63, %s8014_s20  ;;  %v2646_v35 = vor.u32 %v2645_v2, %v2641_v19  ;;  %v3056_v34 = vrot.slane %v3055_v7, 4  ;;  %v3079_v28 = vor.u32 %v3078_v44, %v9469_v33  ;;  %v3082_v58 = vshll.u32 %v2724_v62, 16 }
 0x223   : > { %v3070_v0 = vrot.slane %v3069_v41, 4  ;;  %v2666_v61 = vsel %vm8137_vm2, %v2661_v14, %v2665_v59  ;;  %v2675_v12 = vrot.slane %v2673_v40, 5  ;;  %v2637_v27 = vrot.slane %v2636_v51, 4  ;;  %v2291_v25 = vld [vmem:[#allocation2 + $0xb0] sm:$0x1] }
 0x224   : > { %v8016_v63 = vmov 0   ;;  %v2032_v15 = vsel %vm8662_vm9, 0, %v2031_v9  ;;  %v2723_v17 = vld [vmem:[#allocation2 + $0xb0] sm:$0x1]  ;;  %v3080_v26 = vrot.slane %v3079_v28, 4  ;;  %v3084_v56 = vrot.slane %v3082_v58, 5 }
 0x225   : > { %2026 = vst.msk [vmem:[#allocation2 + $0xc0] sm:$0xf] %vm2025_vm10, %v8016_v63  ;;  %2027 = vst.msk [vmem:[#allocation2 + $0xc4] sm:$0xf] %vm2025_vm10, %v8016_v63  ;;  %3378 = vrot.lane.b32.xlu0 %v7416_v4, %s8013_s12  ;;  %v2676_v29 = vsel %vm8137_vm2, %v2671_v53, %v2675_v12  ;;  %v2647_v3 = vrot.slane %v2646_v35, 4  ;;  %v2649_v31 = vshll.u32 %v2291_v25, 16  ;;  %v3075_v8 = vsel %vm8137_vm2, %v3070_v0, %v9469_v33 }
 0x226   : > { %3376 = vrot.lane.b32.xlu1 %v7415_v21, %s8013_s12  ;;  %2033 = vst [vmem:[#allocation2 + $0xc8] sm:$0x1] %v2032_v15  ;;  %v3058_v59 = vshll.u32 %v2723_v17, 16  ;;  %v7401_v18 = vcombine.low %v2666_v61, %v2676_v29  ;;  %v3085_v50 = vsel %vm8137_vm2, %v3080_v26, %v3084_v56  ;;  %v2642_v16 = vsel %vm8137_vm2, %v2637_v27, %v2641_v19  ;;  %v3351_v56 = vpop.permute.xlu0 %3350 }
 0x227   : > { %v2651_v21 = vrot.slane %v2649_v31, 5  ;;  %v3051_v23 = vsel %vm8137_vm2, %v3046_v47, %v9443_v6  ;;  %v7432_v1 = vcombine.low %v3075_v8, %v3085_v50  ;;  %v7376_v7 = vcombine.low %v9181_v5, %v9183_v10  ;;  %3914 = vst.msk [vmem:[#allocation3 + $0xc0] sm:$0xf] %vm3913_vm14, %v8016_v63  ;;  %3915 = vst.msk [vmem:[#allocation3 + $0xc4] sm:$0xf] %vm3913_vm14, %v8016_v63 }
 0x228   : > { %v3060_v46 = vrot.slane %v3058_v59, 5  ;;  %v7380_v6 = vcombine.low %v9213_v39, %v9257_v32  ;;  %v7381_v53 = vcombine.low %v9291_v22, %v9294_v20  ;;  %v7382_v47 = vcombine.low %v9337_v60, %v9339_v24 }
 0x229   : > { %v2652_v43 = vsel %vm8137_vm2, %v2647_v3, %v2651_v21  ;;  %v7383_v35 = vcombine.low %v9381_v42, %v9389_v36  ;;  %v7384_v13 = vcombine.low %v9463_v45, %v9472_v49 }
 0x22a   : > { %3268 = vrot.lane.b32.xlu1 %v7401_v18, %s8014_s20  ;;  %v3061_v33 = vsel %vm8137_vm2, %v3056_v34, %v3060_v46  ;;  %v7400_v52 = vcombine.low %v2642_v16, %v2652_v43  ;;  %v7385_v34 = vcombine.low %v9436_v57, %v9445_v48  ;;  %v11495_v46 = vld [vmem:[#allocation12_spill] sm:$0xff] }
 0x22b   : > { %v7431_v44 = vcombine.low %v3051_v23, %v3061_v33  ;;  %v11494_v23 = vld [vmem:[#allocation11_spill] sm:$0xff] }
 0x22c   : > { %v2708_v54 = vld [vmem:[#allocation2 + $0xc0] sm:$0xf]  ;;  %v2709_v38 = vld [vmem:[#allocation2 + $0xc4] sm:$0xf]  ;;  %3266 = vrot.lane.b32.xlu0 %v7400_v52, %s8014_s20  ;;  %v11496_v43 = vcombine.low %v11494_v23, %v11495_v46  ;;  %v7981_v46 = vld [vmem:[#allocation2 + $0x28] sm:$0xf] }
 0x22d   : > { %v3087_v14 = vshrl.u32 %v2708_v54, 16  ;;  %v3090_v30 = vshll.u32 %v2708_v54, 16  ;;  %v3096_v19 = vshll.u32 %v2709_v38, 16  ;;  %v3100_v2 = vshrl.u32 %v2709_v38, 16  ;;  %v2082_v9 = vld [vmem:[#allocation2 + $0xc8] sm:$0x1] }
 0x22e   : > { %3456 = vrot.lane.b32.xlu1 %v7431_v44, %s8015_s21  ;;  %v7417_v4 = vcombine.low %v2708_v54, %v2709_v38  ;;  %v2083_v55 = vsel %vm8662_vm9, 0, %v2082_v9  ;;  %v7977_v9 = vld [vmem:[#allocation2 + $0x1c] sm:$0xf] }
 0x22f   : > { %v3089_v62 = vrot.slane %v3087_v14, 4  ;;  %v3092_v41 = vrot.slane %v3090_v30, 5  ;;  %v3098_v40 = vrot.slane %v3096_v19, 5  ;;  %v3102_v51 = vrot.slane %v3100_v2, 4  ;;  %2084 = vst [vmem:[#allocation2 + $0xc8] sm:$0x1] %v2083_v55 }
 0x230   : > { %3458 = vrot.lane.b32.xlu0 %v7432_v1, %s8015_s21  ;;  %v7976_v2 = vld [vmem:[#allocation2 + $0x18] sm:$0xf] }
 0x231   : > { %v3093_v0 = vor.u32 %v3092_v41, %v3089_v62  ;;  %v3103_v28 = vor.u32 %v3102_v51, %v3098_v40  ;;  %v11497_v51 = vld [vmem:[#allocation7_spill] sm:$0xff] }
 0x232   : > { %3380 = vrot.lane.b32.xlu1 %v7417_v4, %s8013_s12  ;;  %v7372_v4 = vcombine.low %v7976_v2, %v7977_v9 }
 0x233   : > { %v3094_v58 = vrot.slane %v3093_v0, 4  ;;  %v3104_v12 = vrot.slane %v3103_v28, 4  ;;  %v11498_v0 = vld [vmem:[#allocation10_spill] sm:$0xff] }
 0x234   : > { %v11499_v28 = vcombine.low %v11497_v51, %v11498_v0  ;;  %v7983_v51 = vld [vmem:[#allocation2 + $0x40] sm:$0xf] }
 0x235   : > { %v3099_v15 = vsel %vm8137_vm2, %v3094_v58, %v3098_v40 }
 0x236   : > { %v2725_v61 = vld [vmem:[#allocation2 + $0xc8] sm:$0x1] }
 0x237   : > { %v3106_v27 = vshll.u32 %v2725_v61, 16 }
 0x239   : > { %v3108_v25 = vrot.slane %v3106_v27, 5 }
 0x23b   : > { %v3109_v17 = vsel %vm8137_vm2, %v3104_v12, %v3108_v25 }
 0x23c   : > { %v7433_v26 = vcombine.low %v3099_v15, %v3109_v17 }
 0x23e   : > { %3460 = vrot.lane.b32.xlu1 %v7433_v26, %s8015_s21 }
 0x244   : > { %v9546_v29 = vpop.permute.xlu0 %3366 }
 0x246   : > { %v9548_v3 = vpop.permute.xlu1 %3364 }
 0x249   : > { %v3355_v31 = vpop.permute.xlu0 %3354 }
 0x24a   : > { %v3241_v59 = vpop.permute.xlu1 %3240 }
 0x24b   : > { %v3468_v58 = vsel %vm3462_vm11, %v11499_v28, %v3241_v59  ;;  %v7980_v59 = vld [vmem:[#allocation2 + $0x24] sm:$0xf] }
 0x24d   : > { %v3431_v18 = vpop.permute.xlu0 %3430 }
 0x250   : > { %v3353_v8 = vpop.permute.xlu1 %3352 }
 0x251   : > { %v9550_v50 = vpop.permute.xlu0 %3446  ;;  %v3515_v61 = vsel %vm3511_vm12, %v3468_v58, %v3353_v8  ;;  %v7373_v8 = vcombine.low %v7980_v59, %v7981_v46 }
 0x254   : > { %v9552_v16 = vpop.permute.xlu1 %3256 }
 0x255   : > { %v3239_v21 = vpop.permute.xlu0 %3238 }
 0x256   : > { %v3465_v33 = vsel %vm3462_vm11, %v11496_v43, %v3239_v21 }
 0x257   : > { %v3513_v1 = vsel %vm3511_vm12, %v3465_v33, %v3351_v56  ;;  %v7978_v56 = vld [vmem:[#allocation2 + $0x30] sm:$0xf] }
 0x258   : > { %v9559_v52 = vpop.permute.xlu1 %3368  ;;  %v3545_v44 = vsel %vm1720_vm6, %v3513_v1, %v3431_v18 }
 0x259   : > { %7790 = vmatprep.mubr.msk.bf16.mxu1 %vm3608_vm13, %v3545_v44  ;;  %v3255_v54 = vpop.permute.xlu0 %3254 }
 0x25d   : > { %v9563_v38 = vpop.permute.xlu1 %3444 }
 0x25f   : > { %v3359_v14 = vpop.permute.xlu0 %3358 }
 0x261   : > { %v3245_v30 = vpop.permute.xlu1 %3244 }
 0x262   : > { %v3474_v1 = vsel %vm3462_vm11, %v7373_v8, %v3245_v30 }
 0x263   : > { %v3435_v19 = vpop.permute.xlu0 %3434 }
 0x267   : > { %v3357_v55 = vpop.permute.xlu1 %3356  ;;  %v3243_v62 = vpop.permute.xlu0 %3242 }
 0x268   : > { %v3471_v41 = vsel %vm3462_vm11, %v7372_v4, %v3243_v62  ;;  %v3519_v44 = vsel %vm3511_vm12, %v3474_v1, %v3357_v55 }
 0x269   : > { %v3517_v40 = vsel %vm3511_vm12, %v3471_v41, %v3355_v31  ;;  %v7979_v31 = vld [vmem:[#allocation2 + $0x34] sm:$0xf] }
 0x26a   : > { %v3549_v27 = vsel %vm1720_vm6, %v3517_v40, %v3435_v19  ;;  %v7374_v18 = vcombine.low %v7978_v56, %v7979_v31  ;;  %v7982_v40 = vld [vmem:[#allocation2 + $0x3c] sm:$0xf]  ;;  %v7985_v56 = vld [vmem:[#allocation2 + $0x60] sm:$0xf]  ;;  %v7986_v31 = vld [vmem:[#allocation2 + $0x64] sm:$0xf] }
 0x26b   : > { %v3433_v12 = vpop.permute.xlu1 %3432  ;;  %v3363_v15 = vpop.permute.xlu0 %3362  ;;  %v7375_v0 = vcombine.low %v7982_v40, %v7983_v51  ;;  %v7378_v5 = vcombine.low %v7985_v56, %v7986_v31  ;;  %v3942_v31 = vld [vmem:[#allocation3 + $0x5c] sm:$0x1] }
 0x26c   : > { %v3547_v25 = vsel %vm1720_vm6, %v3515_v61, %v3433_v12 }
 0x26d   : > { %7791 = vmatmul.mubr.msk.bf16.vlgmr.msra.gmra.mrb[16].mxu1 %vm3608_vm13, %v3547_v25 }
 0x26e   : > { %7794 = vmatprep.mubr.msk.bf16.mxu1 %vm3608_vm13, %v3549_v27  ;;  %v7984_v27 = vld [vmem:[#allocation2 + $0x54] sm:$0xf] }
 0x26f   : > { %v3249_v17 = vpop.permute.xlu1 %3248  ;;  %v3439_v26 = vpop.permute.xlu0 %3438  ;;  %v7377_v25 = vcombine.low %v7984_v27, %v9155_v37  ;;  %v3936_v27 = vld [vmem:[#allocation3 + $0x44] sm:$0x1] }
 0x270   : > { %v3480_v55 = vsel %vm3462_vm11, %v7375_v0, %v3249_v17 }
 0x273   : > { %v3247_v23 = vpop.permute.xlu0 %3246 }
 0x274   : > { %v3361_v21 = vpop.permute.xlu1 %3360  ;;  %v3477_v43 = vsel %vm3462_vm11, %v7374_v18, %v3247_v23 }
 0x275   : > { %v3521_v33 = vsel %vm3511_vm12, %v3477_v43, %v3359_v14  ;;  %v3523_v28 = vsel %vm3511_vm12, %v3480_v55, %v3361_v21  ;;  %v7987_v43 = vld [vmem:[#allocation2 + $0x6c] sm:$0xf]  ;;  %v3924_v55 = vld [vmem:[#allocation3 + $0x14] sm:$0x1] }
 0x276   : > { %v3553_v2 = vsel %vm1720_vm6, %v3521_v33, %v3439_v26  ;;  %v7988_v33 = vld [vmem:[#allocation2 + $0x70] sm:$0xf]  ;;  %v3925_v48 = vsel %vm9661_vm0, 0, %v3924_v55 }
 0x277   : > { %v3443_v9 = vpop.permute.xlu0 %3442  ;;  %3926 = vst [vmem:[#allocation3 + $0x14] sm:$0x1] %v3925_v48 }
 0x278   : > { %v3437_v19 = vpop.permute.xlu1 %3436 }
 0x279   : > { %v3551_v4 = vsel %vm1720_vm6, %v3519_v44, %v3437_v19 }
 0x27a   : > { %7795 = vmatmul.mubr.msk.bf16.gmra.mrb[20].mxu1 %vm3608_vm13, %v3551_v4 }
 0x27b   : > { %7798 = vmatprep.mubr.msk.bf16.mxu1 %vm3608_vm13, %v3553_v2  ;;  %v3251_v41 = vpop.permute.xlu0 %3250 }
 0x27c   : > { %v3253_v62 = vpop.permute.xlu1 %3252  ;;  %v3483_v14 = vsel %vm3462_vm11, %v7376_v7, %v3251_v41  ;;  %v3489_v7 = vsel %vm3462_vm11, %v7378_v5, %v3255_v54  ;;  %v3943_v5 = vsel %vm9661_vm0, 0, %v3942_v31 }
 0x27d   : > { %v3525_v30 = vsel %vm3511_vm12, %v3483_v14, %v3363_v15  ;;  %v3486_v10 = vsel %vm3462_vm11, %v7377_v25, %v3253_v62  ;;  %v3529_v37 = vsel %vm3511_vm12, %v3489_v7, %v9546_v29  ;;  %v3937_v25 = vsel %vm9661_vm0, 0, %v3936_v27  ;;  %3944 = vst [vmem:[#allocation3 + $0x5c] sm:$0x1] %v3943_v5  ;;  %v3951_v5 = vld [vmem:[#allocation3 + $0x80] sm:$0x1] }
 0x27e   : > { %v3557_v61 = vsel %vm1720_vm6, %v3525_v30, %v3443_v9  ;;  %v3527_v18 = vsel %vm3511_vm12, %v3486_v10, %v9548_v3  ;;  %v3561_v46 = vsel %vm1720_vm6, %v3529_v37, %v9550_v50  ;;  %v7379_v3 = vcombine.low %v7987_v43, %v7988_v33  ;;  %3938 = vst [vmem:[#allocation3 + $0x44] sm:$0x1] %v3937_v25  ;;  %v3939_v10 = vld [vmem:[#allocation3 + $0x50] sm:$0x1] }
 0x27f   : > { %v3259_v12 = vpop.permute.xlu0 %3258  ;;  %v3559_v59 = vsel %vm1720_vm6, %v3527_v18, %v9563_v38  ;;  %v3940_v7 = vsel %vm9661_vm0, 0, %v3939_v10  ;;  %v3945_v18 = vld [vmem:[#allocation3 + $0x68] sm:$0x1] }
 0x280   : > { %v3441_v58 = vpop.permute.xlu1 %3440  ;;  %v3492_v29 = vsel %vm3462_vm11, %v7379_v3, %v9552_v16  ;;  %v3495_v38 = vsel %vm3462_vm11, %v7380_v6, %v3259_v12  ;;  %3941 = vst [vmem:[#allocation3 + $0x50] sm:$0x1] %v3940_v7  ;;  %v3946_v37 = vsel %vm9661_vm0, 0, %v3945_v18  ;;  %v3952_v18 = vsel %vm9661_vm0, 0, %v3951_v5 }
 0x281   : > { %v3555_v26 = vsel %vm1720_vm6, %v3523_v28, %v3441_v58  ;;  %v3531_v1 = vsel %vm3511_vm12, %v3492_v29, %v9559_v52  ;;  %v3930_v58 = vld [vmem:[#allocation3 + $0x2c] sm:$0x1]  ;;  %3947 = vst [vmem:[#allocation3 + $0x68] sm:$0x1] %v3946_v37  ;;  %3953 = vst [vmem:[#allocation3 + $0x80] sm:$0x1] %v3952_v18 }
 0x282   : > { %7799 = vmatmul.mubr.msk.bf16.gmra.mrb[24].mxu1 %vm3608_vm13, %v3555_v26  ;;  %v3931_v63 = vsel %vm9661_vm0, 0, %v3930_v58  ;;  %v3933_v26 = vld [vmem:[#allocation3 + $0x38] sm:$0x1] }
 0x283   : > { %7802 = vmatprep.mubr.msk.bf16.mxu1 %vm3608_vm13, %v3557_v61  ;;  %v3371_v17 = vpop.permute.xlu0 %3370  ;;  %3932 = vst [vmem:[#allocation3 + $0x2c] sm:$0x1] %v3931_v63  ;;  %v3927_v61 = vld [vmem:[#allocation3 + $0x20] sm:$0x1]  ;;  %v3934_v56 = vsel %vm9661_vm0, 0, %v3933_v26 }
 0x284   : > { %v3449_v15 = vpop.permute.xlu1 %3448  ;;  %v3533_v2 = vsel %vm3511_vm12, %v3495_v38, %v3371_v17  ;;  %v3928_v12 = vsel %vm9661_vm0, 0, %v3927_v61  ;;  %3935 = vst [vmem:[#allocation3 + $0x38] sm:$0x1] %v3934_v56 }
 0x285   : > { %v3563_v19 = vsel %vm1720_vm6, %v3531_v1, %v3449_v15  ;;  %3929 = vst [vmem:[#allocation3 + $0x20] sm:$0x1] %v3928_v12  ;;  %v3948_v15 = vld [vmem:[#allocation3 + $0x74] sm:$0x1] }
 0x286   : > { %v3949_v17 = vsel %vm9661_vm0, 0, %v3948_v15 }
 0x287   : > { %v3451_v23 = vpop.permute.xlu0 %3450  ;;  %3950 = vst [vmem:[#allocation3 + $0x74] sm:$0x1] %v3949_v17  ;;  %v4170_v12 = vld [vmem:[#allocation3 + $0x50] sm:$0x1] }
 0x288   : > { %v3261_v21 = vpop.permute.xlu1 %3260  ;;  %v3565_v9 = vsel %vm1720_vm6, %v3533_v2, %v3451_v23  ;;  %v4597_v23 = vld [vmem:[#allocation3 + $0x14] sm:$0x1]  ;;  %v4604_v15 = vld [vmem:[#allocation3 + $0x68] sm:$0x1] }
 0x289   : > { %v3498_v39 = vsel %vm3462_vm11, %v7381_v53, %v3261_v21  ;;  %v4165_v21 = vld [vmem:[#allocation3 + $0x14] sm:$0x1]  ;;  %v4633_v33 = vshll.u32 %v4597_v23, 16  ;;  %v4172_v17 = vld [vmem:[#allocation3 + $0x68] sm:$0x1] }
 0x28a   : > { %7803 = vmatmul.mubr.msk.bf16.gmra.mrb[28].mxu1 %vm3608_vm13, %v3559_v59  ;;  %v4224_v43 = vshll.u32 %v4165_v21, 16 }
 0x28b   : > { %7806 = vmatprep.mubr.msk.bf16.mxu1 %vm3608_vm13, %v3561_v46  ;;  %v3263_v8 = vpop.permute.xlu0 %3262  ;;  %v4167_v46 = vld [vmem:[#allocation3 + $0x2c] sm:$0x1] }
 0x28c   : > { %v3373_v54 = vpop.permute.xlu1 %3372  ;;  %v3501_v6 = vsel %vm3462_vm11, %v7382_v47, %v3263_v8  ;;  %v9688_v8 = vld [vmem:[%s11423_s5] ss:$0 sm:$0xff]  ;;  %v4272_v29 = vshll.u32 %v4167_v46, 16 }
 0x28d   : > { %v3535_v32 = vsel %vm3511_vm12, %v3498_v39, %v3373_v54  ;;  %v4599_v54 = vld [vmem:[#allocation3 + $0x2c] sm:$0x1] }
 0x28e   : > { %v4681_v1 = vshll.u32 %v4599_v54, 16  ;;  %v4173_v27 = vld [vmem:[#allocation3 + $0x74] sm:$0x1] }
 0x28f   : > { %v3375_v50 = vpop.permute.xlu0 %3374  ;;  %v4605_v31 = vld [vmem:[#allocation3 + $0x74] sm:$0x1] }
 0x290   : > { %v3453_v44 = vpop.permute.xlu1 %3452  ;;  %v3537_v41 = vsel %vm3511_vm12, %v3501_v6, %v3375_v50  ;;  %v3954_v50 = vld [vmem:[#allocation3 + $0x8c] sm:$0x1]  ;;  %v9699_v6 = vrot.slane %v4224_v43, 5  ;;  %v4416_v43 = vshll.u32 %v4173_v27, 16 }
 0x291   : > { %v3567_v62 = vsel %vm1720_vm6, %v3535_v32, %v3453_v44  ;;  %v9693_v44 = vld [vmem:[%s11424_s6] ss:$0 sm:$0xff] }
 0x292   : > { %7807 = vmatmul.mubr.msk.bf16.gmra.mrb[32].mxu1 %vm3608_vm13, %v3563_v19 }
 0x293   : > { %7810 = vmatprep.mubr.msk.bf16.mxu1 %vm3608_vm13, %v3565_v9  ;;  %v3455_v4 = vpop.permute.xlu0 %3454  ;;  %v4598_v9 = vld [vmem:[#allocation3 + $0x20] sm:$0x1] }
 0x294   : > { %v3265_v16 = vpop.permute.xlu1 %3264  ;;  %v3569_v40 = vsel %vm1720_vm6, %v3537_v41, %v3455_v4  ;;  %v3955_v4 = vsel %vm9661_vm0, 0, %v3954_v50  ;;  %v4169_v41 = vld [vmem:[#allocation3 + $0x44] sm:$0x1]  ;;  %v4392_v50 = vshll.u32 %v4172_v17, 16 }
 0x295   : > { %v3504_v20 = vsel %vm3462_vm11, %v7383_v35, %v3265_v16  ;;  %v4166_v16 = vld [vmem:[#allocation3 + $0x20] sm:$0x1]  ;;  %3956 = vst [vmem:[#allocation3 + $0x8c] sm:$0x1] %v3955_v4 }
 0x297   : > { %v3379_v51 = vpop.permute.xlu0 %3378 }
 0x298   : > { %v3377_v52 = vpop.permute.xlu1 %3376 }
 0x299   : > { %v3539_v60 = vsel %vm3511_vm12, %v3504_v20, %v3377_v52  ;;  %v9701_v52 = vrot.slane %v4633_v33, 5  ;;  %v9707_v20 = vrot.slane %v4272_v29, 5  ;;  %v4825_v33 = vshll.u32 %v4605_v31, 16 }
 0x29a   : > { %7811 = vmatmul.mubr.msk.bf16.gmra.mrb[36].mxu1 %vm3608_vm13, %v3567_v62 }
 0x29b   : > { %7814 = vmatprep.mubr.msk.bf16.mxu1 %vm3608_vm13, %v3569_v40 }
 0x29c   : > { %v3269_v22 = vpop.permute.xlu1 %3268 }
 0x29d   : > { %v3510_v35 = vsel %vm3462_vm11, %v7385_v34, %v3269_v22  ;;  %v3921_v34 = vld [vmem:[#allocation3 + $0x8] sm:$0x1] }
 0x29e   : > { %v3267_v24 = vpop.permute.xlu0 %3266  ;;  %v3922_v28 = vsel %vm9661_vm0, 0, %v3921_v34  ;;  %v4603_v34 = vld [vmem:[#allocation3 + $0x5c] sm:$0x1] }
 0x29f   : > { %v3507_v47 = vsel %vm3462_vm11, %v7384_v13, %v3267_v24  ;;  %3923 = vst [vmem:[#allocation3 + $0x8] sm:$0x1] %v3922_v28  ;;  %v4601_v24 = vld [vmem:[#allocation3 + $0x44] sm:$0x1]  ;;  %v4602_v28 = vld [vmem:[#allocation3 + $0x50] sm:$0x1] }
 0x2a0   : > { %v3457_v53 = vpop.permute.xlu1 %3456  ;;  %v3541_v14 = vsel %vm3511_vm12, %v3507_v47, %v3379_v51  ;;  %v4729_v48 = vshll.u32 %v4601_v24, 16  ;;  %v4777_v21 = vshll.u32 %v4603_v34, 16  ;;  %v4753_v23 = vshll.u32 %v4602_v28, 16 }
 0x2a1   : > { %v3571_v0 = vsel %vm1720_vm6, %v3539_v60, %v3457_v53  ;;  %v9709_v60 = vrot.slane %v4681_v1, 5 }
 0x2a2   : > { %7815 = vmatmul.mubr.msk.bf16.gmra.mrb[40].mxu1 %vm3608_vm13, %v3571_v0  ;;  %v3459_v30 = vpop.permute.xlu0 %3458  ;;  %v4657_v0 = vshll.u32 %v4598_v9, 16  ;;  %v9727_v1 = vrot.slane %v4729_v48, 5 }
 0x2a3   : > { %v3573_v42 = vsel %vm1720_vm6, %v3541_v14, %v3459_v30  ;;  %v4248_v14 = vshll.u32 %v4166_v16, 16  ;;  %v4600_v30 = vld [vmem:[#allocation3 + $0x38] sm:$0x1] }
 0x2a4   : > { %7818 = vmatprep.mubr.msk.bf16.mxu1 %vm3608_vm13, %v3573_v42  ;;  %v3381_v36 = vpop.permute.xlu1 %3380  ;;  %v4705_v61 = vshll.u32 %v4600_v30, 16  ;;  %v9720_v46 = vrot.slane %v4657_v0, 5  ;;  %v9747_v0 = vrot.slane %v4825_v33, 5 }
 0x2a5   : > { %v3543_v45 = vsel %vm3511_vm12, %v3510_v35, %v3381_v36  ;;  %v4320_v35 = vshll.u32 %v4169_v41, 16  ;;  %v9722_v54 = vrot.slane %v4248_v14, 5  ;;  %v9737_v41 = vrot.slane %v4777_v21, 5 }
 0x2a6   : > { %v4164_v59 = vld [vmem:[#allocation3 + $0x8] sm:$0x1]  ;;  %v9730_v9 = vrot.slane %v4705_v61, 5  ;;  %v4175_v61 = vld [vmem:[#allocation3 + $0x8c] sm:$0x1] }
 0x2a7   : > { %v4200_v3 = vshll.u32 %v4164_v59, 16  ;;  %v4344_v59 = vshll.u32 %v4170_v12, 16  ;;  %v9725_v29 = vrot.slane %v4320_v35, 5 }
 0x2a9   : > { %v9703_v62 = vrot.slane %v4200_v3, 5 }
 0x2b0   : > { %v3461_v49 = vpop.permute.xlu1 %3460 }
 0x2b1   : > { %v3575_v13 = vsel %vm1720_vm6, %v3543_v45, %v3461_v49  ;;  %v4168_v45 = vld [vmem:[#allocation3 + $0x38] sm:$0x1]  ;;  %v4171_v49 = vld [vmem:[#allocation3 + $0x5c] sm:$0x1] }
 0x2b2   : > { %7819 = vmatmul.mubr.msk.bf16.gmra.mrb[44].mxu1 %vm3608_vm13, %v3575_v13  ;;  %v4296_v56 = vshll.u32 %v4168_v45, 16  ;;  %v4368_v7 = vshll.u32 %v4171_v49, 16  ;;  %v9753_v45 = vrot.slane %v4392_v50, 5 }
 0x2b4   : > { %v9732_v16 = vrot.slane %v4296_v56, 5  ;;  %v9734_v4 = vrot.slane %v4368_v7, 5  ;;  %v4607_v56 = vld [vmem:[#allocation3 + $0x8c] sm:$0x1] }
 0x2b5   : > { %v4873_v50 = vshll.u32 %v4607_v56, 16 }
 0x340   : > { %v7792_v38 = vpop.f32.mrb[16].mxu1 }
 0x341   : > { %v3811_v19 = vmul.f32 %v7792_v38, %v9688_v8  ;;  %v3675_v2 = vpop.f32.mrb[17].mxu1  ;;  %v4801_v38 = vshll.u32 %v4604_v15, 16 }
 0x342   : > { %v3809_v39 = vmul.f32 %v9688_v8, %v3675_v2  ;;  %v7793_v32 = vpop.f32.mrb[18].mxu1 }
 0x343   : > { %v3850_v40 = vadd.f32 %v9693_v44, %v3811_v19  ;;  %v3812_v51 = vmul.f32 %v7793_v32, %v9688_v8  ;;  %v3678_v22 = vpop.f32.mrb[19].mxu1  ;;  %v9751_v35 = vrot.slane %v4801_v38, 5 }
 0x344   : > { %v3848_v53 = vadd.f32 %v9693_v44, %v3809_v39  ;;  %v3810_v47 = vmul.f32 %v9688_v8, %v3678_v22 }
 0x345   : > { %v3882_v42 = vmax.f32 %v3850_v40, 0.0  ;;  %v3851_v36 = vadd.f32 %v9693_v44, %v3812_v51  ;;  %v9739_v40 = vrot.slane %v4753_v23, 5  ;;  %v9741_v51 = vrot.slane %v4344_v59, 5 }
 0x346   : > { %v3880_v13 = vmax.f32 %v3848_v53, 0.0  ;;  %v3849_v55 = vadd.f32 %v9693_v44, %v3810_v47  ;;  %v9745_v47 = vrot.slane %v4416_v43, 5  ;;  %v4464_v59 = vshll.u32 %v4175_v61, 16 }
 0x347   : > { %v7657_v58 = vpack.c.bf16 %v3882_v42, %v3882_v42  ;;  %v3883_v63 = vmax.f32 %v3851_v36, 0.0 }
 0x348   : > { %v7655_v25 = vpack.c.bf16 %v3880_v13, %v3880_v13  ;;  %v3881_v26 = vmax.f32 %v3849_v55, 0.0 }
 0x349   : > { %4102 = vst.msk [vmem:[#allocation3 + $0xc] sm:$0xf] %vm3913_vm14, %v7657_v58  ;;  %v7658_v10 = vpack.c.bf16 %v3883_v63, %v3883_v63 }
 0x34a   : > { %4100 = vst.msk [vmem:[#allocation3] sm:$0xf] %vm3913_vm14, %v7655_v25  ;;  %v7656_v37 = vpack.c.bf16 %v3881_v26, %v3881_v26 }
 0x34b   : > { %4103 = vst.msk [vmem:[#allocation3 + $0x10] sm:$0xf] %vm3913_vm14, %v7658_v10 }
 0x34c   : > { %4101 = vst.msk [vmem:[#allocation3 + $0x4] sm:$0xf] %vm3913_vm14, %v7656_v37 }
 0x34d   : > { %v7796_v3 = vpop.f32.mrb[20].mxu1 }
 0x34e   : > { %v3815_v19 = vmul.f32 %v7796_v3, %v9688_v8  ;;  %v3691_v2 = vpop.f32.mrb[21].mxu1 }
 0x34f   : > { %v3813_v39 = vmul.f32 %v9688_v8, %v3691_v2  ;;  %v7797_v32 = vpop.f32.mrb[22].mxu1 }
 0x350   : > { %v3854_v22 = vadd.f32 %v9693_v44, %v3815_v19  ;;  %v3816_v24 = vmul.f32 %v7797_v32, %v9688_v8  ;;  %v3694_v53 = vpop.f32.mrb[23].mxu1  ;;  %v4565_v42 = vld [vmem:[#allocation3 + $0xc] sm:$0xf] }
 0x351   : > { %v3852_v14 = vadd.f32 %v9693_v44, %v3813_v39  ;;  %v3814_v30 = vmul.f32 %v9688_v8, %v3694_v53  ;;  %v4134_v36 = vld [vmem:[#allocation3 + $0xc] sm:$0xf]  ;;  %v4614_v55 = vshrl.u32 %v4565_v42, 16  ;;  %v4617_v48 = vshll.u32 %v4565_v42, 16 }
 0x352   : > { %v3886_v49 = vmax.f32 %v3854_v22, 0.0  ;;  %v3855_v13 = vadd.f32 %v9693_v44, %v3816_v24  ;;  %v4566_v58 = vld [vmem:[#allocation3 + $0x10] sm:$0xf]  ;;  %v4205_v63 = vshrl.u32 %v4134_v36, 16 }
 0x353   : > { %v3884_v34 = vmax.f32 %v3852_v14, 0.0  ;;  %v3853_v28 = vadd.f32 %v9693_v44, %v3814_v30  ;;  %v4616_v25 = vrot.slane %v4614_v55, 4  ;;  %v4619_v26 = vrot.slane %v4617_v48, 5  ;;  %v4135_v23 = vld [vmem:[#allocation3 + $0x10] sm:$0xf] }
 0x354   : > { %v7661_v12 = vpack.c.bf16 %v3886_v49, %v3886_v49  ;;  %v3887_v27 = vmax.f32 %v3855_v13, 0.0  ;;  %v7520_v7 = vcombine.low %v4565_v42, %v4566_v58  ;;  %v4623_v15 = vshll.u32 %v4566_v58, 16 }
 0x355   : > { %v7659_v31 = vpack.c.bf16 %v3884_v34, %v3884_v34  ;;  %v3885_v5 = vmax.f32 %v3853_v28, 0.0  ;;  %v7800_v10 = vpop.f32.mrb[24].mxu1  ;;  %v4627_v37 = vshrl.u32 %v4566_v58, 16  ;;  %v4620_v33 = vor.u32 %v4619_v26, %v4616_v25 }
 0x356   : > { %4106 = vst.msk [vmem:[#allocation3 + $0x24] sm:$0xf] %vm3913_vm14, %v7661_v12  ;;  %v7662_v17 = vpack.c.bf16 %v3887_v27, %v3887_v27  ;;  %v3819_v18 = vmul.f32 %v7800_v10, %v9688_v8  ;;  %v3707_v21 = vpop.f32.mrb[25].mxu1  ;;  %5237 = vrot.lane.b32.xlu0 %v7520_v7, %s8014_s20  ;;  %v9764_v2 = vrot.slane %v4623_v15, 5  ;;  %v4207_v22 = vrot.slane %v4205_v63, 4 }
 0x357   : > { %4104 = vst.msk [vmem:[#allocation3 + $0x18] sm:$0xf] %vm3913_vm14, %v7659_v31  ;;  %v7660_v43 = vpack.c.bf16 %v3885_v5, %v3885_v5  ;;  %v3817_v3 = vmul.f32 %v9688_v8, %v3707_v21  ;;  %v7801_v38 = vpop.f32.mrb[26].mxu1  ;;  %v4208_v14 = vshll.u32 %v4134_v36, 16  ;;  %v4214_v30 = vshll.u32 %v4135_v23, 16 }
 0x358   : > { %4107 = vst.msk [vmem:[#allocation3 + $0x28] sm:$0xf] %vm3913_vm14, %v7662_v17  ;;  %v3858_v19 = vadd.f32 %v9693_v44, %v3819_v18  ;;  %v3820_v39 = vmul.f32 %v7801_v38, %v9688_v8  ;;  %v3710_v32 = vpop.f32.mrb[27].mxu1  ;;  %v4629_v49 = vrot.slane %v4627_v37, 4  ;;  %v4218_v55 = vshrl.u32 %v4135_v23, 16 }
 0x359   : > { %4105 = vst.msk [vmem:[#allocation3 + $0x1c] sm:$0xf] %vm3913_vm14, %v7660_v43  ;;  %v3856_v24 = vadd.f32 %v9693_v44, %v3817_v3  ;;  %v3818_v53 = vmul.f32 %v9688_v8, %v3710_v32  ;;  %v4210_v28 = vrot.slane %v4208_v14, 5  ;;  %v4216_v58 = vrot.slane %v4214_v30, 5 }
 0x35a   : > { %v3890_v42 = vmax.f32 %v3858_v19, 0.0  ;;  %v3859_v13 = vadd.f32 %v9693_v44, %v3820_v39  ;;  %v4220_v12 = vrot.slane %v4218_v55, 4  ;;  %v9772_v27 = vrot.slane %v4464_v59, 5 }
 0x35b   : > { %v3888_v48 = vmax.f32 %v3856_v24, 0.0  ;;  %v3857_v34 = vadd.f32 %v9693_v44, %v3818_v53  ;;  %v4211_v36 = vor.u32 %v4210_v28, %v4207_v22  ;;  %v9774_v5 = vrot.slane %v4873_v50, 5 }
 0x35c   : > { %v7665_v61 = vpack.c.bf16 %v3890_v42, %v3890_v42  ;;  %v3891_v63 = vmax.f32 %v3859_v13, 0.0  ;;  %v9777_v10 = vrot.slane %v4620_v33, 4  ;;  %v4221_v18 = vor.u32 %v4220_v12, %v4216_v58 }
 0x35d   : > { %v7663_v25 = vpack.c.bf16 %v3888_v48, %v3888_v48  ;;  %v3889_v26 = vmax.f32 %v3857_v34, 0.0  ;;  %v7804_v56 = vpop.f32.mrb[28].mxu1  ;;  %v4569_v31 = vld [vmem:[#allocation3 + $0x24] sm:$0xf]  ;;  %v4630_v37 = vor.u32 %v4629_v49, %v9764_v2  ;;  %v4212_v59 = vrot.slane %v4211_v36, 4 }
 0x35e   : > { %4110 = vst.msk [vmem:[#allocation3 + $0x3c] sm:$0xf] %vm3913_vm14, %v7665_v61  ;;  %v7666_v7 = vpack.c.bf16 %v3891_v63, %v3891_v63  ;;  %v3823_v15 = vmul.f32 %v7804_v56, %v9688_v8  ;;  %v3723_v17 = vpop.f32.mrb[29].mxu1  ;;  %v4222_v38 = vrot.slane %v4221_v18, 4  ;;  %v4662_v39 = vshrl.u32 %v4569_v31, 16 }
 0x35f   : > { %4108 = vst.msk [vmem:[#allocation3 + $0x30] sm:$0xf] %vm3913_vm14, %v7663_v25  ;;  %v7664_v21 = vpack.c.bf16 %v3889_v26, %v3889_v26  ;;  %v3821_v23 = vmul.f32 %v9688_v8, %v3723_v17  ;;  %v7805_v43 = vpop.f32.mrb[30].mxu1  ;;  %v4570_v3 = vld [vmem:[#allocation3 + $0x28] sm:$0xf]  ;;  %v4217_v22 = vsel %vm8137_vm2, %v4212_v59, %v4216_v58  ;;  %v4665_v53 = vshll.u32 %v4569_v31, 16 }
 0x360   : > { %4111 = vst.msk [vmem:[#allocation3 + $0x40] sm:$0xf] %vm3913_vm14, %v7666_v7  ;;  %v3862_v33 = vadd.f32 %v9693_v44, %v3823_v15  ;;  %v3824_v50 = vmul.f32 %v7805_v43, %v9688_v8  ;;  %v3726_v19 = vpop.f32.mrb[31].mxu1  ;;  %v4227_v30 = vsel %vm8137_vm2, %v4222_v38, %v9699_v6  ;;  %v7522_v49 = vcombine.low %v4569_v31, %v4570_v3  ;;  %v9795_v13 = vld [vmem:[#allocation3 + $0x18] sm:$0xf] }
 0x361   : > { %4109 = vst.msk [vmem:[#allocation3 + $0x34] sm:$0xf] %vm3913_vm14, %v7664_v21  ;;  %v3860_v32 = vadd.f32 %v9693_v44, %v3821_v23  ;;  %v3822_v24 = vmul.f32 %v9688_v8, %v3726_v19  ;;  %v7505_v48 = vcombine.low %v4217_v22, %v4227_v30  ;;  %v4671_v28 = vshll.u32 %v4570_v3, 16  ;;  %v9798_v61 = vld [vmem:[#allocation3 + $0x1c] sm:$0xf] }
 0x362   : > { %v3894_v14 = vmax.f32 %v3862_v33, 0.0  ;;  %v3863_v42 = vadd.f32 %v9693_v44, %v3824_v50  ;;  %v4631_v58 = vrot.slane %v4630_v37, 4  ;;  %5241 = vrot.lane.b32.xlu0 %v7522_v49, %s8014_s20  ;;  %v4675_v25 = vshrl.u32 %v4570_v3, 16  ;;  %v4132_v43 = vld [vmem:[#allocation3] sm:$0xf] }
 0x363   : > { %v3892_v55 = vmax.f32 %v3860_v32, 0.0  ;;  %v3861_v34 = vadd.f32 %v9693_v44, %v3822_v24  ;;  %5127 = vrot.lane.b32.xlu1 %v7505_v48, %s8017_s16  ;;  %v4638_v56 = vshrl.u32 %v9795_v13, 16  ;;  %v4626_v31 = vsel %vm8137_vm2, %v9777_v10, %v9764_v2 }
 0x364   : > { %v7669_v63 = vpack.c.bf16 %v3894_v14, %v3894_v14  ;;  %v3895_v12 = vmax.f32 %v3863_v42, 0.0  ;;  %v9808_v15 = vrot.slane %v4662_v39, 4  ;;  %v9810_v17 = vrot.slane %v4665_v53, 5  ;;  %v4133_v39 = vld [vmem:[#allocation3 + $0x4] sm:$0xf] }
 0x365   : > { %v7667_v26 = vpack.c.bf16 %v3892_v55, %v3892_v55  ;;  %v3893_v6 = vmax.f32 %v3861_v34, 0.0  ;;  %v7808_v36 = vpop.f32.mrb[32].mxu1  ;;  %v7521_v18 = vcombine.low %v9795_v13, %v9798_v61  ;;  %v9815_v23 = vrot.slane %v4671_v28, 5  ;;  %v4138_v28 = vld [vmem:[#allocation3 + $0x24] sm:$0xf] }
 0x366   : > { %4114 = vst.msk [vmem:[#allocation3 + $0x54] sm:$0xf] %vm3913_vm14, %v7669_v63  ;;  %v7670_v7 = vpack.c.bf16 %v3895_v12, %v3895_v12  ;;  %v3739_v37 = vpop.f32.mrb[33].mxu1  ;;  %v9817_v59 = vrot.slane %v4675_v25, 4  ;;  %v4641_v2 = vshll.u32 %v9795_v13, 16  ;;  %v3827_v3 = vmul.f32 %v7808_v36, %v9688_v8 }
 0x367   : > { %4112 = vst.msk [vmem:[#allocation3 + $0x48] sm:$0xf] %vm3913_vm14, %v7667_v26  ;;  %v7668_v21 = vpack.c.bf16 %v3893_v6, %v3893_v6  ;;  %v7809_v10 = vpop.f32.mrb[34].mxu1  ;;  %v4636_v33 = vsel %vm8137_vm2, %v4631_v58, %v9701_v52  ;;  %v3825_v38 = vmul.f32 %v9688_v8, %v3739_v37  ;;  %v9828_v32 = vrot.slane %v4638_v56, 4  ;;  %5239 = vrot.lane.b32.xlu1 %v7521_v18, %s8014_s20  ;;  %v4139_v26 = vld [vmem:[#allocation3 + $0x28] sm:$0xf] }
 0x368   : > { %4115 = vst.msk [vmem:[#allocation3 + $0x58] sm:$0xf] %vm3913_vm14, %v7670_v7  ;;  %v3828_v50 = vmul.f32 %v7809_v10, %v9688_v8  ;;  %v3742_v19 = vpop.f32.mrb[35].mxu1  ;;  %v4647_v22 = vshll.u32 %v9798_v61, 16  ;;  %v7536_v24 = vcombine.low %v4626_v31, %v4636_v33  ;;  %v3866_v14 = vadd.f32 %v9693_v44, %v3827_v3 }
 0x369   : > { %4113 = vst.msk [vmem:[#allocation3 + $0x4c] sm:$0xf] %vm3913_vm14, %v7668_v21  ;;  %v3826_v53 = vmul.f32 %v9688_v8, %v3742_v19  ;;  %v3864_v52 = vadd.f32 %v9693_v44, %v3825_v38  ;;  %v4181_v42 = vshrl.u32 %v4132_v43, 16  ;;  %v4184_v55 = vshll.u32 %v4132_v43, 16  ;;  %v4573_v19 = vld [vmem:[#allocation3 + $0x3c] sm:$0xf] }
 0x36a   : > { %v3867_v30 = vadd.f32 %v9693_v44, %v3828_v50  ;;  %5317 = vrot.lane.b32.xlu0 %v7536_v24, %s8010_s19  ;;  %v4190_v48 = vshll.u32 %v4133_v39, 16  ;;  %v4194_v34 = vshrl.u32 %v4133_v39, 16  ;;  %v3898_v58 = vmax.f32 %v3866_v14, 0.0 }
 0x36b   : > { %v3865_v49 = vadd.f32 %v9693_v44, %v3826_v53  ;;  %v3896_v63 = vmax.f32 %v3864_v52, 0.0  ;;  %v4183_v25 = vrot.slane %v4181_v42, 4  ;;  %v4186_v56 = vrot.slane %v4184_v55, 5 }
 0x36c   : > { %v3899_v12 = vmax.f32 %v3867_v30, 0.0  ;;  %v4192_v36 = vrot.slane %v4190_v48, 5  ;;  %v4196_v31 = vrot.slane %v4194_v34, 4  ;;  %v7673_v18 = vpack.c.bf16 %v3898_v58, %v3898_v58 }
 0x36d   : > { %v3897_v6 = vmax.f32 %v3865_v49, 0.0  ;;  %v7812_v7 = vpop.f32.mrb[36].mxu1  ;;  %v7671_v37 = vpack.c.bf16 %v3896_v63, %v3896_v63  ;;  %v4253_v10 = vshrl.u32 %v4138_v28, 16  ;;  %v4187_v43 = vor.u32 %v4186_v56, %v4183_v25  ;;  %v4574_v63 = vld [vmem:[#allocation3 + $0x40] sm:$0xf] }
 0x36e   : > { %v7674_v21 = vpack.c.bf16 %v3899_v12, %v3899_v12  ;;  %v3755_v3 = vpop.f32.mrb[37].mxu1  ;;  %v4197_v38 = vor.u32 %v4196_v31, %v4192_v36  ;;  %v4256_v50 = vshll.u32 %v4138_v28, 16  ;;  %4118 = vst.msk [vmem:[#allocation3 + $0x6c] sm:$0xf] %vm3913_vm14, %v7673_v18  ;;  %v4262_v53 = vshll.u32 %v4139_v26, 16 }
 0x36f   : > { %v7672_v33 = vpack.c.bf16 %v3897_v6, %v3897_v6  ;;  %v7813_v39 = vpop.f32.mrb[38].mxu1  ;;  %4116 = vst.msk [vmem:[#allocation3 + $0x60] sm:$0xf] %vm3913_vm14, %v7671_v37  ;;  %v4255_v24 = vrot.slane %v4253_v10, 4  ;;  %v4266_v14 = vshrl.u32 %v4139_v26, 16  ;;  %v3831_v52 = vmul.f32 %v7812_v7, %v9688_v8 }
 0x370   : > { %4119 = vst.msk [vmem:[#allocation3 + $0x70] sm:$0xf] %vm3913_vm14, %v7674_v21  ;;  %v3758_v30 = vpop.f32.mrb[39].mxu1  ;;  %v4651_v42 = vshrl.u32 %v9798_v61, 16  ;;  %v4188_v49 = vrot.slane %v4187_v43, 4  ;;  %v4198_v55 = vrot.slane %v4197_v38, 4 }
 0x371   : > { %4117 = vst.msk [vmem:[#allocation3 + $0x64] sm:$0xf] %vm3913_vm14, %v7672_v33  ;;  %v4258_v48 = vrot.slane %v4256_v50, 5  ;;  %v4264_v34 = vrot.slane %v4262_v53, 5  ;;  %v4268_v28 = vrot.slane %v4266_v14, 4  ;;  %v3870_v58 = vadd.f32 %v9693_v44, %v3831_v52 }
 0x372   : > { %v4710_v12 = vshrl.u32 %v4573_v19, 16  ;;  %v4193_v25 = vsel %vm8137_vm2, %v4188_v49, %v4192_v36  ;;  %v4203_v26 = vsel %vm8137_vm2, %v4198_v55, %v9703_v62  ;;  %v4713_v61 = vshll.u32 %v4573_v19, 16  ;;  %v9850_v56 = vld [vmem:[#allocation3 + $0x30] sm:$0xf] }
 0x373   : > { %v4259_v6 = vor.u32 %v4258_v48, %v4255_v24  ;;  %v4643_v31 = vrot.slane %v4641_v2, 5  ;;  %v7504_v7 = vcombine.low %v4193_v25, %v4203_v26  ;;  %v4269_v18 = vor.u32 %v4268_v28, %v4264_v34  ;;  %v9874_v48 = vld [vmem:[#allocation3 + $0x34] sm:$0xf] }
 0x374   : > { %v3902_v37 = vmax.f32 %v3870_v58, 0.0  ;;  %v9854_v21 = vrot.slane %v4647_v22, 5  ;;  %v4719_v33 = vshll.u32 %v4574_v63, 16  ;;  %v4723_v43 = vshrl.u32 %v4574_v63, 16 }
 0x375   : > { %v4260_v10 = vrot.slane %v4259_v6, 4  ;;  %v7816_v36 = vpop.f32.mrb[40].mxu1  ;;  %5125 = vrot.lane.b32.xlu0 %v7504_v7, %s8017_s16  ;;  %v4270_v38 = vrot.slane %v4269_v18, 4  ;;  %v3829_v50 = vmul.f32 %v9688_v8, %v3755_v3  ;;  %v4686_v24 = vshrl.u32 %v9850_v56, 16 }
 0x376   : > { %v7677_v62 = vpack.c.bf16 %v3902_v37, %v3902_v37  ;;  %v3771_v53 = vpop.f32.mrb[41].mxu1  ;;  %v4653_v13 = vrot.slane %v4651_v42, 4  ;;  %v9859_v2 = vrot.slane %v4710_v12, 4  ;;  %v9861_v14 = vrot.slane %v4713_v61, 5  ;;  %v4136_v37 = vld [vmem:[#allocation3 + $0x18] sm:$0xf] }
 0x377   : > { %v7524_v22 = vcombine.low %v4573_v19, %v4574_v63  ;;  %v9863_v52 = vpop.f32.mrb[42].mxu1  ;;  %v4265_v49 = vsel %vm8137_vm2, %v4260_v10, %v4264_v34  ;;  %v4275_v55 = vsel %vm8137_vm2, %v4270_v38, %v9707_v20  ;;  %v9871_v3 = vrot.slane %v4719_v33, 5 }
 0x378   : > { %4122 = vst.msk [vmem:[#allocation3 + $0x84] sm:$0xf] %vm3913_vm14, %v7677_v62  ;;  %v3868_v42 = vadd.f32 %v9693_v44, %v3829_v50  ;;  %v9876_v28 = vpop.f32.mrb[43].mxu1  ;;  %v7507_v19 = vcombine.low %v4265_v49, %v4275_v55  ;;  %v9878_v58 = vrot.slane %v4723_v43, 4  ;;  %v9880_v63 = vrot.slane %v4686_v24, 4 }
 0x379   : > { %v4689_v34 = vshll.u32 %v9850_v56, 16  ;;  %5245 = vrot.lane.b32.xlu0 %v7524_v22, %s8014_s20  ;;  %v3832_v12 = vmul.f32 %v7813_v39, %v9688_v8  ;;  %v3830_v25 = vmul.f32 %v9688_v8, %v3758_v30  ;;  %v4668_v26 = vor.u32 %v9810_v17, %v9808_v15  ;;  %v4142_v49 = vld [vmem:[#allocation3 + $0x3c] sm:$0xf] }
 0x37a   : > { %v3900_v20 = vmax.f32 %v3868_v42, 0.0  ;;  %5131 = vrot.lane.b32.xlu1 %v7507_v19, %s8017_s16  ;;  %v7523_v6 = vcombine.low %v9850_v56, %v9874_v48  ;;  %v4695_v61 = vshll.u32 %v9874_v48, 16  ;;  %v4678_v7 = vor.u32 %v9817_v59, %v9815_v23 }
 0x37b   : > { %v4644_v18 = vor.u32 %v4643_v31, %v9828_v32  ;;  %v3871_v39 = vadd.f32 %v9693_v44, %v3832_v12  ;;  %v3869_v30 = vadd.f32 %v9693_v44, %v3830_v25  ;;  %v4669_v33 = vrot.slane %v4668_v26, 4  ;;  %v4137_v32 = vld [vmem:[#allocation3 + $0x1c] sm:$0xf] }
 0x37c   : > { %v7675_v10 = vpack.c.bf16 %v3900_v20, %v3900_v20  ;;  %v4679_v15 = vrot.slane %v4678_v7, 4  ;;  %v4654_v43 = vor.u32 %v4653_v13, %v9854_v21  ;;  %v3835_v38 = vmul.f32 %v7816_v36, %v9688_v8 }
 0x37d   : > { %v4645_v17 = vrot.slane %v4644_v18, 4  ;;  %v3903_v62 = vmax.f32 %v3871_v39, 0.0  ;;  %v3901_v50 = vmax.f32 %v3869_v30, 0.0  ;;  %v4674_v59 = vsel %vm8137_vm2, %v4669_v33, %v9815_v23 }
 0x37e   : > { %4120 = vst.msk [vmem:[#allocation3 + $0x78] sm:$0xf] %vm3913_vm14, %v7675_v10  ;;  %v4229_v31 = vshrl.u32 %v4136_v37, 16  ;;  %5243 = vrot.lane.b32.xlu1 %v7523_v6, %s8014_s20  ;;  %v4684_v24 = vsel %vm8137_vm2, %v4679_v15, %v9709_v60  ;;  %v4655_v13 = vrot.slane %v4654_v43, 4  ;;  %v3874_v22 = vadd.f32 %v9693_v44, %v3835_v38  ;;  %v4143_v60 = vld [vmem:[#allocation3 + $0x40] sm:$0xf] }
 0x37f   : > { %v4650_v36 = vsel %vm8137_vm2, %v4645_v17, %v9854_v21  ;;  %v7678_v55 = vpack.c.bf16 %v3903_v62, %v3903_v62  ;;  %v7676_v42 = vpack.c.bf16 %v3901_v50, %v3901_v50  ;;  %v7538_v19 = vcombine.low %v4674_v59, %v4684_v24 }
 0x380   : > { %v4231_v23 = vrot.slane %v4229_v31, 4  ;;  %v4660_v20 = vsel %vm8137_vm2, %v4655_v13, %v9720_v46  ;;  %v3906_v12 = vmax.f32 %v3874_v22, 0.0  ;;  %v4232_v25 = vshll.u32 %v4136_v37, 16  ;;  %v7952_v22 = vld [vmem:[%s11425_s7] sm:$0xff]  }
 0x381   : > { %v4238_v26 = vshll.u32 %v4137_v32, 16  ;;  %4123 = vst.msk [vmem:[#allocation3 + $0x88] sm:$0xf] %vm3913_vm14, %v7678_v55  ;;  %4121 = vst.msk [vmem:[#allocation3 + $0x7c] sm:$0xf] %vm3913_vm14, %v7676_v42  ;;  %5321 = vrot.lane.b32.xlu0 %v7538_v19, %s8010_s19  ;;  %v7537_v21 = vcombine.low %v4650_v36, %v4660_v20  ;;  %v4242_v6 = vshrl.u32 %v4137_v32, 16  ;;  %v3833_v7 = vmul.f32 %v9688_v8, %v3771_v53 }
 0x382   : > { %v4301_v18 = vshrl.u32 %v4142_v49, 16  ;;  %v7681_v10 = vpack.c.bf16 %v3906_v12, %v3906_v12  ;;  %v4234_v39 = vrot.slane %v4232_v25, 5  ;;  %v4304_v33 = vshll.u32 %v4142_v49, 16  ;;  %v4577_v36 = vld [vmem:[#allocation3 + $0x54] sm:$0xf]  ;;  %7822 = vmatprep.subr.bf16.mxu0 %v7952_v22 }
 0x383   : > { %v4240_v30 = vrot.slane %v4238_v26, 5  ;;  %5319 = vrot.lane.b32.xlu1 %v7537_v21, %s8010_s19  ;;  %v4244_v46 = vrot.slane %v4242_v6, 4  ;;  %v3872_v37 = vadd.f32 %v9693_v44, %v3833_v7  ;;  %v4310_v17 = vshll.u32 %v4143_v60, 16  ;;  %v4578_v7 = vld [vmem:[#allocation3 + $0x58] sm:$0xf]  ;;  %7823 = vmatpush3.bf16.msra.mxu0 %v7952_v22 }
 0x384   : > { %v4303_v15 = vrot.slane %v4301_v18, 4  ;;  %4126 = vst.msk [vmem:[#allocation3 + $0x9c] sm:$0xf] %vm3913_vm14, %v7681_v10  ;;  %v4235_v43 = vor.u32 %v4234_v39, %v4231_v23  ;;  %v4306_v38 = vrot.slane %v4304_v33, 5  ;;  %v4314_v62 = vshrl.u32 %v4143_v60, 16 }
 0x385   : > { %v3836_v53 = vmul.f32 %v9863_v52, %v9688_v8  ;;  %v7820_v50 = vpop.f32.mrb[44].mxu1  ;;  %v4245_v59 = vor.u32 %v4244_v46, %v4240_v30  ;;  %v3904_v32 = vmax.f32 %v3872_v37, 0.0  ;;  %v4312_v31 = vrot.slane %v4310_v17, 5  ;;  %v7953_v52 = vld [vmem:[%s11425_s7 + $0x8] sm:$0xff]   ;;  %v9940_v37 = vld [vmem:[#allocation3 + $0x48] sm:$0xf] }
 0x386   : > { %v3834_v24 = vmul.f32 %v9688_v8, %v9876_v28  ;;  %v3787_v13 = vpop.f32.mrb[45].mxu1  ;;  %v4236_v49 = vrot.slane %v4235_v43, 4  ;;  %v4307_v55 = vor.u32 %v4306_v38, %v4303_v15  ;;  %v4316_v42 = vrot.slane %v4314_v62, 4  ;;  %7824 = vmatprep.subr.bf16.mxu0 %v7953_v52 }
 0x387   : > { %v3875_v19 = vadd.f32 %v9693_v44, %v3836_v53  ;;  %v7821_v23 = vpop.f32.mrb[46].mxu1  ;;  %v4699_v20 = vshrl.u32 %v9874_v48, 16  ;;  %v4246_v12 = vrot.slane %v4245_v59, 4  ;;  %v7679_v28 = vpack.c.bf16 %v3904_v32, %v3904_v32  ;;  %7825 = vmatpush3.bf16.msra.mxu0 %v7953_v52 }
 0x388   : > { %v3873_v25 = vadd.f32 %v9693_v44, %v3834_v24  ;;  %v3790_v26 = vpop.f32.mrb[47].mxu1  ;;  %v4308_v60 = vrot.slane %v4307_v55, 4  ;;  %v4317_v21 = vor.u32 %v4316_v42, %v4312_v31  ;;  %v4758_v18 = vshrl.u32 %v4577_v36, 16 }
 0x389   : > { %v3907_v6 = vmax.f32 %v3875_v19, 0.0  ;;  %v4241_v10 = vsel %vm8137_vm2, %v4236_v49, %v4240_v30  ;;  %v4251_v39 = vsel %vm8137_vm2, %v4246_v12, %v9722_v54  ;;  %4124 = vst.msk [vmem:[#allocation3 + $0x90] sm:$0xf] %vm3913_vm14, %v7679_v28  ;;  %v4761_v46 = vshll.u32 %v4577_v36, 16  ;;  %v9946_v54 = vld [vmem:[#allocation3 + $0x4c] sm:$0xf] }
 0x38a   : > { %v3905_v33 = vmax.f32 %v3873_v25, 0.0  ;;  %v4691_v15 = vrot.slane %v4689_v34, 5  ;;  %v7506_v17 = vcombine.low %v4241_v10, %v4251_v39  ;;  %v4318_v43 = vrot.slane %v4317_v21, 4 }
 0x38b   : > { %v7682_v38 = vpack.c.bf16 %v3907_v6, %v3907_v6  ;;  %v4697_v30 = vrot.slane %v4695_v61, 5  ;;  %v4701_v62 = vrot.slane %v4699_v20, 4  ;;  %v4767_v59 = vshll.u32 %v4578_v7, 16 }
 0x38c   : > { %v7680_v53 = vpack.c.bf16 %v3905_v33, %v3905_v33  ;;  %5129 = vrot.lane.b32.xlu0 %v7506_v17, %s8017_s16  ;;  %v4313_v32 = vsel %vm8137_vm2, %v4308_v60, %v4312_v31  ;;  %v4323_v56 = vsel %vm8137_vm2, %v4318_v43, %v9725_v29  ;;  %v4771_v34 = vshrl.u32 %v4578_v7, 16  ;;  %v9992_v33 = vld [vmem:[#allocation3 + $0x34] sm:$0xf] }
 0x38d   : > { %4127 = vst.msk [vmem:[#allocation3 + $0xa0] sm:$0xf] %vm3913_vm14, %v7682_v38  ;;  %v4734_v48 = vshrl.u32 %v9940_v37, 16  ;;  %v7509_v61 = vcombine.low %v4313_v32, %v4323_v56  ;;  %v9957_v24 = vrot.slane %v4758_v18, 4  ;;  %v9959_v22 = vrot.slane %v4761_v46, 5 }
 0x38e   : > { %4125 = vst.msk [vmem:[#allocation3 + $0x94] sm:$0xf] %vm3913_vm14, %v7680_v53  ;;  %v7526_v49 = vcombine.low %v4577_v36, %v4578_v7  ;;  %v9961_v55 = vrot.slane %v4767_v59, 5  ;;  %v4737_v31 = vshll.u32 %v9940_v37, 16  ;;  %v7525_v29 = vcombine.low %v9940_v37, %v9946_v54  ;;  %v4146_v17 = vld [vmem:[#allocation3 + $0x54] sm:$0xf] }
 0x38f   : > { %v4743_v42 = vshll.u32 %v9946_v54, 16  ;;  %5135 = vrot.lane.b32.xlu1 %v7509_v61, %s8017_s16  ;;  %v9968_v19 = vrot.slane %v4771_v34, 4  ;;  %v3839_v52 = vmul.f32 %v7820_v50, %v9688_v8  ;;  %v4716_v20 = vor.u32 %v9861_v14, %v9859_v2  ;;  %v4147_v56 = vld [vmem:[#allocation3 + $0x58] sm:$0xf] }
 0x390   : > { %v4726_v36 = vor.u32 %v9878_v58, %v9871_v3  ;;  %5249 = vrot.lane.b32.xlu0 %v7526_v49, %s8014_s20  ;;  %v9976_v12 = vrot.slane %v4734_v48, 4  ;;  %v3837_v28 = vmul.f32 %v9688_v8, %v3787_v13  ;;  %v4692_v25 = vor.u32 %v4691_v15, %v9880_v63 }
 0x391   : > { %v4702_v60 = vor.u32 %v4701_v62, %v4697_v30  ;;  %v3878_v21 = vadd.f32 %v9693_v44, %v3839_v52  ;;  %v4717_v6 = vrot.slane %v4716_v20, 4  ;;  %v3840_v50 = vmul.f32 %v7821_v23, %v9688_v8  ;;  %v4140_v23 = vld [vmem:[#allocation3 + $0x30] sm:$0xf]  ;;  %v10006_v52 = vld [vmem:[#allocation3 + $0x6c] sm:$0xf] }
 0x392   : > { %v4727_v7 = vrot.slane %v4726_v36, 4  ;;  %v3876_v2 = vadd.f32 %v9693_v44, %v3837_v28  ;;  %v4693_v14 = vrot.slane %v4692_v25, 4  ;;  %v3838_v58 = vmul.f32 %v9688_v8, %v3790_v26 }
 0x393   : > { %v4703_v18 = vrot.slane %v4702_v60, 4  ;;  %5247 = vrot.lane.b32.xlu1 %v7525_v29, %s8014_s20  ;;  %v3910_v10 = vmax.f32 %v3878_v21, 0.0  ;;  %v4722_v63 = vsel %vm8137_vm2, %v4717_v6, %v9871_v3  ;;  %v3879_v39 = vadd.f32 %v9693_v44, %v3840_v50  ;;  %v4582_v50 = vld [vmem:[#allocation3 + $0x70] sm:$0xf] }
 0x394   : > { %v4732_v13 = vsel %vm8137_vm2, %v4727_v7, %v9727_v1  ;;  %v3908_v15 = vmax.f32 %v3876_v2, 0.0  ;;  %v4698_v8 = vsel %vm8137_vm2, %v4693_v14, %v4697_v30  ;;  %v3877_v1 = vadd.f32 %v9693_v44, %v3838_v58 }
 0x395   : > { %v7540_v46 = vcombine.low %v4722_v63, %v4732_v13  ;;  %v4708_v26 = vsel %vm8137_vm2, %v4703_v18, %v9730_v9  ;;  %v7685_v3 = vpack.c.bf16 %v3910_v10, %v3910_v10  ;;  %v3911_v38 = vmax.f32 %v3879_v39, 0.0  ;;  %v10014_v10 = vld [vmem:[#allocation3 + $0x60] sm:$0xf] }
 0x396   : > { %v7539_v43 = vcombine.low %v4698_v8, %v4708_v26  ;;  %v7683_v62 = vpack.c.bf16 %v3908_v15, %v3908_v15  ;;  %v4277_v53 = vshrl.u32 %v4140_v23, 16  ;;  %v4280_v59 = vshll.u32 %v4140_v23, 16 }
 0x397   : > { %5325 = vrot.lane.b32.xlu0 %v7540_v46, %s8010_s19  ;;  %v4286_v32 = vshll.u32 %v9992_v33, 16  ;;  %4130 = vst.msk [vmem:[#allocation3 + $0xb4] sm:$0xf] %vm3913_vm14, %v7685_v3  ;;  %v7686_v30 = vpack.c.bf16 %v3911_v38, %v3911_v38  ;;  %v3909_v9 = vmax.f32 %v3877_v1, 0.0  ;;  %v4290_v34 = vshrl.u32 %v9992_v33, 16 }
 0x398   : > { %5323 = vrot.lane.b32.xlu1 %v7539_v43, %s8010_s19  ;;  %v4349_v48 = vshrl.u32 %v4146_v17, 16  ;;  %4128 = vst.msk [vmem:[#allocation3 + $0xa8] sm:$0xf] %vm3913_vm14, %v7683_v62  ;;  %v4279_v44 = vrot.slane %v4277_v53, 4  ;;  %v4282_v61 = vrot.slane %v4280_v59, 5  ;;  %v4352_v29 = vshll.u32 %v4146_v17, 16 }
 0x399   : > { %v4288_v49 = vrot.slane %v4286_v32, 5  ;;  %4131 = vst.msk [vmem:[#allocation3 + $0xb8] sm:$0xf] %vm3913_vm14, %v7686_v30  ;;  %v7684_v20 = vpack.c.bf16 %v3909_v9, %v3909_v9  ;;  %v4292_v36 = vrot.slane %v4290_v34, 4  ;;  %v4358_v25 = vshll.u32 %v4147_v56, 16 }
 0x39a   : > { %v4351_v28 = vrot.slane %v4349_v48, 4  ;;  %v4747_v60 = vshrl.u32 %v9946_v54, 16  ;;  %v4283_v21 = vor.u32 %v4282_v61, %v4279_v44  ;;  %v4354_v6 = vrot.slane %v4352_v29, 5  ;;  %v4580_v32 = vld [vmem:[#allocation3 + $0x64] sm:$0xf] }
 0x39b   : > { %v4362_v7 = vshrl.u32 %v4147_v56, 16  ;;  %v4739_v2 = vrot.slane %v4737_v31, 5  ;;  %4129 = vst.msk [vmem:[#allocation3 + $0xac] sm:$0xf] %vm3913_vm14, %v7684_v20  ;;  %v4293_v14 = vor.u32 %v4292_v36, %v4288_v49  ;;  %v4360_v18 = vrot.slane %v4358_v25, 5 }
 0x39c   : > { %v4806_v58 = vshrl.u32 %v10006_v52, 16  ;;  %v4284_v63 = vrot.slane %v4283_v21, 4  ;;  %v4355_v13 = vor.u32 %v4354_v6, %v4351_v28  ;;  %v4809_v23 = vshll.u32 %v10006_v52, 16  ;;  %v10039_v34 = vld [vmem:[#allocation3 + $0x48] sm:$0xf] }
 0x39d   : > { %v4364_v39 = vrot.slane %v4362_v7, 4  ;;  %v4745_v46 = vrot.slane %v4743_v42, 5  ;;  %v4294_v15 = vrot.slane %v4293_v14, 4  ;;  %v4815_v8 = vshll.u32 %v4582_v50, 16  ;;  %v10050_v29 = vld [vmem:[#allocation3 + $0x4c] sm:$0xf] }
 0x39e   : > { %v4819_v37 = vshrl.u32 %v4582_v50, 16  ;;  %v4749_v31 = vrot.slane %v4747_v60, 4  ;;  %v4356_v26 = vrot.slane %v4355_v13, 4  ;;  %v4782_v3 = vshrl.u32 %v10014_v10, 16  ;;  %v10058_v6 = vld [vmem:[#allocation3 + $0x6c] sm:$0xf] }
 0x39f   : > { %v4365_v17 = vor.u32 %v4364_v39, %v4360_v18  ;;  %v4289_v43 = vsel %vm8137_vm2, %v4284_v63, %v4288_v49  ;;  %v4299_v38 = vsel %vm8137_vm2, %v4294_v15, %v9732_v16  ;;  %v10025_v1 = vrot.slane %v4806_v58, 4  ;;  %v10074_v39 = vld [vmem:[#allocation3 + $0x84] sm:$0xf] }
 0x3a0   : > { %v7528_v54 = vcombine.low %v10006_v52, %v4582_v50  ;;  %v7508_v42 = vcombine.low %v4289_v43, %v4299_v38  ;;  %v10028_v53 = vrot.slane %v4809_v23, 5  ;;  %v10030_v59 = vrot.slane %v4815_v8, 5 }
 0x3a1   : > { %v4366_v62 = vrot.slane %v4365_v17, 4  ;;  %v4361_v56 = vsel %vm8137_vm2, %v4356_v26, %v4360_v18  ;;  %v10034_v30 = vrot.slane %v4819_v37, 4  ;;  %v10036_v9 = vrot.slane %v4782_v3, 4  ;;  %v10067_v18 = vld [vmem:[#allocation3 + $0x70] sm:$0xf] }
 0x3a2   : > { %v4785_v16 = vshll.u32 %v10014_v10, 16  ;;  %5133 = vrot.lane.b32.xlu0 %v7508_v42, %s8017_s16  ;;  %v4764_v44 = vor.u32 %v9959_v22, %v9957_v24  ;;  %v4774_v61 = vor.u32 %v9968_v19, %v9961_v55  ;;  %v4740_v49 = vor.u32 %v4739_v2, %v9976_v12  ;;  %v4586_v3 = vld [vmem:[#allocation3 + $0x88] sm:$0xf] }
 0x3a3   : > { %v4371_v48 = vsel %vm8137_vm2, %v4366_v62, %v9734_v4  ;;  %v7527_v20 = vcombine.low %v10014_v10, %v4580_v32  ;;  %v4791_v36 = vshll.u32 %v4580_v32, 16  ;;  %v4750_v28 = vor.u32 %v4749_v31, %v4745_v46 }
 0x3a4   : > { %v7511_v52 = vcombine.low %v4361_v56, %v4371_v48  ;;  %v4765_v25 = vrot.slane %v4764_v44, 4  ;;  %v4775_v60 = vrot.slane %v4774_v61, 4  ;;  %v4741_v21 = vrot.slane %v4740_v49, 4 }
 0x3a5   : > { %v4325_v4 = vshrl.u32 %v10039_v34, 16  ;;  %v4751_v24 = vrot.slane %v4750_v28, 4  ;;  %v4328_v22 = vshll.u32 %v10039_v34, 16  ;;  %v4334_v19 = vshll.u32 %v10050_v29, 16  ;;  %v10085_v28 = vld [vmem:[#allocation3 + $0x78] sm:$0xf] }
 0x3a6   : > { %5139 = vrot.lane.b32.xlu1 %v7511_v52, %s8017_s16  ;;  %v4338_v12 = vshrl.u32 %v10050_v29, 16  ;;  %5253 = vrot.lane.b32.xlu0 %v7528_v54, %s8014_s20  ;;  %v4795_v7 = vshrl.u32 %v4580_v32, 16  ;;  %v4770_v50 = vsel %vm8137_vm2, %v4765_v25, %v9961_v55  ;;  %v4780_v2 = vsel %vm8137_vm2, %v4775_v60, %v9737_v41 }
 0x3a7   : > { %v4327_v14 = vrot.slane %v4325_v4, 4  ;;  %v4746_v58 = vsel %vm8137_vm2, %v4741_v21, %v4745_v46  ;;  %v4756_v10 = vsel %vm8137_vm2, %v4751_v24, %v9739_v40  ;;  %v4330_v63 = vrot.slane %v4328_v22, 5 }
 0x3a8   : > { %v4336_v13 = vrot.slane %v4334_v19, 5  ;;  %v7542_v23 = vcombine.low %v4770_v50, %v4780_v2  ;;  %v4340_v55 = vrot.slane %v4338_v12, 4  ;;  %v4397_v15 = vshrl.u32 %v10058_v6, 16 }
 0x3a9   : > { %v4400_v41 = vshll.u32 %v10058_v6, 16  ;;  %v7541_v8 = vcombine.low %v4746_v58, %v4756_v10  ;;  %v4331_v37 = vor.u32 %v4330_v63, %v4327_v14  ;;  %v4406_v46 = vshll.u32 %v10067_v18, 16 }
 0x3aa   : > { %5251 = vrot.lane.b32.xlu1 %v7527_v20, %s8014_s20  ;;  %v4410_v31 = vshrl.u32 %v10067_v18, 16  ;;  %5329 = vrot.lane.b32.xlu0 %v7542_v23, %s8010_s19  ;;  %v4341_v40 = vor.u32 %v4340_v55, %v4336_v13  ;;  %v4399_v26 = vrot.slane %v4397_v15, 4  ;;  %v4854_v43 = vshrl.u32 %v10074_v39, 16  ;;  %v10120_v15 = vld [vmem:[#allocation3 + $0x64] sm:$0xf] }
 0x3ab   : > { %v4402_v17 = vrot.slane %v4400_v41, 5  ;;  %v4332_v38 = vrot.slane %v4331_v37, 4  ;;  %v4408_v54 = vrot.slane %v4406_v46, 5  ;;  %v4857_v62 = vshll.u32 %v10074_v39, 16 }
 0x3ac   : > { %v4412_v42 = vrot.slane %v4410_v31, 4  ;;  %v4787_v32 = vrot.slane %v4785_v16, 5  ;;  %v4793_v56 = vrot.slane %v4791_v36, 5  ;;  %v4342_v48 = vrot.slane %v4341_v40, 4  ;;  %v10094_v36 = vld [vmem:[#allocation3 + $0x7c] sm:$0xf] }
 0x3ad   : > { %v4403_v44 = vor.u32 %v4402_v17, %v4399_v26  ;;  %v4797_v61 = vrot.slane %v4795_v7, 4  ;;  %v4863_v52 = vshll.u32 %v4586_v3, 16  ;;  %v4867_v20 = vshrl.u32 %v4586_v3, 16 }
 0x3ae   : > { %5327 = vrot.lane.b32.xlu1 %v7541_v8, %s8010_s19  ;;  %v4413_v49 = vor.u32 %v4412_v42, %v4408_v54  ;;  %v4337_v25 = vsel %vm8137_vm2, %v4332_v38, %v4336_v13  ;;  %v4347_v60 = vsel %vm8137_vm2, %v4342_v48, %v9741_v51  ;;  %v10092_v16 = vrot.slane %v4854_v43, 4  ;;  %v10105_v51 = vld [vmem:[#allocation3 + $0x60] sm:$0xf] }
 0x3af   : > { %v4404_v21 = vrot.slane %v4403_v44, 4  ;;  %v7510_v4 = vcombine.low %v4337_v25, %v4347_v60  ;;  %v10096_v22 = vrot.slane %v4857_v62, 5  ;;  %v7530_v19 = vcombine.low %v10074_v39, %v4586_v3  ;;  %v10135_v3 = vld [vmem:[#allocation3 + $0x88] sm:$0xf] }
 0x3b0   : > { %v4414_v24 = vrot.slane %v4413_v49, 4  ;;  %v10099_v12 = vrot.slane %v4863_v52, 5  ;;  %v10101_v7 = vrot.slane %v4867_v20, 4  ;;  %v4830_v50 = vshrl.u32 %v10085_v28, 16  ;;  %v4590_v20 = vld [vmem:[#allocation3 + $0xa0] sm:$0xf] }
 0x3b1   : > { %v4833_v2 = vshll.u32 %v10085_v28, 16  ;;  %5137 = vrot.lane.b32.xlu0 %v7510_v4, %s8017_s16  ;;  %v4409_v14 = vsel %vm8137_vm2, %v4404_v21, %v4408_v54  ;;  %v7529_v10 = vcombine.low %v10085_v28, %v10094_v36  ;;  %v4812_v63 = vor.u32 %v10028_v53, %v10025_v1 }
 0x3b2   : > { %v4419_v58 = vsel %vm8137_vm2, %v4414_v24, %v9745_v47  ;;  %v4822_v39 = vor.u32 %v10034_v30, %v10030_v59  ;;  %v4788_v23 = vor.u32 %v4787_v32, %v10036_v9  ;;  %v4798_v55 = vor.u32 %v4797_v61, %v4793_v56  ;;  %v10127_v30 = vld [vmem:[#allocation3 + $0x84] sm:$0xf] }
 0x3b3   : > { %v7513_v13 = vcombine.low %v4409_v14, %v4419_v58  ;;  %v4839_v41 = vshll.u32 %v10094_v36, 16  ;;  %v4843_v8 = vshrl.u32 %v10094_v36, 16  ;;  %v4813_v47 = vrot.slane %v4812_v63, 4 }
 0x3b4   : > { %v4373_v37 = vshrl.u32 %v10105_v51, 16  ;;  %v4823_v46 = vrot.slane %v4822_v39, 4  ;;  %v4789_v1 = vrot.slane %v4788_v23, 4  ;;  %v4799_v53 = vrot.slane %v4798_v55, 4  ;;  %v10158_v23 = vld [vmem:[#allocation3 + $0x90] sm:$0xf] }
 0x3b5   : > { %5143 = vrot.lane.b32.xlu1 %v7513_v13, %s8017_s16  ;;  %v4376_v31 = vshll.u32 %v10105_v51, 16  ;;  %5257 = vrot.lane.b32.xlu0 %v7530_v19, %s8014_s20  ;;  %v4818_v9 = vsel %vm8137_vm2, %v4813_v47, %v10030_v59  ;;  %v4382_v26 = vshll.u32 %v10120_v15, 16  ;;  %v4386_v17 = vshrl.u32 %v10120_v15, 16  ;;  %v10145_v59 = vld [vmem:[#allocation3 + $0x9c] sm:$0xf] }
 0x3b6   : > { %v4375_v40 = vrot.slane %v4373_v37, 4  ;;  %v4828_v43 = vsel %vm8137_vm2, %v4823_v46, %v9747_v0  ;;  %v4794_v38 = vsel %vm8137_vm2, %v4789_v1, %v4793_v56  ;;  %v4804_v54 = vsel %vm8137_vm2, %v4799_v53, %v9751_v35  ;;  %v10165_v37 = vld [vmem:[#allocation3 + $0x94] sm:$0xf] }
 0x3b7   : > { %v4378_v42 = vrot.slane %v4376_v31, 5  ;;  %v7544_v62 = vcombine.low %v4818_v9, %v4828_v43  ;;  %v7543_v32 = vcombine.low %v4794_v38, %v4804_v54  ;;  %v4384_v48 = vrot.slane %v4382_v26, 5  ;;  %v4606_v38 = vld [vmem:[#allocation3 + $0x80] sm:$0x1] }
 0x3b8   : > { %v4388_v44 = vrot.slane %v4386_v17, 4  ;;  %v4445_v49 = vshrl.u32 %v10127_v30, 16  ;;  %v4448_v0 = vshll.u32 %v10127_v30, 16  ;;  %v4454_v56 = vshll.u32 %v10135_v3, 16 }
 0x3b9   : > { %5255 = vrot.lane.b32.xlu1 %v7529_v10, %s8014_s20  ;;  %v4379_v61 = vor.u32 %v4378_v42, %v4375_v40  ;;  %5333 = vrot.lane.b32.xlu0 %v7544_v62, %s8010_s19  ;;  %v4458_v35 = vshrl.u32 %v10135_v3, 16  ;;  %v4902_v28 = vshrl.u32 %v10145_v59, 16  ;;  %v4905_v25 = vshll.u32 %v10145_v59, 16 }
 0x3ba   : > { %v4389_v52 = vor.u32 %v4388_v44, %v4384_v48  ;;  %v4447_v21 = vrot.slane %v4445_v49, 4  ;;  %v4450_v36 = vrot.slane %v4448_v0, 5  ;;  %v4456_v4 = vrot.slane %v4454_v56, 5 }
 0x3bb   : > { %v4380_v60 = vrot.slane %v4379_v61, 4  ;;  %v4832_v24 = vrot.slane %v4830_v50, 4  ;;  %v4835_v19 = vrot.slane %v4833_v2, 5  ;;  %v4460_v58 = vrot.slane %v4458_v35, 4 }
 0x3bc   : > { %v4390_v14 = vrot.slane %v4389_v52, 4  ;;  %v10155_v10 = vrot.slane %v4839_v41, 5  ;;  %v4845_v63 = vrot.slane %v4843_v8, 4  ;;  %v4451_v13 = vor.u32 %v4450_v36, %v4447_v21 }
 0x3bd   : > { %5331 = vrot.lane.b32.xlu1 %v7543_v32, %s8010_s19  ;;  %v4911_v39 = vshll.u32 %v4590_v20, 16  ;;  %v4385_v55 = vsel %vm8137_vm2, %v4380_v60, %v4384_v48  ;;  %v4461_v50 = vor.u32 %v4460_v58, %v4456_v4  ;;  %v4915_v2 = vshrl.u32 %v4590_v20, 16  ;;  %v10190_v32 = vld [vmem:[#allocation3 + $0x78] sm:$0xf]  ;;  %v10192_v48 = vld [vmem:[#allocation3 + $0x7c] sm:$0xf] }
 0x3be   : > { %v4395_v47 = vsel %vm8137_vm2, %v4390_v14, %v9753_v45  ;;  %v4452_v46 = vrot.slane %v4451_v13, 4  ;;  %v10167_v8 = vrot.slane %v4902_v28, 4  ;;  %v10169_v1 = vrot.slane %v4905_v25, 5  ;;  %v3960_v25 = vld [vmem:[#allocation3 + $0xa4] sm:$0x1] }
 0x3bf   : > { %v7512_v41 = vcombine.low %v4385_v55, %v4395_v47  ;;  %v4462_v53 = vrot.slane %v4461_v50, 4  ;;  %v7532_v31 = vcombine.low %v10145_v59, %v4590_v20  ;;  %v10172_v9 = vrot.slane %v4911_v39, 5  ;;  %v10213_v13 = vld [vmem:[#allocation3 + $0xa0] sm:$0xf] }
 0x3c0   : > { %v4878_v40 = vshrl.u32 %v10158_v23, 16  ;;  %v4457_v45 = vsel %vm8137_vm2, %v4452_v46, %v4456_v4  ;;  %v10178_v26 = vrot.slane %v4915_v2, 4  ;;  %v4881_v17 = vshll.u32 %v10158_v23, 16 }
 0x3c1   : > { %5141 = vrot.lane.b32.xlu0 %v7512_v41, %s8017_s16  ;;  %v7531_v43 = vcombine.low %v10158_v23, %v10165_v37  ;;  %v4467_v54 = vsel %vm8137_vm2, %v4462_v53, %v9772_v27  ;;  %v4860_v42 = vor.u32 %v10096_v22, %v10092_v16  ;;  %v4870_v59 = vor.u32 %v10101_v7, %v10099_v12  ;;  %v4174_v16 = vld [vmem:[#allocation3 + $0x80] sm:$0x1] }
 0x3c2   : > { %v4836_v62 = vor.u32 %v4835_v19, %v4832_v24  ;;  %v7515_v44 = vcombine.low %v4457_v45, %v4467_v54  ;;  %v4887_v61 = vshll.u32 %v10165_v37, 16  ;;  %v4891_v49 = vshrl.u32 %v10165_v37, 16  ;;  %v10211_v24 = vld [vmem:[#allocation3 + $0x9c] sm:$0xf] }
 0x3c3   : > { %v4846_v0 = vor.u32 %v4845_v63, %v10155_v10  ;;  %v4861_v56 = vrot.slane %v4860_v42, 4  ;;  %v4871_v27 = vrot.slane %v4870_v59, 4  ;;  %v4849_v35 = vshll.u32 %v4606_v38, 16 }
 0x3c4   : > { %v4837_v52 = vrot.slane %v4836_v62, 4  ;;  %5147 = vrot.lane.b32.xlu1 %v7515_v44, %s8017_s16  ;;  %v4421_v7 = vshrl.u32 %v10190_v32, 16  ;;  %v4424_v20 = vshll.u32 %v10190_v32, 16  ;;  %v4430_v28 = vshll.u32 %v10192_v48, 16  ;;  %v10230_v44 = vld [vmem:[#allocation3 + $0xa8] sm:$0xf] }
 0x3c5   : > { %5261 = vrot.lane.b32.xlu0 %v7532_v31, %s8014_s20  ;;  %v4847_v22 = vrot.slane %v4846_v0, 4  ;;  %v4866_v60 = vsel %vm8137_vm2, %v4861_v56, %v10099_v12  ;;  %v4876_v21 = vsel %vm8137_vm2, %v4871_v27, %v9774_v5  ;;  %v4851_v4 = vrot.slane %v4849_v35, 5 }
 0x3c6   : > { %v4842_v36 = vsel %vm8137_vm2, %v4837_v52, %v10155_v10  ;;  %v7546_v19 = vcombine.low %v4866_v60, %v4876_v21  ;;  %v4423_v14 = vrot.slane %v4421_v7, 4  ;;  %v4426_v58 = vrot.slane %v4424_v20, 5  ;;  %v3957_v52 = vld [vmem:[#allocation3 + $0x98] sm:$0x1] }
 0x3c7   : > { %v4432_v63 = vrot.slane %v4430_v28, 5  ;;  %v4852_v12 = vsel %vm8137_vm2, %v4847_v22, %v4851_v4  ;;  %v4434_v39 = vshrl.u32 %v10192_v48, 16  ;;  %v4440_v55 = vshll.u32 %v4174_v16, 16  ;;  %v10237_v22 = vld [vmem:[#allocation3 + $0x90] sm:$0xf] }
 0x3c8   : > { %v3961_v5 = vsel %vm9661_vm0, 0, %v3960_v25  ;;  %5259 = vrot.lane.b32.xlu1 %v7531_v43, %s8014_s20  ;;  %v7545_v10 = vcombine.low %v4842_v36, %v4852_v12  ;;  %v4427_v47 = vor.u32 %v4426_v58, %v4423_v14  ;;  %v4493_v50 = vshrl.u32 %v10211_v24, 16  ;;  %v10242_v28 = vld [vmem:[#allocation3 + $0x94] sm:$0xf]  ;;  %v4592_v14 = vld [vmem:[#allocation3 + $0xac] sm:$0xf] }
 0x3c9   : > { %5337 = vrot.lane.b32.xlu0 %v7546_v19, %s8010_s19  ;;  %3962 = vst [vmem:[#allocation3 + $0xa4] sm:$0x1] %v3961_v5  ;;  %v4496_v2 = vshll.u32 %v10211_v24, 16  ;;  %v4436_v37 = vrot.slane %v4434_v39, 4  ;;  %v4442_v41 = vrot.slane %v4440_v55, 5  ;;  %v4502_v46 = vshll.u32 %v10213_v13, 16 }
 0x3ca   : > { %v4506_v53 = vshrl.u32 %v10213_v13, 16  ;;  %v4428_v31 = vrot.slane %v4427_v47, 4  ;;  %v4495_v45 = vrot.slane %v4493_v50, 4  ;;  %v4908_v43 = vor.u32 %v10169_v1, %v10167_v8 }
 0x3cb   : > { %v4498_v38 = vrot.slane %v4496_v2, 5  ;;  %v4437_v54 = vor.u32 %v4436_v37, %v4432_v63  ;;  %v4504_v42 = vrot.slane %v4502_v46, 5  ;;  %v4918_v62 = vor.u32 %v10178_v26, %v10172_v9 }
 0x3cc   : > { %v4508_v59 = vrot.slane %v4506_v53, 4  ;;  %v4880_v0 = vrot.slane %v4878_v40, 4  ;;  %5335 = vrot.lane.b32.xlu1 %v7545_v10, %s8010_s19  ;;  %v4909_v27 = vrot.slane %v4908_v43, 4  ;;  %v4883_v35 = vrot.slane %v4881_v17, 5 }
 0x3cd   : > { %v4499_v56 = vor.u32 %v4498_v38, %v4495_v45  ;;  %v10235_v16 = vrot.slane %v4887_v61, 5  ;;  %v4438_v8 = vrot.slane %v4437_v54, 4  ;;  %v4893_v7 = vrot.slane %v4891_v49, 4  ;;  %v10263_v45 = vld [vmem:[#allocation3 + $0xb8] sm:$0xf] }
 0x3ce   : > { %v4509_v1 = vor.u32 %v4508_v59, %v4504_v42  ;;  %v4433_v26 = vsel %vm8137_vm2, %v4428_v31, %v4432_v63  ;;  %v4926_v40 = vshrl.u32 %v10230_v44, 16  ;;  %v4914_v61 = vsel %vm8137_vm2, %v4909_v27, %v10172_v9  ;;  %v10265_v59 = vld [vmem:[#allocation3 + $0xb4] sm:$0xf] }
 0x3cf   : > { %v4500_v20 = vrot.slane %v4499_v56, 4  ;;  %v4443_v25 = vsel %vm8137_vm2, %v4438_v8, %v4442_v41  ;;  %v4919_v60 = vrot.slane %v4918_v62, 4  ;;  %v4929_v49 = vshll.u32 %v10230_v44, 16 }
 0x3d0   : > { %v4177_v23 = vld [vmem:[#allocation3 + $0xa4] sm:$0x1]  ;;  %v7514_v21 = vcombine.low %v4433_v26, %v4443_v25  ;;  %v4510_v36 = vrot.slane %v4509_v1, 4  ;;  %v3958_v63 = vsel %vm9661_vm0, 0, %v3957_v52  ;;  %v4469_v12 = vshrl.u32 %v10237_v22, 16 }
 0x3d1   : > { %v4609_v17 = vld [vmem:[#allocation3 + $0xa4] sm:$0x1]  ;;  %v4512_v4 = vshll.u32 %v4177_v23, 16  ;;  %v4505_v58 = vsel %vm8137_vm2, %v4500_v20, %v4504_v42  ;;  %v4884_v39 = vor.u32 %v4883_v35, %v4880_v0  ;;  %3959 = vst [vmem:[#allocation3 + $0x98] sm:$0x1] %v3958_v63  ;;  %v4472_v5 = vshll.u32 %v10237_v22, 16 }
 0x3d2   : > { %v4921_v19 = vshll.u32 %v4609_v17, 16  ;;  %5145 = vrot.lane.b32.xlu0 %v7514_v21, %s8017_s16  ;;  %v4478_v10 = vshll.u32 %v10242_v28, 16  ;;  %v4935_v47 = vshll.u32 %v4592_v14, 16  ;;  %v4939_v50 = vshrl.u32 %v4592_v14, 16  ;;  %v3966_v52 = vld [vmem:[#allocation3 + $0xbc] sm:$0x1] }
 0x3d3   : > { %v4514_v9 = vrot.slane %v4512_v4, 5  ;;  %v4471_v2 = vrot.slane %v4469_v12, 4  ;;  %v4482_v37 = vshrl.u32 %v10242_v28, 16  ;;  %v4474_v53 = vrot.slane %v4472_v5, 5  ;;  %v10279_v20 = vld [vmem:[#allocation3 + $0xb4] sm:$0xf]  ;;  %v10302_v5 = vpop.permute.xlu0 %5237 }
 0x3d4   : > { %v4923_v55 = vrot.slane %v4921_v19, 5  ;;  %v4480_v31 = vrot.slane %v4478_v10, 5  ;;  %v4885_v42 = vrot.slane %v4884_v39, 4  ;;  %v10267_v62 = vrot.slane %v4926_v40, 4  ;;  %v10283_v17 = vld [vmem:[#allocation3 + $0xb8] sm:$0xf] }
 0x3d5   : > { %v4515_v41 = vsel %vm8137_vm2, %v4510_v36, %v4514_v9  ;;  %v4484_v54 = vrot.slane %v4482_v37, 4  ;;  %v10269_v0 = vrot.slane %v4929_v49, 5  ;;  %v4475_v56 = vor.u32 %v4474_v53, %v4471_v2  ;;  %v3963_v39 = vld [vmem:[#allocation3 + $0xb0] sm:$0x1] }
 0x3d6   : > { %v4924_v46 = vsel %vm8137_vm2, %v4919_v60, %v4923_v55  ;;  %v7517_v38 = vcombine.low %v4505_v58, %v4515_v41  ;;  %v4894_v27 = vor.u32 %v4893_v7, %v10235_v16  ;;  %v10274_v35 = vrot.slane %v4935_v47, 5  ;;  %v10300_v55 = vld [vmem:[#allocation3 + $0xa8] sm:$0xf] }
 0x3d7   : > { %v7548_v43 = vcombine.low %v4914_v61, %v4924_v46  ;;  %v10276_v8 = vrot.slane %v4939_v50, 4  ;;  %v4485_v1 = vor.u32 %v4484_v54, %v4480_v31  ;;  %v4959_v26 = vshll.u32 %v10263_v45, 16 }
 0x3d8   : > { %5151 = vrot.lane.b32.xlu1 %v7517_v38, %s8017_s16  ;;  %v4476_v40 = vrot.slane %v4475_v56, 4  ;;  %v4895_v25 = vrot.slane %v4894_v27, 4  ;;  %v4950_v23 = vshrl.u32 %v10265_v59, 16  ;;  %v4953_v7 = vshll.u32 %v10265_v59, 16  ;;  %v4176_v60 = vld [vmem:[#allocation3 + $0x98] sm:$0x1] }
 0x3d9   : > { %5341 = vrot.lane.b32.xlu0 %v7548_v43, %s8010_s19  ;;  %v7533_v61 = vcombine.low %v10230_v44, %v4592_v14  ;;  %v4486_v49 = vrot.slane %v4485_v1, 4  ;;  %v4608_v21 = vld [vmem:[#allocation3 + $0x98] sm:$0x1]  ;;  %v4890_v36 = vsel %vm8137_vm2, %v4885_v42, %v10235_v16  ;;  %v10289_v4 = vrot.slane %v4959_v26, 5  ;;  %v10315_v26 = vpop.permute.xlu0 %5241 }
 0x3da   : > { %v4481_v19 = vsel %vm8137_vm2, %v4476_v40, %v4480_v31  ;;  %v4488_v58 = vshll.u32 %v4176_v60, 16  ;;  %v4897_v63 = vshll.u32 %v4608_v21, 16  ;;  %v4963_v12 = vshrl.u32 %v10263_v45, 16  ;;  %v10307_v31 = vld [vmem:[#allocation3 + $0xac] sm:$0xf] }
 0x3db   : > { %v3967_v44 = vsel %vm9661_vm0, 0, %v3966_v52  ;;  %v4541_v14 = vshrl.u32 %v10279_v20, 16  ;;  %v4544_v9 = vshll.u32 %v10279_v20, 16  ;;  %v4550_v16 = vshll.u32 %v10283_v17, 16 }
 0x3dc   : > { %5263 = vrot.lane.b32.xlu1 %v7533_v61, %s8014_s20  ;;  %v4490_v10 = vrot.slane %v4488_v58, 5  ;;  %v4899_v47 = vrot.slane %v4897_v63, 5  ;;  %v4965_v50 = vrot.slane %v4963_v12, 4  ;;  %3968 = vst [vmem:[#allocation3 + $0xbc] sm:$0x1] %v3967_v44  ;;  %v4554_v2 = vshrl.u32 %v10283_v17, 16 }
 0x3dd   : > { %v4543_v37 = vrot.slane %v4541_v14, 4  ;;  %v4546_v41 = vrot.slane %v4544_v9, 5  ;;  %v4552_v46 = vrot.slane %v4550_v16, 5  ;;  %v3964_v53 = vsel %vm9661_vm0, 0, %v3963_v39  ;;  %v10325_v39 = vpop.permute.xlu1 %5127 }
 0x3de   : > { %v4491_v38 = vsel %vm8137_vm2, %v4486_v49, %v4490_v10  ;;  %v4900_v43 = vsel %vm8137_vm2, %v4895_v25, %v4899_v47  ;;  %v4556_v54 = vrot.slane %v4554_v2, 4  ;;  %3965 = vst [vmem:[#allocation3 + $0xb0] sm:$0x1] %v3964_v53  ;;  %v4517_v42 = vshrl.u32 %v10300_v55, 16 }
 0x3df   : > { %v7516_v56 = vcombine.low %v4481_v19, %v4491_v38  ;;  %v7547_v27 = vcombine.low %v4890_v36, %v4900_v43  ;;  %v4547_v52 = vor.u32 %v4546_v41, %v4543_v37  ;;  %v4520_v1 = vshll.u32 %v10300_v55, 16  ;;  %v5318_v38 = vpop.permute.xlu0 %5317 }
 0x3e0   : > { %v4557_v40 = vor.u32 %v4556_v54, %v4552_v46  ;;  %v4519_v61 = vrot.slane %v4517_v42, 4  ;;  %v4526_v60 = vshll.u32 %v10307_v31, 16  ;;  %v4530_v49 = vshrl.u32 %v10307_v31, 16 }
 0x3e1   : > { %5149 = vrot.lane.b32.xlu0 %v7516_v56, %s8017_s16  ;;  %5339 = vrot.lane.b32.xlu1 %v7547_v27, %s8010_s19  ;;  %v4952_v25 = vrot.slane %v4950_v23, 4  ;;  %v4955_v21 = vrot.slane %v4953_v7, 5  ;;  %v4522_v58 = vrot.slane %v4520_v1, 5  ;;  %v4942_v36 = vor.u32 %v10276_v8, %v10274_v35 }
 0x3e2   : > { %v7534_v19 = vcombine.low %v10265_v59, %v10263_v45  ;;  %v4528_v63 = vrot.slane %v4526_v60, 5  ;;  %v4532_v12 = vrot.slane %v4530_v49, 4  ;;  %v4548_v14 = vrot.slane %v4547_v52, 4  ;;  %v3918_v49 = vld [vmem:[#allocation3 + $0xc8] sm:$0x1] }
 0x3e3   : > { %v4179_v44 = vld [vmem:[#allocation3 + $0xbc] sm:$0x1]  ;;  %v4523_v9 = vor.u32 %v4522_v58, %v4519_v61  ;;  %v4932_v16 = vor.u32 %v10269_v0, %v10267_v62  ;;  %v4966_v23 = vor.u32 %v4965_v50, %v10289_v4  ;;  %v4558_v7 = vrot.slane %v4557_v40, 4  ;;  %v5240_v61 = vpop.permute.xlu1 %5239 }
 0x3e4   : > { %v4611_v10 = vld [vmem:[#allocation3 + $0xbc] sm:$0x1]  ;;  %v4560_v47 = vshll.u32 %v4179_v44, 16  ;;  %v4533_v2 = vor.u32 %v4532_v12, %v4528_v63  ;;  %v4943_v41 = vrot.slane %v4942_v36, 4  ;;  %v4956_v53 = vor.u32 %v4955_v21, %v4952_v25 }
 0x3e5   : > { %v4969_v8 = vshll.u32 %v4611_v10, 16  ;;  %5265 = vrot.lane.b32.xlu0 %v7534_v19, %s8014_s20  ;;  %v4178_v45 = vld [vmem:[#allocation3 + $0xb0] sm:$0x1]  ;;  %v4524_v59 = vrot.slane %v4523_v9, 4  ;;  %v4553_v62 = vsel %vm8137_vm2, %v4548_v14, %v4552_v46  ;;  %v4933_v0 = vrot.slane %v4932_v16, 4 }
 0x3e6   : > { %v4610_v37 = vld [vmem:[#allocation3 + $0xb0] sm:$0x1]  ;;  %v4562_v43 = vrot.slane %v4560_v47, 5  ;;  %v4534_v54 = vrot.slane %v4533_v2, 4  ;;  %v4536_v42 = vshll.u32 %v4178_v45, 16  ;;  %v4967_v50 = vrot.slane %v4966_v23, 4 }
 0x3e7   : > { %v4945_v56 = vshll.u32 %v4610_v37, 16  ;;  %v4971_v40 = vrot.slane %v4969_v8, 5  ;;  %v4529_v25 = vsel %vm8137_vm2, %v4524_v59, %v4528_v63  ;;  %v4957_v58 = vrot.slane %v4956_v53, 4  ;;  %v5126_v19 = vpop.permute.xlu0 %5125  ;;  %v7989_v14 = vld [vmem:[#allocation3] sm:$0xf] }
 0x3e8   : > { %v4563_v27 = vsel %vm8137_vm2, %v4558_v7, %v4562_v43  ;;  %v4538_v52 = vrot.slane %v4536_v42, 5  ;;  %v4938_v12 = vsel %vm8137_vm2, %v4933_v0, %v10274_v35  ;;  %v3919_v63 = vsel %vm9661_vm0, 0, %v3918_v49  ;;  %v7990_v9 = vld [vmem:[#allocation3 + $0x4] sm:$0xf]  ;;  %v4595_v7 = vld [vmem:[#allocation3 + $0xc0] sm:$0xf] }
 0x3e9   : > { %v4947_v1 = vrot.slane %v4945_v56, 5  ;;  %v7519_v60 = vcombine.low %v4553_v62, %v4563_v27  ;;  %v4972_v44 = vsel %vm8137_vm2, %v4967_v50, %v4971_v40  ;;  %v7488_v16 = vcombine.low %v7989_v14, %v7990_v9  ;;  %3920 = vst [vmem:[#allocation3 + $0xc8] sm:$0x1] %v3919_v63  ;;  %v4596_v47 = vld [vmem:[#allocation3 + $0xc4] sm:$0xf] }
 0x3ea   : > { %v4539_v21 = vsel %vm8137_vm2, %v4534_v54, %v4538_v52  ;;  %v4962_v35 = vsel %vm8137_vm2, %v4957_v58, %v10289_v4  ;;  %v7535_v45 = vcombine.low %v4595_v7, %v4596_v47  ;;  %v4974_v37 = vshrl.u32 %v4595_v7, 16  ;;  %v7991_v4 = vld [vmem:[#allocation3 + $0xc] sm:$0xf]  ;;  %v7992_v56 = vld [vmem:[#allocation3 + $0x10] sm:$0xf] }
 0x3eb   : > { %v4948_v46 = vsel %vm8137_vm2, %v4943_v41, %v4947_v1  ;;  %5155 = vrot.lane.b32.xlu1 %v7519_v60, %s8017_s16  ;;  %v7518_v36 = vcombine.low %v4529_v25, %v4539_v21  ;;  %v5352_v2 = vsel %vm5349_vm1, %v7488_v16, %v5126_v19  ;;  %v7550_v8 = vcombine.low %v4962_v35, %v4972_v44  ;;  %v5246_v50 = vpop.permute.xlu0 %5245 }
 0x3ec   : > { %v10349_v10 = vpop.permute.xlu1 %5131  ;;  %v7549_v23 = vcombine.low %v4938_v12, %v4948_v46  ;;  %v5399_v59 = vsel %vm3462_vm11, %v5352_v2, %v10302_v5  ;;  %v4977_v41 = vshll.u32 %v4595_v7, 16  ;;  %v4983_v54 = vshll.u32 %v4596_v47, 16  ;;  %v7993_v7 = vld [vmem:[#allocation3 + $0x18] sm:$0xf] }
 0x3ed   : > { %5153 = vrot.lane.b32.xlu0 %v7518_v36, %s8017_s16  ;;  %v5431_v53 = vsel %vm1630_vm4, %v5399_v59, %v5318_v38  ;;  %v4987_v42 = vshrl.u32 %v4596_v47, 16  ;;  %v7489_v62 = vcombine.low %v7991_v4, %v7992_v56  ;;  %v7496_v0 = vcombine.low %v10105_v51, %v10120_v15  ;;  %v7995_v4 = vld [vmem:[#allocation3 + $0x24] sm:$0xf]  ;;  %v7996_v56 = vld [vmem:[#allocation3 + $0x28] sm:$0xf] }
 0x3ee   : > { %7826 = vmatprep.mubr.msk.bf16.mxu0 %vm3511_vm12, %v5431_v53  ;;  %v7499_v5 = vcombine.low %v10127_v30, %v10135_v3  ;;  %v7498_v38 = vcombine.low %v10190_v32, %v10192_v48  ;;  %v7501_v27 = vcombine.low %v10211_v24, %v10213_v13  ;;  %v7500_v52 = vcombine.low %v10237_v22, %v10242_v28 }
 0x3ef   : > { %5343 = vrot.lane.b32.xlu1 %v7549_v23, %s8010_s19  ;;  %v7503_v1 = vcombine.low %v10279_v20, %v10283_v17  ;;  %v7502_v40 = vcombine.low %v10300_v55, %v10307_v31  ;;  %v4976_v60 = vrot.slane %v4974_v37, 4  ;;  %v4979_v49 = vrot.slane %v4977_v41, 5 }
 0x3f0   : > { %v5244_v43 = vpop.permute.xlu1 %5243  ;;  %v3969_v25 = vld [vmem:[#allocation3 + $0xc8] sm:$0x1]  ;;  %v5355_v21 = vsel %vm5349_vm1, %v7489_v62, %v10325_v39  ;;  %v4985_v19 = vrot.slane %v4983_v54, 5  ;;  %v4989_v12 = vrot.slane %v4987_v42, 4  ;;  %v7994_v39 = vld [vmem:[#allocation3 + $0x1c] sm:$0xf]  ;;  %v7491_v62 = vcombine.low %v7995_v4, %v7996_v56 }
 0x3f1   : > { %5345 = vrot.lane.b32.xlu0 %v7550_v8, %s8010_s19  ;;  %v3970_v46 = vsel %vm9661_vm0, 0, %v3969_v25  ;;  %v5401_v58 = vsel %vm3462_vm11, %v5355_v21, %v5240_v61  ;;  %v4980_v63 = vor.u32 %v4979_v49, %v4976_v60  ;;  %v7490_v35 = vcombine.low %v7993_v7, %v7994_v39 }
 0x3f2   : > { %3971 = vst [vmem:[#allocation3 + $0xc8] sm:$0x1] %v3970_v46  ;;  %v4990_v9 = vor.u32 %v4989_v12, %v4985_v19  ;;  %v5361_v60 = vsel %vm5349_vm1, %v7491_v62, %v10349_v10 }
 0x3f3   : > { %5267 = vrot.lane.b32.xlu1 %v7535_v45, %s8014_s20  ;;  %v5322_v14 = vpop.permute.xlu0 %5321  ;;  %v4981_v16 = vrot.slane %v4980_v63, 4 }
 0x3f4   : > { %v4991_v57 = vrot.slane %v4990_v9, 4  ;;  %v7998_v9 = vld [vmem:[#allocation3 + $0x3c] sm:$0xf] }
 0x3f5   : > { %v5320_v36 = vpop.permute.xlu1 %5319  ;;  %v4986_v8 = vsel %vm8137_vm2, %v4981_v16, %v4985_v19  ;;  %v7999_v16 = vld [vmem:[#allocation3 + $0x40] sm:$0xf] }
 0x3f6   : > { %v5433_v44 = vsel %vm1630_vm4, %v5401_v58, %v5320_v36  ;;  %v7997_v58 = vld [vmem:[#allocation3 + $0x30] sm:$0xf] }
 0x3f7   : > { %7827 = vmatmul.mubr.msk.bf16.vlgmr.msra.gmra.mrb[16].mxu0 %vm3511_vm12, %v5433_v44  ;;  %v7492_v36 = vcombine.low %v7997_v58, %v9992_v33  ;;  %v7497_v58 = vcombine.low %v10058_v6, %v10067_v18 }
 0x3f9   : > { %v4612_v23 = vld [vmem:[#allocation3 + $0xc8] sm:$0x1] }
 0x3fa   : > { %v4993_v47 = vshll.u32 %v4612_v23, 16  ;;  %v7493_v23 = vcombine.low %v7998_v9, %v7999_v16 }
 0x3fc   : > { %v4995_v45 = vrot.slane %v4993_v47, 5 }
 0x3fe   : > { %v5130_v2 = vpop.permute.xlu0 %5129  ;;  %v4996_v53 = vsel %vm8137_vm2, %v4991_v57, %v4995_v45 }
 0x3ff   : > { %v5358_v61 = vsel %vm5349_vm1, %v7490_v35, %v5130_v2  ;;  %v7551_v54 = vcombine.low %v4986_v8, %v4996_v53  ;;  %v8001_v53 = vld [vmem:[#allocation3 + $0x58] sm:$0xf] }
 0x400   : > { %v5403_v59 = vsel %vm3462_vm11, %v5358_v61, %v10315_v26  ;;  %v5405_v26 = vsel %vm3462_vm11, %v5361_v60, %v5244_v43 }
 0x401   : > { %v5136_v37 = vpop.permute.xlu1 %5135  ;;  %v5435_v41 = vsel %vm1630_vm4, %v5403_v59, %v5322_v14  ;;  %5347 = vrot.lane.b32.xlu1 %v7551_v54, %s8010_s19 }
 0x402   : > { %7830 = vmatprep.mubr.msk.bf16.mxu0 %vm3511_vm12, %v5435_v41  ;;  %v5250_v49 = vpop.permute.xlu0 %5249  ;;  %v5367_v39 = vsel %vm5349_vm1, %v7493_v23, %v5136_v37  ;;  %v8000_v41 = vld [vmem:[#allocation3 + $0x54] sm:$0xf] }
 0x403   : > { %v7495_v54 = vcombine.low %v8000_v41, %v8001_v53 }
 0x405   : > { %v5248_v42 = vpop.permute.xlu1 %5247 }
 0x406   : > { %v5409_v33 = vsel %vm3462_vm11, %v5367_v39, %v5248_v42 }
 0x409   : > { %v5326_v46 = vpop.permute.xlu0 %5325 }
 0x40a   : > { %v5324_v25 = vpop.permute.xlu1 %5323 }
 0x40b   : > { %v5437_v21 = vsel %vm1630_vm4, %v5405_v26, %v5324_v25 }
 0x40c   : > { %7831 = vmatmul.mubr.msk.bf16.gmra.mrb[20].mxu0 %vm3511_vm12, %v5437_v21 }
 0x414   : > { %v5134_v19 = vpop.permute.xlu0 %5133 }
 0x415   : > { %v5364_v12 = vsel %vm5349_vm1, %v7492_v36, %v5134_v19 }
 0x416   : > { %v5407_v44 = vsel %vm3462_vm11, %v5364_v12, %v5246_v50  ;;  %v7494_v50 = vcombine.low %v10039_v34, %v10050_v29 }
 0x417   : > { %v5439_v10 = vsel %vm1630_vm4, %v5407_v44, %v5326_v46 }
 0x418   : > { %v5140_v63 = vpop.permute.xlu1 %5139  ;;  %7834 = vmatprep.mubr.msk.bf16.mxu0 %vm3511_vm12, %v5439_v10  ;;  %v5254_v43 = vpop.permute.xlu0 %5253 }
 0x419   : > { %v5373_v4 = vsel %vm5349_vm1, %v7495_v54, %v5140_v63 }
 0x41c   : > { %v5252_v14 = vpop.permute.xlu1 %5251  ;;  %v5330_v7 = vpop.permute.xlu0 %5329 }
 0x41d   : > { %v5413_v34 = vsel %vm3462_vm11, %v5373_v4, %v5252_v14 }
 0x420   : > { %v5328_v35 = vpop.permute.xlu1 %5327 }
 0x421   : > { %v5441_v57 = vsel %vm1630_vm4, %v5409_v33, %v5328_v35 }
 0x422   : > { %7835 = vmatmul.mubr.msk.bf16.gmra.mrb[24].mxu0 %vm3511_vm12, %v5441_v57 }
 0x423   : > { %v5138_v47 = vpop.permute.xlu0 %5137 }
 0x424   : > { %v5370_v2 = vsel %vm5349_vm1, %v7494_v50, %v5138_v47 }
 0x425   : > { %v5411_v61 = vsel %vm3462_vm11, %v5370_v2, %v5250_v49  ;;  %v10481_v2 = vld [vmem:[%s11427_s9] ss:$0 sm:$0xff] }
 0x426   : > { %v5443_v45 = vsel %vm1630_vm4, %v5411_v61, %v5330_v7 }
 0x427   : > { %v5144_v8 = vpop.permute.xlu1 %5143  ;;  %7838 = vmatprep.mubr.msk.bf16.mxu0 %vm3511_vm12, %v5443_v45  ;;  %v5258_v59 = vpop.permute.xlu0 %5257 }
 0x428   : > { %v5379_v36 = vsel %vm5349_vm1, %v7497_v58, %v5144_v8 }
 0x42b   : > { %v5256_v37 = vpop.permute.xlu1 %5255  ;;  %v5334_v42 = vpop.permute.xlu0 %5333 }
 0x42c   : > { %v5417_v19 = vsel %vm3462_vm11, %v5379_v36, %v5256_v37 }
 0x42f   : > { %v5332_v29 = vpop.permute.xlu1 %5331 }
 0x430   : > { %v5445_v56 = vsel %vm1630_vm4, %v5413_v34, %v5332_v29 }
 0x431   : > { %7839 = vmatmul.mubr.msk.bf16.gmra.mrb[28].mxu0 %vm3511_vm12, %v5445_v56 }
 0x433   : > { %v5142_v62 = vpop.permute.xlu0 %5141 }
 0x434   : > { %v5376_v60 = vsel %vm5349_vm1, %v7496_v0, %v5142_v62 }
 0x435   : > { %v5415_v49 = vsel %vm3462_vm11, %v5376_v60, %v5254_v43 }
 0x436   : > { %v5447_v26 = vsel %vm1630_vm4, %v5415_v49, %v5334_v42  ;;  %v5148_v25 = vpop.permute.xlu1 %5147 }
 0x437   : > { %7842 = vmatprep.mubr.msk.bf16.mxu0 %vm3511_vm12, %v5447_v26  ;;  %v5262_v21 = vpop.permute.xlu0 %5261  ;;  %v5385_v14 = vsel %vm5349_vm1, %v7499_v5, %v5148_v25 }
 0x43a   : > { %v5260_v46 = vpop.permute.xlu1 %5259 }
 0x43b   : > { %v5338_v12 = vpop.permute.xlu0 %5337  ;;  %v5421_v9 = vsel %vm3462_vm11, %v5385_v14, %v5260_v46 }
 0x43e   : > { %v5336_v51 = vpop.permute.xlu1 %5335 }
 0x43f   : > { %v5449_v15 = vsel %vm1630_vm4, %v5417_v19, %v5336_v51 }
 0x440   : > { %7843 = vmatmul.mubr.msk.bf16.gmra.mrb[32].mxu0 %vm3511_vm12, %v5449_v15 }
 0x444   : > { %v5146_v0 = vpop.permute.xlu0 %5145 }
 0x445   : > { %v5382_v44 = vsel %vm5349_vm1, %v7498_v38, %v5146_v0 }
 0x446   : > { %v5419_v63 = vsel %vm3462_vm11, %v5382_v44, %v5258_v59 }
 0x447   : > { %v5451_v6 = vsel %vm1630_vm4, %v5419_v63, %v5338_v12 }
 0x448   : > { %7846 = vmatprep.mubr.msk.bf16.mxu0 %vm3511_vm12, %v5451_v6 }
 0x44a   : > { %v5152_v18 = vpop.permute.xlu1 %5151 }
 0x44b   : > { %v5342_v10 = vpop.permute.xlu0 %5341  ;;  %v5391_v22 = vsel %vm5349_vm1, %v7501_v27, %v5152_v18 }
 0x44e   : > { %v5264_v43 = vpop.permute.xlu1 %5263 }
 0x453   : > { %v5150_v16 = vpop.permute.xlu0 %5149  ;;  %v5340_v32 = vpop.permute.xlu1 %5339 }
 0x454   : > { %v5388_v48 = vsel %vm5349_vm1, %v7500_v52, %v5150_v16  ;;  %v5453_v38 = vsel %vm1630_vm4, %v5421_v9, %v5340_v32  ;;  %v5425_v52 = vsel %vm3462_vm11, %v5391_v22, %v5264_v43 }
 0x455   : > { %v5423_v23 = vsel %vm3462_vm11, %v5388_v48, %v5262_v21  ;;  %7847 = vmatmul.mubr.msk.bf16.gmra.mrb[36].mxu0 %vm3511_vm12, %v5453_v38 }
 0x456   : > { %v5455_v7 = vsel %vm1630_vm4, %v5423_v23, %v5342_v10 }
 0x457   : > { %7850 = vmatprep.mubr.msk.bf16.mxu0 %vm3511_vm12, %v5455_v7  ;;  %v5266_v30 = vpop.permute.xlu0 %5265 }
 0x45d   : > { %v5156_v3 = vpop.permute.xlu1 %5155 }
 0x45e   : > { %v5397_v13 = vsel %vm5349_vm1, %v7503_v1, %v5156_v3 }
 0x45f   : > { %v5154_v5 = vpop.permute.xlu0 %5153 }
 0x460   : > { %v5394_v28 = vsel %vm5349_vm1, %v7502_v40, %v5154_v5  ;;  %v10476_v40 = vld [vmem:[%s11426_s8] ss:$0 sm:$0xff] }
 0x461   : > { %v5344_v39 = vpop.permute.xlu1 %5343  ;;  %v5427_v35 = vsel %vm3462_vm11, %v5394_v28, %v5266_v30 }
 0x462   : > { %v5457_v33 = vsel %vm1630_vm4, %v5425_v52, %v5344_v39 }
 0x463   : > { %7851 = vmatmul.mubr.msk.bf16.gmra.mrb[40].mxu0 %vm3511_vm12, %v5457_v33  ;;  %v5346_v57 = vpop.permute.xlu0 %5345 }
 0x464   : > { %v5459_v50 = vsel %vm1630_vm4, %v5427_v35, %v5346_v57  ;;  %v10511_v35 = vld [vmem:[#allocation2 + $0xc] sm:$0xf] }
 0x465   : > { %7854 = vmatprep.mubr.msk.bf16.mxu0 %vm3511_vm12, %v5459_v50  ;;  %v5268_v24 = vpop.permute.xlu1 %5267  ;;  %v10513_v50 = vld [vmem:[#allocation2 + $0x10] sm:$0xf] }
 0x466   : > { %v5429_v55 = vsel %vm3462_vm11, %v5397_v13, %v5268_v24  ;;  %v10516_v24 = vld [vmem:[#allocation2 + $0x18] sm:$0xf]  ;;  %v5854_v13 = vshrl.u32 %v10511_v35, 16 }
 0x473   : > { %v5348_v31 = vpop.permute.xlu1 %5347 }
 0x474   : > { %v5461_v27 = vsel %vm1630_vm4, %v5429_v55, %v5348_v31  ;;  %v10520_v55 = vld [vmem:[#allocation2 + $0x1c] sm:$0xf]  ;;  %v5857_v31 = vshll.u32 %v10511_v35, 16 }
 0x475   : > { %7855 = vmatmul.mubr.msk.bf16.gmra.mrb[44].mxu0 %vm3511_vm12, %v5461_v27  ;;  %v5863_v27 = vshll.u32 %v10513_v50, 16 }
 0x4ca   : > { %v7828_v47 = vpop.f32.mrb[16].mxu0 }
 0x4cb   : > { %v5680_v20 = vmul.f32 %v7828_v47, %v10476_v40  ;;  %v5544_v17 = vpop.f32.mrb[17].mxu0  ;;  %v5867_v47 = vshrl.u32 %v10513_v50, 16 }
 0x4cc   : > { %v5678_v1 = vmul.f32 %v10476_v40, %v5544_v17  ;;  %v7829_v61 = vpop.f32.mrb[18].mxu0  ;;  %v6353_v17 = vshll.u32 %v10516_v24, 16 }
 0x4cd   : > { %v5719_v8 = vadd.f32 %v10481_v2, %v5680_v20  ;;  %v5681_v45 = vmul.f32 %v7829_v61, %v10476_v40  ;;  %v5547_v59 = vpop.f32.mrb[19].mxu0  ;;  %v6350_v20 = vshrl.u32 %v10516_v24, 16  ;;  %v6359_v61 = vshll.u32 %v10520_v55, 16 }
 0x4ce   : > { %v5717_v37 = vadd.f32 %v10481_v2, %v5678_v1  ;;  %v5679_v41 = vmul.f32 %v10476_v40, %v5547_v59 }
 0x4cf   : > { %v5720_v53 = vadd.f32 %v10481_v2, %v5681_v45  ;;  %v5751_v42 = vmax.f32 %v5719_v8, 0.0  ;;  %v6363_v8 = vshrl.u32 %v10520_v55, 16 }
 0x4d0   : > { %v5718_v54 = vadd.f32 %v10481_v2, %v5679_v41  ;;  %v5749_v34 = vmax.f32 %v5717_v37, 0.0  ;;  %v5856_v37 = vrot.slane %v5854_v13, 4 }
 0x4d1   : > { %v5752_v4 = vmax.f32 %v5720_v53, 0.0 }
 0x4d2   : > { %v5750_v29 = vmax.f32 %v5718_v54, 0.0  ;;  %v5814_v54 = vld [vmem:[#allocation2 + $0x14] sm:$0x1] }
 0x4d3   : > { %v6806_v56 = vpack.c.bf16 %v5752_v4, %v5751_v42  ;;  %v5859_v42 = vrot.slane %v5857_v31, 5  ;;  %v10531_v4 = vrot.slane %v5863_v27, 5 }
 0x4d4   : > { %v6805_v62 = vpack.c.bf16 %v5750_v29, %v5749_v34  ;;  %v5869_v34 = vrot.slane %v5867_v47, 4 }
 0x4d5   : > { %6919 = vrot.lane.b32.xlu1 %v6806_v56, %s8014_s20 }
 0x4d6   : > { %6917 = vrot.lane.b32.xlu0 %v6805_v62, %s8014_s20 }
 0x4df   : > { %v7832_v60 = vpop.f32.mrb[20].mxu0 }
 0x4e0   : > { %v5684_v49 = vmul.f32 %v7832_v60, %v10476_v40  ;;  %v5560_v26 = vpop.f32.mrb[21].mxu0  ;;  %v6352_v60 = vrot.slane %v6350_v20, 4 }
 0x4e1   : > { %v5682_v25 = vmul.f32 %v10476_v40, %v5560_v26  ;;  %v7833_v21 = vpop.f32.mrb[22].mxu0 }
 0x4e2   : > { %v5723_v46 = vadd.f32 %v10481_v2, %v5684_v49  ;;  %v5685_v58 = vmul.f32 %v7833_v21, %v10476_v40  ;;  %v5563_v36 = vpop.f32.mrb[23].mxu0  ;;  %v6355_v49 = vrot.slane %v6353_v17, 5  ;;  %v6310_v21 = vld [vmem:[#allocation2 + $0x20] sm:$0x1] }
 0x4e3   : > { %v5721_v19 = vadd.f32 %v10481_v2, %v5682_v25  ;;  %v5683_v12 = vmul.f32 %v10476_v40, %v5563_v36 }
 0x4e4   : > { %v5724_v51 = vadd.f32 %v10481_v2, %v5685_v58  ;;  %v5755_v0 = vmax.f32 %v5723_v46, 0.0  ;;  %v10537_v46 = vrot.slane %v6359_v61, 5  ;;  %v6365_v58 = vrot.slane %v6363_v8, 4  ;;  %v10573_v61 = vld [vmem:[#allocation2 + $0x24] sm:$0xf] }
 0x4e5   : > { %v5722_v15 = vadd.f32 %v10481_v2, %v5683_v12  ;;  %v5753_v63 = vmax.f32 %v5721_v19, 0.0  ;;  %v5873_v19 = vshll.u32 %v5814_v54, 16 }
 0x4e6   : > { %v5756_v44 = vmax.f32 %v5724_v51, 0.0  ;;  %v5860_v51 = vor.u32 %v5859_v42, %v5856_v37  ;;  %v6309_v37 = vld [vmem:[#allocation2 + $0x14] sm:$0x1] }
 0x4e7   : > { %v5754_v6 = vmax.f32 %v5722_v15, 0.0  ;;  %v10541_v15 = vld [vmem:[#allocation2] sm:$0xf] }
 0x4e8   : > { %v6808_v18 = vpack.c.bf16 %v5756_v44, %v5755_v0 }
 0x4e9   : > { %v6807_v10 = vpack.c.bf16 %v5754_v6, %v5753_v63  ;;  %v5870_v63 = vor.u32 %v5869_v34, %v10531_v4  ;;  %v6369_v6 = vshll.u32 %v6310_v21, 16  ;;  %v5905_v21 = vshll.u32 %v10573_v61, 16 }
 0x4ea   : > { %6923 = vrot.lane.b32.xlu1 %v6808_v18, %s8014_s20  ;;  %v10544_v18 = vld [vmem:[#allocation2 + $0x4] sm:$0xf] }
 0x4eb   : > { %6921 = vrot.lane.b32.xlu0 %v6807_v10, %s8014_s20 }
 0x4f5   : > { %v7836_v43 = vpop.f32.mrb[24].mxu0 }
 0x4f6   : > { %v5688_v14 = vmul.f32 %v7836_v43, %v10476_v40  ;;  %v5576_v9 = vpop.f32.mrb[25].mxu0 }
 0x4f7   : > { %v5686_v16 = vmul.f32 %v10476_v40, %v5576_v9  ;;  %v7837_v32 = vpop.f32.mrb[26].mxu0  ;;  %v6366_v9 = vor.u32 %v6365_v58, %v10537_v46 }
 0x4f8   : > { %v5727_v48 = vadd.f32 %v10481_v2, %v5688_v14  ;;  %v5689_v38 = vmul.f32 %v7837_v32, %v10476_v40  ;;  %v5579_v23 = vpop.f32.mrb[27].mxu0  ;;  %v6356_v14 = vor.u32 %v6355_v49, %v6352_v60 }
 0x4f9   : > { %v5725_v7 = vadd.f32 %v10481_v2, %v5686_v16  ;;  %v5687_v30 = vmul.f32 %v10476_v40, %v5579_v23  ;;  %v10547_v16 = vld [vmem:[#allocation2 + $0xc] sm:$0xf]  ;;  %v5833_v23 = vshll.u32 %v10541_v15, 16  ;;  %v6367_v13 = vrot.slane %v6366_v9, 4 }
 0x4fa   : > { %v5728_v3 = vadd.f32 %v10481_v2, %v5689_v38  ;;  %v5759_v22 = vmax.f32 %v5727_v48, 0.0  ;;  %v10549_v48 = vrot.slane %v5873_v19, 5  ;;  %v5830_v38 = vshrl.u32 %v10541_v15, 16 }
 0x4fb   : > { %v5726_v5 = vadd.f32 %v10481_v2, %v5687_v30  ;;  %v5757_v52 = vmax.f32 %v5725_v7, 0.0  ;;  %v10553_v7 = vld [vmem:[#allocation2 + $0x10] sm:$0xf]  ;;  %v5835_v20 = vrot.slane %v5833_v23, 5  ;;  %v5907_v23 = vrot.slane %v5905_v21, 5 }
 0x4fc   : > { %v5760_v28 = vmax.f32 %v5728_v3, 0.0  ;;  %v10555_v3 = vrot.slane %v5860_v51, 4  ;;  %v6335_v31 = vshll.u32 %v10553_v7, 16  ;;  %v6339_v27 = vshrl.u32 %v10553_v7, 16 }
 0x4fd   : > { %v5758_v39 = vmax.f32 %v5726_v5, 0.0  ;;  %v5839_v5 = vshll.u32 %v10544_v18, 16  ;;  %v5832_v47 = vrot.slane %v5830_v38, 4 }
 0x4fe   : > { %v6810_v33 = vpack.c.bf16 %v5760_v28, %v5759_v22  ;;  %v5843_v22 = vshrl.u32 %v10544_v18, 16  ;;  %v10560_v28 = vrot.slane %v5870_v63, 4  ;;  %v5866_v8 = vsel %vm8137_vm2, %v10555_v3, %v10531_v4 }
 0x4ff   : > { %v6809_v57 = vpack.c.bf16 %v5758_v39, %v5757_v52  ;;  %v10562_v52 = vrot.slane %v6369_v6, 5  ;;  %v6326_v39 = vshrl.u32 %v10547_v16, 16  ;;  %v10571_v17 = vrot.slane %v5839_v5, 5 }
 0x500   : > { %6927 = vrot.lane.b32.xlu1 %v6810_v33, %s8014_s20  ;;  %v6329_v33 = vshll.u32 %v10547_v16, 16 }
 0x501   : > { %6925 = vrot.lane.b32.xlu0 %v6809_v57, %s8014_s20  ;;  %v10567_v57 = vrot.slane %v6356_v14, 4  ;;  %v6372_v34 = vsel %vm8137_vm2, %v6367_v13, %v10562_v52  ;;  %v10608_v13 = vld [vmem:[#allocation2 + $0x30] sm:$0xf] }
 0x503   : > { %v6362_v42 = vsel %vm8137_vm2, %v10567_v57, %v10537_v46 }
 0x504   : > { %v7840_v1 = vpop.f32.mrb[28].mxu0 }
 0x505   : > { %v5692_v45 = vmul.f32 %v7840_v1, %v10476_v40  ;;  %v5592_v59 = vpop.f32.mrb[29].mxu0  ;;  %v5845_v1 = vrot.slane %v5843_v22, 4 }
 0x506   : > { %v5690_v41 = vmul.f32 %v10476_v40, %v5592_v59  ;;  %v7841_v53 = vpop.f32.mrb[30].mxu0  ;;  %v5813_v59 = vld [vmem:[#allocation2 + $0x8] sm:$0x1] }
 0x507   : > { %v5731_v29 = vadd.f32 %v10481_v2, %v5692_v45  ;;  %v5693_v56 = vmul.f32 %v7841_v53, %v10476_v40  ;;  %v5595_v62 = vpop.f32.mrb[31].mxu0  ;;  %v5876_v45 = vsel %vm8137_vm2, %v10560_v28, %v10549_v48  ;;  %v6331_v53 = vrot.slane %v6329_v33, 5 }
 0x508   : > { %v5729_v26 = vadd.f32 %v10481_v2, %v5690_v41  ;;  %v5691_v25 = vmul.f32 %v10476_v40, %v5595_v62  ;;  %v6328_v41 = vrot.slane %v6326_v39, 4  ;;  %v10592_v62 = vld [vmem:[#allocation2 + $0x28] sm:$0xf]  ;;  %v5849_v19 = vshll.u32 %v5813_v59, 16 }
 0x509   : > { %v5732_v36 = vadd.f32 %v10481_v2, %v5693_v56  ;;  %v5763_v0 = vmax.f32 %v5731_v29, 0.0  ;;  %v10590_v29 = vrot.slane %v6335_v31, 5  ;;  %v6341_v56 = vrot.slane %v6339_v27, 4 }
 0x50a   : > { %v5730_v12 = vadd.f32 %v10481_v2, %v5691_v25  ;;  %v5761_v10 = vmax.f32 %v5729_v26, 0.0  ;;  %v5836_v26 = vor.u32 %v5835_v20, %v5832_v47  ;;  %v5902_v25 = vshrl.u32 %v10573_v61, 16 }
 0x50b   : > { %v5764_v44 = vmax.f32 %v5732_v36, 0.0  ;;  %v5846_v36 = vor.u32 %v5845_v1, %v10571_v17  ;;  %v6332_v63 = vor.u32 %v6331_v53, %v6328_v41  ;;  %v5911_v6 = vshll.u32 %v10592_v62, 16  ;;  %v10610_v1 = vld [vmem:[#allocation2 + $0x34] sm:$0xf]  ;;  %v5816_v53 = vld [vmem:[#allocation2 + $0x2c] sm:$0x1] }
 0x50c   : > { %v5762_v43 = vmax.f32 %v5730_v12, 0.0  ;;  %v6345_v12 = vshll.u32 %v6309_v37, 16  ;;  %v6342_v14 = vor.u32 %v6341_v56, %v10590_v29  ;;  %v5915_v9 = vshrl.u32 %v10592_v62, 16 }
 0x50d   : > { %v6812_v32 = vpack.c.bf16 %v5764_v44, %v5763_v0  ;;  %v5837_v48 = vrot.slane %v5836_v26, 4  ;;  %v5904_v38 = vrot.slane %v5902_v25, 4  ;;  %v5847_v5 = vrot.slane %v5846_v36, 4 }
 0x50e   : > { %v6811_v30 = vpack.c.bf16 %v5762_v43, %v5761_v10  ;;  %v5851_v22 = vrot.slane %v5849_v19, 5  ;;  %v6347_v28 = vrot.slane %v6345_v12, 5  ;;  %v6333_v33 = vrot.slane %v6332_v63, 4  ;;  %v6312_v19 = vld [vmem:[#allocation2 + $0x38] sm:$0x1] }
 0x50f   : > { %6931 = vrot.lane.b32.xlu1 %v6812_v32, %s8014_s20  ;;  %v5913_v57 = vrot.slane %v5911_v6, 5  ;;  %v6343_v47 = vrot.slane %v6342_v14, 4  ;;  %v5917_v20 = vrot.slane %v5915_v9, 4  ;;  %v6248_v37 = vmax.bf16 %v5876_v45, %v10513_v50 }
 0x510   : > { %6929 = vrot.lane.b32.xlu0 %v6811_v30, %s8014_s20  ;;  %v6744_v41 = vmax.bf16 %v6372_v34, %v10520_v55  ;;  %v6401_v26 = vshll.u32 %v10608_v13, 16  ;;  %v5842_v25 = vsel %vm8137_vm2, %v5837_v48, %v10571_v17  ;;  %v6338_v50 = vsel %vm8137_vm2, %v6333_v33, %v10590_v29  ;;  %v10669_v48 = vld [vmem:[#allocation2 + $0x28] sm:$0xf] }
 0x511   : > { %v6407_v55 = vshll.u32 %v10610_v1, 16  ;;  %v6411_v45 = vshrl.u32 %v10610_v1, 16  ;;  %v5918_v34 = vor.u32 %v5917_v20, %v5913_v57  ;;  %v5921_v21 = vshll.u32 %v5816_v53, 16 }
 0x512   : > { %v6247_v17 = vmax.bf16 %v5866_v8, %v10511_v35  ;;  %v6776_v29 = vmax.bf16 %v6744_v41, %v6248_v37  ;;  %v10641_v36 = vmax.bf16 %v6338_v50, %v10547_v16  ;;  %v10657_v16 = vld [vmem:[#allocation2 + $0x1c] sm:$0xf]  ;;  %v6387_v20 = vshrl.u32 %v10669_v48, 16 }
 0x513   : > { %v7844_v54 = vpop.f32.mrb[32].mxu0  ;;  %v10651_v35 = vrot.slane %v6407_v55, 5  ;;  %v6413_v4 = vrot.slane %v6411_v45, 4  ;;  %v10655_v8 = vrot.slane %v5921_v21, 5 }
 0x514   : > { %v5696_v60 = vmul.f32 %v7844_v54, %v10476_v40  ;;  %v5608_v49 = vpop.f32.mrb[33].mxu0  ;;  %v5908_v54 = vor.u32 %v5907_v23, %v5904_v38 }
 0x515   : > { %v5694_v58 = vmul.f32 %v10476_v40, %v5608_v49  ;;  %v7845_v46 = vpop.f32.mrb[34].mxu0  ;;  %v6398_v49 = vshrl.u32 %v10608_v13, 16  ;;  %v6414_v23 = vor.u32 %v6413_v4, %v10651_v35  ;;  %v6311_v4 = vld [vmem:[#allocation2 + $0x2c] sm:$0x1] }
 0x516   : > { %v5735_v51 = vadd.f32 %v10481_v2, %v5696_v60  ;;  %v5697_v0 = vmul.f32 %v7845_v46, %v10476_v40  ;;  %v5611_v44 = vpop.f32.mrb[35].mxu0  ;;  %v6743_v60 = vmax.bf16 %v6362_v42, %v10516_v24  ;;  %v5852_v24 = vsel %vm8137_vm2, %v5847_v5, %v5851_v22 }
 0x517   : > { %v5733_v10 = vadd.f32 %v10481_v2, %v5694_v58  ;;  %v5695_v43 = vmul.f32 %v10476_v40, %v5611_v44  ;;  %v6348_v42 = vsel %vm8137_vm2, %v6343_v47, %v6347_v28  ;;  %v5909_v58 = vrot.slane %v5908_v54, 4 }
 0x518   : > { %v5736_v32 = vadd.f32 %v10481_v2, %v5697_v0  ;;  %v5767_v52 = vmax.f32 %v5735_v51, 0.0  ;;  %v10638_v46 = vmax.bf16 %v5842_v25, %v10541_v15  ;;  %v6400_v12 = vrot.slane %v6398_v49, 4  ;;  %v10643_v0 = vld [vmem:[#allocation2 + $0x18] sm:$0xf] }
 0x519   : > { %v5734_v30 = vadd.f32 %v10481_v2, %v5695_v43  ;;  %v5765_v31 = vmax.f32 %v5733_v10, 0.0  ;;  %v6403_v51 = vrot.slane %v6401_v26, 5  ;;  %v10646_v44 = vmax.bf16 %v5852_v24, %v10544_v18  ;;  %v10662_v43 = vld [vmem:[#allocation2 + $0x24] sm:$0xf] }
 0x51a   : > { %v5768_v39 = vmax.f32 %v5736_v32, 0.0  ;;  %v10649_v63 = vmax.bf16 %v6348_v42, %v10553_v7  ;;  %v6775_v3 = vmax.bf16 %v6743_v60, %v6247_v17  ;;  %v10653_v15 = vrot.slane %v5918_v34, 4  ;;  %v10695_v42 = vld [vmem:[#allocation2 + $0x3c] sm:$0xf] }
 0x51b   : > { %v5766_v27 = vmax.f32 %v5734_v30, 0.0  ;;  %v5914_v6 = vsel %vm8137_vm2, %v5909_v58, %v5913_v57  ;;  %v6417_v10 = vshll.u32 %v6312_v19, 16  ;;  %v5878_v18 = vshrl.u32 %v10643_v0, 16  ;;  %v5815_v30 = vld [vmem:[#allocation2 + $0x20] sm:$0x1] }
 0x51c   : > { %v6814_v59 = vpack.c.bf16 %v5768_v39, %v5767_v52  ;;  %v10664_v7 = vcombine.low %v6775_v3, %v6776_v29  ;;  %v6773_v14 = vmax.bf16 %v10641_v36, %v10638_v46  ;;  %v6404_v9 = vor.u32 %v6403_v51, %v6400_v12 }
 0x51d   : > { %v6813_v56 = vpack.c.bf16 %v5766_v27, %v5765_v31  ;;  %v5881_v32 = vshll.u32 %v10643_v0, 16  ;;  %v6774_v38 = vmax.bf16 %v10649_v63, %v10646_v44  ;;  %v5887_v5 = vshll.u32 %v10657_v16, 16 }
 0x51e   : > { %6935 = vrot.lane.b32.xlu1 %v6814_v59, %s8014_s20  ;;  %v5891_v22 = vshrl.u32 %v10657_v16, 16  ;;  %v5924_v28 = vsel %vm8137_vm2, %v10653_v15, %v10655_v8  ;;  %v10681_v52 = vmax.bf16 %v5914_v6, %v10573_v61  ;;  %v6374_v39 = vshrl.u32 %v10662_v43, 16  ;;  %v10712_v6 = vld [vmem:[#allocation2 + $0x40] sm:$0xf] }
 0x51f   : > { %6933 = vrot.lane.b32.xlu0 %v6813_v56, %s8014_s20  ;;  %v6377_v33 = vshll.u32 %v10662_v43, 16  ;;  %v10685_v31 = vrot.slane %v6417_v10, 5  ;;  %v5880_v27 = vrot.slane %v5878_v18, 4  ;;  %v6383_v47 = vshll.u32 %v10669_v48, 16 }
 0x520   : > { %v6405_v41 = vrot.slane %v6404_v9, 4  ;;  %v5883_v53 = vrot.slane %v5881_v32, 5  ;;  %v5897_v54 = vshll.u32 %v5815_v30, 16  ;;  %v6415_v60 = vrot.slane %v6414_v23, 4  ;;  %v10716_v23 = vld [vmem:[#allocation2 + $0x48] sm:$0xf] }
 0x521   : > { %v10691_v49 = vrot.slane %v5887_v5, 5  ;;  %v5893_v26 = vrot.slane %v5891_v22, 4  ;;  %v6376_v45 = vrot.slane %v6374_v39, 4  ;;  %v6379_v24 = vrot.slane %v6377_v33, 5 }
 0x522   : > { %v10699_v17 = vrot.slane %v6383_v47, 5  ;;  %v6389_v29 = vrot.slane %v6387_v20, 4  ;;  %v6410_v19 = vsel %vm8137_vm2, %v6405_v41, %v10651_v35  ;;  %v5884_v12 = vor.u32 %v5883_v53, %v5880_v27  ;;  %v10723_v47 = vld [vmem:[#allocation2 + $0x4c] sm:$0xf] }
 0x523   : > { %v10705_v51 = vrot.slane %v5897_v54, 5  ;;  %v6420_v15 = vsel %vm8137_vm2, %v6415_v60, %v10685_v31  ;;  %v5894_v8 = vor.u32 %v5893_v26, %v10691_v49  ;;  %v5950_v10 = vshrl.u32 %v10695_v42, 16 }
 0x524   : > { %v6380_v32 = vor.u32 %v6379_v24, %v6376_v45  ;;  %v5953_v35 = vshll.u32 %v10695_v42, 16  ;;  %v6390_v22 = vor.u32 %v6389_v29, %v10699_v17  ;;  %v6393_v39 = vshll.u32 %v6311_v4, 16 }
 0x525   : > { %v5959_v31 = vshll.u32 %v10712_v6, 16  ;;  %v5963_v27 = vshrl.u32 %v10712_v6, 16  ;;  %v6449_v41 = vshll.u32 %v10716_v23, 16  ;;  %v10731_v53 = vmax.bf16 %v5924_v28, %v10592_v62 }
 0x526   : > { %v10733_v54 = vrot.slane %v6380_v32, 4  ;;  %v10736_v60 = vrot.slane %v6390_v22, 4  ;;  %v10738_v26 = vrot.slane %v6393_v39, 5  ;;  %v10743_v45 = vmax.bf16 %v6410_v19, %v10608_v13  ;;  %v10772_v32 = vld [vmem:[#allocation2 + $0x34] sm:$0xf] }
 0x527   : > { %v10746_v62 = vmax.bf16 %v6420_v15, %v10610_v1  ;;  %v10748_v28 = vrot.slane %v5959_v31, 5  ;;  %v5965_v24 = vrot.slane %v5963_v27, 4  ;;  %v6451_v19 = vrot.slane %v6449_v41, 5 }
 0x528   : > { %v7848_v57 = vpop.f32.mrb[36].mxu0  ;;  %v6386_v4 = vsel %vm8137_vm2, %v10733_v54, %v10699_v17 }
 0x529   : > { %v5700_v59 = vmul.f32 %v7848_v57, %v10476_v40  ;;  %v5624_v37 = vpop.f32.mrb[37].mxu0  ;;  %v10719_v57 = vrot.slane %v5884_v12, 4 }
 0x52a   : > { %v5698_v61 = vmul.f32 %v10476_v40, %v5624_v37  ;;  %v7849_v56 = vpop.f32.mrb[38].mxu0  ;;  %v6446_v37 = vshrl.u32 %v10716_v23, 16 }
 0x52b   : > { %v5739_v25 = vadd.f32 %v10481_v2, %v5700_v59  ;;  %v5701_v50 = vmul.f32 %v7849_v56, %v10476_v40  ;;  %v5627_v55 = vpop.f32.mrb[39].mxu0  ;;  %v10725_v59 = vrot.slane %v5894_v8, 4  ;;  %v5955_v56 = vrot.slane %v5953_v35, 5  ;;  %v10763_v8 = vld [vmem:[#allocation2 + $0x30] sm:$0xf] }
 0x52c   : > { %v5737_v34 = vadd.f32 %v10481_v2, %v5698_v61  ;;  %v5699_v21 = vmul.f32 %v10476_v40, %v5627_v55  ;;  %v5952_v61 = vrot.slane %v5950_v10, 4  ;;  %v6459_v55 = vshrl.u32 %v10723_v47, 16 }
 0x52d   : > { %v5740_v58 = vadd.f32 %v10481_v2, %v5701_v50  ;;  %v5771_v18 = vmax.f32 %v5739_v25, 0.0  ;;  %v5818_v25 = vld [vmem:[#allocation2 + $0x44] sm:$0x1]  ;;  %v6455_v50 = vshll.u32 %v10723_v47, 16  ;;  %v5900_v29 = vsel %vm8137_vm2, %v10725_v59, %v10705_v51 }
 0x52e   : > { %v5738_v3 = vadd.f32 %v10481_v2, %v5699_v21  ;;  %v5769_v30 = vmax.f32 %v5737_v34, 0.0  ;;  %v5890_v21 = vsel %vm8137_vm2, %v10719_v57, %v10691_v49  ;;  %v6448_v13 = vrot.slane %v6446_v37, 4 }
 0x52f   : > { %v5772_v9 = vmax.f32 %v5740_v58, 0.0  ;;  %v6314_v58 = vld [vmem:[#allocation2 + $0x50] sm:$0x1]  ;;  %v5969_v15 = vshll.u32 %v5818_v25, 16  ;;  %v6396_v51 = vsel %vm8137_vm2, %v10736_v60, %v10738_v26  ;;  %v5926_v31 = vshrl.u32 %v10763_v8, 16 }
 0x530   : > { %v5770_v5 = vmax.f32 %v5738_v3, 0.0  ;;  %v5956_v3 = vor.u32 %v5955_v56, %v5952_v61  ;;  %v6465_v22 = vshll.u32 %v6314_v58, 16  ;;  %v6452_v57 = vor.u32 %v6451_v19, %v6448_v13 }
 0x531   : > { %v6816_v33 = vpack.c.bf16 %v5772_v9, %v5771_v18  ;;  %v10770_v18 = vrot.slane %v6455_v50, 5  ;;  %v6461_v9 = vrot.slane %v6459_v55, 4  ;;  %v5935_v59 = vshll.u32 %v10772_v32, 16  ;;  %v10786_v55 = vld [vmem:[#allocation2 + $0x3c] sm:$0xf] }
 0x532   : > { %v6815_v20 = vpack.c.bf16 %v5770_v5, %v5769_v30  ;;  %v5966_v5 = vor.u32 %v5965_v24, %v10748_v28  ;;  %v5939_v37 = vshrl.u32 %v10772_v32, 16  ;;  %v5957_v54 = vrot.slane %v5956_v3, 4 }
 0x533   : > { %6939 = vrot.lane.b32.xlu1 %v6816_v33, %s8014_s20  ;;  %v5971_v61 = vrot.slane %v5969_v15, 5  ;;  %v6462_v56 = vor.u32 %v6461_v9, %v10770_v18  ;;  %v6467_v50 = vrot.slane %v6465_v22, 5  ;;  %v6453_v58 = vrot.slane %v6452_v57, 4 }
 0x534   : > { %6937 = vrot.lane.b32.xlu0 %v6815_v20, %s8014_s20  ;;  %v5929_v20 = vshll.u32 %v10763_v8, 16  ;;  %v5967_v25 = vrot.slane %v5966_v5, 4  ;;  %v5928_v13 = vrot.slane %v5926_v31, 4  ;;  %v6422_v9 = vshrl.u32 %v10786_v55, 16 }
 0x535   : > { %v6463_v15 = vrot.slane %v6462_v56, 4  ;;  %v6249_v5 = vmax.bf16 %v5890_v21, %v10643_v0  ;;  %v6745_v22 = vmax.bf16 %v6386_v4, %v10662_v43  ;;  %v6746_v57 = vmax.bf16 %v6396_v51, %v10669_v48  ;;  %v6313_v56 = vld [vmem:[#allocation2 + $0x44] sm:$0x1] }
 0x536   : > { %v7852_v34 = vpop.f32.mrb[40].mxu0  ;;  %v6458_v0 = vsel %vm8137_vm2, %v6453_v58, %v10770_v18  ;;  %v6424_v21 = vrot.slane %v6422_v9, 4 }
 0x537   : > { %v5704_v1 = vmul.f32 %v7852_v34, %v10476_v40  ;;  %v5640_v12 = vpop.f32.mrb[41].mxu0  ;;  %v6777_v51 = vmax.bf16 %v6745_v22, %v6249_v5  ;;  %v10835_v44 = vmax.bf16 %v6458_v0, %v10716_v23 }
 0x538   : > { %v5702_v49 = vmul.f32 %v10476_v40, %v5640_v12  ;;  %v7853_v10 = vpop.f32.mrb[42].mxu0  ;;  %v5931_v12 = vrot.slane %v5929_v20, 5 }
 0x539   : > { %v5743_v35 = vadd.f32 %v10481_v2, %v5704_v1  ;;  %v5705_v17 = vmul.f32 %v7853_v10, %v10476_v40  ;;  %v5643_v30 = vpop.f32.mrb[43].mxu0  ;;  %v5817_v1 = vld [vmem:[#allocation2 + $0x38] sm:$0x1]  ;;  %v5941_v10 = vrot.slane %v5939_v37, 4 }
 0x53a   : > { %v5741_v39 = vadd.f32 %v10481_v2, %v5702_v49  ;;  %v5703_v33 = vmul.f32 %v10476_v40, %v5643_v30  ;;  %v10788_v49 = vrot.slane %v5935_v59, 5  ;;  %v6780_v30 = vmax.bf16 %v10746_v62, %v10731_v53 }
 0x53b   : > { %v5744_v27 = vadd.f32 %v10481_v2, %v5705_v17  ;;  %v5775_v60 = vmax.f32 %v5743_v35, 0.0  ;;  %v6425_v35 = vshll.u32 %v10786_v55, 16  ;;  %v6779_v17 = vmax.bf16 %v10743_v45, %v10681_v52 }
 0x53c   : > { %v5742_v41 = vadd.f32 %v10481_v2, %v5703_v33  ;;  %v5773_v24 = vmax.f32 %v5741_v39, 0.0  ;;  %v10799_v39 = vld [vmem:[#allocation2 + $0x40] sm:$0xf]  ;;  %v6250_v33 = vmax.bf16 %v5900_v29, %v10657_v16  ;;  %v5962_v52 = vsel %vm8137_vm2, %v5957_v54, %v10748_v28 }
 0x53d   : > { %v5776_v26 = vmax.f32 %v5744_v27, 0.0  ;;  %v5945_v45 = vshll.u32 %v5817_v1, 16  ;;  %v5972_v53 = vsel %vm8137_vm2, %v5967_v25, %v5971_v61  ;;  %v5932_v43 = vor.u32 %v5931_v12, %v5928_v13 }
 0x53e   : > { %v5774_v34 = vmax.f32 %v5742_v41, 0.0  ;;  %v5942_v62 = vor.u32 %v5941_v10, %v10788_v49  ;;  %v6468_v16 = vsel %vm8137_vm2, %v6463_v15, %v6467_v50  ;;  %v6427_v48 = vrot.slane %v6425_v35, 5 }
 0x53f   : > { %v6818_v19 = vpack.c.bf16 %v5776_v26, %v5775_v60  ;;  %v6431_v29 = vshll.u32 %v10799_v39, 16  ;;  %v7572_v28 = vcombine.low %v6773_v14, %v6774_v38  ;;  %v10823_v4 = vcombine.low %v6779_v17, %v6780_v30  ;;  %v10844_v14 = vld [vmem:[#allocation2 + $0x54] sm:$0xf]  ;;  %v10889_v30 = vld [vmem:[#allocation2 + $0x64] sm:$0xf] }
 0x540   : > { %v6817_v3 = vpack.c.bf16 %v5774_v34, %v5773_v24  ;;  %v6435_v18 = vshrl.u32 %v10799_v39, 16  ;;  %v6778_v31 = vmax.bf16 %v6746_v57, %v6250_v33  ;;  %v10827_v27 = vmax.bf16 %v5962_v52, %v10695_v42  ;;  %v10860_v24 = vld [vmem:[#allocation2 + $0x60] sm:$0xf] }
 0x541   : > { %6943 = vrot.lane.b32.xlu1 %v6818_v19, %s8014_s20  ;;  %v10830_v20 = vmax.bf16 %v5972_v53, %v10712_v6  ;;  %v10832_v59 = vrot.slane %v5945_v45, 5  ;;  %v10838_v46 = vmax.bf16 %v6468_v16, %v10723_v47  ;;  %v10840_v36 = vrot.slane %v5932_v43, 4  ;;  %v10855_v47 = vld [vmem:[#allocation2 + $0x58] sm:$0xf]  ;;  %v5820_v16 = vld [vmem:[#allocation2 + $0x5c] sm:$0x1] }
 0x542   : > { %6941 = vrot.lane.b32.xlu0 %v6817_v3, %s8014_s20  ;;  %v10842_v63 = vrot.slane %v5942_v62, 4  ;;  %v6428_v6 = vor.u32 %v6427_v48, %v6424_v21  ;;  %v10853_v23 = vrot.slane %v6431_v29, 5  ;;  %v6437_v60 = vrot.slane %v6435_v18, 4 }
 0x543   : > { %v5998_v50 = vshrl.u32 %v10844_v14, 16  ;;  %v10866_v34 = vcombine.low %v6777_v51, %v6778_v31  ;;  %v6007_v13 = vshll.u32 %v10855_v47, 16  ;;  %v6011_v19 = vshrl.u32 %v10855_v47, 16 }
 0x544   : > { %v5938_v10 = vsel %vm8137_vm2, %v10840_v36, %v10788_v49  ;;  %v5948_v3 = vsel %vm8137_vm2, %v10842_v63, %v10832_v59  ;;  %v6441_v15 = vshll.u32 %v6313_v56, 16  ;;  %v10887_v17 = vrot.slane %v6428_v6, 4  ;;  %v10915_v56 = vld [vmem:[#allocation2 + $0x4c] sm:$0xf]  ;;  %v10980_v36 = vld [vmem:[#allocation2 + $0x70] sm:$0xf] }
 0x545   : > { %v6494_v5 = vshrl.u32 %v10860_v24, 16  ;;  %v6497_v22 = vshll.u32 %v10860_v24, 16  ;;  %v6438_v52 = vor.u32 %v6437_v60, %v10853_v23  ;;  %v6000_v45 = vrot.slane %v5998_v50, 4 }
 0x546   : > { %v10897_v21 = vrot.slane %v6007_v13, 5  ;;  %v6013_v48 = vrot.slane %v6011_v19, 4  ;;  %v6503_v51 = vshll.u32 %v10889_v30, 16  ;;  %v6507_v18 = vshrl.u32 %v10889_v30, 16  ;;  %v10918_v13 = vld [vmem:[#allocation2 + $0x54] sm:$0xf] }
 0x547   : > { %v6920_v37 = vpop.permute.xlu1 %6919 }
 0x548   : > { %v6954_v38 = vsel %vm3462_vm11, %v10664_v7, %v6920_v37  ;;  %v6918_v42 = vpop.permute.xlu0 %6917  ;;  %v6001_v7 = vshll.u32 %v10844_v14, 16  ;;  %v7856_v1 = vpop.f32.mrb[44].mxu0  ;;  %v10904_v37 = vrot.slane %v6441_v15, 5  ;;  %v6014_v50 = vor.u32 %v6013_v48, %v10897_v21 }
 0x549   : > { %v7590_v41 = vcombine.low %v6954_v38, %v6954_v38  ;;  %v7591_v54 = vcombine.high %v6954_v38, %v6954_v38  ;;  %v6951_v61 = vsel %vm3462_vm11, %v7572_v28, %v6918_v42  ;;  %v5708_v9 = vmul.f32 %v7856_v1, %v10476_v40  ;;  %v5656_v35 = vpop.f32.mrb[45].mxu0 }
 0x54a   : > { %v7588_v26 = vcombine.low %v6951_v61, %v6951_v61  ;;  %v7589_v25 = vcombine.high %v6951_v61, %v6951_v61  ;;  %v5706_v33 = vmul.f32 %v10476_v40, %v5656_v35  ;;  %v7857_v57 = vpop.f32.mrb[46].mxu0  ;;  %v6003_v53 = vrot.slane %v6001_v7, 5  ;;  %v10913_v61 = vld [vmem:[#allocation2 + $0x48] sm:$0xf] }
 0x54b   : > { %7112 = vst.msk [vmem:[%s10849_s28 + $0x8] sm:$0xf] %vm7109_vm3, %v7590_v41  ;;  %7113 = vst.msk [vmem:[%s10849_s28 + $0xc] sm:$0xf] %vm7109_vm3, %v7591_v54  ;;  %v5747_v0 = vadd.f32 %v10481_v2, %v5708_v9  ;;  %v5709_v43 = vmul.f32 %v7857_v57, %v10476_v40  ;;  %v5659_v62 = vpop.f32.mrb[47].mxu0  ;;  %v6496_v38 = vrot.slane %v6494_v5, 4  ;;  %v6434_v41 = vsel %vm8137_vm2, %v10887_v17, %v10853_v23 }
 0x54c   : > { %7110 = vst.msk [vmem:[%s10849_s28] sm:$0xf] %vm7109_vm3, %v7588_v26  ;;  %7111 = vst.msk [vmem:[%s10849_s28 + $0x4] sm:$0xf] %vm7109_vm3, %v7589_v25  ;;  %v5745_v29 = vadd.f32 %v10481_v2, %v5706_v33  ;;  %v5707_v28 = vmul.f32 %v10476_v40, %v5659_v62  ;;  %v6499_v42 = vrot.slane %v6497_v22, 5  ;;  %v10911_v54 = vrot.slane %v6438_v52, 4 }
 0x54d   : > { %v5748_v31 = vadd.f32 %v10481_v2, %v5709_v43  ;;  %v6017_v40 = vshll.u32 %v5820_v16, 16  ;;  %v5779_v60 = vmax.f32 %v5747_v0, 0.0  ;;  %v6004_v25 = vor.u32 %v6003_v53, %v6000_v45  ;;  %v6316_v7 = vld [vmem:[#allocation2 + $0x68] sm:$0x1]  ;;  %v10922_v9 = vld [vmem:[#allocation2 + $0x58] sm:$0xf] }
 0x54e   : > { %v5746_v6 = vadd.f32 %v10481_v2, %v5707_v28  ;;  %v5777_v2 = vmax.f32 %v5745_v29, 0.0  ;;  %v10920_v1 = vrot.slane %v6503_v51, 5  ;;  %v6509_v15 = vrot.slane %v6507_v18, 4  ;;  %v5819_v0 = vld [vmem:[#allocation2 + $0x50] sm:$0x1] }
 0x54f   : > { %v5780_v26 = vmax.f32 %v5748_v31, 0.0  ;;  %v6500_v5 = vor.u32 %v6499_v42, %v6496_v38  ;;  %v5974_v22 = vshrl.u32 %v10913_v61, 16  ;;  %v5977_v33 = vshll.u32 %v10913_v61, 16 }
 0x550   : > { %v5778_v19 = vmax.f32 %v5746_v6, 0.0  ;;  %v6513_v52 = vshll.u32 %v6316_v7, 16  ;;  %v5983_v45 = vshll.u32 %v10915_v56, 16  ;;  %v5987_v53 = vshrl.u32 %v10915_v56, 16 }
 0x551   : > { %v6820_v35 = vpack.c.bf16 %v5780_v26, %v5779_v60  ;;  %v6470_v43 = vshrl.u32 %v10918_v13, 16  ;;  %v6473_v62 = vshll.u32 %v10918_v13, 16  ;;  %v6479_v16 = vshll.u32 %v10922_v9, 16  ;;  %v10939_v60 = vld [vmem:[#allocation2 + $0x6c] sm:$0xf] }
 0x552   : > { %v6819_v57 = vpack.c.bf16 %v5778_v19, %v5777_v2  ;;  %v6483_v48 = vshrl.u32 %v10922_v9, 16  ;;  %v6444_v29 = vsel %vm8137_vm2, %v10911_v54, %v10904_v37  ;;  %v6005_v28 = vrot.slane %v6004_v25, 4 }
 0x553   : > { %6947 = vrot.lane.b32.xlu1 %v6820_v35, %s8014_s20  ;;  %v6019_v51 = vrot.slane %v6017_v40, 5  ;;  %v6510_v18 = vor.u32 %v6509_v15, %v10920_v1  ;;  %v6015_v31 = vrot.slane %v6014_v50, 4  ;;  %v6501_v38 = vrot.slane %v6500_v5, 4 }
 0x554   : > { %6945 = vrot.lane.b32.xlu0 %v6819_v57, %s8014_s20  ;;  %v5976_v42 = vrot.slane %v5974_v22, 4  ;;  %v5979_v6 = vrot.slane %v5977_v33, 5  ;;  %v6515_v26 = vrot.slane %v6513_v52, 5  ;;  %v10941_v7 = vrot.slane %v5983_v45, 5  ;;  %v6315_v57 = vld [vmem:[#allocation2 + $0x5c] sm:$0x1] }
 0x555   : > { %v5989_v2 = vrot.slane %v5987_v53, 4  ;;  %v5993_v19 = vshll.u32 %v5819_v0, 16  ;;  %v6472_v58 = vrot.slane %v6470_v43, 4  ;;  %v6475_v12 = vrot.slane %v6473_v62, 5 }
 0x556   : > { %v10943_v37 = vrot.slane %v6479_v16, 5  ;;  %v6485_v54 = vrot.slane %v6483_v48, 4  ;;  %v6511_v50 = vrot.slane %v6510_v18, 4  ;;  %v6046_v15 = vshrl.u32 %v10939_v60, 16 }
 0x557   : > { %v6049_v5 = vshll.u32 %v10939_v60, 16  ;;  %v5980_v45 = vor.u32 %v5979_v6, %v5976_v42  ;;  %v5990_v43 = vor.u32 %v5989_v2, %v10941_v7  ;;  %v6489_v62 = vshll.u32 %v6315_v57, 16 }
 0x558   : > { %v6476_v16 = vor.u32 %v6475_v12, %v6472_v58  ;;  %v6486_v48 = vor.u32 %v6485_v54, %v10943_v37  ;;  %v6750_v49 = vmax.bf16 %v6444_v29, %v10799_v39  ;;  %v6048_v59 = vrot.slane %v6046_v15, 4 }
 0x559   : > { %v6010_v63 = vsel %vm8137_vm2, %v6005_v28, %v10897_v21  ;;  %v6020_v58 = vsel %vm8137_vm2, %v6015_v31, %v6019_v51  ;;  %v6506_v12 = vsel %vm8137_vm2, %v6501_v38, %v10920_v1  ;;  %v5981_v23 = vrot.slane %v5980_v45, 4  ;;  %v10994_v28 = vld [vmem:[#allocation2 + $0x78] sm:$0xf] }
 0x55a   : > { %v5991_v39 = vrot.slane %v5990_v43, 4  ;;  %v6477_v17 = vrot.slane %v6476_v16, 4  ;;  %v6055_v29 = vshll.u32 %v10980_v36, 16  ;;  %v6059_v21 = vshrl.u32 %v10980_v36, 16  ;;  %v11036_v16 = vld [vmem:[#allocation2 + $0x70] sm:$0xf] }
 0x55b   : > { %v11502_v51 = vmax.bf16 %v10838_v46, %v10830_v20  ;;  %v11503_v1 = vmax.bf16 %v10835_v44, %v10827_v27  ;;  %v6259_v6 = vmax.bf16 %v6010_v63, %v10844_v14  ;;  %v6755_v2 = vmax.bf16 %v6506_v12, %v10860_v24  ;;  %v11016_v46 = vld [vmem:[#allocation2 + $0x60] sm:$0xf]  ;;  %v5822_v24 = vld [vmem:[#allocation2 + $0x74] sm:$0x1] }
 0x55c   : > { %v6924_v35 = vpop.permute.xlu1 %6923  ;;  %v5986_v20 = vsel %vm8137_vm2, %v5981_v23, %v10941_v7  ;;  %v6542_v44 = vshrl.u32 %v10994_v28, 16  ;;  %v6482_v14 = vsel %vm8137_vm2, %v6477_v17, %v10943_v37  ;;  %v6061_v57 = vrot.slane %v6059_v21, 4 }
 0x55d   : > { %v6960_v40 = vsel %vm3462_vm11, %v10823_v4, %v6924_v35  ;;  %v6922_v25 = vpop.permute.xlu0 %6921  ;;  %v6253_v4 = vmax.bf16 %v5938_v10, %v10763_v8  ;;  %v6749_v8 = vmax.bf16 %v6434_v41, %v10786_v55  ;;  %v6516_v55 = vsel %vm8137_vm2, %v6511_v50, %v6515_v26 }
 0x55e   : > { %v7594_v22 = vcombine.low %v6960_v40, %v6960_v40  ;;  %v7595_v33 = vcombine.high %v6960_v40, %v6960_v40  ;;  %v6957_v52 = vsel %vm3462_vm11, %v10866_v34, %v6922_v25  ;;  %v6254_v34 = vmax.bf16 %v5948_v3, %v10772_v32 }
 0x55f   : > { %v7592_v53 = vcombine.low %v6957_v52, %v6957_v52  ;;  %v7593_v0 = vcombine.high %v6957_v52, %v6957_v52  ;;  %v6051_v32 = vrot.slane %v6049_v5, 5  ;;  %v5995_v10 = vrot.slane %v5993_v19, 5  ;;  %v11007_v19 = vld [vmem:[#allocation2 + $0x7c] sm:$0xf] }
 0x560   : > { %7116 = vst.msk [vmem:[%s10849_s28 + $0x18] sm:$0xf] %vm7109_vm3, %v7594_v22  ;;  %7117 = vst.msk [vmem:[%s10849_s28 + $0x1c] sm:$0xf] %vm7109_vm3, %v7595_v33  ;;  %v6491_v3 = vrot.slane %v6489_v62, 5  ;;  %v6487_v41 = vrot.slane %v6486_v48, 4  ;;  %v11002_v18 = vcombine.low %v11503_v1, %v11502_v51  ;;  %v6781_v31 = vmax.bf16 %v6749_v8, %v6253_v4 }
 0x561   : > { %7114 = vst.msk [vmem:[%s10849_s28 + $0x10] sm:$0xf] %vm7109_vm3, %v7592_v53  ;;  %7115 = vst.msk [vmem:[%s10849_s28 + $0x14] sm:$0xf] %vm7109_vm3, %v7593_v0  ;;  %v6052_v38 = vor.u32 %v6051_v32, %v6048_v59  ;;  %v6782_v42 = vmax.bf16 %v6750_v49, %v6254_v34  ;;  %v6260_v26 = vmax.bf16 %v6020_v58, %v10855_v47  ;;  %v6545_v7 = vshll.u32 %v10994_v28, 16 }
 0x562   : > { %v6756_v35 = vmax.bf16 %v6516_v55, %v10889_v30  ;;  %v5996_v27 = vsel %vm8137_vm2, %v5991_v39, %v5995_v10  ;;  %v6492_v47 = vsel %vm8137_vm2, %v6487_v41, %v6491_v3  ;;  %v6057_v30 = vrot.slane %v6055_v29, 5  ;;  %v11030_v53 = vld [vmem:[#allocation2 + $0x64] sm:$0xf]  ;;  %v11034_v34 = vld [vmem:[#allocation2 + $0x6c] sm:$0xf] }
 0x563   : > { %v6053_v54 = vrot.slane %v6052_v38, 4  ;;  %v6551_v40 = vshll.u32 %v11007_v19, 16  ;;  %v6555_v25 = vshrl.u32 %v11007_v19, 16  ;;  %v7576_v50 = vcombine.low %v6781_v31, %v6782_v42  ;;  %v6318_v49 = vld [vmem:[#allocation2 + $0x80] sm:$0x1] }
 0x564   : > { %v6787_v15 = vmax.bf16 %v6755_v2, %v6259_v6  ;;  %v6022_v5 = vshrl.u32 %v11016_v46, 16  ;;  %v6025_v22 = vshll.u32 %v11016_v46, 16  ;;  %v6788_v37 = vmax.bf16 %v6756_v35, %v6260_v26  ;;  %v5821_v2 = vld [vmem:[#allocation2 + $0x68] sm:$0x1] }
 0x565   : > { %v6257_v33 = vmax.bf16 %v5986_v20, %v10913_v61  ;;  %v6258_v52 = vmax.bf16 %v5996_v27, %v10915_v56  ;;  %v6065_v45 = vshll.u32 %v5822_v24, 16  ;;  %v6753_v0 = vmax.bf16 %v6482_v14, %v10918_v13 }
 0x566   : > { %v6754_v43 = vmax.bf16 %v6492_v47, %v10922_v9  ;;  %v6062_v62 = vor.u32 %v6061_v57, %v6057_v30  ;;  %v6544_v4 = vrot.slane %v6542_v44, 4  ;;  %v6058_v48 = vsel %vm8137_vm2, %v6053_v54, %v6057_v30  ;;  %v6317_v47 = vld [vmem:[#allocation2 + $0x74] sm:$0x1] }
 0x567   : > { %v6547_v8 = vrot.slane %v6545_v7, 5  ;;  %v11040_v61 = vrot.slane %v6551_v40, 5  ;;  %v6557_v56 = vrot.slane %v6555_v25, 4  ;;  %v6024_v59 = vrot.slane %v6022_v5, 4  ;;  %v11067_v7 = vld [vmem:[#allocation2 + $0x84] sm:$0xf] }
 0x568   : > { %v6027_v32 = vrot.slane %v6025_v22, 5  ;;  %v6031_v13 = vshll.u32 %v11030_v53, 16  ;;  %v6035_v9 = vshrl.u32 %v11030_v53, 16  ;;  %v11044_v63 = vcombine.low %v6787_v15, %v6788_v37  ;;  %v11069_v40 = vld [vmem:[#allocation2 + $0x88] sm:$0xf] }
 0x569   : > { %v6518_v58 = vshrl.u32 %v11034_v34, 16  ;;  %v6521_v12 = vshll.u32 %v11034_v34, 16  ;;  %v6527_v55 = vshll.u32 %v11036_v16, 16  ;;  %v6785_v23 = vmax.bf16 %v6753_v0, %v6257_v33  ;;  %v11079_v22 = vld [vmem:[#allocation2 + $0x90] sm:$0xf] }
 0x56a   : > { %v6786_v39 = vmax.bf16 %v6754_v43, %v6258_v52  ;;  %v11049_v10 = vrot.slane %v6065_v45, 5  ;;  %v6531_v3 = vshrl.u32 %v11036_v16, 16  ;;  %v11052_v17 = vrot.slane %v6062_v62, 4  ;;  %v11086_v0 = vld [vmem:[#allocation2 + $0x94] sm:$0xf] }
 0x56b   : > { %v11055_v41 = vmax.bf16 %v6058_v48, %v10939_v60  ;;  %v6548_v29 = vor.u32 %v6547_v8, %v6544_v4  ;;  %v6561_v21 = vshll.u32 %v6318_v49, 16  ;;  %v6558_v1 = vor.u32 %v6557_v56, %v11040_v61 }
 0x56c   : > { %v6028_v31 = vor.u32 %v6027_v32, %v6024_v59  ;;  %v11058_v38 = vrot.slane %v6031_v13, 5  ;;  %v6037_v42 = vrot.slane %v6035_v9, 4  ;;  %v6520_v35 = vrot.slane %v6518_v58, 4 }
 0x56d   : > { %v6523_v20 = vrot.slane %v6521_v12, 5  ;;  %v11062_v60 = vrot.slane %v6527_v55, 5  ;;  %v6533_v24 = vrot.slane %v6531_v3, 4  ;;  %v11065_v54 = vcombine.low %v6785_v23, %v6786_v39  ;;  %v11102_v12 = vld [vmem:[#allocation2 + $0x78] sm:$0xf] }
 0x56e   : > { %v6068_v25 = vsel %vm8137_vm2, %v11052_v17, %v11049_v10  ;;  %v6563_v15 = vrot.slane %v6561_v21, 5  ;;  %v6041_v5 = vshll.u32 %v5821_v2, 16  ;;  %v6029_v37 = vrot.slane %v6028_v31, 4  ;;  %v5824_v21 = vld [vmem:[#allocation2 + $0x8c] sm:$0x1] }
 0x56f   : > { %v6038_v33 = vor.u32 %v6037_v42, %v11058_v38  ;;  %v6524_v52 = vor.u32 %v6523_v20, %v6520_v35  ;;  %v6537_v45 = vshll.u32 %v6317_v47, 16  ;;  %v6534_v43 = vor.u32 %v6533_v24, %v11062_v60 }
 0x570   : > { %v6094_v62 = vshrl.u32 %v11067_v7, 16  ;;  %v6097_v4 = vshll.u32 %v11067_v7, 16  ;;  %v6103_v48 = vshll.u32 %v11069_v40, 16  ;;  %v6107_v56 = vshrl.u32 %v11069_v40, 16 }
 0x571   : > { %v6590_v49 = vshrl.u32 %v11079_v22, 16  ;;  %v6593_v59 = vshll.u32 %v11079_v22, 16  ;;  %v6043_v13 = vrot.slane %v6041_v5, 5  ;;  %v6599_v9 = vshll.u32 %v11086_v0, 16 }
 0x572   : > { %v6928_v51 = vpop.permute.xlu1 %6927  ;;  %v6603_v58 = vshrl.u32 %v11086_v0, 16  ;;  %v6039_v55 = vrot.slane %v6038_v33, 4  ;;  %v6525_v23 = vrot.slane %v6524_v52, 4  ;;  %v6539_v39 = vrot.slane %v6537_v45, 5 }
 0x573   : > { %v6966_v6 = vsel %vm3462_vm11, %v11002_v18, %v6928_v51  ;;  %v6926_v26 = vpop.permute.xlu0 %6925  ;;  %v6549_v18 = vrot.slane %v6548_v29, 4  ;;  %v6535_v10 = vrot.slane %v6534_v43, 4  ;;  %v6096_v3 = vrot.slane %v6094_v62, 4 }
 0x574   : > { %v7598_v27 = vcombine.low %v6966_v6, %v6966_v6  ;;  %v7599_v44 = vcombine.high %v6966_v6, %v6966_v6  ;;  %v6963_v14 = vsel %vm3462_vm11, %v7576_v50, %v6926_v26  ;;  %v6559_v50 = vrot.slane %v6558_v1, 4 }
 0x575   : > { %v7596_v30 = vcombine.low %v6963_v14, %v6963_v14  ;;  %v7597_v57 = vcombine.high %v6963_v14, %v6963_v14  ;;  %v6554_v8 = vsel %vm8137_vm2, %v6549_v18, %v11040_v61  ;;  %v6034_v61 = vsel %vm8137_vm2, %v6029_v37, %v11058_v38  ;;  %v6320_v38 = vld [vmem:[#allocation2 + $0x98] sm:$0x1]  ;;  %v11126_v14 = vld [vmem:[#allocation2 + $0x7c] sm:$0xf] }
 0x576   : > { %7120 = vst.msk [vmem:[%s10849_s28 + $0x28] sm:$0xf] %vm7109_vm3, %v7598_v27  ;;  %7121 = vst.msk [vmem:[%s10849_s28 + $0x2c] sm:$0xf] %vm7109_vm3, %v7599_v44  ;;  %v6564_v32 = vsel %vm8137_vm2, %v6559_v50, %v6563_v15  ;;  %v6099_v17 = vrot.slane %v6097_v4, 5  ;;  %v11107_v29 = vrot.slane %v6103_v48, 5  ;;  %v11111_v6 = vmax.bf16 %v6068_v25, %v10980_v36 }
 0x577   : > { %7118 = vst.msk [vmem:[%s10849_s28 + $0x20] sm:$0xf] %vm7109_vm3, %v7596_v30  ;;  %7119 = vst.msk [vmem:[%s10849_s28 + $0x24] sm:$0xf] %vm7109_vm3, %v7597_v57  ;;  %v6109_v51 = vrot.slane %v6107_v56, 4  ;;  %v6592_v1 = vrot.slane %v6590_v49, 4  ;;  %v11114_v26 = vmax.bf16 %v6554_v8, %v10994_v28  ;;  %v11119_v20 = vmax.bf16 %v6564_v32, %v11007_v19 }
 0x578   : > { %v6595_v31 = vrot.slane %v6593_v59, 5  ;;  %v6070_v42 = vshrl.u32 %v11102_v12, 16  ;;  %v11116_v2 = vrot.slane %v6599_v9, 5  ;;  %v6605_v35 = vrot.slane %v6603_v58, 4  ;;  %v11135_v50 = vld [vmem:[#allocation2 + $0x84] sm:$0xf] }
 0x579   : > { %v6044_v27 = vsel %vm8137_vm2, %v6039_v55, %v6043_v13  ;;  %v11124_v44 = vmax.bf16 %v6034_v61, %v11016_v46  ;;  %v6073_v36 = vshll.u32 %v11102_v12, 16  ;;  %v6530_v28 = vsel %vm8137_vm2, %v6525_v23, %v11062_v60  ;;  %v11144_v8 = vld [vmem:[#allocation2 + $0x88] sm:$0xf]  ;;  %v5823_v55 = vld [vmem:[#allocation2 + $0x80] sm:$0x1] }
 0x57a   : > { %v6540_v47 = vsel %vm8137_vm2, %v6535_v10, %v6539_v39  ;;  %v6100_v24 = vor.u32 %v6099_v17, %v6096_v3  ;;  %v6113_v19 = vshll.u32 %v5824_v21, 16  ;;  %v6110_v57 = vor.u32 %v6109_v51, %v11107_v29 }
 0x57b   : > { %v6596_v18 = vor.u32 %v6595_v31, %v6592_v1  ;;  %v6609_v25 = vshll.u32 %v6320_v38, 16  ;;  %v6072_v46 = vrot.slane %v6070_v42, 4  ;;  %v6606_v60 = vor.u32 %v6605_v35, %v11116_v2 }
 0x57c   : > { %v6079_v37 = vshll.u32 %v11126_v14, 16  ;;  %v6083_v33 = vshrl.u32 %v11126_v14, 16  ;;  %v6075_v62 = vrot.slane %v6073_v36, 5  ;;  %v6569_v56 = vshll.u32 %v11135_v50, 16  ;;  %v6319_v36 = vld [vmem:[#allocation2 + $0x8c] sm:$0x1] }
 0x57d   : > { %v6262_v49 = vmax.bf16 %v6044_v27, %v11030_v53  ;;  %v6757_v59 = vmax.bf16 %v6530_v28, %v11034_v34  ;;  %v6758_v32 = vmax.bf16 %v6540_v47, %v11036_v16  ;;  %v6101_v13 = vrot.slane %v6100_v24, 4  ;;  %v11183_v24 = vld [vmem:[#allocation2 + $0x9c] sm:$0xf] }
 0x57e   : > { %v6111_v9 = vrot.slane %v6110_v57, 4  ;;  %v6597_v58 = vrot.slane %v6596_v18, 4  ;;  %v6611_v61 = vrot.slane %v6609_v25, 5  ;;  %v11159_v23 = vrot.slane %v6079_v37, 5  ;;  %v11195_v25 = vld [vmem:[#allocation2 + $0xa8] sm:$0xf] }
 0x57f   : > { %v6085_v39 = vrot.slane %v6083_v33, 4  ;;  %v6575_v10 = vshll.u32 %v11144_v8, 16  ;;  %v6579_v53 = vshrl.u32 %v11144_v8, 16  ;;  %v6607_v34 = vrot.slane %v6606_v60, 4  ;;  %v11206_v60 = vld [vmem:[#allocation2 + $0xac] sm:$0xf] }
 0x580   : > { %v6076_v3 = vor.u32 %v6075_v62, %v6072_v46  ;;  %v6571_v17 = vrot.slane %v6569_v56, 5  ;;  %v6792_v21 = vmax.bf16 %v11119_v20, %v11111_v6  ;;  %v6790_v51 = vmax.bf16 %v6758_v32, %v6262_v49 }
 0x581   : > { %v6932_v30 = vpop.permute.xlu1 %6931  ;;  %v6791_v1 = vmax.bf16 %v11114_v26, %v11055_v41  ;;  %v6789_v31 = vmax.bf16 %v6757_v59, %v11124_v44  ;;  %v6106_v42 = vsel %vm8137_vm2, %v6101_v13, %v11107_v29  ;;  %v6089_v38 = vshll.u32 %v5823_v55, 16 }
 0x582   : > { %v6972_v15 = vsel %vm3462_vm11, %v11044_v63, %v6932_v30  ;;  %v6930_v5 = vpop.permute.xlu0 %6929  ;;  %v6566_v63 = vshrl.u32 %v11135_v50, 16  ;;  %v6086_v27 = vor.u32 %v6085_v39, %v11159_v23  ;;  %v11174_v28 = vrot.slane %v6575_v10, 5  ;;  %v11226_v10 = vld [vmem:[#allocation2 + $0x94] sm:$0xf] }
 0x583   : > { %v7602_v52 = vcombine.low %v6972_v15, %v6972_v15  ;;  %v7603_v45 = vcombine.high %v6972_v15, %v6972_v15  ;;  %v6969_v43 = vsel %vm3462_vm11, %v11065_v54, %v6930_v5  ;;  %v6115_v54 = vrot.slane %v6113_v19, 5 }
 0x584   : > { %v7600_v4 = vcombine.low %v6969_v43, %v6969_v43  ;;  %v7601_v48 = vcombine.high %v6969_v43, %v6969_v43  ;;  %v6568_v16 = vrot.slane %v6566_v63, 4  ;;  %v6581_v6 = vrot.slane %v6579_v53, 4  ;;  %v11228_v53 = vld [vmem:[#allocation2 + $0x9c] sm:$0xf] }
 0x585   : > { %7124 = vst.msk [vmem:[%s10849_s28 + $0x38] sm:$0xf] %vm7109_vm3, %v7602_v52  ;;  %7125 = vst.msk [vmem:[%s10849_s28 + $0x3c] sm:$0xf] %vm7109_vm3, %v7603_v45  ;;  %v6116_v35 = vsel %vm8137_vm2, %v6111_v9, %v6115_v54  ;;  %v6602_v41 = vsel %vm8137_vm2, %v6597_v58, %v11116_v2  ;;  %v6612_v26 = vsel %vm8137_vm2, %v6607_v34, %v6611_v61  ;;  %v11181_v20 = vrot.slane %v6076_v3, 4 }
 0x586   : > { %7122 = vst.msk [vmem:[%s10849_s28 + $0x30] sm:$0xf] %vm7109_vm3, %v7600_v4  ;;  %7123 = vst.msk [vmem:[%s10849_s28 + $0x34] sm:$0xf] %vm7109_vm3, %v7601_v48  ;;  %v6572_v29 = vor.u32 %v6571_v17, %v6568_v16  ;;  %v7581_v44 = vcombine.low %v6791_v1, %v6792_v21  ;;  %v7580_v47 = vcombine.low %v6789_v31, %v6790_v51  ;;  %v11191_v57 = vrot.slane %v6089_v38, 5 }
 0x587   : > { %v11186_v19 = vmax.bf16 %v6106_v42, %v11067_v7  ;;  %v11189_v30 = vmax.bf16 %v6116_v35, %v11069_v40  ;;  %v6585_v18 = vshll.u32 %v6319_v36, 16  ;;  %v11193_v2 = vld [vmem:[#allocation2 + $0xa0] sm:$0xf]  ;;  %v11198_v46 = vmax.bf16 %v6602_v41, %v11079_v22  ;;  %v11224_v9 = vld [vmem:[#allocation2 + $0x90] sm:$0xf] }
 0x588   : > { %v11201_v15 = vmax.bf16 %v6612_v26, %v11086_v0  ;;  %v11203_v5 = vrot.slane %v6086_v27, 4  ;;  %v6582_v7 = vor.u32 %v6581_v6, %v11174_v28  ;;  %v6082_v40 = vsel %vm8137_vm2, %v11181_v20, %v11159_v23  ;;  %v5826_v34 = vld [vmem:[#allocation2 + $0xa4] sm:$0x1]  ;;  %v11244_v38 = vld [vmem:[#allocation2 + $0xa0] sm:$0xf] }
 0x589   : > { %v11212_v37 = vrot.slane %v6572_v29, 4  ;;  %v6142_v33 = vshrl.u32 %v11183_v24, 16  ;;  %v6145_v22 = vshll.u32 %v11183_v24, 16  ;;  %v6151_v0 = vshll.u32 %v11193_v2, 16  ;;  %v6322_v35 = vld [vmem:[#allocation2 + $0xb0] sm:$0x1] }
 0x58a   : > { %v6155_v45 = vshrl.u32 %v11193_v2, 16  ;;  %v6638_v43 = vshrl.u32 %v11195_v25, 16  ;;  %v6641_v62 = vshll.u32 %v11195_v25, 16  ;;  %v6587_v63 = vrot.slane %v6585_v18, 5 }
 0x58b   : > { %v6647_v56 = vshll.u32 %v11206_v60, 16  ;;  %v6651_v49 = vshrl.u32 %v11206_v60, 16  ;;  %v6583_v13 = vrot.slane %v6582_v7, 4  ;;  %v6144_v55 = vrot.slane %v6142_v33, 4 }
 0x58c   : > { %v6147_v39 = vrot.slane %v6145_v22, 5  ;;  %v11234_v3 = vrot.slane %v6151_v0, 5  ;;  %v6157_v16 = vrot.slane %v6155_v45, 4  ;;  %v6640_v17 = vrot.slane %v6638_v43, 4 }
 0x58d   : > { %v6643_v21 = vrot.slane %v6641_v62, 5  ;;  %v11240_v51 = vrot.slane %v6647_v56, 5  ;;  %v6653_v1 = vrot.slane %v6651_v49, 4  ;;  %v6118_v31 = vshrl.u32 %v11224_v9, 16 }
 0x58e   : > { %v6121_v42 = vshll.u32 %v11224_v9, 16  ;;  %v6127_v27 = vshll.u32 %v11226_v10, 16  ;;  %v6131_v36 = vshrl.u32 %v11226_v10, 16  ;;  %v6614_v6 = vshrl.u32 %v11228_v53, 16 }
 0x58f   : > { %v6617_v41 = vshll.u32 %v11228_v53, 16  ;;  %v6092_v26 = vsel %vm8137_vm2, %v11203_v5, %v11191_v57  ;;  %v6588_v29 = vsel %vm8137_vm2, %v6583_v13, %v6587_v63  ;;  %v6158_v18 = vor.u32 %v6157_v16, %v11234_v3  ;;  %v6321_v16 = vld [vmem:[#allocation2 + $0xa4] sm:$0x1] }
 0x590   : > { %v6936_v52 = vpop.permute.xlu1 %6935  ;;  %v6644_v7 = vor.u32 %v6643_v21, %v6640_v17  ;;  %v6623_v33 = vshll.u32 %v11244_v38, 16  ;;  %v6627_v22 = vshrl.u32 %v11244_v38, 16  ;;  %v6657_v0 = vshll.u32 %v6322_v35, 16  ;;  %v11290_v35 = vld [vmem:[#allocation2 + $0xb4] sm:$0xf] }
 0x591   : > { %v6978_v4 = vsel %vm3462_vm11, %v7581_v44, %v6936_v52  ;;  %v6934_v48 = vpop.permute.xlu0 %6933  ;;  %v6148_v44 = vor.u32 %v6147_v39, %v6144_v55  ;;  %v6654_v52 = vor.u32 %v6653_v1, %v11240_v51  ;;  %v6120_v45 = vrot.slane %v6118_v31, 4 }
 0x592   : > { %v7606_v59 = vcombine.low %v6978_v4, %v6978_v4  ;;  %v7607_v32 = vcombine.high %v6978_v4, %v6978_v4  ;;  %v6975_v54 = vsel %vm3462_vm11, %v7580_v47, %v6934_v48  ;;  %v6161_v47 = vshll.u32 %v5826_v34, 16 }
 0x593   : > { %v7604_v58 = vcombine.low %v6975_v54, %v6975_v54  ;;  %v7605_v61 = vcombine.high %v6975_v54, %v6975_v54  ;;  %v6123_v43 = vrot.slane %v6121_v42, 5  ;;  %v11260_v62 = vrot.slane %v6127_v27, 5 }
 0x594   : > { %7128 = vst.msk [vmem:[%s10849_s28 + $0x48] sm:$0xf] %vm7109_vm3, %v7606_v59  ;;  %7129 = vst.msk [vmem:[%s10849_s28 + $0x4c] sm:$0xf] %vm7109_vm3, %v7607_v32  ;;  %v6133_v57 = vrot.slane %v6131_v36, 4  ;;  %v6616_v5 = vrot.slane %v6614_v6, 4  ;;  %v6266_v48 = vmax.bf16 %v6092_v26, %v11126_v14  ;;  %v6578_v63 = vsel %vm8137_vm2, %v11212_v37, %v11174_v28 }
 0x595   : > { %7126 = vst.msk [vmem:[%s10849_s28 + $0x40] sm:$0xf] %vm7109_vm3, %v7604_v58  ;;  %7127 = vst.msk [vmem:[%s10849_s28 + $0x44] sm:$0xf] %vm7109_vm3, %v7605_v61  ;;  %v6619_v4 = vrot.slane %v6617_v41, 5  ;;  %v6762_v56 = vmax.bf16 %v6588_v29, %v11144_v8  ;;  %v6163_v49 = vrot.slane %v6161_v47, 5  ;;  %v6124_v34 = vor.u32 %v6123_v43, %v6120_v45 }
 0x596   : > { %v5825_v59 = vld [vmem:[#allocation2 + $0x98] sm:$0x1]  ;;  %v6149_v32 = vrot.slane %v6148_v44, 4  ;;  %v6645_v54 = vrot.slane %v6644_v7, 4  ;;  %v6625_v13 = vrot.slane %v6623_v33, 5  ;;  %v6629_v58 = vrot.slane %v6627_v22, 4 }
 0x597   : > { %v6159_v61 = vrot.slane %v6158_v18, 4  ;;  %v6655_v55 = vrot.slane %v6654_v52, 4  ;;  %v6659_v39 = vrot.slane %v6657_v0, 5  ;;  %v6134_v14 = vor.u32 %v6133_v57, %v11260_v62  ;;  %v11313_v33 = vld [vmem:[#allocation2 + $0xb8] sm:$0xf] }
 0x598   : > { %v6137_v17 = vshll.u32 %v5825_v59, 16  ;;  %v6620_v21 = vor.u32 %v6619_v4, %v6616_v5  ;;  %v6795_v28 = vmax.bf16 %v11198_v46, %v11186_v19  ;;  %v6796_v8 = vmax.bf16 %v11201_v15, %v11189_v30 }
 0x599   : > { %v6265_v37 = vmax.bf16 %v6082_v40, %v11102_v12  ;;  %v6761_v1 = vmax.bf16 %v6578_v63, %v11135_v50  ;;  %v6154_v31 = vsel %vm8137_vm2, %v6149_v32, %v11234_v3  ;;  %v6650_v19 = vsel %vm8137_vm2, %v6645_v54, %v11240_v51  ;;  %v11325_v63 = vld [vmem:[#allocation2 + $0xc4] sm:$0xf]  ;;  %v11335_v54 = vld [vmem:[#allocation2 + $0xa8] sm:$0xf] }
 0x59a   : > { %v6630_v46 = vor.u32 %v6629_v58, %v6625_v13  ;;  %v6633_v42 = vshll.u32 %v6321_v16, 16  ;;  %v6794_v30 = vmax.bf16 %v6762_v56, %v6266_v48  ;;  %v6164_v15 = vsel %vm8137_vm2, %v6159_v61, %v6163_v49 }
 0x59b   : > { %v6660_v23 = vsel %vm8137_vm2, %v6655_v55, %v6659_v39  ;;  %v6125_v12 = vrot.slane %v6124_v34, 4  ;;  %v6135_v20 = vrot.slane %v6134_v14, 4  ;;  %v6139_v50 = vrot.slane %v6137_v17, 5  ;;  %v11349_v55 = vld [vmem:[#allocation2 + $0xb4] sm:$0xf] }
 0x59c   : > { %v6621_v40 = vrot.slane %v6620_v21, 4  ;;  %v7583_v3 = vcombine.low %v6795_v28, %v6796_v8  ;;  %v6793_v27 = vmax.bf16 %v6761_v1, %v6265_v37  ;;  %v11293_v36 = vmax.bf16 %v6154_v31, %v11183_v24  ;;  %v11355_v14 = vld [vmem:[#allocation2 + $0xb8] sm:$0xf] }
 0x59d   : > { %v11296_v51 = vmax.bf16 %v6650_v19, %v11195_v25  ;;  %v11299_v6 = vmax.bf16 %v6164_v15, %v11193_v2  ;;  %v11302_v41 = vmax.bf16 %v6660_v23, %v11206_v60  ;;  %v6631_v26 = vrot.slane %v6630_v46, 4  ;;  %v5828_v19 = vld [vmem:[#allocation2 + $0xbc] sm:$0x1] }
 0x59e   : > { %v6635_v29 = vrot.slane %v6633_v42, 5  ;;  %v7582_v47 = vcombine.low %v6793_v27, %v6794_v30  ;;  %v6130_v18 = vsel %vm8137_vm2, %v6125_v12, %v11260_v62  ;;  %v6190_v24 = vshrl.u32 %v11290_v35, 16  ;;  %v11319_v62 = vld [vmem:[#allocation2 + $0xc0] sm:$0xf] }
 0x59f   : > { %v6140_v2 = vsel %vm8137_vm2, %v6135_v20, %v6139_v50  ;;  %v6626_v60 = vsel %vm8137_vm2, %v6621_v40, %v6625_v13  ;;  %v6193_v22 = vshll.u32 %v11290_v35, 16  ;;  %v6799_v43 = vmax.bf16 %v11296_v51, %v11293_v36  ;;  %v11337_v13 = vld [vmem:[#allocation2 + $0xac] sm:$0xf]  ;;  %v6324_v40 = vld [vmem:[#allocation2 + $0xc8] sm:$0x1] }
 0x5a0   : > { %v6800_v4 = vmax.bf16 %v11302_v41, %v11299_v6  ;;  %v6636_v48 = vsel %vm8137_vm2, %v6631_v26, %v6635_v29  ;;  %v6269_v56 = vmax.bf16 %v6130_v18, %v11224_v9  ;;  %v6270_v49 = vmax.bf16 %v6140_v2, %v11226_v10  ;;  %v5827_v26 = vld [vmem:[#allocation2 + $0xb0] sm:$0x1] }
 0x5a1   : > { %v6765_v59 = vmax.bf16 %v6626_v60, %v11228_v53  ;;  %v6199_v32 = vshll.u32 %v11313_v33, 16  ;;  %v11343_v58 = vrot.slane %v6190_v24, 4  ;;  %v11345_v61 = vrot.slane %v6193_v22, 5 }
 0x5a2   : > { %v6203_v9 = vshrl.u32 %v11313_v33, 16  ;;  %v6686_v10 = vshrl.u32 %v11319_v62, 16  ;;  %v6766_v53 = vmax.bf16 %v6636_v48, %v11244_v38  ;;  %v6689_v39 = vshll.u32 %v11319_v62, 16 }
 0x5a3   : > { %v6695_v34 = vshll.u32 %v11325_v63, 16  ;;  %v6699_v16 = vshrl.u32 %v11325_v63, 16  ;;  %v6166_v17 = vshrl.u32 %v11335_v54, 16  ;;  %v6169_v21 = vshll.u32 %v11335_v54, 16 }
 0x5a4   : > { %v6175_v28 = vshll.u32 %v11337_v13, 16  ;;  %v6179_v8 = vshrl.u32 %v11337_v13, 16  ;;  %v6797_v37 = vmax.bf16 %v6765_v59, %v6269_v56  ;;  %v11361_v1 = vrot.slane %v6199_v32, 5 }
 0x5a5   : > { %v6940_v44 = vpop.permute.xlu1 %6939  ;;  %v6662_v38 = vshrl.u32 %v11349_v55, 16  ;;  %v6665_v31 = vshll.u32 %v11349_v55, 16  ;;  %v6205_v46 = vrot.slane %v6203_v9, 4  ;;  %v6688_v42 = vrot.slane %v6686_v10, 4 }
 0x5a6   : > { %v6984_v7 = vsel %vm3462_vm11, %v7583_v3, %v6940_v44  ;;  %v6938_v25 = vpop.permute.xlu0 %6937  ;;  %v6671_v30 = vshll.u32 %v11355_v14, 16  ;;  %v6675_v15 = vshrl.u32 %v11355_v14, 16  ;;  %v6798_v23 = vmax.bf16 %v6766_v53, %v6270_v49 }
 0x5a7   : > { %v7610_v52 = vcombine.low %v6984_v7, %v6984_v7  ;;  %v7611_v0 = vcombine.high %v6984_v7, %v6984_v7  ;;  %v6981_v45 = vsel %vm3462_vm11, %v7582_v47, %v6938_v25  ;;  %v6691_v12 = vrot.slane %v6689_v39, 5 }
 0x5a8   : > { %v7608_v57 = vcombine.low %v6981_v45, %v6981_v45  ;;  %v7609_v5 = vcombine.high %v6981_v45, %v6981_v45  ;;  %v6697_v20 = vrot.slane %v6695_v34, 5  ;;  %v6701_v50 = vrot.slane %v6699_v16, 4 }
 0x5a9   : > { %7132 = vst.msk [vmem:[%s10849_s28 + $0x58] sm:$0xf] %vm7109_vm3, %v7610_v52  ;;  %7133 = vst.msk [vmem:[%s10849_s28 + $0x5c] sm:$0xf] %vm7109_vm3, %v7611_v0  ;;  %v6168_v3 = vrot.slane %v6166_v17, 4  ;;  %v6171_v27 = vrot.slane %v6169_v21, 5  ;;  %v7585_v6 = vcombine.low %v6799_v43, %v6800_v4  ;;  %v6196_v47 = vor.u32 %v11345_v61, %v11343_v58 }
 0x5aa   : > { %7130 = vst.msk [vmem:[%s10849_s28 + $0x50] sm:$0xf] %vm7109_vm3, %v7608_v57  ;;  %7131 = vst.msk [vmem:[%s10849_s28 + $0x54] sm:$0xf] %vm7109_vm3, %v7609_v5  ;;  %v6177_v36 = vrot.slane %v6175_v28, 5  ;;  %v6181_v51 = vrot.slane %v6179_v8, 4  ;;  %v6206_v18 = vor.u32 %v6205_v46, %v11361_v1  ;;  %v7584_v2 = vcombine.low %v6797_v37, %v6798_v23 }
 0x5ab   : > { %v6209_v41 = vshll.u32 %v5828_v19, 16  ;;  %v6664_v29 = vrot.slane %v6662_v38, 4  ;;  %v6667_v44 = vrot.slane %v6665_v31, 5  ;;  %v6673_v24 = vrot.slane %v6671_v30, 5  ;;  %v6323_v0 = vld [vmem:[#allocation2 + $0xbc] sm:$0x1] }
 0x5ac   : > { %v6677_v7 = vrot.slane %v6675_v15, 4  ;;  %v6692_v60 = vor.u32 %v6691_v12, %v6688_v42  ;;  %v6702_v22 = vor.u32 %v6701_v50, %v6697_v20  ;;  %v6705_v52 = vshll.u32 %v6324_v40, 16 }
 0x5ad   : > { %v6172_v57 = vor.u32 %v6171_v27, %v6168_v3  ;;  %v6182_v5 = vor.u32 %v6181_v51, %v6177_v36  ;;  %v6185_v4 = vshll.u32 %v5827_v26, 16  ;;  %v6668_v59 = vor.u32 %v6667_v44, %v6664_v29 }
 0x5ae   : > { %v6678_v61 = vor.u32 %v6677_v7, %v6673_v24  ;;  %v6681_v9 = vshll.u32 %v6323_v0, 16  ;;  %v6197_v10 = vrot.slane %v6196_v47, 4  ;;  %v6207_v53 = vrot.slane %v6206_v18, 4 }
 0x5af   : > { %v6211_v39 = vrot.slane %v6209_v41, 5  ;;  %v6707_v34 = vrot.slane %v6705_v52, 5  ;;  %v6693_v16 = vrot.slane %v6692_v60, 4  ;;  %v6703_v17 = vrot.slane %v6702_v22, 4 }
 0x5b0   : > { %v6173_v21 = vrot.slane %v6172_v57, 4  ;;  %v6187_v28 = vrot.slane %v6185_v4, 5  ;;  %v6183_v8 = vrot.slane %v6182_v5, 4  ;;  %v6669_v37 = vrot.slane %v6668_v59, 4 }
 0x5b1   : > { %v6679_v38 = vrot.slane %v6678_v61, 4  ;;  %v6683_v31 = vrot.slane %v6681_v9, 5  ;;  %v6202_v19 = vsel %vm8137_vm2, %v6197_v10, %v11361_v1  ;;  %v6212_v46 = vsel %vm8137_vm2, %v6207_v53, %v6211_v39 }
 0x5b2   : > { %v6698_v42 = vsel %vm8137_vm2, %v6693_v16, %v6697_v20  ;;  %v6708_v30 = vsel %vm8137_vm2, %v6703_v17, %v6707_v34  ;;  %v6178_v15 = vsel %vm8137_vm2, %v6173_v21, %v6177_v36  ;;  %v6188_v23 = vsel %vm8137_vm2, %v6183_v8, %v6187_v28 }
 0x5b3   : > { %v6944_v25 = vpop.permute.xlu1 %6943  ;;  %v6674_v12 = vsel %vm8137_vm2, %v6669_v37, %v6673_v24  ;;  %v6684_v1 = vsel %vm8137_vm2, %v6679_v38, %v6683_v31  ;;  %v6275_v50 = vmax.bf16 %v6202_v19, %v11290_v35  ;;  %v6276_v40 = vmax.bf16 %v6212_v46, %v11313_v33 }
 0x5b4   : > { %v6990_v45 = vsel %vm3462_vm11, %v7585_v6, %v6944_v25  ;;  %v6942_v43 = vpop.permute.xlu0 %6941  ;;  %v6771_v20 = vmax.bf16 %v6698_v42, %v11319_v62  ;;  %v6772_v3 = vmax.bf16 %v6708_v30, %v11325_v63  ;;  %v6273_v27 = vmax.bf16 %v6178_v15, %v11335_v54 }
 0x5b5   : > { %v7614_v48 = vcombine.low %v6990_v45, %v6990_v45  ;;  %v7615_v56 = vcombine.high %v6990_v45, %v6990_v45  ;;  %v6987_v49 = vsel %vm3462_vm11, %v7584_v2, %v6942_v43  ;;  %v6274_v36 = vmax.bf16 %v6188_v23, %v11337_v13 }
 0x5b6   : > { %v7612_v32 = vcombine.low %v6987_v49, %v6987_v49  ;;  %v7613_v58 = vcombine.high %v6987_v49, %v6987_v49  ;;  %v6769_v51 = vmax.bf16 %v6674_v12, %v11349_v55  ;;  %v6770_v6 = vmax.bf16 %v6684_v1, %v11355_v14 }
 0x5b7   : > { %7136 = vst.msk [vmem:[%s10849_s28 + $0x68] sm:$0xf] %vm7109_vm3, %v7614_v48  ;;  %7137 = vst.msk [vmem:[%s10849_s28 + $0x6c] sm:$0xf] %vm7109_vm3, %v7615_v56  ;;  %v6803_v11 = vmax.bf16 %v6771_v20, %v6275_v50  ;;  %v6804_v41 = vmax.bf16 %v6772_v3, %v6276_v40 }
 0x5b8   : > { %7134 = vst.msk [vmem:[%s10849_s28 + $0x60] sm:$0xf] %vm7109_vm3, %v7612_v32  ;;  %7135 = vst.msk [vmem:[%s10849_s28 + $0x64] sm:$0xf] %vm7109_vm3, %v7613_v58  ;;  %v6801_v35 = vmax.bf16 %v6769_v51, %v6273_v27  ;;  %v6802_v33 = vmax.bf16 %v6770_v6, %v6274_v36 }
 0x5b9   : > { %v7587_v26 = vcombine.low %v6803_v11, %v6804_v41 }
 0x5ba   : > { %v7586_v29 = vcombine.low %v6801_v35, %v6802_v33 }
 0x5c5   : > { %v6948_v62 = vpop.permute.xlu1 %6947 }
 0x5c6   : > { %v6996_v63 = vsel %vm3462_vm11, %v7587_v26, %v6948_v62  ;;  %v6946_v54 = vpop.permute.xlu0 %6945 }
 0x5c7   : > { %v7618_v44 = vcombine.low %v6996_v63, %v6996_v63  ;;  %v7619_v13 = vcombine.high %v6996_v63, %v6996_v63  ;;  %v6993_v55 = vsel %vm3462_vm11, %v7586_v29, %v6946_v54 }
 0x5c8   : > { %v7616_v47 = vcombine.low %v6993_v55, %v6993_v55  ;;  %v7617_v18 = vcombine.high %v6993_v55, %v6993_v55 }
 0x5c9   : > { %7140 = vst.msk [vmem:[%s10849_s28 + $0x78] sm:$0xf] %vm7109_vm3, %v7618_v44  ;;  %7141 = vst.msk [vmem:[%s10849_s28 + $0x7c] sm:$0xf] %vm7109_vm3, %v7619_v13 }
 0x5ca   : > { %7138 = vst.msk [vmem:[%s10849_s28 + $0x70] sm:$0xf] %vm7109_vm3, %v7616_v47  ;;  %7139 = vst.msk [vmem:[%s10849_s28 + $0x74] sm:$0xf] %vm7109_vm3, %v7617_v18 }
 0x5cb PF: > { %s20_s13 = sadd.s32 1, %s8008_s13  }
 0x5cc   : > { %p17_p4 = scmp.ge.s32.totalorder %s20_s13, 4  }
 0x5ce   :  { %19 = sbr.rel (!%p17_p4) target bundleno = 1 (0x1), region = 95 }

</bundles_post_ra>
